<compile_context>
chip_gen: v7x
topology: tpu7x:2x2x1
jax: 0.10.0
libtpu: 0.0.40
codegen_flags: <defaults>
</compile_context>

<pallas_src>
import functools

import jax
import jax.numpy as jnp
from jax import lax
from jax.experimental import pallas as pl
from jax.experimental.pallas import tpu as pltpu


# ------------------------------- the kernel -------------------------------

def eegsnn_kernel(x_ref, w1_ref, b1_ref, s1_ref, t1_ref,
                  w2_ref, b2_ref, s2_ref, t2_ref,
                  wf1_ref, bf1_ref, wf2_ref, bf2_ref, pool_ref,
                  out_ref,
                  spk1_scr, spk2_scr, fc1_scr, h_scr, spk3_scr, z_scr,
                  *, S, B, L, E, NC, thresh, decay):
    f32, bf16 = jnp.float32, jnp.bfloat16
    L2, L4 = L // 2, L // 4
    BL, BL2 = B * L, B * L2
    N1, N2, SB = S * BL, S * BL2, S * B

    # -------- conv1 (+BN1) for ALL steps: 3 shifted-tap matmuls, f32 ---------
    x = x_ref[...]                                                  # (N1, E)
    zE = jnp.zeros((1, E), f32)
    x_m = jnp.concatenate([zE, x[:N1 - 1, :]], axis=0)              # row r -> x[r-1]
    x_p = jnp.concatenate([x[1:, :], zE], axis=0)                   # row r -> x[r+1]
    pos1 = lax.broadcasted_iota(jnp.int32, (N1, E), 0) % L
    x_m = jnp.where(pos1 == 0, 0.0, x_m)                            # window start
    x_p = jnp.where(pos1 == L - 1, 0.0, x_p)                        # window end
    y1 = (jnp.dot(x_m, w1_ref[0], preferred_element_type=f32)
          + jnp.dot(x, w1_ref[1], preferred_element_type=f32)
          + jnp.dot(x_p, w1_ref[2], preferred_element_type=f32))    # (N1, 32)
    a1 = (y1 + b1_ref[...]) * s1_ref[...] + t1_ref[...]             # BN1, one pass

    # -------- LIF1: sequential over S, elementwise VPU only ------------------
    mem1 = jnp.zeros((BL, 32), f32)
    for s in range(S):
        m = mem1 * decay + a1[s * BL:(s + 1) * BL, :]
        fire = m >= thresh
        spk1_scr[s * BL:(s + 1) * BL, :] = fire.astype(f32)
        mem1 = jnp.where(fire, 0.0, m)

    # -------- pool1: max over adjacent positions via strided reads -----------
    p1 = jnp.maximum(spk1_scr[pl.ds(0, N2, 2), :],
                     spk1_scr[pl.ds(1, N2, 2), :])                  # (N2, 32)

    # -------- conv2 (+BN2) for ALL steps: 3 shifted-tap matmuls, bf16 --------
    z32 = jnp.zeros((1, 32), f32)
    p1m = jnp.concatenate([z32, p1[:N2 - 1, :]], axis=0)
    p1p = jnp.concatenate([p1[1:, :], z32], axis=0)
    pos2 = lax.broadcasted_iota(jnp.int32, (N2, 32), 0) % L2
    p1m = jnp.where(pos2 == 0, 0.0, p1m).astype(bf16)
    p1p = jnp.where(pos2 == L2 - 1, 0.0, p1p).astype(bf16)
    y2 = (jnp.dot(p1m, w2_ref[0], preferred_element_type=f32)
          + jnp.dot(p1.astype(bf16), w2_ref[1], preferred_element_type=f32)
          + jnp.dot(p1p, w2_ref[2], preferred_element_type=f32))    # (N2, 64)
    a2 = (y2 + b2_ref[...]) * s2_ref[...] + t2_ref[...]             # BN2, one pass

    # -------- LIF2 ------------------------------------------------------------
    mem2 = jnp.zeros((BL2, 64), f32)
    for s in range(S):
        m = mem2 * decay + a2[s * BL2:(s + 1) * BL2, :]
        fire = m >= thresh
        spk2_scr[s * BL2:(s + 1) * BL2, :] = fire.astype(f32)
        mem2 = jnp.where(fire, 0.0, m)

    # -------- pool2 fused into the fc1 LHS assembly (flat lane = l*64 + c) ---
    for l in range(L4):
        e0 = spk2_scr[pl.ds(2 * l, SB, L2), :]                      # (SB, 64)
        e1 = spk2_scr[pl.ds(2 * l + 1, SB, L2), :]
        fc1_scr[:, l * 64:(l + 1) * 64] = jnp.maximum(e0, e1)

    # -------- fc1 for ALL steps: ONE (SB, 512)@(512, 128) matmul -------------
    h_scr[...] = jnp.dot(fc1_scr[...].astype(bf16), wf1_ref[...],
                         preferred_element_type=f32) + bf1_ref[...]

    # -------- LIF3 ------------------------------------------------------------
    mem3 = jnp.zeros((B, 128), f32)
    for s in range(S):
        m = mem3 * decay + h_scr[s * B:(s + 1) * B, :]
        fire = m >= thresh
        spk3_scr[s * B:(s + 1) * B, :] = fire.astype(f32)
        mem3 = jnp.where(fire, 0.0, m)

    # -------- fc2 for ALL steps: ONE (SB, 128)@(128, NC) matmul --------------
    z_scr[...] = jnp.dot(spk3_scr[...].astype(bf16), wf2_ref[...],
                         preferred_element_type=f32) + bf2_ref[...]

    # -------- LIF4 (pre-reset membrane readout) + folded boost/mean ----------
    mem4 = jnp.zeros((B, NC), f32)
    acc = jnp.zeros((B, NC), f32)
    for s in range(S):
        m = mem4 * decay + z_scr[s * B:(s + 1) * B, :]
        acc = acc + m
        fire = m >= thresh
        mem4 = jnp.where(fire, 0.0, m)
    out_ref[...] = jnp.dot(acc, pool_ref[...], preferred_element_type=f32)


# --------------------------------- wrapper ---------------------------------

def eegsnn1_forward(x, params, *, time_windows=32, P=10, thresh=1.0, tau=2.0):
    """x: (B, T, input_size)  ->  (B, num_classes // P)"""
    B, T, E = x.shape
    L = time_windows
    S = T // L
    L2, L4 = L // 2, L // 4
    NC = params["wf2"].shape[1]
    NCP = NC // P
    decay = 1.0 - 1.0 / tau
    N1, N2, SB = S * B * L, S * B * L2, S * B

    # (B,T,E) -> (S*B*L, E); the k=3/pad=1 im2col is built inside the kernel.
    xs = (x.reshape(B, S, L, E).transpose(1, 0, 2, 3)
           .reshape(N1, E).astype(jnp.float32))

    # eval-mode BN folded to per-row (per-step) scale / shift column vectors
    s1 = jnp.repeat(params["bn1_scale"], B * L).reshape(N1, 1)
    t1 = jnp.repeat(params["bn1_shift"], B * L).reshape(N1, 1)
    s2 = jnp.repeat(params["bn2_scale"], B * L2).reshape(N2, 1)
    t2 = jnp.repeat(params["bn2_shift"], B * L2).reshape(N2, 1)

    # boost AvgPool1d(P,P) over classes + mean over steps -> one (NC, NC//P)
    # pooling matrix with 1/(P*S) entries, applied in-kernel.
    cls = jnp.arange(NC)
    grp = jnp.arange(NCP)
    pool_mat = ((cls[:, None] // P) == grp[None, :]).astype(jnp.float32) / (P * S)

    kernel = functools.partial(eegsnn_kernel, S=S, B=B, L=L, E=E, NC=NC,
                               thresh=thresh, decay=decay)
    vmem = pl.BlockSpec(memory_space=pltpu.MemorySpace.VMEM)

    out = pl.pallas_call(
        kernel,
        out_shape=jax.ShapeDtypeStruct((B, NCP), jnp.float32),
        in_specs=[vmem] * 14,
        out_specs=vmem,
        scratch_shapes=[
            pltpu.VMEM((N1, 32), jnp.float32),        # LIF1 spikes (all steps)
            pltpu.VMEM((N2, 64), jnp.float32),        # LIF2 spikes (all steps)
            pltpu.VMEM((SB, 64 * L4), jnp.float32),   # fc1 LHS (pool2 fused in)
            pltpu.VMEM((SB, 128), jnp.float32),       # fc1 output (all steps)
            pltpu.VMEM((SB, 128), jnp.float32),       # LIF3 spikes (all steps)
            pltpu.VMEM((SB, NC), jnp.float32),        # fc2 output (all steps)
        ],
    )(xs, params["w1"], params["b1"], s1, t1,
      params["w2"], params["b2"], s2, t2,
      params["wf1"], params["bf1"], params["wf2"], params["bf2"], pool_mat)
    return out


# ----------------------------- parameter init -----------------------------

def init_params(key, input_size, num_classes, time_windows, n_steps):
    """Deterministic synthetic parameters (torch default-init-like uniforms),
    converted to the kernel's per-tap / pre-permuted layouts."""
    L4 = time_windows // 4
    ks = jax.random.split(key, 8)

    def u(k, shape, bound):
        return jax.random.uniform(k, shape, jnp.float32, -bound, bound)

    bw1 = 1.0 / (input_size * 3) ** 0.5
    W1 = u(ks[0], (32, input_size, 3), bw1)      # torch Conv1d layout (O, I, K)
    b1 = u(ks[1], (32,), bw1)
    bw2 = 1.0 / (32 * 3) ** 0.5
    W2 = u(ks[2], (64, 32, 3), bw2)
    b2 = u(ks[3], (64,), bw2)
    bwf1 = 1.0 / (64 * L4) ** 0.5
    Wf1 = u(ks[4], (128, 64 * L4), bwf1)         # torch Linear layout (out, in)
    bf1 = u(ks[5], (128,), bwf1)
    bwf2 = 1.0 / 128 ** 0.5
    Wf2 = u(ks[6], (num_classes, 128), bwf2)
    bf2 = u(ks[7], (num_classes,), bwf2)

    eps = 1e-5
    bn_scale = jnp.full((n_steps,), 1.0 / jnp.sqrt(1.0 + eps), jnp.float32)
    bn_shift = jnp.zeros((n_steps,), jnp.float32)

    # conv taps: (K, Cin, Cout); tap 0 -> x[l-1], tap 1 -> x[l], tap 2 -> x[l+1]
    w1 = jnp.transpose(W1, (2, 1, 0))                             # (3, E, 32) f32
    w2 = jnp.transpose(W2, (2, 1, 0)).astype(jnp.bfloat16)        # (3, 32, 64)
    # fc1: torch flat input index = c*L4 + l  ->  kernel flat lane = l*64 + c
    wf1 = jnp.transpose(Wf1.reshape(128, 64, L4), (2, 1, 0))      # (L4, 64, 128)
    wf1 = wf1.reshape(L4 * 64, 128).astype(jnp.bfloat16)

    return dict(
        w1=w1, b1=b1.reshape(1, 32),
        w2=w2, b2=b2.reshape(1, 64),
        wf1=wf1, bf1=bf1.reshape(1, 128),
        wf2=Wf2.T.astype(jnp.bfloat16), bf2=bf2.reshape(1, num_classes),
        bn1_scale=bn_scale, bn1_shift=bn_shift,
        bn2_scale=bn_scale, bn2_shift=bn_shift,
    )


# ----------------------------------- main -----------------------------------

if __name__ == "__main__":
    key = jax.random.PRNGKey(0)
    kx, kp = jax.random.split(key)

    # Shapes consistent with the module: input (B, 384, input_size),
    # time_windows=32 -> S = 384//32 = 12 = 128*3//time_windows (matches the
    # module's hard-coded BatchNorm2d feature count).
    B, T, E = 2, 384, 16
    time_windows, P, num_classes = 32, 10, 40

    x = jax.random.normal(kx, (B, T, E), jnp.float32)
    params = init_params(kp, E, num_classes, time_windows,
                         n_steps=T // time_windows)

    fwd = jax.jit(functools.partial(eegsnn1_forward, time_windows=time_windows,
                                    P=P, thresh=1.0, tau=2.0))
    out = jax.block_until_ready(fwd(x, params))

    assert out.shape == (B, num_classes // P), out.shape
    assert bool(jnp.all(jnp.isfinite(out)))
    print("KERNEL_OK")
</pallas_src>

<mosaic_0001>
module attributes {stable_mosaic.version = 11 : i64} {
  func.func @eegsnn_kernel(%arg0: memref<768x16xf32, #tpu.memory_space<vmem>>, %arg1: memref<3x16x32xf32, #tpu.memory_space<vmem>>, %arg2: memref<1x32xf32, #tpu.memory_space<vmem>>, %arg3: memref<768x1xf32, #tpu.memory_space<vmem>>, %arg4: memref<768x1xf32, #tpu.memory_space<vmem>>, %arg5: memref<3x32x64xbf16, #tpu.memory_space<vmem>>, %arg6: memref<1x64xf32, #tpu.memory_space<vmem>>, %arg7: memref<384x1xf32, #tpu.memory_space<vmem>>, %arg8: memref<384x1xf32, #tpu.memory_space<vmem>>, %arg9: memref<512x128xbf16, #tpu.memory_space<vmem>>, %arg10: memref<1x128xf32, #tpu.memory_space<vmem>>, %arg11: memref<128x40xbf16, #tpu.memory_space<vmem>>, %arg12: memref<1x40xf32, #tpu.memory_space<vmem>>, %arg13: memref<40x4xf32, #tpu.memory_space<vmem>>, %arg14: memref<2x4xf32, #tpu.memory_space<vmem>>, %arg15: memref<768x32xf32, #tpu.memory_space<vmem>>, %arg16: memref<384x64xf32, #tpu.memory_space<vmem>>, %arg17: memref<24x512xf32, #tpu.memory_space<vmem>>, %arg18: memref<24x128xf32, #tpu.memory_space<vmem>>, %arg19: memref<24x128xf32, #tpu.memory_space<vmem>>, %arg20: memref<24x40xf32, #tpu.memory_space<vmem>>) attributes {dimension_semantics = [], scalar_prefetch = 0 : i64, scratch_operands = 6 : i64, tpu.core_type = #tpu.core_type<tc>} {
    %c0 = arith.constant 0 : index
    %c0_0 = arith.constant 0 : index
    %0 = vector.load %arg0[%c0, %c0_0] : memref<768x16xf32, #tpu.memory_space<vmem>>, vector<768x16xf32>
    %cst = arith.constant 0.000000e+00 : f32
    %1 = vector.broadcast %cst : f32 to vector<1x16xf32>
    %2 = vector.extract_strided_slice %0 {offsets = [0, 0], sizes = [767, 16], strides = [1, 1]} : vector<768x16xf32> to vector<767x16xf32>
    %3 = tpu.concatenate %1, %2 in 0 : vector<1x16xf32>, vector<767x16xf32> -> vector<768x16xf32>
    %4 = vector.extract_strided_slice %0 {offsets = [1, 0], sizes = [767, 16], strides = [1, 1]} : vector<768x16xf32> to vector<767x16xf32>
    %5 = tpu.concatenate %4, %1 in 0 : vector<767x16xf32>, vector<1x16xf32> -> vector<768x16xf32>
    %6 = tpu.iota {dimensions = array<i32: 0>} : vector<768x16xi32>
    %c32_i32 = arith.constant 32 : i32
    %c0_i32 = arith.constant 0 : i32
    %7 = arith.cmpi eq, %c32_i32, %c0_i32 : i32
    %c1_i32 = arith.constant 1 : i32
    %8 = arith.select %7, %c1_i32, %c32_i32 : i32
    %9 = vector.broadcast %8 : i32 to vector<768x16xi32>
    %10 = arith.remsi %6, %9 : vector<768x16xi32>
    %c0_i32_1 = arith.constant 0 : i32
    %11 = vector.broadcast %c0_i32_1 : i32 to vector<768x16xi32>
    %12 = arith.cmpi ne, %10, %11 : vector<768x16xi32>
    %c0_i32_2 = arith.constant 0 : i32
    %13 = vector.broadcast %c0_i32_2 : i32 to vector<768x16xi32>
    %14 = arith.cmpi slt, %10, %13 : vector<768x16xi32>
    %c0_i32_3 = arith.constant 0 : i32
    %15 = arith.cmpi slt, %8, %c0_i32_3 : i32
    %16 = vector.broadcast %15 : i1 to vector<768x16xi1>
    %17 = vector.broadcast %16 : vector<768x16xi1> to vector<768x16xi1>
    %18 = arith.xori %14, %17 : vector<768x16xi1>
    %19 = arith.andi %18, %12 : vector<768x16xi1>
    %20 = vector.broadcast %8 : i32 to vector<768x16xi32>
    %21 = arith.addi %10, %20 : vector<768x16xi32>
    %22 = arith.select %19, %21, %10 : vector<768x16xi1>, vector<768x16xi32>
    %c0_i32_4 = arith.constant 0 : i32
    %23 = vector.broadcast %c0_i32_4 : i32 to vector<768x16xi32>
    %24 = arith.cmpi eq, %22, %23 : vector<768x16xi32>
    %cst_5 = arith.constant 0.000000e+00 : f32
    %25 = vector.broadcast %cst_5 : f32 to vector<768x16xf32>
    %26 = arith.select %24, %25, %3 : vector<768x16xi1>, vector<768x16xf32>
    %c31_i32 = arith.constant 31 : i32
    %27 = vector.broadcast %c31_i32 : i32 to vector<768x16xi32>
    %28 = arith.cmpi eq, %22, %27 : vector<768x16xi32>
    %cst_6 = arith.constant 0.000000e+00 : f32
    %29 = vector.broadcast %cst_6 : f32 to vector<768x16xf32>
    %30 = arith.select %28, %29, %5 : vector<768x16xi1>, vector<768x16xf32>
    %c0_7 = arith.constant 0 : index
    %c0_8 = arith.constant 0 : index
    %c0_9 = arith.constant 0 : index
    %31 = vector.load %arg1[%c0_7, %c0_8, %c0_9] : memref<3x16x32xf32, #tpu.memory_space<vmem>>, vector<1x16x32xf32>
    %32 = vector.shape_cast %31 : vector<1x16x32xf32> to vector<16x32xf32>
    %cst_10 = arith.constant dense<0.000000e+00> : vector<768x32xf32>
    %33 = tpu.matmul %26, %32, %cst_10 {dimension_numbers = #tpu.dot_dimension_numbers<[1], [0], [0], [1], [0, 0, 1, 1], [], []>} : vector<768x16xf32>, vector<16x32xf32>, vector<768x32xf32> -> vector<768x32xf32>
    %c1 = arith.constant 1 : index
    %c0_11 = arith.constant 0 : index
    %c0_12 = arith.constant 0 : index
    %34 = vector.load %arg1[%c1, %c0_11, %c0_12] : memref<3x16x32xf32, #tpu.memory_space<vmem>>, vector<1x16x32xf32>
    %35 = vector.shape_cast %34 : vector<1x16x32xf32> to vector<16x32xf32>
    %cst_13 = arith.constant dense<0.000000e+00> : vector<768x32xf32>
    %36 = tpu.matmul %0, %35, %cst_13 {dimension_numbers = #tpu.dot_dimension_numbers<[1], [0], [0], [1], [0, 0, 1, 1], [], []>} : vector<768x16xf32>, vector<16x32xf32>, vector<768x32xf32> -> vector<768x32xf32>
    %37 = arith.addf %33, %36 : vector<768x32xf32>
    %c2 = arith.constant 2 : index
    %c0_14 = arith.constant 0 : index
    %c0_15 = arith.constant 0 : index
    %38 = vector.load %arg1[%c2, %c0_14, %c0_15] : memref<3x16x32xf32, #tpu.memory_space<vmem>>, vector<1x16x32xf32>
    %39 = vector.shape_cast %38 : vector<1x16x32xf32> to vector<16x32xf32>
    %cst_16 = arith.constant dense<0.000000e+00> : vector<768x32xf32>
    %40 = tpu.matmul %30, %39, %cst_16 {dimension_numbers = #tpu.dot_dimension_numbers<[1], [0], [0], [1], [0, 0, 1, 1], [], []>} : vector<768x16xf32>, vector<16x32xf32>, vector<768x32xf32> -> vector<768x32xf32>
    %41 = arith.addf %37, %40 : vector<768x32xf32>
    %c0_17 = arith.constant 0 : index
    %c0_18 = arith.constant 0 : index
    %42 = vector.load %arg2[%c0_17, %c0_18] : memref<1x32xf32, #tpu.memory_space<vmem>>, vector<1x32xf32>
    %43 = vector.broadcast %42 : vector<1x32xf32> to vector<768x32xf32>
    %44 = arith.addf %41, %43 : vector<768x32xf32>
    %c0_19 = arith.constant 0 : index
    %c0_20 = arith.constant 0 : index
    %45 = vector.load %arg3[%c0_19, %c0_20] : memref<768x1xf32, #tpu.memory_space<vmem>>, vector<768x1xf32>
    %46 = vector.broadcast %45 : vector<768x1xf32> to vector<768x32xf32>
    %47 = arith.mulf %44, %46 : vector<768x32xf32>
    %c0_21 = arith.constant 0 : index
    %c0_22 = arith.constant 0 : index
    %48 = vector.load %arg4[%c0_21, %c0_22] : memref<768x1xf32, #tpu.memory_space<vmem>>, vector<768x1xf32>
    %49 = vector.broadcast %48 : vector<768x1xf32> to vector<768x32xf32>
    %50 = arith.addf %47, %49 : vector<768x32xf32>
    %cst_23 = arith.constant 0.000000e+00 : f32
    %51 = vector.broadcast %cst_23 : f32 to vector<64x32xf32>
    %cst_24 = arith.constant 5.000000e-01 : f32
    %52 = vector.broadcast %cst_24 : f32 to vector<64x32xf32>
    %53 = arith.mulf %51, %52 : vector<64x32xf32>
    %54 = vector.extract_strided_slice %50 {offsets = [0, 0], sizes = [64, 32], strides = [1, 1]} : vector<768x32xf32> to vector<64x32xf32>
    %55 = arith.addf %53, %54 : vector<64x32xf32>
    %cst_25 = arith.constant 1.000000e+00 : f32
    %56 = vector.broadcast %cst_25 : f32 to vector<64x32xf32>
    %57 = arith.cmpf oge, %55, %56 : vector<64x32xf32>
    %58 = arith.extui %57 : vector<64x32xi1> to vector<64x32xi32>
    %59 = arith.sitofp %58 : vector<64x32xi32> to vector<64x32xf32>
    %c0_26 = arith.constant 0 : index
    %c0_27 = arith.constant 0 : index
    %60 = vector.load %arg15[%c0_26, %c0_27] : memref<768x32xf32, #tpu.memory_space<vmem>>, vector<64x32xf32>
    tpu.vector_store %arg15[%c0_26, %c0_27], %59 {strides = array<i32>} : memref<768x32xf32, #tpu.memory_space<vmem>>, vector<64x32xf32>,
    %cst_28 = arith.constant 0.000000e+00 : f32
    %61 = vector.broadcast %cst_28 : f32 to vector<64x32xf32>
    %62 = arith.select %57, %61, %55 : vector<64x32xi1>, vector<64x32xf32>
    %cst_29 = arith.constant 5.000000e-01 : f32
    %63 = vector.broadcast %cst_29 : f32 to vector<64x32xf32>
    %64 = arith.mulf %62, %63 : vector<64x32xf32>
    %65 = vector.extract_strided_slice %50 {offsets = [64, 0], sizes = [64, 32], strides = [1, 1]} : vector<768x32xf32> to vector<64x32xf32>
    %66 = arith.addf %64, %65 : vector<64x32xf32>
    %cst_30 = arith.constant 1.000000e+00 : f32
    %67 = vector.broadcast %cst_30 : f32 to vector<64x32xf32>
    %68 = arith.cmpf oge, %66, %67 : vector<64x32xf32>
    %69 = arith.extui %68 : vector<64x32xi1> to vector<64x32xi32>
    %70 = arith.sitofp %69 : vector<64x32xi32> to vector<64x32xf32>
    %c64 = arith.constant 64 : index
    %c0_31 = arith.constant 0 : index
    %71 = vector.load %arg15[%c64, %c0_31] : memref<768x32xf32, #tpu.memory_space<vmem>>, vector<64x32xf32>
    tpu.vector_store %arg15[%c64, %c0_31], %70 {strides = array<i32>} : memref<768x32xf32, #tpu.memory_space<vmem>>, vector<64x32xf32>,
    %cst_32 = arith.constant 0.000000e+00 : f32
    %72 = vector.broadcast %cst_32 : f32 to vector<64x32xf32>
    %73 = arith.select %68, %72, %66 : vector<64x32xi1>, vector<64x32xf32>
    %cst_33 = arith.constant 5.000000e-01 : f32
    %74 = vector.broadcast %cst_33 : f32 to vector<64x32xf32>
    %75 = arith.mulf %73, %74 : vector<64x32xf32>
    %76 = vector.extract_strided_slice %50 {offsets = [128, 0], sizes = [64, 32], strides = [1, 1]} : vector<768x32xf32> to vector<64x32xf32>
    %77 = arith.addf %75, %76 : vector<64x32xf32>
    %cst_34 = arith.constant 1.000000e+00 : f32
    %78 = vector.broadcast %cst_34 : f32 to vector<64x32xf32>
    %79 = arith.cmpf oge, %77, %78 : vector<64x32xf32>
    %80 = arith.extui %79 : vector<64x32xi1> to vector<64x32xi32>
    %81 = arith.sitofp %80 : vector<64x32xi32> to vector<64x32xf32>
    %c128 = arith.constant 128 : index
    %c0_35 = arith.constant 0 : index
    %82 = vector.load %arg15[%c128, %c0_35] : memref<768x32xf32, #tpu.memory_space<vmem>>, vector<64x32xf32>
    tpu.vector_store %arg15[%c128, %c0_35], %81 {strides = array<i32>} : memref<768x32xf32, #tpu.memory_space<vmem>>, vector<64x32xf32>,
    %cst_36 = arith.constant 0.000000e+00 : f32
    %83 = vector.broadcast %cst_36 : f32 to vector<64x32xf32>
    %84 = arith.select %79, %83, %77 : vector<64x32xi1>, vector<64x32xf32>
    %cst_37 = arith.constant 5.000000e-01 : f32
    %85 = vector.broadcast %cst_37 : f32 to vector<64x32xf32>
    %86 = arith.mulf %84, %85 : vector<64x32xf32>
    %87 = vector.extract_strided_slice %50 {offsets = [192, 0], sizes = [64, 32], strides = [1, 1]} : vector<768x32xf32> to vector<64x32xf32>
    %88 = arith.addf %86, %87 : vector<64x32xf32>
    %cst_38 = arith.constant 1.000000e+00 : f32
    %89 = vector.broadcast %cst_38 : f32 to vector<64x32xf32>
    %90 = arith.cmpf oge, %88, %89 : vector<64x32xf32>
    %91 = arith.extui %90 : vector<64x32xi1> to vector<64x32xi32>
    %92 = arith.sitofp %91 : vector<64x32xi32> to vector<64x32xf32>
    %c192 = arith.constant 192 : index
    %c0_39 = arith.constant 0 : index
    %93 = vector.load %arg15[%c192, %c0_39] : memref<768x32xf32, #tpu.memory_space<vmem>>, vector<64x32xf32>
    tpu.vector_store %arg15[%c192, %c0_39], %92 {strides = array<i32>} : memref<768x32xf32, #tpu.memory_space<vmem>>, vector<64x32xf32>,
    %cst_40 = arith.constant 0.000000e+00 : f32
    %94 = vector.broadcast %cst_40 : f32 to vector<64x32xf32>
    %95 = arith.select %90, %94, %88 : vector<64x32xi1>, vector<64x32xf32>
    %cst_41 = arith.constant 5.000000e-01 : f32
    %96 = vector.broadcast %cst_41 : f32 to vector<64x32xf32>
    %97 = arith.mulf %95, %96 : vector<64x32xf32>
    %98 = vector.extract_strided_slice %50 {offsets = [256, 0], sizes = [64, 32], strides = [1, 1]} : vector<768x32xf32> to vector<64x32xf32>
    %99 = arith.addf %97, %98 : vector<64x32xf32>
    %cst_42 = arith.constant 1.000000e+00 : f32
    %100 = vector.broadcast %cst_42 : f32 to vector<64x32xf32>
    %101 = arith.cmpf oge, %99, %100 : vector<64x32xf32>
    %102 = arith.extui %101 : vector<64x32xi1> to vector<64x32xi32>
    %103 = arith.sitofp %102 : vector<64x32xi32> to vector<64x32xf32>
    %c256 = arith.constant 256 : index
    %c0_43 = arith.constant 0 : index
    %104 = vector.load %arg15[%c256, %c0_43] : memref<768x32xf32, #tpu.memory_space<vmem>>, vector<64x32xf32>
    tpu.vector_store %arg15[%c256, %c0_43], %103 {strides = array<i32>} : memref<768x32xf32, #tpu.memory_space<vmem>>, vector<64x32xf32>,
    %cst_44 = arith.constant 0.000000e+00 : f32
    %105 = vector.broadcast %cst_44 : f32 to vector<64x32xf32>
    %106 = arith.select %101, %105, %99 : vector<64x32xi1>, vector<64x32xf32>
    %cst_45 = arith.constant 5.000000e-01 : f32
    %107 = vector.broadcast %cst_45 : f32 to vector<64x32xf32>
    %108 = arith.mulf %106, %107 : vector<64x32xf32>
    %109 = vector.extract_strided_slice %50 {offsets = [320, 0], sizes = [64, 32], strides = [1, 1]} : vector<768x32xf32> to vector<64x32xf32>
    %110 = arith.addf %108, %109 : vector<64x32xf32>
    %cst_46 = arith.constant 1.000000e+00 : f32
    %111 = vector.broadcast %cst_46 : f32 to vector<64x32xf32>
    %112 = arith.cmpf oge, %110, %111 : vector<64x32xf32>
    %113 = arith.extui %112 : vector<64x32xi1> to vector<64x32xi32>
    %114 = arith.sitofp %113 : vector<64x32xi32> to vector<64x32xf32>
    %c320 = arith.constant 320 : index
    %c0_47 = arith.constant 0 : index
    %115 = vector.load %arg15[%c320, %c0_47] : memref<768x32xf32, #tpu.memory_space<vmem>>, vector<64x32xf32>
    tpu.vector_store %arg15[%c320, %c0_47], %114 {strides = array<i32>} : memref<768x32xf32, #tpu.memory_space<vmem>>, vector<64x32xf32>,
    %cst_48 = arith.constant 0.000000e+00 : f32
    %116 = vector.broadcast %cst_48 : f32 to vector<64x32xf32>
    %117 = arith.select %112, %116, %110 : vector<64x32xi1>, vector<64x32xf32>
    %cst_49 = arith.constant 5.000000e-01 : f32
    %118 = vector.broadcast %cst_49 : f32 to vector<64x32xf32>
    %119 = arith.mulf %117, %118 : vector<64x32xf32>
    %120 = vector.extract_strided_slice %50 {offsets = [384, 0], sizes = [64, 32], strides = [1, 1]} : vector<768x32xf32> to vector<64x32xf32>
    %121 = arith.addf %119, %120 : vector<64x32xf32>
    %cst_50 = arith.constant 1.000000e+00 : f32
    %122 = vector.broadcast %cst_50 : f32 to vector<64x32xf32>
    %123 = arith.cmpf oge, %121, %122 : vector<64x32xf32>
    %124 = arith.extui %123 : vector<64x32xi1> to vector<64x32xi32>
    %125 = arith.sitofp %124 : vector<64x32xi32> to vector<64x32xf32>
    %c384 = arith.constant 384 : index
    %c0_51 = arith.constant 0 : index
    %126 = vector.load %arg15[%c384, %c0_51] : memref<768x32xf32, #tpu.memory_space<vmem>>, vector<64x32xf32>
    tpu.vector_store %arg15[%c384, %c0_51], %125 {strides = array<i32>} : memref<768x32xf32, #tpu.memory_space<vmem>>, vector<64x32xf32>,
    %cst_52 = arith.constant 0.000000e+00 : f32
    %127 = vector.broadcast %cst_52 : f32 to vector<64x32xf32>
    %128 = arith.select %123, %127, %121 : vector<64x32xi1>, vector<64x32xf32>
    %cst_53 = arith.constant 5.000000e-01 : f32
    %129 = vector.broadcast %cst_53 : f32 to vector<64x32xf32>
    %130 = arith.mulf %128, %129 : vector<64x32xf32>
    %131 = vector.extract_strided_slice %50 {offsets = [448, 0], sizes = [64, 32], strides = [1, 1]} : vector<768x32xf32> to vector<64x32xf32>
    %132 = arith.addf %130, %131 : vector<64x32xf32>
    %cst_54 = arith.constant 1.000000e+00 : f32
    %133 = vector.broadcast %cst_54 : f32 to vector<64x32xf32>
    %134 = arith.cmpf oge, %132, %133 : vector<64x32xf32>
    %135 = arith.extui %134 : vector<64x32xi1> to vector<64x32xi32>
    %136 = arith.sitofp %135 : vector<64x32xi32> to vector<64x32xf32>
    %c448 = arith.constant 448 : index
    %c0_55 = arith.constant 0 : index
    %137 = vector.load %arg15[%c448, %c0_55] : memref<768x32xf32, #tpu.memory_space<vmem>>, vector<64x32xf32>
    tpu.vector_store %arg15[%c448, %c0_55], %136 {strides = array<i32>} : memref<768x32xf32, #tpu.memory_space<vmem>>, vector<64x32xf32>,
    %cst_56 = arith.constant 0.000000e+00 : f32
    %138 = vector.broadcast %cst_56 : f32 to vector<64x32xf32>
    %139 = arith.select %134, %138, %132 : vector<64x32xi1>, vector<64x32xf32>
    %cst_57 = arith.constant 5.000000e-01 : f32
    %140 = vector.broadcast %cst_57 : f32 to vector<64x32xf32>
    %141 = arith.mulf %139, %140 : vector<64x32xf32>
    %142 = vector.extract_strided_slice %50 {offsets = [512, 0], sizes = [64, 32], strides = [1, 1]} : vector<768x32xf32> to vector<64x32xf32>
    %143 = arith.addf %141, %142 : vector<64x32xf32>
    %cst_58 = arith.constant 1.000000e+00 : f32
    %144 = vector.broadcast %cst_58 : f32 to vector<64x32xf32>
    %145 = arith.cmpf oge, %143, %144 : vector<64x32xf32>
    %146 = arith.extui %145 : vector<64x32xi1> to vector<64x32xi32>
    %147 = arith.sitofp %146 : vector<64x32xi32> to vector<64x32xf32>
    %c512 = arith.constant 512 : index
    %c0_59 = arith.constant 0 : index
    %148 = vector.load %arg15[%c512, %c0_59] : memref<768x32xf32, #tpu.memory_space<vmem>>, vector<64x32xf32>
    tpu.vector_store %arg15[%c512, %c0_59], %147 {strides = array<i32>} : memref<768x32xf32, #tpu.memory_space<vmem>>, vector<64x32xf32>,
    %cst_60 = arith.constant 0.000000e+00 : f32
    %149 = vector.broadcast %cst_60 : f32 to vector<64x32xf32>
    %150 = arith.select %145, %149, %143 : vector<64x32xi1>, vector<64x32xf32>
    %cst_61 = arith.constant 5.000000e-01 : f32
    %151 = vector.broadcast %cst_61 : f32 to vector<64x32xf32>
    %152 = arith.mulf %150, %151 : vector<64x32xf32>
    %153 = vector.extract_strided_slice %50 {offsets = [576, 0], sizes = [64, 32], strides = [1, 1]} : vector<768x32xf32> to vector<64x32xf32>
    %154 = arith.addf %152, %153 : vector<64x32xf32>
    %cst_62 = arith.constant 1.000000e+00 : f32
    %155 = vector.broadcast %cst_62 : f32 to vector<64x32xf32>
    %156 = arith.cmpf oge, %154, %155 : vector<64x32xf32>
    %157 = arith.extui %156 : vector<64x32xi1> to vector<64x32xi32>
    %158 = arith.sitofp %157 : vector<64x32xi32> to vector<64x32xf32>
    %c576 = arith.constant 576 : index
    %c0_63 = arith.constant 0 : index
    %159 = vector.load %arg15[%c576, %c0_63] : memref<768x32xf32, #tpu.memory_space<vmem>>, vector<64x32xf32>
    tpu.vector_store %arg15[%c576, %c0_63], %158 {strides = array<i32>} : memref<768x32xf32, #tpu.memory_space<vmem>>, vector<64x32xf32>,
    %cst_64 = arith.constant 0.000000e+00 : f32
    %160 = vector.broadcast %cst_64 : f32 to vector<64x32xf32>
    %161 = arith.select %156, %160, %154 : vector<64x32xi1>, vector<64x32xf32>
    %cst_65 = arith.constant 5.000000e-01 : f32
    %162 = vector.broadcast %cst_65 : f32 to vector<64x32xf32>
    %163 = arith.mulf %161, %162 : vector<64x32xf32>
    %164 = vector.extract_strided_slice %50 {offsets = [640, 0], sizes = [64, 32], strides = [1, 1]} : vector<768x32xf32> to vector<64x32xf32>
    %165 = arith.addf %163, %164 : vector<64x32xf32>
    %cst_66 = arith.constant 1.000000e+00 : f32
    %166 = vector.broadcast %cst_66 : f32 to vector<64x32xf32>
    %167 = arith.cmpf oge, %165, %166 : vector<64x32xf32>
    %168 = arith.extui %167 : vector<64x32xi1> to vector<64x32xi32>
    %169 = arith.sitofp %168 : vector<64x32xi32> to vector<64x32xf32>
    %c640 = arith.constant 640 : index
    %c0_67 = arith.constant 0 : index
    %170 = vector.load %arg15[%c640, %c0_67] : memref<768x32xf32, #tpu.memory_space<vmem>>, vector<64x32xf32>
    tpu.vector_store %arg15[%c640, %c0_67], %169 {strides = array<i32>} : memref<768x32xf32, #tpu.memory_space<vmem>>, vector<64x32xf32>,
    %cst_68 = arith.constant 0.000000e+00 : f32
    %171 = vector.broadcast %cst_68 : f32 to vector<64x32xf32>
    %172 = arith.select %167, %171, %165 : vector<64x32xi1>, vector<64x32xf32>
    %cst_69 = arith.constant 5.000000e-01 : f32
    %173 = vector.broadcast %cst_69 : f32 to vector<64x32xf32>
    %174 = arith.mulf %172, %173 : vector<64x32xf32>
    %175 = vector.extract_strided_slice %50 {offsets = [704, 0], sizes = [64, 32], strides = [1, 1]} : vector<768x32xf32> to vector<64x32xf32>
    %176 = arith.addf %174, %175 : vector<64x32xf32>
    %cst_70 = arith.constant 1.000000e+00 : f32
    %177 = vector.broadcast %cst_70 : f32 to vector<64x32xf32>
    %178 = arith.cmpf oge, %176, %177 : vector<64x32xf32>
    %179 = arith.extui %178 : vector<64x32xi1> to vector<64x32xi32>
    %180 = arith.sitofp %179 : vector<64x32xi32> to vector<64x32xf32>
    %c704 = arith.constant 704 : index
    %c0_71 = arith.constant 0 : index
    %181 = vector.load %arg15[%c704, %c0_71] : memref<768x32xf32, #tpu.memory_space<vmem>>, vector<64x32xf32>
    tpu.vector_store %arg15[%c704, %c0_71], %180 {strides = array<i32>} : memref<768x32xf32, #tpu.memory_space<vmem>>, vector<64x32xf32>,
    %c0_72 = arith.constant 0 : index
    %c0_73 = arith.constant 0 : index
    %182 = tpu.strided_load %arg15[%c0_72, %c0_73] {strides = array<i32: 2, 1>} : memref<768x32xf32, #tpu.memory_space<vmem>>, vector<384x32xf32>
    %c1_74 = arith.constant 1 : index
    %c0_75 = arith.constant 0 : index
    %183 = tpu.strided_load %arg15[%c1_74, %c0_75] {strides = array<i32: 2, 1>} : memref<768x32xf32, #tpu.memory_space<vmem>>, vector<384x32xf32>
    %184 = arith.maximumf %182, %183 : vector<384x32xf32>
    %cst_76 = arith.constant 0.000000e+00 : f32
    %185 = vector.broadcast %cst_76 : f32 to vector<1x32xf32>
    %186 = vector.extract_strided_slice %184 {offsets = [0, 0], sizes = [383, 32], strides = [1, 1]} : vector<384x32xf32> to vector<383x32xf32>
    %187 = tpu.concatenate %185, %186 in 0 : vector<1x32xf32>, vector<383x32xf32> -> vector<384x32xf32>
    %188 = vector.extract_strided_slice %184 {offsets = [1, 0], sizes = [383, 32], strides = [1, 1]} : vector<384x32xf32> to vector<383x32xf32>
    %189 = tpu.concatenate %188, %185 in 0 : vector<383x32xf32>, vector<1x32xf32> -> vector<384x32xf32>
    %190 = tpu.iota {dimensions = array<i32: 0>} : vector<384x32xi32>
    %c16_i32 = arith.constant 16 : i32
    %c0_i32_77 = arith.constant 0 : i32
    %191 = arith.cmpi eq, %c16_i32, %c0_i32_77 : i32
    %c1_i32_78 = arith.constant 1 : i32
    %192 = arith.select %191, %c1_i32_78, %c16_i32 : i32
    %193 = vector.broadcast %192 : i32 to vector<384x32xi32>
    %194 = arith.remsi %190, %193 : vector<384x32xi32>
    %c0_i32_79 = arith.constant 0 : i32
    %195 = vector.broadcast %c0_i32_79 : i32 to vector<384x32xi32>
    %196 = arith.cmpi ne, %194, %195 : vector<384x32xi32>
    %c0_i32_80 = arith.constant 0 : i32
    %197 = vector.broadcast %c0_i32_80 : i32 to vector<384x32xi32>
    %198 = arith.cmpi slt, %194, %197 : vector<384x32xi32>
    %c0_i32_81 = arith.constant 0 : i32
    %199 = arith.cmpi slt, %192, %c0_i32_81 : i32
    %200 = vector.broadcast %199 : i1 to vector<384x32xi1>
    %201 = vector.broadcast %200 : vector<384x32xi1> to vector<384x32xi1>
    %202 = arith.xori %198, %201 : vector<384x32xi1>
    %203 = arith.andi %202, %196 : vector<384x32xi1>
    %204 = vector.broadcast %192 : i32 to vector<384x32xi32>
    %205 = arith.addi %194, %204 : vector<384x32xi32>
    %206 = arith.select %203, %205, %194 : vector<384x32xi1>, vector<384x32xi32>
    %c0_i32_82 = arith.constant 0 : i32
    %207 = vector.broadcast %c0_i32_82 : i32 to vector<384x32xi32>
    %208 = arith.cmpi eq, %206, %207 : vector<384x32xi32>
    %cst_83 = arith.constant 0.000000e+00 : f32
    %209 = vector.broadcast %cst_83 : f32 to vector<384x32xf32>
    %210 = arith.select %208, %209, %187 : vector<384x32xi1>, vector<384x32xf32>
    %211 = arith.truncf %210 : vector<384x32xf32> to vector<384x32xbf16>
    %c15_i32 = arith.constant 15 : i32
    %212 = vector.broadcast %c15_i32 : i32 to vector<384x32xi32>
    %213 = arith.cmpi eq, %206, %212 : vector<384x32xi32>
    %cst_84 = arith.constant 0.000000e+00 : f32
    %214 = vector.broadcast %cst_84 : f32 to vector<384x32xf32>
    %215 = arith.select %213, %214, %189 : vector<384x32xi1>, vector<384x32xf32>
    %216 = arith.truncf %215 : vector<384x32xf32> to vector<384x32xbf16>
    %c0_85 = arith.constant 0 : index
    %c0_86 = arith.constant 0 : index
    %c0_87 = arith.constant 0 : index
    %217 = vector.load %arg5[%c0_85, %c0_86, %c0_87] : memref<3x32x64xbf16, #tpu.memory_space<vmem>>, vector<1x32x64xbf16>
    %218 = vector.shape_cast %217 : vector<1x32x64xbf16> to vector<32x64xbf16>
    %cst_88 = arith.constant dense<0.000000e+00> : vector<384x64xf32>
    %219 = tpu.matmul %211, %218, %cst_88 {dimension_numbers = #tpu.dot_dimension_numbers<[1], [0], [0], [1], [0, 0, 1, 1], [], []>} : vector<384x32xbf16>, vector<32x64xbf16>, vector<384x64xf32> -> vector<384x64xf32>
    %220 = arith.truncf %184 : vector<384x32xf32> to vector<384x32xbf16>
    %c1_89 = arith.constant 1 : index
    %c0_90 = arith.constant 0 : index
    %c0_91 = arith.constant 0 : index
    %221 = vector.load %arg5[%c1_89, %c0_90, %c0_91] : memref<3x32x64xbf16, #tpu.memory_space<vmem>>, vector<1x32x64xbf16>
    %222 = vector.shape_cast %221 : vector<1x32x64xbf16> to vector<32x64xbf16>
    %cst_92 = arith.constant dense<0.000000e+00> : vector<384x64xf32>
    %223 = tpu.matmul %220, %222, %cst_92 {dimension_numbers = #tpu.dot_dimension_numbers<[1], [0], [0], [1], [0, 0, 1, 1], [], []>} : vector<384x32xbf16>, vector<32x64xbf16>, vector<384x64xf32> -> vector<384x64xf32>
    %224 = arith.addf %219, %223 : vector<384x64xf32>
    %c2_93 = arith.constant 2 : index
    %c0_94 = arith.constant 0 : index
    %c0_95 = arith.constant 0 : index
    %225 = vector.load %arg5[%c2_93, %c0_94, %c0_95] : memref<3x32x64xbf16, #tpu.memory_space<vmem>>, vector<1x32x64xbf16>
    %226 = vector.shape_cast %225 : vector<1x32x64xbf16> to vector<32x64xbf16>
    %cst_96 = arith.constant dense<0.000000e+00> : vector<384x64xf32>
    %227 = tpu.matmul %216, %226, %cst_96 {dimension_numbers = #tpu.dot_dimension_numbers<[1], [0], [0], [1], [0, 0, 1, 1], [], []>} : vector<384x32xbf16>, vector<32x64xbf16>, vector<384x64xf32> -> vector<384x64xf32>
    %228 = arith.addf %224, %227 : vector<384x64xf32>
    %c0_97 = arith.constant 0 : index
    %c0_98 = arith.constant 0 : index
    %229 = vector.load %arg6[%c0_97, %c0_98] : memref<1x64xf32, #tpu.memory_space<vmem>>, vector<1x64xf32>
    %230 = vector.broadcast %229 : vector<1x64xf32> to vector<384x64xf32>
    %231 = arith.addf %228, %230 : vector<384x64xf32>
    %c0_99 = arith.constant 0 : index
    %c0_100 = arith.constant 0 : index
    %232 = vector.load %arg7[%c0_99, %c0_100] : memref<384x1xf32, #tpu.memory_space<vmem>>, vector<384x1xf32>
    %233 = vector.broadcast %232 : vector<384x1xf32> to vector<384x64xf32>
    %234 = arith.mulf %231, %233 : vector<384x64xf32>
    %c0_101 = arith.constant 0 : index
    %c0_102 = arith.constant 0 : index
    %235 = vector.load %arg8[%c0_101, %c0_102] : memref<384x1xf32, #tpu.memory_space<vmem>>, vector<384x1xf32>
    %236 = vector.broadcast %235 : vector<384x1xf32> to vector<384x64xf32>
    %237 = arith.addf %234, %236 : vector<384x64xf32>
    %cst_103 = arith.constant 0.000000e+00 : f32
    %238 = vector.broadcast %cst_103 : f32 to vector<32x64xf32>
    %cst_104 = arith.constant 5.000000e-01 : f32
    %239 = vector.broadcast %cst_104 : f32 to vector<32x64xf32>
    %240 = arith.mulf %238, %239 : vector<32x64xf32>
    %241 = vector.extract_strided_slice %237 {offsets = [0, 0], sizes = [32, 64], strides = [1, 1]} : vector<384x64xf32> to vector<32x64xf32>
    %242 = arith.addf %240, %241 : vector<32x64xf32>
    %cst_105 = arith.constant 1.000000e+00 : f32
    %243 = vector.broadcast %cst_105 : f32 to vector<32x64xf32>
    %244 = arith.cmpf oge, %242, %243 : vector<32x64xf32>
    %245 = arith.extui %244 : vector<32x64xi1> to vector<32x64xi32>
    %246 = arith.sitofp %245 : vector<32x64xi32> to vector<32x64xf32>
    %c0_106 = arith.constant 0 : index
    %c0_107 = arith.constant 0 : index
    %247 = vector.load %arg16[%c0_106, %c0_107] : memref<384x64xf32, #tpu.memory_space<vmem>>, vector<32x64xf32>
    tpu.vector_store %arg16[%c0_106, %c0_107], %246 {strides = array<i32>} : memref<384x64xf32, #tpu.memory_space<vmem>>, vector<32x64xf32>,
    %cst_108 = arith.constant 0.000000e+00 : f32
    %248 = vector.broadcast %cst_108 : f32 to vector<32x64xf32>
    %249 = arith.select %244, %248, %242 : vector<32x64xi1>, vector<32x64xf32>
    %cst_109 = arith.constant 5.000000e-01 : f32
    %250 = vector.broadcast %cst_109 : f32 to vector<32x64xf32>
    %251 = arith.mulf %249, %250 : vector<32x64xf32>
    %252 = vector.extract_strided_slice %237 {offsets = [32, 0], sizes = [32, 64], strides = [1, 1]} : vector<384x64xf32> to vector<32x64xf32>
    %253 = arith.addf %251, %252 : vector<32x64xf32>
    %cst_110 = arith.constant 1.000000e+00 : f32
    %254 = vector.broadcast %cst_110 : f32 to vector<32x64xf32>
    %255 = arith.cmpf oge, %253, %254 : vector<32x64xf32>
    %256 = arith.extui %255 : vector<32x64xi1> to vector<32x64xi32>
    %257 = arith.sitofp %256 : vector<32x64xi32> to vector<32x64xf32>
    %c32 = arith.constant 32 : index
    %c0_111 = arith.constant 0 : index
    %258 = vector.load %arg16[%c32, %c0_111] : memref<384x64xf32, #tpu.memory_space<vmem>>, vector<32x64xf32>
    tpu.vector_store %arg16[%c32, %c0_111], %257 {strides = array<i32>} : memref<384x64xf32, #tpu.memory_space<vmem>>, vector<32x64xf32>,
    %cst_112 = arith.constant 0.000000e+00 : f32
    %259 = vector.broadcast %cst_112 : f32 to vector<32x64xf32>
    %260 = arith.select %255, %259, %253 : vector<32x64xi1>, vector<32x64xf32>
    %cst_113 = arith.constant 5.000000e-01 : f32
    %261 = vector.broadcast %cst_113 : f32 to vector<32x64xf32>
    %262 = arith.mulf %260, %261 : vector<32x64xf32>
    %263 = vector.extract_strided_slice %237 {offsets = [64, 0], sizes = [32, 64], strides = [1, 1]} : vector<384x64xf32> to vector<32x64xf32>
    %264 = arith.addf %262, %263 : vector<32x64xf32>
    %cst_114 = arith.constant 1.000000e+00 : f32
    %265 = vector.broadcast %cst_114 : f32 to vector<32x64xf32>
    %266 = arith.cmpf oge, %264, %265 : vector<32x64xf32>
    %267 = arith.extui %266 : vector<32x64xi1> to vector<32x64xi32>
    %268 = arith.sitofp %267 : vector<32x64xi32> to vector<32x64xf32>
    %c64_115 = arith.constant 64 : index
    %c0_116 = arith.constant 0 : index
    %269 = vector.load %arg16[%c64_115, %c0_116] : memref<384x64xf32, #tpu.memory_space<vmem>>, vector<32x64xf32>
    tpu.vector_store %arg16[%c64_115, %c0_116], %268 {strides = array<i32>} : memref<384x64xf32, #tpu.memory_space<vmem>>, vector<32x64xf32>,
    %cst_117 = arith.constant 0.000000e+00 : f32
    %270 = vector.broadcast %cst_117 : f32 to vector<32x64xf32>
    %271 = arith.select %266, %270, %264 : vector<32x64xi1>, vector<32x64xf32>
    %cst_118 = arith.constant 5.000000e-01 : f32
    %272 = vector.broadcast %cst_118 : f32 to vector<32x64xf32>
    %273 = arith.mulf %271, %272 : vector<32x64xf32>
    %274 = vector.extract_strided_slice %237 {offsets = [96, 0], sizes = [32, 64], strides = [1, 1]} : vector<384x64xf32> to vector<32x64xf32>
    %275 = arith.addf %273, %274 : vector<32x64xf32>
    %cst_119 = arith.constant 1.000000e+00 : f32
    %276 = vector.broadcast %cst_119 : f32 to vector<32x64xf32>
    %277 = arith.cmpf oge, %275, %276 : vector<32x64xf32>
    %278 = arith.extui %277 : vector<32x64xi1> to vector<32x64xi32>
    %279 = arith.sitofp %278 : vector<32x64xi32> to vector<32x64xf32>
    %c96 = arith.constant 96 : index
    %c0_120 = arith.constant 0 : index
    %280 = vector.load %arg16[%c96, %c0_120] : memref<384x64xf32, #tpu.memory_space<vmem>>, vector<32x64xf32>
    tpu.vector_store %arg16[%c96, %c0_120], %279 {strides = array<i32>} : memref<384x64xf32, #tpu.memory_space<vmem>>, vector<32x64xf32>,
    %cst_121 = arith.constant 0.000000e+00 : f32
    %281 = vector.broadcast %cst_121 : f32 to vector<32x64xf32>
    %282 = arith.select %277, %281, %275 : vector<32x64xi1>, vector<32x64xf32>
    %cst_122 = arith.constant 5.000000e-01 : f32
    %283 = vector.broadcast %cst_122 : f32 to vector<32x64xf32>
    %284 = arith.mulf %282, %283 : vector<32x64xf32>
    %285 = vector.extract_strided_slice %237 {offsets = [128, 0], sizes = [32, 64], strides = [1, 1]} : vector<384x64xf32> to vector<32x64xf32>
    %286 = arith.addf %284, %285 : vector<32x64xf32>
    %cst_123 = arith.constant 1.000000e+00 : f32
    %287 = vector.broadcast %cst_123 : f32 to vector<32x64xf32>
    %288 = arith.cmpf oge, %286, %287 : vector<32x64xf32>
    %289 = arith.extui %288 : vector<32x64xi1> to vector<32x64xi32>
    %290 = arith.sitofp %289 : vector<32x64xi32> to vector<32x64xf32>
    %c128_124 = arith.constant 128 : index
    %c0_125 = arith.constant 0 : index
    %291 = vector.load %arg16[%c128_124, %c0_125] : memref<384x64xf32, #tpu.memory_space<vmem>>, vector<32x64xf32>
    tpu.vector_store %arg16[%c128_124, %c0_125], %290 {strides = array<i32>} : memref<384x64xf32, #tpu.memory_space<vmem>>, vector<32x64xf32>,
    %cst_126 = arith.constant 0.000000e+00 : f32
    %292 = vector.broadcast %cst_126 : f32 to vector<32x64xf32>
    %293 = arith.select %288, %292, %286 : vector<32x64xi1>, vector<32x64xf32>
    %cst_127 = arith.constant 5.000000e-01 : f32
    %294 = vector.broadcast %cst_127 : f32 to vector<32x64xf32>
    %295 = arith.mulf %293, %294 : vector<32x64xf32>
    %296 = vector.extract_strided_slice %237 {offsets = [160, 0], sizes = [32, 64], strides = [1, 1]} : vector<384x64xf32> to vector<32x64xf32>
    %297 = arith.addf %295, %296 : vector<32x64xf32>
    %cst_128 = arith.constant 1.000000e+00 : f32
    %298 = vector.broadcast %cst_128 : f32 to vector<32x64xf32>
    %299 = arith.cmpf oge, %297, %298 : vector<32x64xf32>
    %300 = arith.extui %299 : vector<32x64xi1> to vector<32x64xi32>
    %301 = arith.sitofp %300 : vector<32x64xi32> to vector<32x64xf32>
    %c160 = arith.constant 160 : index
    %c0_129 = arith.constant 0 : index
    %302 = vector.load %arg16[%c160, %c0_129] : memref<384x64xf32, #tpu.memory_space<vmem>>, vector<32x64xf32>
    tpu.vector_store %arg16[%c160, %c0_129], %301 {strides = array<i32>} : memref<384x64xf32, #tpu.memory_space<vmem>>, vector<32x64xf32>,
    %cst_130 = arith.constant 0.000000e+00 : f32
    %303 = vector.broadcast %cst_130 : f32 to vector<32x64xf32>
    %304 = arith.select %299, %303, %297 : vector<32x64xi1>, vector<32x64xf32>
    %cst_131 = arith.constant 5.000000e-01 : f32
    %305 = vector.broadcast %cst_131 : f32 to vector<32x64xf32>
    %306 = arith.mulf %304, %305 : vector<32x64xf32>
    %307 = vector.extract_strided_slice %237 {offsets = [192, 0], sizes = [32, 64], strides = [1, 1]} : vector<384x64xf32> to vector<32x64xf32>
    %308 = arith.addf %306, %307 : vector<32x64xf32>
    %cst_132 = arith.constant 1.000000e+00 : f32
    %309 = vector.broadcast %cst_132 : f32 to vector<32x64xf32>
    %310 = arith.cmpf oge, %308, %309 : vector<32x64xf32>
    %311 = arith.extui %310 : vector<32x64xi1> to vector<32x64xi32>
    %312 = arith.sitofp %311 : vector<32x64xi32> to vector<32x64xf32>
    %c192_133 = arith.constant 192 : index
    %c0_134 = arith.constant 0 : index
    %313 = vector.load %arg16[%c192_133, %c0_134] : memref<384x64xf32, #tpu.memory_space<vmem>>, vector<32x64xf32>
    tpu.vector_store %arg16[%c192_133, %c0_134], %312 {strides = array<i32>} : memref<384x64xf32, #tpu.memory_space<vmem>>, vector<32x64xf32>,
    %cst_135 = arith.constant 0.000000e+00 : f32
    %314 = vector.broadcast %cst_135 : f32 to vector<32x64xf32>
    %315 = arith.select %310, %314, %308 : vector<32x64xi1>, vector<32x64xf32>
    %cst_136 = arith.constant 5.000000e-01 : f32
    %316 = vector.broadcast %cst_136 : f32 to vector<32x64xf32>
    %317 = arith.mulf %315, %316 : vector<32x64xf32>
    %318 = vector.extract_strided_slice %237 {offsets = [224, 0], sizes = [32, 64], strides = [1, 1]} : vector<384x64xf32> to vector<32x64xf32>
    %319 = arith.addf %317, %318 : vector<32x64xf32>
    %cst_137 = arith.constant 1.000000e+00 : f32
    %320 = vector.broadcast %cst_137 : f32 to vector<32x64xf32>
    %321 = arith.cmpf oge, %319, %320 : vector<32x64xf32>
    %322 = arith.extui %321 : vector<32x64xi1> to vector<32x64xi32>
    %323 = arith.sitofp %322 : vector<32x64xi32> to vector<32x64xf32>
    %c224 = arith.constant 224 : index
    %c0_138 = arith.constant 0 : index
    %324 = vector.load %arg16[%c224, %c0_138] : memref<384x64xf32, #tpu.memory_space<vmem>>, vector<32x64xf32>
    tpu.vector_store %arg16[%c224, %c0_138], %323 {strides = array<i32>} : memref<384x64xf32, #tpu.memory_space<vmem>>, vector<32x64xf32>,
    %cst_139 = arith.constant 0.000000e+00 : f32
    %325 = vector.broadcast %cst_139 : f32 to vector<32x64xf32>
    %326 = arith.select %321, %325, %319 : vector<32x64xi1>, vector<32x64xf32>
    %cst_140 = arith.constant 5.000000e-01 : f32
    %327 = vector.broadcast %cst_140 : f32 to vector<32x64xf32>
    %328 = arith.mulf %326, %327 : vector<32x64xf32>
    %329 = vector.extract_strided_slice %237 {offsets = [256, 0], sizes = [32, 64], strides = [1, 1]} : vector<384x64xf32> to vector<32x64xf32>
    %330 = arith.addf %328, %329 : vector<32x64xf32>
    %cst_141 = arith.constant 1.000000e+00 : f32
    %331 = vector.broadcast %cst_141 : f32 to vector<32x64xf32>
    %332 = arith.cmpf oge, %330, %331 : vector<32x64xf32>
    %333 = arith.extui %332 : vector<32x64xi1> to vector<32x64xi32>
    %334 = arith.sitofp %333 : vector<32x64xi32> to vector<32x64xf32>
    %c256_142 = arith.constant 256 : index
    %c0_143 = arith.constant 0 : index
    %335 = vector.load %arg16[%c256_142, %c0_143] : memref<384x64xf32, #tpu.memory_space<vmem>>, vector<32x64xf32>
    tpu.vector_store %arg16[%c256_142, %c0_143], %334 {strides = array<i32>} : memref<384x64xf32, #tpu.memory_space<vmem>>, vector<32x64xf32>,
    %cst_144 = arith.constant 0.000000e+00 : f32
    %336 = vector.broadcast %cst_144 : f32 to vector<32x64xf32>
    %337 = arith.select %332, %336, %330 : vector<32x64xi1>, vector<32x64xf32>
    %cst_145 = arith.constant 5.000000e-01 : f32
    %338 = vector.broadcast %cst_145 : f32 to vector<32x64xf32>
    %339 = arith.mulf %337, %338 : vector<32x64xf32>
    %340 = vector.extract_strided_slice %237 {offsets = [288, 0], sizes = [32, 64], strides = [1, 1]} : vector<384x64xf32> to vector<32x64xf32>
    %341 = arith.addf %339, %340 : vector<32x64xf32>
    %cst_146 = arith.constant 1.000000e+00 : f32
    %342 = vector.broadcast %cst_146 : f32 to vector<32x64xf32>
    %343 = arith.cmpf oge, %341, %342 : vector<32x64xf32>
    %344 = arith.extui %343 : vector<32x64xi1> to vector<32x64xi32>
    %345 = arith.sitofp %344 : vector<32x64xi32> to vector<32x64xf32>
    %c288 = arith.constant 288 : index
    %c0_147 = arith.constant 0 : index
    %346 = vector.load %arg16[%c288, %c0_147] : memref<384x64xf32, #tpu.memory_space<vmem>>, vector<32x64xf32>
    tpu.vector_store %arg16[%c288, %c0_147], %345 {strides = array<i32>} : memref<384x64xf32, #tpu.memory_space<vmem>>, vector<32x64xf32>,
    %cst_148 = arith.constant 0.000000e+00 : f32
    %347 = vector.broadcast %cst_148 : f32 to vector<32x64xf32>
    %348 = arith.select %343, %347, %341 : vector<32x64xi1>, vector<32x64xf32>
    %cst_149 = arith.constant 5.000000e-01 : f32
    %349 = vector.broadcast %cst_149 : f32 to vector<32x64xf32>
    %350 = arith.mulf %348, %349 : vector<32x64xf32>
    %351 = vector.extract_strided_slice %237 {offsets = [320, 0], sizes = [32, 64], strides = [1, 1]} : vector<384x64xf32> to vector<32x64xf32>
    %352 = arith.addf %350, %351 : vector<32x64xf32>
    %cst_150 = arith.constant 1.000000e+00 : f32
    %353 = vector.broadcast %cst_150 : f32 to vector<32x64xf32>
    %354 = arith.cmpf oge, %352, %353 : vector<32x64xf32>
    %355 = arith.extui %354 : vector<32x64xi1> to vector<32x64xi32>
    %356 = arith.sitofp %355 : vector<32x64xi32> to vector<32x64xf32>
    %c320_151 = arith.constant 320 : index
    %c0_152 = arith.constant 0 : index
    %357 = vector.load %arg16[%c320_151, %c0_152] : memref<384x64xf32, #tpu.memory_space<vmem>>, vector<32x64xf32>
    tpu.vector_store %arg16[%c320_151, %c0_152], %356 {strides = array<i32>} : memref<384x64xf32, #tpu.memory_space<vmem>>, vector<32x64xf32>,
    %cst_153 = arith.constant 0.000000e+00 : f32
    %358 = vector.broadcast %cst_153 : f32 to vector<32x64xf32>
    %359 = arith.select %354, %358, %352 : vector<32x64xi1>, vector<32x64xf32>
    %cst_154 = arith.constant 5.000000e-01 : f32
    %360 = vector.broadcast %cst_154 : f32 to vector<32x64xf32>
    %361 = arith.mulf %359, %360 : vector<32x64xf32>
    %362 = vector.extract_strided_slice %237 {offsets = [352, 0], sizes = [32, 64], strides = [1, 1]} : vector<384x64xf32> to vector<32x64xf32>
    %363 = arith.addf %361, %362 : vector<32x64xf32>
    %cst_155 = arith.constant 1.000000e+00 : f32
    %364 = vector.broadcast %cst_155 : f32 to vector<32x64xf32>
    %365 = arith.cmpf oge, %363, %364 : vector<32x64xf32>
    %366 = arith.extui %365 : vector<32x64xi1> to vector<32x64xi32>
    %367 = arith.sitofp %366 : vector<32x64xi32> to vector<32x64xf32>
    %c352 = arith.constant 352 : index
    %c0_156 = arith.constant 0 : index
    %368 = vector.load %arg16[%c352, %c0_156] : memref<384x64xf32, #tpu.memory_space<vmem>>, vector<32x64xf32>
    tpu.vector_store %arg16[%c352, %c0_156], %367 {strides = array<i32>} : memref<384x64xf32, #tpu.memory_space<vmem>>, vector<32x64xf32>,
    %c0_157 = arith.constant 0 : index
    %c0_158 = arith.constant 0 : index
    %369 = tpu.strided_load %arg16[%c0_157, %c0_158] {strides = array<i32: 16, 1>} : memref<384x64xf32, #tpu.memory_space<vmem>>, vector<24x64xf32>
    %c1_159 = arith.constant 1 : index
    %c0_160 = arith.constant 0 : index
    %370 = tpu.strided_load %arg16[%c1_159, %c0_160] {strides = array<i32: 16, 1>} : memref<384x64xf32, #tpu.memory_space<vmem>>, vector<24x64xf32>
    %371 = arith.maximumf %369, %370 : vector<24x64xf32>
    %c0_161 = arith.constant 0 : index
    %c0_162 = arith.constant 0 : index
    %372 = vector.load %arg17[%c0_161, %c0_162] : memref<24x512xf32, #tpu.memory_space<vmem>>, vector<24x64xf32>
    tpu.vector_store %arg17[%c0_161, %c0_162], %371 {strides = array<i32>} : memref<24x512xf32, #tpu.memory_space<vmem>>, vector<24x64xf32>,
    %c2_163 = arith.constant 2 : index
    %c0_164 = arith.constant 0 : index
    %373 = tpu.strided_load %arg16[%c2_163, %c0_164] {strides = array<i32: 16, 1>} : memref<384x64xf32, #tpu.memory_space<vmem>>, vector<24x64xf32>
    %c3 = arith.constant 3 : index
    %c0_165 = arith.constant 0 : index
    %374 = tpu.strided_load %arg16[%c3, %c0_165] {strides = array<i32: 16, 1>} : memref<384x64xf32, #tpu.memory_space<vmem>>, vector<24x64xf32>
    %375 = arith.maximumf %373, %374 : vector<24x64xf32>
    %c0_166 = arith.constant 0 : index
    %c64_167 = arith.constant 64 : index
    %376 = vector.load %arg17[%c0_166, %c64_167] : memref<24x512xf32, #tpu.memory_space<vmem>>, vector<24x64xf32>
    tpu.vector_store %arg17[%c0_166, %c64_167], %375 {strides = array<i32>} : memref<24x512xf32, #tpu.memory_space<vmem>>, vector<24x64xf32>,
    %c4 = arith.constant 4 : index
    %c0_168 = arith.constant 0 : index
    %377 = tpu.strided_load %arg16[%c4, %c0_168] {strides = array<i32: 16, 1>} : memref<384x64xf32, #tpu.memory_space<vmem>>, vector<24x64xf32>
    %c5 = arith.constant 5 : index
    %c0_169 = arith.constant 0 : index
    %378 = tpu.strided_load %arg16[%c5, %c0_169] {strides = array<i32: 16, 1>} : memref<384x64xf32, #tpu.memory_space<vmem>>, vector<24x64xf32>
    %379 = arith.maximumf %377, %378 : vector<24x64xf32>
    %c0_170 = arith.constant 0 : index
    %c128_171 = arith.constant 128 : index
    %380 = vector.load %arg17[%c0_170, %c128_171] : memref<24x512xf32, #tpu.memory_space<vmem>>, vector<24x64xf32>
    tpu.vector_store %arg17[%c0_170, %c128_171], %379 {strides = array<i32>} : memref<24x512xf32, #tpu.memory_space<vmem>>, vector<24x64xf32>,
    %c6 = arith.constant 6 : index
    %c0_172 = arith.constant 0 : index
    %381 = tpu.strided_load %arg16[%c6, %c0_172] {strides = array<i32: 16, 1>} : memref<384x64xf32, #tpu.memory_space<vmem>>, vector<24x64xf32>
    %c7 = arith.constant 7 : index
    %c0_173 = arith.constant 0 : index
    %382 = tpu.strided_load %arg16[%c7, %c0_173] {strides = array<i32: 16, 1>} : memref<384x64xf32, #tpu.memory_space<vmem>>, vector<24x64xf32>
    %383 = arith.maximumf %381, %382 : vector<24x64xf32>
    %c0_174 = arith.constant 0 : index
    %c192_175 = arith.constant 192 : index
    %384 = vector.load %arg17[%c0_174, %c192_175] : memref<24x512xf32, #tpu.memory_space<vmem>>, vector<24x64xf32>
    tpu.vector_store %arg17[%c0_174, %c192_175], %383 {strides = array<i32>} : memref<24x512xf32, #tpu.memory_space<vmem>>, vector<24x64xf32>,
    %c8 = arith.constant 8 : index
    %c0_176 = arith.constant 0 : index
    %385 = tpu.strided_load %arg16[%c8, %c0_176] {strides = array<i32: 16, 1>} : memref<384x64xf32, #tpu.memory_space<vmem>>, vector<24x64xf32>
    %c9 = arith.constant 9 : index
    %c0_177 = arith.constant 0 : index
    %386 = tpu.strided_load %arg16[%c9, %c0_177] {strides = array<i32: 16, 1>} : memref<384x64xf32, #tpu.memory_space<vmem>>, vector<24x64xf32>
    %387 = arith.maximumf %385, %386 : vector<24x64xf32>
    %c0_178 = arith.constant 0 : index
    %c256_179 = arith.constant 256 : index
    %388 = vector.load %arg17[%c0_178, %c256_179] : memref<24x512xf32, #tpu.memory_space<vmem>>, vector<24x64xf32>
    tpu.vector_store %arg17[%c0_178, %c256_179], %387 {strides = array<i32>} : memref<24x512xf32, #tpu.memory_space<vmem>>, vector<24x64xf32>,
    %c10 = arith.constant 10 : index
    %c0_180 = arith.constant 0 : index
    %389 = tpu.strided_load %arg16[%c10, %c0_180] {strides = array<i32: 16, 1>} : memref<384x64xf32, #tpu.memory_space<vmem>>, vector<24x64xf32>
    %c11 = arith.constant 11 : index
    %c0_181 = arith.constant 0 : index
    %390 = tpu.strided_load %arg16[%c11, %c0_181] {strides = array<i32: 16, 1>} : memref<384x64xf32, #tpu.memory_space<vmem>>, vector<24x64xf32>
    %391 = arith.maximumf %389, %390 : vector<24x64xf32>
    %c0_182 = arith.constant 0 : index
    %c320_183 = arith.constant 320 : index
    %392 = vector.load %arg17[%c0_182, %c320_183] : memref<24x512xf32, #tpu.memory_space<vmem>>, vector<24x64xf32>
    tpu.vector_store %arg17[%c0_182, %c320_183], %391 {strides = array<i32>} : memref<24x512xf32, #tpu.memory_space<vmem>>, vector<24x64xf32>,
    %c12 = arith.constant 12 : index
    %c0_184 = arith.constant 0 : index
    %393 = tpu.strided_load %arg16[%c12, %c0_184] {strides = array<i32: 16, 1>} : memref<384x64xf32, #tpu.memory_space<vmem>>, vector<24x64xf32>
    %c13 = arith.constant 13 : index
    %c0_185 = arith.constant 0 : index
    %394 = tpu.strided_load %arg16[%c13, %c0_185] {strides = array<i32: 16, 1>} : memref<384x64xf32, #tpu.memory_space<vmem>>, vector<24x64xf32>
    %395 = arith.maximumf %393, %394 : vector<24x64xf32>
    %c0_186 = arith.constant 0 : index
    %c384_187 = arith.constant 384 : index
    %396 = vector.load %arg17[%c0_186, %c384_187] : memref<24x512xf32, #tpu.memory_space<vmem>>, vector<24x64xf32>
    tpu.vector_store %arg17[%c0_186, %c384_187], %395 {strides = array<i32>} : memref<24x512xf32, #tpu.memory_space<vmem>>, vector<24x64xf32>,
    %c14 = arith.constant 14 : index
    %c0_188 = arith.constant 0 : index
    %397 = tpu.strided_load %arg16[%c14, %c0_188] {strides = array<i32: 16, 1>} : memref<384x64xf32, #tpu.memory_space<vmem>>, vector<24x64xf32>
    %c15 = arith.constant 15 : index
    %c0_189 = arith.constant 0 : index
    %398 = tpu.strided_load %arg16[%c15, %c0_189] {strides = array<i32: 16, 1>} : memref<384x64xf32, #tpu.memory_space<vmem>>, vector<24x64xf32>
    %399 = arith.maximumf %397, %398 : vector<24x64xf32>
    %c0_190 = arith.constant 0 : index
    %c448_191 = arith.constant 448 : index
    %400 = vector.load %arg17[%c0_190, %c448_191] : memref<24x512xf32, #tpu.memory_space<vmem>>, vector<24x64xf32>
    tpu.vector_store %arg17[%c0_190, %c448_191], %399 {strides = array<i32>} : memref<24x512xf32, #tpu.memory_space<vmem>>, vector<24x64xf32>,
    %c0_192 = arith.constant 0 : index
    %c0_193 = arith.constant 0 : index
    %401 = vector.load %arg17[%c0_192, %c0_193] : memref<24x512xf32, #tpu.memory_space<vmem>>, vector<24x512xf32>
    %402 = arith.truncf %401 : vector<24x512xf32> to vector<24x512xbf16>
    %c0_194 = arith.constant 0 : index
    %c0_195 = arith.constant 0 : index
    %403 = vector.load %arg9[%c0_194, %c0_195] : memref<512x128xbf16, #tpu.memory_space<vmem>>, vector<512x128xbf16>
    %cst_196 = arith.constant dense<0.000000e+00> : vector<24x128xf32>
    %404 = tpu.matmul %402, %403, %cst_196 {dimension_numbers = #tpu.dot_dimension_numbers<[1], [0], [0], [1], [0, 0, 1, 1], [], []>} : vector<24x512xbf16>, vector<512x128xbf16>, vector<24x128xf32> -> vector<24x128xf32>
    %c0_197 = arith.constant 0 : index
    %c0_198 = arith.constant 0 : index
    %405 = vector.load %arg10[%c0_197, %c0_198] : memref<1x128xf32, #tpu.memory_space<vmem>>, vector<1x128xf32>
    %406 = vector.broadcast %405 : vector<1x128xf32> to vector<24x128xf32>
    %407 = arith.addf %404, %406 : vector<24x128xf32>
    %c0_199 = arith.constant 0 : index
    %c0_200 = arith.constant 0 : index
    %408 = vector.load %arg18[%c0_199, %c0_200] : memref<24x128xf32, #tpu.memory_space<vmem>>, vector<24x128xf32>
    tpu.vector_store %arg18[%c0_199, %c0_200], %407 {strides = array<i32>} : memref<24x128xf32, #tpu.memory_space<vmem>>, vector<24x128xf32>,
    %cst_201 = arith.constant 0.000000e+00 : f32
    %409 = vector.broadcast %cst_201 : f32 to vector<2x128xf32>
    %cst_202 = arith.constant 5.000000e-01 : f32
    %410 = vector.broadcast %cst_202 : f32 to vector<2x128xf32>
    %411 = arith.mulf %409, %410 : vector<2x128xf32>
    %c0_203 = arith.constant 0 : index
    %c0_204 = arith.constant 0 : index
    %412 = vector.load %arg18[%c0_203, %c0_204] : memref<24x128xf32, #tpu.memory_space<vmem>>, vector<2x128xf32>
    %413 = arith.addf %411, %412 : vector<2x128xf32>
    %cst_205 = arith.constant 1.000000e+00 : f32
    %414 = vector.broadcast %cst_205 : f32 to vector<2x128xf32>
    %415 = arith.cmpf oge, %413, %414 : vector<2x128xf32>
    %416 = arith.extui %415 : vector<2x128xi1> to vector<2x128xi32>
    %417 = arith.sitofp %416 : vector<2x128xi32> to vector<2x128xf32>
    %c0_206 = arith.constant 0 : index
    %c0_207 = arith.constant 0 : index
    %418 = vector.load %arg19[%c0_206, %c0_207] : memref<24x128xf32, #tpu.memory_space<vmem>>, vector<2x128xf32>
    tpu.vector_store %arg19[%c0_206, %c0_207], %417 {strides = array<i32>} : memref<24x128xf32, #tpu.memory_space<vmem>>, vector<2x128xf32>,
    %cst_208 = arith.constant 0.000000e+00 : f32
    %419 = vector.broadcast %cst_208 : f32 to vector<2x128xf32>
    %420 = arith.select %415, %419, %413 : vector<2x128xi1>, vector<2x128xf32>
    %cst_209 = arith.constant 5.000000e-01 : f32
    %421 = vector.broadcast %cst_209 : f32 to vector<2x128xf32>
    %422 = arith.mulf %420, %421 : vector<2x128xf32>
    %c2_210 = arith.constant 2 : index
    %c0_211 = arith.constant 0 : index
    %423 = vector.load %arg18[%c2_210, %c0_211] : memref<24x128xf32, #tpu.memory_space<vmem>>, vector<2x128xf32>
    %424 = arith.addf %422, %423 : vector<2x128xf32>
    %cst_212 = arith.constant 1.000000e+00 : f32
    %425 = vector.broadcast %cst_212 : f32 to vector<2x128xf32>
    %426 = arith.cmpf oge, %424, %425 : vector<2x128xf32>
    %427 = arith.extui %426 : vector<2x128xi1> to vector<2x128xi32>
    %428 = arith.sitofp %427 : vector<2x128xi32> to vector<2x128xf32>
    %c2_213 = arith.constant 2 : index
    %c0_214 = arith.constant 0 : index
    %429 = vector.load %arg19[%c2_213, %c0_214] : memref<24x128xf32, #tpu.memory_space<vmem>>, vector<2x128xf32>
    tpu.vector_store %arg19[%c2_213, %c0_214], %428 {strides = array<i32>} : memref<24x128xf32, #tpu.memory_space<vmem>>, vector<2x128xf32>,
    %cst_215 = arith.constant 0.000000e+00 : f32
    %430 = vector.broadcast %cst_215 : f32 to vector<2x128xf32>
    %431 = arith.select %426, %430, %424 : vector<2x128xi1>, vector<2x128xf32>
    %cst_216 = arith.constant 5.000000e-01 : f32
    %432 = vector.broadcast %cst_216 : f32 to vector<2x128xf32>
    %433 = arith.mulf %431, %432 : vector<2x128xf32>
    %c4_217 = arith.constant 4 : index
    %c0_218 = arith.constant 0 : index
    %434 = vector.load %arg18[%c4_217, %c0_218] : memref<24x128xf32, #tpu.memory_space<vmem>>, vector<2x128xf32>
    %435 = arith.addf %433, %434 : vector<2x128xf32>
    %cst_219 = arith.constant 1.000000e+00 : f32
    %436 = vector.broadcast %cst_219 : f32 to vector<2x128xf32>
    %437 = arith.cmpf oge, %435, %436 : vector<2x128xf32>
    %438 = arith.extui %437 : vector<2x128xi1> to vector<2x128xi32>
    %439 = arith.sitofp %438 : vector<2x128xi32> to vector<2x128xf32>
    %c4_220 = arith.constant 4 : index
    %c0_221 = arith.constant 0 : index
    %440 = vector.load %arg19[%c4_220, %c0_221] : memref<24x128xf32, #tpu.memory_space<vmem>>, vector<2x128xf32>
    tpu.vector_store %arg19[%c4_220, %c0_221], %439 {strides = array<i32>} : memref<24x128xf32, #tpu.memory_space<vmem>>, vector<2x128xf32>,
    %cst_222 = arith.constant 0.000000e+00 : f32
    %441 = vector.broadcast %cst_222 : f32 to vector<2x128xf32>
    %442 = arith.select %437, %441, %435 : vector<2x128xi1>, vector<2x128xf32>
    %cst_223 = arith.constant 5.000000e-01 : f32
    %443 = vector.broadcast %cst_223 : f32 to vector<2x128xf32>
    %444 = arith.mulf %442, %443 : vector<2x128xf32>
    %c6_224 = arith.constant 6 : index
    %c0_225 = arith.constant 0 : index
    %445 = vector.load %arg18[%c6_224, %c0_225] : memref<24x128xf32, #tpu.memory_space<vmem>>, vector<2x128xf32>
    %446 = arith.addf %444, %445 : vector<2x128xf32>
    %cst_226 = arith.constant 1.000000e+00 : f32
    %447 = vector.broadcast %cst_226 : f32 to vector<2x128xf32>
    %448 = arith.cmpf oge, %446, %447 : vector<2x128xf32>
    %449 = arith.extui %448 : vector<2x128xi1> to vector<2x128xi32>
    %450 = arith.sitofp %449 : vector<2x128xi32> to vector<2x128xf32>
    %c6_227 = arith.constant 6 : index
    %c0_228 = arith.constant 0 : index
    %451 = vector.load %arg19[%c6_227, %c0_228] : memref<24x128xf32, #tpu.memory_space<vmem>>, vector<2x128xf32>
    tpu.vector_store %arg19[%c6_227, %c0_228], %450 {strides = array<i32>} : memref<24x128xf32, #tpu.memory_space<vmem>>, vector<2x128xf32>,
    %cst_229 = arith.constant 0.000000e+00 : f32
    %452 = vector.broadcast %cst_229 : f32 to vector<2x128xf32>
    %453 = arith.select %448, %452, %446 : vector<2x128xi1>, vector<2x128xf32>
    %cst_230 = arith.constant 5.000000e-01 : f32
    %454 = vector.broadcast %cst_230 : f32 to vector<2x128xf32>
    %455 = arith.mulf %453, %454 : vector<2x128xf32>
    %c8_231 = arith.constant 8 : index
    %c0_232 = arith.constant 0 : index
    %456 = vector.load %arg18[%c8_231, %c0_232] : memref<24x128xf32, #tpu.memory_space<vmem>>, vector<2x128xf32>
    %457 = arith.addf %455, %456 : vector<2x128xf32>
    %cst_233 = arith.constant 1.000000e+00 : f32
    %458 = vector.broadcast %cst_233 : f32 to vector<2x128xf32>
    %459 = arith.cmpf oge, %457, %458 : vector<2x128xf32>
    %460 = arith.extui %459 : vector<2x128xi1> to vector<2x128xi32>
    %461 = arith.sitofp %460 : vector<2x128xi32> to vector<2x128xf32>
    %c8_234 = arith.constant 8 : index
    %c0_235 = arith.constant 0 : index
    %462 = vector.load %arg19[%c8_234, %c0_235] : memref<24x128xf32, #tpu.memory_space<vmem>>, vector<2x128xf32>
    tpu.vector_store %arg19[%c8_234, %c0_235], %461 {strides = array<i32>} : memref<24x128xf32, #tpu.memory_space<vmem>>, vector<2x128xf32>,
    %cst_236 = arith.constant 0.000000e+00 : f32
    %463 = vector.broadcast %cst_236 : f32 to vector<2x128xf32>
    %464 = arith.select %459, %463, %457 : vector<2x128xi1>, vector<2x128xf32>
    %cst_237 = arith.constant 5.000000e-01 : f32
    %465 = vector.broadcast %cst_237 : f32 to vector<2x128xf32>
    %466 = arith.mulf %464, %465 : vector<2x128xf32>
    %c10_238 = arith.constant 10 : index
    %c0_239 = arith.constant 0 : index
    %467 = vector.load %arg18[%c10_238, %c0_239] : memref<24x128xf32, #tpu.memory_space<vmem>>, vector<2x128xf32>
    %468 = arith.addf %466, %467 : vector<2x128xf32>
    %cst_240 = arith.constant 1.000000e+00 : f32
    %469 = vector.broadcast %cst_240 : f32 to vector<2x128xf32>
    %470 = arith.cmpf oge, %468, %469 : vector<2x128xf32>
    %471 = arith.extui %470 : vector<2x128xi1> to vector<2x128xi32>
    %472 = arith.sitofp %471 : vector<2x128xi32> to vector<2x128xf32>
    %c10_241 = arith.constant 10 : index
    %c0_242 = arith.constant 0 : index
    %473 = vector.load %arg19[%c10_241, %c0_242] : memref<24x128xf32, #tpu.memory_space<vmem>>, vector<2x128xf32>
    tpu.vector_store %arg19[%c10_241, %c0_242], %472 {strides = array<i32>} : memref<24x128xf32, #tpu.memory_space<vmem>>, vector<2x128xf32>,
    %cst_243 = arith.constant 0.000000e+00 : f32
    %474 = vector.broadcast %cst_243 : f32 to vector<2x128xf32>
    %475 = arith.select %470, %474, %468 : vector<2x128xi1>, vector<2x128xf32>
    %cst_244 = arith.constant 5.000000e-01 : f32
    %476 = vector.broadcast %cst_244 : f32 to vector<2x128xf32>
    %477 = arith.mulf %475, %476 : vector<2x128xf32>
    %c12_245 = arith.constant 12 : index
    %c0_246 = arith.constant 0 : index
    %478 = vector.load %arg18[%c12_245, %c0_246] : memref<24x128xf32, #tpu.memory_space<vmem>>, vector<2x128xf32>
    %479 = arith.addf %477, %478 : vector<2x128xf32>
    %cst_247 = arith.constant 1.000000e+00 : f32
    %480 = vector.broadcast %cst_247 : f32 to vector<2x128xf32>
    %481 = arith.cmpf oge, %479, %480 : vector<2x128xf32>
    %482 = arith.extui %481 : vector<2x128xi1> to vector<2x128xi32>
    %483 = arith.sitofp %482 : vector<2x128xi32> to vector<2x128xf32>
    %c12_248 = arith.constant 12 : index
    %c0_249 = arith.constant 0 : index
    %484 = vector.load %arg19[%c12_248, %c0_249] : memref<24x128xf32, #tpu.memory_space<vmem>>, vector<2x128xf32>
    tpu.vector_store %arg19[%c12_248, %c0_249], %483 {strides = array<i32>} : memref<24x128xf32, #tpu.memory_space<vmem>>, vector<2x128xf32>,
    %cst_250 = arith.constant 0.000000e+00 : f32
    %485 = vector.broadcast %cst_250 : f32 to vector<2x128xf32>
    %486 = arith.select %481, %485, %479 : vector<2x128xi1>, vector<2x128xf32>
    %cst_251 = arith.constant 5.000000e-01 : f32
    %487 = vector.broadcast %cst_251 : f32 to vector<2x128xf32>
    %488 = arith.mulf %486, %487 : vector<2x128xf32>
    %c14_252 = arith.constant 14 : index
    %c0_253 = arith.constant 0 : index
    %489 = vector.load %arg18[%c14_252, %c0_253] : memref<24x128xf32, #tpu.memory_space<vmem>>, vector<2x128xf32>
    %490 = arith.addf %488, %489 : vector<2x128xf32>
    %cst_254 = arith.constant 1.000000e+00 : f32
    %491 = vector.broadcast %cst_254 : f32 to vector<2x128xf32>
    %492 = arith.cmpf oge, %490, %491 : vector<2x128xf32>
    %493 = arith.extui %492 : vector<2x128xi1> to vector<2x128xi32>
    %494 = arith.sitofp %493 : vector<2x128xi32> to vector<2x128xf32>
    %c14_255 = arith.constant 14 : index
    %c0_256 = arith.constant 0 : index
    %495 = vector.load %arg19[%c14_255, %c0_256] : memref<24x128xf32, #tpu.memory_space<vmem>>, vector<2x128xf32>
    tpu.vector_store %arg19[%c14_255, %c0_256], %494 {strides = array<i32>} : memref<24x128xf32, #tpu.memory_space<vmem>>, vector<2x128xf32>,
    %cst_257 = arith.constant 0.000000e+00 : f32
    %496 = vector.broadcast %cst_257 : f32 to vector<2x128xf32>
    %497 = arith.select %492, %496, %490 : vector<2x128xi1>, vector<2x128xf32>
    %cst_258 = arith.constant 5.000000e-01 : f32
    %498 = vector.broadcast %cst_258 : f32 to vector<2x128xf32>
    %499 = arith.mulf %497, %498 : vector<2x128xf32>
    %c16 = arith.constant 16 : index
    %c0_259 = arith.constant 0 : index
    %500 = vector.load %arg18[%c16, %c0_259] : memref<24x128xf32, #tpu.memory_space<vmem>>, vector<2x128xf32>
    %501 = arith.addf %499, %500 : vector<2x128xf32>
    %cst_260 = arith.constant 1.000000e+00 : f32
    %502 = vector.broadcast %cst_260 : f32 to vector<2x128xf32>
    %503 = arith.cmpf oge, %501, %502 : vector<2x128xf32>
    %504 = arith.extui %503 : vector<2x128xi1> to vector<2x128xi32>
    %505 = arith.sitofp %504 : vector<2x128xi32> to vector<2x128xf32>
    %c16_261 = arith.constant 16 : index
    %c0_262 = arith.constant 0 : index
    %506 = vector.load %arg19[%c16_261, %c0_262] : memref<24x128xf32, #tpu.memory_space<vmem>>, vector<2x128xf32>
    tpu.vector_store %arg19[%c16_261, %c0_262], %505 {strides = array<i32>} : memref<24x128xf32, #tpu.memory_space<vmem>>, vector<2x128xf32>,
    %cst_263 = arith.constant 0.000000e+00 : f32
    %507 = vector.broadcast %cst_263 : f32 to vector<2x128xf32>
    %508 = arith.select %503, %507, %501 : vector<2x128xi1>, vector<2x128xf32>
    %cst_264 = arith.constant 5.000000e-01 : f32
    %509 = vector.broadcast %cst_264 : f32 to vector<2x128xf32>
    %510 = arith.mulf %508, %509 : vector<2x128xf32>
    %c18 = arith.constant 18 : index
    %c0_265 = arith.constant 0 : index
    %511 = vector.load %arg18[%c18, %c0_265] : memref<24x128xf32, #tpu.memory_space<vmem>>, vector<2x128xf32>
    %512 = arith.addf %510, %511 : vector<2x128xf32>
    %cst_266 = arith.constant 1.000000e+00 : f32
    %513 = vector.broadcast %cst_266 : f32 to vector<2x128xf32>
    %514 = arith.cmpf oge, %512, %513 : vector<2x128xf32>
    %515 = arith.extui %514 : vector<2x128xi1> to vector<2x128xi32>
    %516 = arith.sitofp %515 : vector<2x128xi32> to vector<2x128xf32>
    %c18_267 = arith.constant 18 : index
    %c0_268 = arith.constant 0 : index
    %517 = vector.load %arg19[%c18_267, %c0_268] : memref<24x128xf32, #tpu.memory_space<vmem>>, vector<2x128xf32>
    tpu.vector_store %arg19[%c18_267, %c0_268], %516 {strides = array<i32>} : memref<24x128xf32, #tpu.memory_space<vmem>>, vector<2x128xf32>,
    %cst_269 = arith.constant 0.000000e+00 : f32
    %518 = vector.broadcast %cst_269 : f32 to vector<2x128xf32>
    %519 = arith.select %514, %518, %512 : vector<2x128xi1>, vector<2x128xf32>
    %cst_270 = arith.constant 5.000000e-01 : f32
    %520 = vector.broadcast %cst_270 : f32 to vector<2x128xf32>
    %521 = arith.mulf %519, %520 : vector<2x128xf32>
    %c20 = arith.constant 20 : index
    %c0_271 = arith.constant 0 : index
    %522 = vector.load %arg18[%c20, %c0_271] : memref<24x128xf32, #tpu.memory_space<vmem>>, vector<2x128xf32>
    %523 = arith.addf %521, %522 : vector<2x128xf32>
    %cst_272 = arith.constant 1.000000e+00 : f32
    %524 = vector.broadcast %cst_272 : f32 to vector<2x128xf32>
    %525 = arith.cmpf oge, %523, %524 : vector<2x128xf32>
    %526 = arith.extui %525 : vector<2x128xi1> to vector<2x128xi32>
    %527 = arith.sitofp %526 : vector<2x128xi32> to vector<2x128xf32>
    %c20_273 = arith.constant 20 : index
    %c0_274 = arith.constant 0 : index
    %528 = vector.load %arg19[%c20_273, %c0_274] : memref<24x128xf32, #tpu.memory_space<vmem>>, vector<2x128xf32>
    tpu.vector_store %arg19[%c20_273, %c0_274], %527 {strides = array<i32>} : memref<24x128xf32, #tpu.memory_space<vmem>>, vector<2x128xf32>,
    %cst_275 = arith.constant 0.000000e+00 : f32
    %529 = vector.broadcast %cst_275 : f32 to vector<2x128xf32>
    %530 = arith.select %525, %529, %523 : vector<2x128xi1>, vector<2x128xf32>
    %cst_276 = arith.constant 5.000000e-01 : f32
    %531 = vector.broadcast %cst_276 : f32 to vector<2x128xf32>
    %532 = arith.mulf %530, %531 : vector<2x128xf32>
    %c22 = arith.constant 22 : index
    %c0_277 = arith.constant 0 : index
    %533 = vector.load %arg18[%c22, %c0_277] : memref<24x128xf32, #tpu.memory_space<vmem>>, vector<2x128xf32>
    %534 = arith.addf %532, %533 : vector<2x128xf32>
    %cst_278 = arith.constant 1.000000e+00 : f32
    %535 = vector.broadcast %cst_278 : f32 to vector<2x128xf32>
    %536 = arith.cmpf oge, %534, %535 : vector<2x128xf32>
    %537 = arith.extui %536 : vector<2x128xi1> to vector<2x128xi32>
    %538 = arith.sitofp %537 : vector<2x128xi32> to vector<2x128xf32>
    %c22_279 = arith.constant 22 : index
    %c0_280 = arith.constant 0 : index
    %539 = vector.load %arg19[%c22_279, %c0_280] : memref<24x128xf32, #tpu.memory_space<vmem>>, vector<2x128xf32>
    tpu.vector_store %arg19[%c22_279, %c0_280], %538 {strides = array<i32>} : memref<24x128xf32, #tpu.memory_space<vmem>>, vector<2x128xf32>,
    %c0_281 = arith.constant 0 : index
    %c0_282 = arith.constant 0 : index
    %540 = vector.load %arg19[%c0_281, %c0_282] : memref<24x128xf32, #tpu.memory_space<vmem>>, vector<24x128xf32>
    %541 = arith.truncf %540 : vector<24x128xf32> to vector<24x128xbf16>
    %c0_283 = arith.constant 0 : index
    %c0_284 = arith.constant 0 : index
    %542 = vector.load %arg11[%c0_283, %c0_284] : memref<128x40xbf16, #tpu.memory_space<vmem>>, vector<128x40xbf16>
    %cst_285 = arith.constant dense<0.000000e+00> : vector<24x40xf32>
    %543 = tpu.matmul %541, %542, %cst_285 {dimension_numbers = #tpu.dot_dimension_numbers<[1], [0], [0], [1], [0, 0, 1, 1], [], []>} : vector<24x128xbf16>, vector<128x40xbf16>, vector<24x40xf32> -> vector<24x40xf32>
    %c0_286 = arith.constant 0 : index
    %c0_287 = arith.constant 0 : index
    %544 = vector.load %arg12[%c0_286, %c0_287] : memref<1x40xf32, #tpu.memory_space<vmem>>, vector<1x40xf32>
    %545 = vector.broadcast %544 : vector<1x40xf32> to vector<24x40xf32>
    %546 = arith.addf %543, %545 : vector<24x40xf32>
    %c0_288 = arith.constant 0 : index
    %c0_289 = arith.constant 0 : index
    %547 = vector.load %arg20[%c0_288, %c0_289] : memref<24x40xf32, #tpu.memory_space<vmem>>, vector<24x40xf32>
    tpu.vector_store %arg20[%c0_288, %c0_289], %546 {strides = array<i32>} : memref<24x40xf32, #tpu.memory_space<vmem>>, vector<24x40xf32>,
    %cst_290 = arith.constant 0.000000e+00 : f32
    %548 = vector.broadcast %cst_290 : f32 to vector<2x40xf32>
    %cst_291 = arith.constant 0.000000e+00 : f32
    %549 = vector.broadcast %cst_291 : f32 to vector<2x40xf32>
    %cst_292 = arith.constant 5.000000e-01 : f32
    %550 = vector.broadcast %cst_292 : f32 to vector<2x40xf32>
    %551 = arith.mulf %548, %550 : vector<2x40xf32>
    %c0_293 = arith.constant 0 : index
    %c0_294 = arith.constant 0 : index
    %552 = vector.load %arg20[%c0_293, %c0_294] : memref<24x40xf32, #tpu.memory_space<vmem>>, vector<2x40xf32>
    %553 = arith.addf %551, %552 : vector<2x40xf32>
    %554 = arith.addf %549, %553 : vector<2x40xf32>
    %cst_295 = arith.constant 1.000000e+00 : f32
    %555 = vector.broadcast %cst_295 : f32 to vector<2x40xf32>
    %556 = arith.cmpf oge, %553, %555 : vector<2x40xf32>
    %cst_296 = arith.constant 0.000000e+00 : f32
    %557 = vector.broadcast %cst_296 : f32 to vector<2x40xf32>
    %558 = arith.select %556, %557, %553 : vector<2x40xi1>, vector<2x40xf32>
    %cst_297 = arith.constant 5.000000e-01 : f32
    %559 = vector.broadcast %cst_297 : f32 to vector<2x40xf32>
    %560 = arith.mulf %558, %559 : vector<2x40xf32>
    %c2_298 = arith.constant 2 : index
    %c0_299 = arith.constant 0 : index
    %561 = vector.load %arg20[%c2_298, %c0_299] : memref<24x40xf32, #tpu.memory_space<vmem>>, vector<2x40xf32>
    %562 = arith.addf %560, %561 : vector<2x40xf32>
    %563 = arith.addf %554, %562 : vector<2x40xf32>
    %cst_300 = arith.constant 1.000000e+00 : f32
    %564 = vector.broadcast %cst_300 : f32 to vector<2x40xf32>
    %565 = arith.cmpf oge, %562, %564 : vector<2x40xf32>
    %cst_301 = arith.constant 0.000000e+00 : f32
    %566 = vector.broadcast %cst_301 : f32 to vector<2x40xf32>
    %567 = arith.select %565, %566, %562 : vector<2x40xi1>, vector<2x40xf32>
    %cst_302 = arith.constant 5.000000e-01 : f32
    %568 = vector.broadcast %cst_302 : f32 to vector<2x40xf32>
    %569 = arith.mulf %567, %568 : vector<2x40xf32>
    %c4_303 = arith.constant 4 : index
    %c0_304 = arith.constant 0 : index
    %570 = vector.load %arg20[%c4_303, %c0_304] : memref<24x40xf32, #tpu.memory_space<vmem>>, vector<2x40xf32>
    %571 = arith.addf %569, %570 : vector<2x40xf32>
    %572 = arith.addf %563, %571 : vector<2x40xf32>
    %cst_305 = arith.constant 1.000000e+00 : f32
    %573 = vector.broadcast %cst_305 : f32 to vector<2x40xf32>
    %574 = arith.cmpf oge, %571, %573 : vector<2x40xf32>
    %cst_306 = arith.constant 0.000000e+00 : f32
    %575 = vector.broadcast %cst_306 : f32 to vector<2x40xf32>
    %576 = arith.select %574, %575, %571 : vector<2x40xi1>, vector<2x40xf32>
    %cst_307 = arith.constant 5.000000e-01 : f32
    %577 = vector.broadcast %cst_307 : f32 to vector<2x40xf32>
    %578 = arith.mulf %576, %577 : vector<2x40xf32>
    %c6_308 = arith.constant 6 : index
    %c0_309 = arith.constant 0 : index
    %579 = vector.load %arg20[%c6_308, %c0_309] : memref<24x40xf32, #tpu.memory_space<vmem>>, vector<2x40xf32>
    %580 = arith.addf %578, %579 : vector<2x40xf32>
    %581 = arith.addf %572, %580 : vector<2x40xf32>
    %cst_310 = arith.constant 1.000000e+00 : f32
    %582 = vector.broadcast %cst_310 : f32 to vector<2x40xf32>
    %583 = arith.cmpf oge, %580, %582 : vector<2x40xf32>
    %cst_311 = arith.constant 0.000000e+00 : f32
    %584 = vector.broadcast %cst_311 : f32 to vector<2x40xf32>
    %585 = arith.select %583, %584, %580 : vector<2x40xi1>, vector<2x40xf32>
    %cst_312 = arith.constant 5.000000e-01 : f32
    %586 = vector.broadcast %cst_312 : f32 to vector<2x40xf32>
    %587 = arith.mulf %585, %586 : vector<2x40xf32>
    %c8_313 = arith.constant 8 : index
    %c0_314 = arith.constant 0 : index
    %588 = vector.load %arg20[%c8_313, %c0_314] : memref<24x40xf32, #tpu.memory_space<vmem>>, vector<2x40xf32>
    %589 = arith.addf %587, %588 : vector<2x40xf32>
    %590 = arith.addf %581, %589 : vector<2x40xf32>
    %cst_315 = arith.constant 1.000000e+00 : f32
    %591 = vector.broadcast %cst_315 : f32 to vector<2x40xf32>
    %592 = arith.cmpf oge, %589, %591 : vector<2x40xf32>
    %cst_316 = arith.constant 0.000000e+00 : f32
    %593 = vector.broadcast %cst_316 : f32 to vector<2x40xf32>
    %594 = arith.select %592, %593, %589 : vector<2x40xi1>, vector<2x40xf32>
    %cst_317 = arith.constant 5.000000e-01 : f32
    %595 = vector.broadcast %cst_317 : f32 to vector<2x40xf32>
    %596 = arith.mulf %594, %595 : vector<2x40xf32>
    %c10_318 = arith.constant 10 : index
    %c0_319 = arith.constant 0 : index
    %597 = vector.load %arg20[%c10_318, %c0_319] : memref<24x40xf32, #tpu.memory_space<vmem>>, vector<2x40xf32>
    %598 = arith.addf %596, %597 : vector<2x40xf32>
    %599 = arith.addf %590, %598 : vector<2x40xf32>
    %cst_320 = arith.constant 1.000000e+00 : f32
    %600 = vector.broadcast %cst_320 : f32 to vector<2x40xf32>
    %601 = arith.cmpf oge, %598, %600 : vector<2x40xf32>
    %cst_321 = arith.constant 0.000000e+00 : f32
    %602 = vector.broadcast %cst_321 : f32 to vector<2x40xf32>
    %603 = arith.select %601, %602, %598 : vector<2x40xi1>, vector<2x40xf32>
    %cst_322 = arith.constant 5.000000e-01 : f32
    %604 = vector.broadcast %cst_322 : f32 to vector<2x40xf32>
    %605 = arith.mulf %603, %604 : vector<2x40xf32>
    %c12_323 = arith.constant 12 : index
    %c0_324 = arith.constant 0 : index
    %606 = vector.load %arg20[%c12_323, %c0_324] : memref<24x40xf32, #tpu.memory_space<vmem>>, vector<2x40xf32>
    %607 = arith.addf %605, %606 : vector<2x40xf32>
    %608 = arith.addf %599, %607 : vector<2x40xf32>
    %cst_325 = arith.constant 1.000000e+00 : f32
    %609 = vector.broadcast %cst_325 : f32 to vector<2x40xf32>
    %610 = arith.cmpf oge, %607, %609 : vector<2x40xf32>
    %cst_326 = arith.constant 0.000000e+00 : f32
    %611 = vector.broadcast %cst_326 : f32 to vector<2x40xf32>
    %612 = arith.select %610, %611, %607 : vector<2x40xi1>, vector<2x40xf32>
    %cst_327 = arith.constant 5.000000e-01 : f32
    %613 = vector.broadcast %cst_327 : f32 to vector<2x40xf32>
    %614 = arith.mulf %612, %613 : vector<2x40xf32>
    %c14_328 = arith.constant 14 : index
    %c0_329 = arith.constant 0 : index
    %615 = vector.load %arg20[%c14_328, %c0_329] : memref<24x40xf32, #tpu.memory_space<vmem>>, vector<2x40xf32>
    %616 = arith.addf %614, %615 : vector<2x40xf32>
    %617 = arith.addf %608, %616 : vector<2x40xf32>
    %cst_330 = arith.constant 1.000000e+00 : f32
    %618 = vector.broadcast %cst_330 : f32 to vector<2x40xf32>
    %619 = arith.cmpf oge, %616, %618 : vector<2x40xf32>
    %cst_331 = arith.constant 0.000000e+00 : f32
    %620 = vector.broadcast %cst_331 : f32 to vector<2x40xf32>
    %621 = arith.select %619, %620, %616 : vector<2x40xi1>, vector<2x40xf32>
    %cst_332 = arith.constant 5.000000e-01 : f32
    %622 = vector.broadcast %cst_332 : f32 to vector<2x40xf32>
    %623 = arith.mulf %621, %622 : vector<2x40xf32>
    %c16_333 = arith.constant 16 : index
    %c0_334 = arith.constant 0 : index
    %624 = vector.load %arg20[%c16_333, %c0_334] : memref<24x40xf32, #tpu.memory_space<vmem>>, vector<2x40xf32>
    %625 = arith.addf %623, %624 : vector<2x40xf32>
    %626 = arith.addf %617, %625 : vector<2x40xf32>
    %cst_335 = arith.constant 1.000000e+00 : f32
    %627 = vector.broadcast %cst_335 : f32 to vector<2x40xf32>
    %628 = arith.cmpf oge, %625, %627 : vector<2x40xf32>
    %cst_336 = arith.constant 0.000000e+00 : f32
    %629 = vector.broadcast %cst_336 : f32 to vector<2x40xf32>
    %630 = arith.select %628, %629, %625 : vector<2x40xi1>, vector<2x40xf32>
    %cst_337 = arith.constant 5.000000e-01 : f32
    %631 = vector.broadcast %cst_337 : f32 to vector<2x40xf32>
    %632 = arith.mulf %630, %631 : vector<2x40xf32>
    %c18_338 = arith.constant 18 : index
    %c0_339 = arith.constant 0 : index
    %633 = vector.load %arg20[%c18_338, %c0_339] : memref<24x40xf32, #tpu.memory_space<vmem>>, vector<2x40xf32>
    %634 = arith.addf %632, %633 : vector<2x40xf32>
    %635 = arith.addf %626, %634 : vector<2x40xf32>
    %cst_340 = arith.constant 1.000000e+00 : f32
    %636 = vector.broadcast %cst_340 : f32 to vector<2x40xf32>
    %637 = arith.cmpf oge, %634, %636 : vector<2x40xf32>
    %cst_341 = arith.constant 0.000000e+00 : f32
    %638 = vector.broadcast %cst_341 : f32 to vector<2x40xf32>
    %639 = arith.select %637, %638, %634 : vector<2x40xi1>, vector<2x40xf32>
    %cst_342 = arith.constant 5.000000e-01 : f32
    %640 = vector.broadcast %cst_342 : f32 to vector<2x40xf32>
    %641 = arith.mulf %639, %640 : vector<2x40xf32>
    %c20_343 = arith.constant 20 : index
    %c0_344 = arith.constant 0 : index
    %642 = vector.load %arg20[%c20_343, %c0_344] : memref<24x40xf32, #tpu.memory_space<vmem>>, vector<2x40xf32>
    %643 = arith.addf %641, %642 : vector<2x40xf32>
    %644 = arith.addf %635, %643 : vector<2x40xf32>
    %cst_345 = arith.constant 1.000000e+00 : f32
    %645 = vector.broadcast %cst_345 : f32 to vector<2x40xf32>
    %646 = arith.cmpf oge, %643, %645 : vector<2x40xf32>
    %cst_346 = arith.constant 0.000000e+00 : f32
    %647 = vector.broadcast %cst_346 : f32 to vector<2x40xf32>
    %648 = arith.select %646, %647, %643 : vector<2x40xi1>, vector<2x40xf32>
    %cst_347 = arith.constant 5.000000e-01 : f32
    %649 = vector.broadcast %cst_347 : f32 to vector<2x40xf32>
    %650 = arith.mulf %648, %649 : vector<2x40xf32>
    %c22_348 = arith.constant 22 : index
    %c0_349 = arith.constant 0 : index
    %651 = vector.load %arg20[%c22_348, %c0_349] : memref<24x40xf32, #tpu.memory_space<vmem>>, vector<2x40xf32>
    %652 = arith.addf %650, %651 : vector<2x40xf32>
    %653 = arith.addf %644, %652 : vector<2x40xf32>
    %c0_350 = arith.constant 0 : index
    %c0_351 = arith.constant 0 : index
    %654 = vector.load %arg13[%c0_350, %c0_351] : memref<40x4xf32, #tpu.memory_space<vmem>>, vector<40x4xf32>
    %cst_352 = arith.constant dense<0.000000e+00> : vector<2x4xf32>
    %655 = tpu.matmul %653, %654, %cst_352 {dimension_numbers = #tpu.dot_dimension_numbers<[1], [0], [0], [1], [0, 0, 1, 1], [], []>} : vector<2x40xf32>, vector<40x4xf32>, vector<2x4xf32> -> vector<2x4xf32>
    %c0_353 = arith.constant 0 : index
    %c0_354 = arith.constant 0 : index
    %656 = vector.load %arg14[%c0_353, %c0_354] : memref<2x4xf32, #tpu.memory_space<vmem>>, vector<2x4xf32>
    tpu.vector_store %arg14[%c0_353, %c0_354], %655 {strides = array<i32>} : memref<2x4xf32, #tpu.memory_space<vmem>>, vector<2x4xf32>,
    return
  }
}

</mosaic_0001>

<bundles_post_ra>
// kernel: eegsnn1_forward.1
= control target key start
LH: loop header
LB: loop body
LE: loop exit
PB: predicated region body
PF: predicated region fallthrough
CT: control target
= control target key end

     0   :  { %vm2457_vm0 = vcmask 130048   ;;  %v13913_v3 = vmov 0   ;;  %vm241_vm1 = vcmask 1040384   ;;  %s19313_s0 = inlined_call_operand.vmem [shape: f32[768,16], index: 0, kind: input, shape index: {}]   ;;  %s19314_s1 = inlined_call_operand.vmem [shape: f32[3,16,32], index: 1, kind: input, shape index: {}]   ;;  %s19315_s2 = inlined_call_operand.vmem [shape: f32[1,32], index: 2, kind: input, shape index: {}]   ;;  %s19316_s3 = inlined_call_operand.vmem [shape: f32[768,1], index: 3, kind: input, shape index: {}]   ;;  %s19317_s4 = inlined_call_operand.vmem [shape: f32[768,1], index: 4, kind: input, shape index: {}]   ;;  %s19318_s5 = inlined_call_operand.vmem [shape: bf16[3,32,64], index: 5, kind: input, shape index: {}]   ;;  %s19319_s6 = inlined_call_operand.vmem [shape: f32[1,64], index: 6, kind: input, shape index: {}]   ;;  %s19320_s7 = inlined_call_operand.vmem [shape: f32[384,1], index: 7, kind: input, shape index: {}]   ;;  %s19321_s8 = inlined_call_operand.vmem [shape: f32[384,1], index: 8, kind: input, shape index: {}]   ;;  %s19322_s9 = inlined_call_operand.vmem [shape: bf16[512,128], index: 9, kind: input, shape index: {}]   ;;  %s19323_s10 = inlined_call_operand.vmem [shape: f32[1,128], index: 10, kind: input, shape index: {}]   ;;  %s19324_s11 = inlined_call_operand.vmem [shape: bf16[128,40], index: 11, kind: input, shape index: {}]   ;;  %s19325_s12 = inlined_call_operand.vmem [shape: f32[1,40], index: 12, kind: input, shape index: {}]   ;;  %s19326_s13 = inlined_call_operand.vmem [shape: f32[40,4], index: 13, kind: input, shape index: {}]   ;;  %s19327_s14 = inlined_call_operand.hbm [shape: f32[2,4], index: 14, kind: output, shape index: {}]  }
   0x1   :  { %v5065_v0 = vld [vmem:[%s19316_s3 + $0x10] sm:$0xff]  ;;  %v5063_v1 = vld [vmem:[%s19316_s3] sm:$0xff]  ;;  %13742 = vset.pattern.permute.xlu1 %v13913_v3  ;;  %13741 = vset.pattern.permute.xlu0 %v13913_v3  ;;  %v11772_v4 = vld [vmem:[%s19314_s1 + $0x18] sm:$0xff] }
   0x2   :  { %v11771_v2 = vld [vmem:[%s19314_s1 + $0x10] sm:$0xff]  ;;  %5171 = vperm.xlu1 %13742, %v5065_v0   ;;  %5161 = vperm.xlu0 %13741, %v5063_v1   ;;  %v14009_v6 = vld [vmem:[%s19313_s0] sm:$0xff]  ;;  %v50_v7 = vld [vmem:[%s19313_s0 + $0x8] sm:$0xff] }
   0x3   :  { %v13427_v5 = vpack.c.bf16 %v11772_v4, %v11771_v2  ;;  %v2452_v8 = vld [vmem:[%s19314_s1] sm:$0xff]  ;;  %v5066_v9 = vld [vmem:[%s19316_s3 + $0x18] sm:$0xff]  ;;  %v5064_v10 = vld [vmem:[%s19316_s3 + $0x8] sm:$0xff]  ;;  %12798 = vmatprep.mubr.msk.f32.mxu0 %vm2457_vm0, %v14009_v6  ;;  %v243_v11 = vrot.slane %v50_v7, 7  ;;  %v19328_v13 = vrot.slane %v14009_v6, 7 }
   0x4   :  { %v2453_v12 = vld [vmem:[%s19314_s1 + $0x8] sm:$0xff]  ;;  %v51_v15 = vld [vmem:[%s19313_s0 + $0x10] sm:$0xff]  ;;  %v52_v16 = vld [vmem:[%s19313_s0 + $0x18] sm:$0xff] }
   0x5   :  { %13428 = vmatprep.subr.bf16.mxu0 %v13427_v5  ;;  %v13431_v14 = vpack.c.bf16 %v2453_v12, %v2452_v8  ;;  %13445 = vmatprep.subr.bf16.mxu1 %v13427_v5  ;;  %v245_v17 = vrot.slane %v51_v15, 7  ;;  %v247_v18 = vrot.slane %v52_v16, 7  ;;  %v53_v19 = vld [vmem:[%s19313_s0 + $0x20] sm:$0xff]  ;;  %v54_v20 = vld [vmem:[%s19313_s0 + $0x28] sm:$0xff]  ;;  %v14044_v21 = vsel %vm241_vm1, %v19328_v13, %v243_v11  ;;  %v55_v26 = vld [vmem:[%s19313_s0 + $0x30] sm:$0xff] }
   0x6   :  { %13430 = vmatpush3.bf16.msra.mxu0 %v13427_v5  ;;  %13446 = vmatpush3.bf16.msra.mxu1 %v13427_v5  ;;  %v5068_v22 = vld [vmem:[%s19316_s3 + $0x28] sm:$0xff]  ;;  %v5067_v23 = vld [vmem:[%s19316_s3 + $0x20] sm:$0xff]  ;;  %v249_v24 = vrot.slane %v53_v19, 7  ;;  %v251_v25 = vrot.slane %v54_v20, 7  ;;  %v253_v27 = vrot.slane %v55_v26, 7  ;;  %v56_v29 = vld [vmem:[%s19313_s0 + $0x38] sm:$0xff] }
   0x7   :  { %5176 = vperm.xlu1 %13742, %v5066_v9   ;;  %5166 = vperm.xlu0 %13741, %v5064_v10   ;;  %v14057_v28 = vsel %vm241_vm1, %v243_v11, %v245_v17  ;;  %v14064_v30 = vsel %vm241_vm1, %v245_v17, %v247_v18  ;;  %v255_v32 = vrot.slane %v56_v29, 7  ;;  %v57_v33 = vld [vmem:[%s19313_s0 + $0x40] sm:$0xff]  ;;  %v5070_v34 = vld [vmem:[%s19316_s3 + $0x38] sm:$0xff]  ;;  %v5069_v35 = vld [vmem:[%s19316_s3 + $0x30] sm:$0xff] }
   0x8   :  { %13432 = vmatprep.subr.bf16.mxu0 %v13431_v14  ;;  %v14067_v31 = vsel %vm241_vm1, %v247_v18, %v249_v24  ;;  %v257_v36 = vrot.slane %v57_v33, 7  ;;  %v14079_v37 = vsel %vm241_vm1, %v249_v24, %v251_v25  ;;  %v58_v38 = vld [vmem:[%s19313_s0 + $0x48] sm:$0xff]  ;;  %v14086_v39 = vsel %vm241_vm1, %v251_v25, %v253_v27  ;;  %v59_v41 = vld [vmem:[%s19313_s0 + $0x50] sm:$0xff]  ;;  %v5735_v45 = vld [vmem:[%s19317_s4] sm:$0xff] }
   0x9   :  { %12799 = vmatmul.mubr.msk.f32.vlgmr.msra.gmra.mrb[0].mxu0 %vm2457_vm0, %v50_v7  ;;  %v259_v40 = vrot.slane %v58_v38, 7  ;;  %v261_v42 = vrot.slane %v59_v41, 7  ;;  %v14093_v43 = vsel %vm241_vm1, %v253_v27, %v255_v32  ;;  %v5736_v44 = vld [vmem:[%s19317_s4 + $0x8] sm:$0xff]  ;;  %v60_v46 = vld [vmem:[%s19313_s0 + $0x58] sm:$0xff]  ;;  %v61_v49 = vld [vmem:[%s19313_s0 + $0x60] sm:$0xff] }
   0xa   :  { %13434 = vmatpush3.bf16.msra.mxu0 %v13431_v14  ;;  %12801 = vmatprep.mubr.msk.f32.mxu0 %vm2457_vm0, %v51_v15  ;;  %v14105_v47 = vsel %vm241_vm1, %v255_v32, %v257_v36  ;;  %v263_v48 = vrot.slane %v60_v46, 7  ;;  %v265_v50 = vrot.slane %v61_v49, 7  ;;  %v62_v52 = vld [vmem:[%s19313_s0 + $0x68] sm:$0xff]  ;;  %v5738_v54 = vld [vmem:[%s19317_s4 + $0x18] sm:$0xff]  ;;  %v5737_v55 = vld [vmem:[%s19317_s4 + $0x10] sm:$0xff] }
   0xb   :  { %5186 = vperm.xlu1 %13742, %v5068_v22   ;;  %5181 = vperm.xlu0 %13741, %v5067_v23   ;;  %v14113_v51 = vsel %vm241_vm1, %v257_v36, %v259_v40  ;;  %v14119_v53 = vsel %vm241_vm1, %v259_v40, %v261_v42  ;;  %v267_v56 = vrot.slane %v62_v52, 7  ;;  %v63_v57 = vld [vmem:[%s19313_s0 + $0x70] sm:$0xff]  ;;  %v14138_v60 = vld [vmem:[%s19313_s0 + $0x78] sm:$0xff]  ;;  %v14147_v63 = vld [vmem:[%s19313_s0 + $0x80] sm:$0xff] }
   0xc   :  { %v269_v58 = vrot.slane %v63_v57, 7  ;;  %v14132_v59 = vsel %vm241_vm1, %v261_v42, %v263_v48  ;;  %v14141_v61 = vsel %vm241_vm1, %v263_v48, %v265_v50  ;;  %v271_v62 = vrot.slane %v14138_v60, 7  ;;  %v5740_v0 = vld [vmem:[%s19317_s4 + $0x28] sm:$0xff]  ;;  %v5739_v1 = vld [vmem:[%s19317_s4 + $0x20] sm:$0xff]  ;;  %v14173_v8 = vld [vmem:[%s19313_s0 + $0x90] sm:$0xff] }
   0xd   :  { %12802 = vmatmul.mubr.msk.f32.gmra.mrb[2].mxu0 %vm2457_vm0, %v52_v16  ;;  %v273_v2 = vrot.slane %v14147_v63, 7  ;;  %v14157_v3 = vsel %vm241_vm1, %v265_v50, %v267_v56  ;;  %v14163_v4 = vld [vmem:[%s19313_s0 + $0x88] sm:$0xff]  ;;  %v14178_v9 = vld [vmem:[%s19313_s0 + $0x98] sm:$0xff]  ;;  %v277_v10 = vrot.slane %v14173_v8, 7  ;;  %v5741_v15 = vld [vmem:[%s19317_s4 + $0x30] sm:$0xff] }
   0xe   :  { %12804 = vmatprep.mubr.msk.f32.mxu0 %vm2457_vm0, %v53_v19  ;;  %v14166_v5 = vsel %vm241_vm1, %v267_v56, %v269_v58  ;;  %v275_v7 = vrot.slane %v14163_v4, 7  ;;  %v279_v11 = vrot.slane %v14178_v9, 7  ;;  %v14183_v12 = vsel %vm241_vm1, %v269_v58, %v271_v62  ;;  %v5742_v14 = vld [vmem:[%s19317_s4 + $0x38] sm:$0xff]  ;;  %v14194_v16 = vld [vmem:[%s19313_s0 + $0xa0] sm:$0xff]  ;;  %v14204_v19 = vld [vmem:[%s19313_s0 + $0xa8] sm:$0xff] }
   0xf   :  { %5196 = vperm.xlu1 %13742, %v5070_v34   ;;  %5191 = vperm.xlu0 %13741, %v5069_v35   ;;  %v14197_v17 = vsel %vm241_vm1, %v271_v62, %v273_v2  ;;  %v281_v18 = vrot.slane %v14194_v16, 7  ;;  %v14214_v23 = vld [vmem:[%s19313_s0 + $0xb0] sm:$0xff]  ;;  %v5071_v27 = vld [vmem:[%s19316_s3 + $0x40] sm:$0xff]  ;;  %v14232_v32 = vld [vmem:[%s19313_s0 + $0xb8] sm:$0xff] }
  0x10   :  { %v14209_v22 = vsel %vm241_vm1, %v273_v2, %v275_v7  ;;  %v14217_v24 = vsel %vm241_vm1, %v275_v7, %v277_v10  ;;  %v14220_v25 = vsel %vm241_vm1, %v277_v10, %v279_v11  ;;  %v14239_v34 = vld [vmem:[%s19313_s0 + $0xc0] sm:$0xff]  ;;  %v14254_v40 = vld [vmem:[%s19313_s0 + $0xd0] sm:$0xff]  ;;  %v14298_v58 = vld [vmem:[%s19313_s0 + $0xf8] sm:$0xff] }
  0x11   :  { %12805 = vmatmul.mubr.msk.f32.gmra.mrb[4].mxu0 %vm2457_vm0, %v54_v20  ;;  %v283_v20 = vrot.slane %v14204_v19, 7  ;;  %v14242_v35 = vsel %vm241_vm1, %v279_v11, %v281_v18  ;;  %v289_v36 = vrot.slane %v14239_v34, 7  ;;  %v5073_v50 = vld [vmem:[%s19316_s3 + $0x50] sm:$0xff]  ;;  %v11965_v62 = vld [vmem:[%s19314_s1 + $0x20] sm:$0xff]  ;;  %v303_v7 = vrot.slane %v14298_v58, 7 }
  0x12   :  { %12807 = vmatprep.mubr.msk.f32.mxu0 %vm2457_vm0, %v55_v26  ;;  %v5072_v26 = vld [vmem:[%s19316_s3 + $0x48] sm:$0xff]  ;;  %v14319_v10 = vld [vmem:[%s19313_s0 + $0x100] sm:$0xff] }
  0x13   :  { %5838 = vperm.xlu1 %13742, %v5736_v44   ;;  %5833 = vperm.xlu0 %13741, %v5735_v45   ;;  %v14262_v42 = vsel %vm241_vm1, %v281_v18, %v283_v20  ;;  %v5074_v44 = vld [vmem:[%s19316_s3 + $0x58] sm:$0xff]  ;;  %v14333_v18 = vld [vmem:[%s19313_s0 + $0x108] sm:$0xff] }
  0x15   :  { %12808 = vmatmul.mubr.msk.f32.gmra.mrb[6].mxu0 %vm2457_vm0, %v56_v29  ;;  %v285_v29 = vrot.slane %v14214_v23, 7 }
  0x16   :  { %12810 = vmatprep.mubr.msk.f32.mxu0 %vm2457_vm0, %v57_v33  ;;  %v287_v33 = vrot.slane %v14232_v32, 7 }
  0x17   :  { %5848 = vperm.xlu1 %13742, %v5738_v54   ;;  %5843 = vperm.xlu0 %13741, %v5737_v55   ;;  %v14282_v54 = vld [vmem:[%s19313_s0 + $0xe8] sm:$0xff]  ;;  %v14287_v55 = vld [vmem:[%s19313_s0 + $0xf0] sm:$0xff]  ;;  %v14290_v56 = vsel %vm241_vm1, %v283_v20, %v285_v29 }
  0x18   :  { %v301_v2 = vrot.slane %v14287_v55, 7  ;;  %v14338_v20 = vld [vmem:[%s19313_s0 + $0x110] sm:$0xff] }
  0x19   :  { %12811 = vmatmul.mubr.msk.f32.gmra.mrb[8].mxu0 %vm2457_vm0, %v58_v38  ;;  %v14249_v38 = vld [vmem:[%s19313_s0 + $0xc8] sm:$0xff] }
  0x1a   :  { %12813 = vmatprep.mubr.msk.f32.mxu0 %vm2457_vm0, %v59_v41  ;;  %v14259_v41 = vld [vmem:[%s19313_s0 + $0xd8] sm:$0xff]  ;;  %v291_v45 = vrot.slane %v14249_v38, 7 }
  0x1b   :  { %5858 = vperm.xlu1 %13742, %v5740_v0   ;;  %5853 = vperm.xlu0 %13741, %v5739_v1   ;;  %v295_v48 = vrot.slane %v14259_v41, 7  ;;  %v11966_v0 = vld [vmem:[%s19314_s1 + $0x28] sm:$0xff]  ;;  %v14307_v1 = vsel %vm241_vm1, %v285_v29, %v287_v33 }
  0x1c   :  { %19427 = vst [vmem:[#allocation11_spill] sm:$0xff] %v14307_v1  ;;  %v14321_v11 = vpack.c.bf16 %v11966_v0, %v11965_v62 }
  0x1d   :  { %12814 = vmatmul.mubr.msk.f32.gmra.mrb[10].mxu0 %vm2457_vm0, %v60_v46  ;;  %v293_v46 = vrot.slane %v14254_v40, 7 }
  0x1e   :  { %12816 = vmatprep.mubr.msk.f32.mxu0 %vm2457_vm0, %v61_v49  ;;  %v14273_v49 = vld [vmem:[%s19313_s0 + $0xe0] sm:$0xff]  ;;  %13436 = vmatprep.subr.bf16.mxu0 %v14321_v11 }
  0x1f   :  { %5868 = vperm.xlu1 %13742, %v5742_v14   ;;  %5863 = vperm.xlu0 %13741, %v5741_v15   ;;  %v14324_v14 = vsel %vm241_vm1, %v287_v33, %v289_v36  ;;  %v305_v15 = vrot.slane %v14319_v10, 7  ;;  %v14347_v29 = vsel %vm241_vm1, %v293_v46, %v295_v48  ;;  %v307_v33 = vrot.slane %v14333_v18, 7 }
  0x20   :  { %19428 = vst [vmem:[#allocation12_spill] sm:$0xff] %v14324_v14  ;;  %19431 = vst [vmem:[#allocation15_spill] sm:$0xff] %v14347_v29  ;;  %v14378_v29 = vld [vmem:[%s19313_s0 + $0x130] sm:$0xff]  ;;  %v14401_v14 = vsel %vm241_vm1, %v301_v2, %v303_v7 }
  0x21   :  { %12817 = vmatmul.mubr.msk.f32.gmra.mrb[12].mxu0 %vm2457_vm0, %v62_v52  ;;  %v297_v52 = vrot.slane %v14273_v49, 7  ;;  %19435 = vst [vmem:[#allocation19_spill] sm:$0xff] %v14401_v14 }
  0x22   :  { %12819 = vmatprep.mubr.msk.f32.mxu0 %vm2457_vm0, %v63_v57  ;;  %v299_v57 = vrot.slane %v14282_v54, 7 }
  0x23   :  { %5206 = vperm.xlu1 %13742, %v5072_v26   ;;  %5201 = vperm.xlu0 %13741, %v5071_v27   ;;  %v14341_v26 = vsel %vm241_vm1, %v289_v36, %v291_v45  ;;  %v14344_v27 = vsel %vm241_vm1, %v291_v45, %v293_v46  ;;  %v14359_v36 = vld [vmem:[%s19313_s0 + $0x120] sm:$0xff]  ;;  %v14364_v45 = vld [vmem:[%s19313_s0 + $0x128] sm:$0xff]  ;;  %v14368_v46 = vsel %vm241_vm1, %v295_v48, %v297_v52 }
  0x24   :  { %19429 = vst [vmem:[#allocation13_spill] sm:$0xff] %v14341_v26  ;;  %19430 = vst [vmem:[#allocation14_spill] sm:$0xff] %v14344_v27  ;;  %v313_v0 = vrot.slane %v14359_v36, 7  ;;  %v315_v13 = vrot.slane %v14364_v45, 7  ;;  %v14383_v27 = vld [vmem:[%s19313_s0 + $0x138] sm:$0xff]  ;;  %v14386_v48 = vsel %vm241_vm1, %v297_v52, %v299_v57  ;;  %v14395_v26 = vld [vmem:[%s19313_s0 + $0x140] sm:$0xff]  ;;  %v14398_v1 = vsel %vm241_vm1, %v299_v57, %v301_v2 }
  0x25   :  { %12820 = vmatmul.mubr.msk.f32.gmra.mrb[14].mxu0 %vm2457_vm0, %v14138_v60  ;;  %v5076_v60 = vld [vmem:[%s19316_s3 + $0x68] sm:$0xff]  ;;  %19432 = vst [vmem:[#allocation16_spill] sm:$0xff] %v14368_v46  ;;  %19433 = vst [vmem:[#allocation17_spill] sm:$0xff] %v14386_v48  ;;  %v319_v46 = vrot.slane %v14383_v27, 7  ;;  %v321_v52 = vrot.slane %v14395_v26, 7  ;;  %v14410_v48 = vsel %vm241_vm1, %v303_v7, %v305_v15  ;;  %v5078_v57 = vld [vmem:[%s19316_s3 + $0x78] sm:$0xff] }
  0x26   :  { %12822 = vmatprep.mubr.msk.f32.mxu0 %vm2457_vm0, %v14147_v63  ;;  %v5075_v63 = vld [vmem:[%s19316_s3 + $0x60] sm:$0xff]  ;;  %19434 = vst [vmem:[#allocation18_spill] sm:$0xff] %v14398_v1  ;;  %19436 = vst [vmem:[#allocation20_spill] sm:$0xff] %v14410_v48  ;;  %v5077_v2 = vld [vmem:[%s19316_s3 + $0x70] sm:$0xff]  ;;  %v14434_v1 = vsel %vm241_vm1, %v313_v0, %v315_v13 }
  0x27   :  { %5216 = vperm.xlu1 %13742, %v5074_v44   ;;  %5211 = vperm.xlu0 %13741, %v5073_v50   ;;  %v309_v44 = vrot.slane %v14338_v20, 7  ;;  %v14354_v50 = vld [vmem:[%s19313_s0 + $0x118] sm:$0xff]  ;;  %19437 = vst [vmem:[#allocation21_spill] sm:$0xff] %v14434_v1  ;;  %v5744_v1 = vld [vmem:[%s19317_s4 + $0x48] sm:$0xff] }
  0x28   :  { %v311_v62 = vrot.slane %v14354_v50, 7 }
  0x29   :  { %12823 = vmatmul.mubr.msk.f32.gmra.mrb[16].mxu0 %vm2457_vm0, %v14163_v4  ;;  %v317_v4 = vrot.slane %v14378_v29, 7  ;;  %v14423_v14 = vsel %vm241_vm1, %v307_v33, %v309_v44 }
  0x2a   :  { %12825 = vmatprep.mubr.msk.f32.mxu0 %vm2457_vm0, %v14173_v8  ;;  %v14407_v8 = vld [vmem:[%s19313_s0 + $0x148] sm:$0xff]  ;;  %v14428_v7 = vsel %vm241_vm1, %v309_v44, %v311_v62  ;;  %v14431_v48 = vsel %vm241_vm1, %v311_v62, %v313_v0  ;;  %v14457_v0 = vsel %vm241_vm1, %v319_v46, %v321_v52 }
  0x2b   :  { %5226 = vperm.xlu1 %13742, %v5076_v60   ;;  %5221 = vperm.xlu0 %13741, %v5075_v63   ;;  %v323_v60 = vrot.slane %v14407_v8, 7  ;;  %v14420_v63 = vsel %vm241_vm1, %v305_v15, %v307_v33  ;;  %v14441_v15 = vld [vmem:[%s19313_s0 + $0x150] sm:$0xff]  ;;  %v14449_v33 = vsel %vm241_vm1, %v315_v13, %v317_v4  ;;  %v14452_v44 = vsel %vm241_vm1, %v317_v4, %v319_v46  ;;  %v5743_v13 = vld [vmem:[%s19317_s4 + $0x40] sm:$0xff] }
  0x2d   :  { %12826 = vmatmul.mubr.msk.f32.gmra.mrb[18].mxu0 %vm2457_vm0, %v14178_v9  ;;  %v14446_v9 = vld [vmem:[%s19313_s0 + $0x158] sm:$0xff]  ;;  %v14466_v4 = vsel %vm241_vm1, %v321_v52, %v323_v60  ;;  %v14483_v52 = vld [vmem:[%s19313_s0 + $0x160] sm:$0xff] }
  0x2e   :  { %12828 = vmatprep.mubr.msk.f32.mxu0 %vm2457_vm0, %v14194_v16  ;;  %v325_v16 = vrot.slane %v14441_v15, 7  ;;  %v19329_v62 = vrot.slane %v14446_v9, 7  ;;  %12864 = vmatprep.mubr.msk.f32.mxu1 %vm2457_vm0, %v14483_v52 }
  0x2f   :  { %5236 = vperm.xlu1 %13742, %v5078_v57   ;;  %5231 = vperm.xlu0 %13741, %v5077_v2   ;;  %v5748_v2 = vld [vmem:[%s19317_s4 + $0x68] sm:$0xff] }
  0x30   :  { %v14473_v46 = vsel %vm241_vm1, %v323_v60, %v325_v16  ;;  %v14478_v57 = vsel %vm241_vm1, %v325_v16, %v19329_v62  ;;  %v14513_v60 = vld [vmem:[%s19313_s0 + $0x170] sm:$0xff]  ;;  %v14534_v16 = vld [vmem:[%s19313_s0 + $0x180] sm:$0xff]  ;;  %v19442_v62 = vrot.slane %v14009_v6, 7  ;;  %v5758_v6 = vld [vmem:[%s19317_s4 + $0xb8] sm:$0xff] }
  0x31   :  { %12829 = vmatmul.mubr.msk.f32.gmra.mrb[20].mxu0 %vm2457_vm0, %v14204_v19  ;;  %v5746_v19 = vld [vmem:[%s19317_s4 + $0x58] sm:$0xff] }
  0x32   :  { %12831 = vmatprep.mubr.msk.f32.mxu0 %vm2457_vm0, %v14214_v23  ;;  %v5745_v23 = vld [vmem:[%s19317_s4 + $0x50] sm:$0xff] }
  0x33   :  { %5878 = vperm.xlu1 %13742, %v5744_v1   ;;  %5873 = vperm.xlu0 %13741, %v5743_v13   ;;  %v14498_v1 = vld [vmem:[%s19313_s0 + $0x168] sm:$0xff]  ;;  %v5749_v13 = vld [vmem:[%s19317_s4 + $0x70] sm:$0xff] }
  0x34   :  { %12865 = vmatmul.mubr.msk.f32.vlgmr.msra.gmra.mrb[0].mxu1 %vm2457_vm0, %v14498_v1 }
  0x35   :  { %12832 = vmatmul.mubr.msk.f32.gmra.mrb[22].mxu0 %vm2457_vm0, %v14232_v32  ;;  %v5747_v32 = vld [vmem:[%s19317_s4 + $0x60] sm:$0xff]  ;;  %12867 = vmatprep.mubr.msk.f32.mxu1 %vm2457_vm0, %v14513_v60 }
  0x36   :  { %12834 = vmatprep.mubr.msk.f32.mxu0 %vm2457_vm0, %v14239_v34  ;;  %v14520_v34 = vld [vmem:[%s19313_s0 + $0x178] sm:$0xff] }
  0x37   :  { %5888 = vperm.xlu1 %13742, %v5746_v19   ;;  %5883 = vperm.xlu0 %13741, %v5745_v23   ;;  %v5080_v19 = vld [vmem:[%s19316_s3 + $0x88] sm:$0xff]  ;;  %v14561_v23 = vld [vmem:[%s19313_s0 + $0x190] sm:$0xff] }
  0x38   :  { %12868 = vmatmul.mubr.msk.f32.gmra.mrb[2].mxu1 %vm2457_vm0, %v14520_v34 }
  0x39   :  { %12835 = vmatmul.mubr.msk.f32.gmra.mrb[24].mxu0 %vm2457_vm0, %v14249_v38  ;;  %v5750_v38 = vld [vmem:[%s19317_s4 + $0x78] sm:$0xff]  ;;  %12870 = vmatprep.mubr.msk.f32.mxu1 %vm2457_vm0, %v14534_v16 }
  0x3a   :  { %12837 = vmatprep.mubr.msk.f32.mxu0 %vm2457_vm0, %v14254_v40  ;;  %v14546_v40 = vld [vmem:[%s19313_s0 + $0x188] sm:$0xff] }
  0x3b   :  { %5898 = vperm.xlu1 %13742, %v5748_v2   ;;  %5893 = vperm.xlu0 %13741, %v5747_v32   ;;  %v14582_v2 = vld [vmem:[%s19313_s0 + $0x1a0] sm:$0xff]  ;;  %v5081_v32 = vld [vmem:[%s19316_s3 + $0x90] sm:$0xff] }
  0x3c   :  { %12871 = vmatmul.mubr.msk.f32.gmra.mrb[4].mxu1 %vm2457_vm0, %v14546_v40 }
  0x3d   :  { %12838 = vmatmul.mubr.msk.f32.gmra.mrb[26].mxu0 %vm2457_vm0, %v14259_v41  ;;  %v5079_v41 = vld [vmem:[%s19316_s3 + $0x80] sm:$0xff]  ;;  %12873 = vmatprep.mubr.msk.f32.mxu1 %vm2457_vm0, %v14561_v23 }
  0x3e   :  { %12840 = vmatprep.mubr.msk.f32.mxu0 %vm2457_vm0, %v14273_v49  ;;  %v14568_v49 = vld [vmem:[%s19313_s0 + $0x198] sm:$0xff] }
  0x3f   :  { %5908 = vperm.xlu1 %13742, %v5750_v38   ;;  %5903 = vperm.xlu0 %13741, %v5749_v13   ;;  %v5084_v38 = vld [vmem:[%s19316_s3 + $0xa8] sm:$0xff]  ;;  %v14609_v13 = vld [vmem:[%s19313_s0 + $0x1b0] sm:$0xff] }
  0x40   :  { %12874 = vmatmul.mubr.msk.f32.gmra.mrb[6].mxu1 %vm2457_vm0, %v14568_v49 }
  0x41   :  { %12841 = vmatmul.mubr.msk.f32.gmra.mrb[28].mxu0 %vm2457_vm0, %v14282_v54  ;;  %v5082_v54 = vld [vmem:[%s19316_s3 + $0x98] sm:$0xff]  ;;  %12876 = vmatprep.mubr.msk.f32.mxu1 %vm2457_vm0, %v14582_v2 }
  0x42   :  { %12843 = vmatprep.mubr.msk.f32.mxu0 %vm2457_vm0, %v14287_v55  ;;  %v14594_v55 = vld [vmem:[%s19313_s0 + $0x1a8] sm:$0xff] }
  0x43   :  { %5246 = vperm.xlu1 %13742, %v5080_v19   ;;  %5241 = vperm.xlu0 %13741, %v5079_v41   ;;  %v14630_v19 = vld [vmem:[%s19313_s0 + $0x1c0] sm:$0xff]  ;;  %v5085_v41 = vld [vmem:[%s19316_s3 + $0xb0] sm:$0xff] }
  0x44   :  { %12877 = vmatmul.mubr.msk.f32.gmra.mrb[8].mxu1 %vm2457_vm0, %v14594_v55 }
  0x45   :  { %12844 = vmatmul.mubr.msk.f32.gmra.mrb[30].mxu0 %vm2457_vm0, %v14298_v58  ;;  %v5083_v58 = vld [vmem:[%s19316_s3 + $0xa0] sm:$0xff]  ;;  %12879 = vmatprep.mubr.msk.f32.mxu1 %vm2457_vm0, %v14609_v13 }
  0x46   :  { %12846 = vmatprep.mubr.msk.f32.mxu0 %vm2457_vm0, %v14319_v10  ;;  %v14616_v10 = vld [vmem:[%s19313_s0 + $0x1b8] sm:$0xff] }
  0x47   :  { %5256 = vperm.xlu1 %13742, %v5082_v54   ;;  %5251 = vperm.xlu0 %13741, %v5081_v32   ;;  %v819_v54 = vlaneseq  ;;  %v5752_v32 = vld [vmem:[%s19317_s4 + $0x88] sm:$0xff] }
  0x48   :  { %12880 = vmatmul.mubr.msk.f32.gmra.mrb[10].mxu1 %vm2457_vm0, %v14616_v10 }
  0x49   :  { %12847 = vmatmul.mubr.msk.f32.gmra.mrb[32].mxu0 %vm2457_vm0, %v14333_v18  ;;  %v5086_v18 = vld [vmem:[%s19316_s3 + $0xb8] sm:$0xff]  ;;  %12882 = vmatprep.mubr.msk.f32.mxu1 %vm2457_vm0, %v14630_v19 }
  0x4a   :  { %12849 = vmatprep.mubr.msk.f32.mxu0 %vm2457_vm0, %v14338_v20  ;;  %v14642_v20 = vld [vmem:[%s19313_s0 + $0x1c8] sm:$0xff] }
  0x4b   :  { %5266 = vperm.xlu1 %13742, %v5084_v38   ;;  %5261 = vperm.xlu0 %13741, %v5083_v58   ;;  %v14654_v38 = vshrl.u32 %v819_v54, 7  ;;  %v14659_v58 = vld [vmem:[%s19313_s0 + $0x1d0] sm:$0xff]  ;;  %v14693_v54 = vld [vmem:[%s19313_s0 + $0x1e8] sm:$0xff] }
  0x4c   :  { %12883 = vmatmul.mubr.msk.f32.gmra.mrb[12].mxu1 %vm2457_vm0, %v14642_v20 }
  0x4d   :  { %12850 = vmatmul.mubr.msk.f32.gmra.mrb[34].mxu0 %vm2457_vm0, %v14354_v50  ;;  %v5751_v50 = vld [vmem:[%s19317_s4 + $0x80] sm:$0xff]  ;;  %19438 = vst [vmem:[#allocation22_spill] sm:$0xff] %v14654_v38  ;;  %12885 = vmatprep.mubr.msk.f32.mxu1 %vm2457_vm0, %v14659_v58 }
  0x4e   :  { %12852 = vmatprep.mubr.msk.f32.mxu0 %vm2457_vm0, %v14359_v36  ;;  %v14666_v36 = vld [vmem:[%s19313_s0 + $0x1d8] sm:$0xff] }
  0x4f   :  { %5276 = vperm.xlu1 %13742, %v5086_v18   ;;  %5271 = vperm.xlu0 %13741, %v5085_v41   ;;  %19439 = vst [vmem:[#allocation23_spill] sm:$0xff] %v14666_v36  ;;  %v14680_v18 = vld [vmem:[%s19313_s0 + $0x1e0] sm:$0xff]  ;;  %v5753_v41 = vld [vmem:[%s19317_s4 + $0x90] sm:$0xff] }
  0x50   :  { %12886 = vmatmul.mubr.msk.f32.gmra.mrb[14].mxu1 %vm2457_vm0, %v14666_v36  ;;  %19440 = vst [vmem:[#allocation24_spill] sm:$0xff] %v14680_v18  ;;  %v14754_v36 = vld [vmem:[%s19313_s0 + $0x208] sm:$0xff] }
  0x51   :  { %12853 = vmatmul.mubr.msk.f32.gmra.mrb[36].mxu0 %vm2457_vm0, %v14364_v45  ;;  %v5754_v45 = vld [vmem:[%s19317_s4 + $0x98] sm:$0xff]  ;;  %12888 = vmatprep.mubr.msk.f32.mxu1 %vm2457_vm0, %v14680_v18  ;;  %v14718_v18 = vld [vmem:[%s19313_s0 + $0x1f0] sm:$0xff] }
  0x52   :  { %12855 = vmatprep.mubr.msk.f32.mxu0 %vm2457_vm0, %v14378_v29  ;;  %v920_v29 = vand.u32 31, %v14654_v38 }
  0x53   :  { %5918 = vperm.xlu1 %13742, %v5752_v32   ;;  %5913 = vperm.xlu0 %13741, %v5751_v50   ;;  %v5756_v32 = vld [vmem:[%s19317_s4 + $0xa8] sm:$0xff]  ;;  %v14701_v50 = vadd.s32 32, %v14654_v38 }
  0x54   :  { %12889 = vmatmul.mubr.msk.f32.gmra.mrb[16].mxu1 %vm2457_vm0, %v14693_v54  ;;  %vm14711_vm2 = vcmp.eq.s32.totalorder %v920_v29, 0  ;;  %v5088_v29 = vld [vmem:[%s19316_s3 + $0xc8] sm:$0xff] }
  0x55   :  { %12856 = vmatmul.mubr.msk.f32.gmra.mrb[38].mxu0 %vm2457_vm0, %v14383_v27  ;;  %19441 = vst [vmem:[#allocation25_spill] sm:$0xff] %v14701_v50  ;;  %v5755_v27 = vld [vmem:[%s19317_s4 + $0xa0] sm:$0xff]  ;;  %12891 = vmatprep.mubr.msk.f32.mxu1 %vm2457_vm0, %v14718_v18 }
  0x56   :  { %12858 = vmatprep.mubr.msk.f32.mxu0 %vm2457_vm0, %v14395_v26  ;;  %v529_v26 = vsel %vm241_vm1, 0.0, %v19442_v62  ;;  %v14741_v62 = vld [vmem:[%s19313_s0 + $0x200] sm:$0xff] }
  0x57   :  { %5928 = vperm.xlu1 %13742, %v5754_v45   ;;  %5923 = vperm.xlu0 %13741, %v5753_v41   ;;  %v14725_v45 = vld [vmem:[%s19313_s0 + $0x1f8] sm:$0xff]  ;;  %v948_v41 = vand.u32 31, %v14701_v50 }
  0x58   :  { %12892 = vmatmul.mubr.msk.f32.gmra.mrb[18].mxu1 %vm2457_vm0, %v14725_v45 }
  0x59   :  { %12859 = vmatmul.mubr.msk.f32.gmra.mrb[40].mxu0 %vm2457_vm0, %v14407_v8  ;;  %v2164_v8 = vsel %vm14711_vm2, 0.0, %v529_v26  ;;  %12894 = vmatprep.mubr.msk.f32.mxu1 %vm2457_vm0, %v14741_v62  ;;  %vm14768_vm3 = vcmp.eq.s32.totalorder %v948_v41, 0  ;;  %v14827_v26 = vadd.s32 96, %v14654_v38 }
  0x5a   :  { %12861 = vmatprep.mubr.msk.f32.mxu0 %vm2457_vm0, %v14441_v15  ;;  %v5757_v15 = vld [vmem:[%s19317_s4 + $0xb0] sm:$0xff] }
  0x5b   :  { %5938 = vperm.xlu1 %13742, %v5756_v32   ;;  %5933 = vperm.xlu0 %13741, %v5755_v27   ;;  %v5087_v32 = vld [vmem:[%s19316_s3 + $0xc0] sm:$0xff]  ;;  %v14766_v27 = vadd.s32 64, %v14654_v38  ;;  %19450 = vst [vmem:[#allocation27_spill] sm:$0xff] %v14827_v26 }
  0x5c   :  { %12895 = vmatmul.mubr.msk.f32.gmra.mrb[20].mxu1 %vm2457_vm0, %v14754_v36 }
  0x5d   :  { %12862 = vmatmul.mubr.msk.f32.gmra.mrb[42].mxu0 %vm2457_vm0, %v14446_v9  ;;  %19445 = vst [vmem:[#allocation26_spill] sm:$0xff] %v14766_v27  ;;  %v976_v41 = vand.u32 31, %v14766_v27 }
  0x5e   :  { %12946 = vmatprep.mubr.msk.f32.mxu0 %vm2457_vm0, %v2164_v8  ;;  %v14775_v8 = vld [vmem:[%s19313_s0 + $0x210] sm:$0xff] }
  0x5f   :  { %5948 = vperm.xlu1 %13742, %v5758_v6   ;;  %5943 = vperm.xlu0 %13741, %v5757_v15   ;;  %v5090_v6 = vld [vmem:[%s19316_s3 + $0xd8] sm:$0xff]  ;;  %v5089_v15 = vld [vmem:[%s19316_s3 + $0xd0] sm:$0xff]  ;;  %vm14817_vm4 = vcmp.eq.s32.totalorder %v976_v41, 0 }
  0x60   :  { %12897 = vmatprep.mubr.msk.f32.mxu1 %vm2457_vm0, %v14775_v8  ;;  %v14854_v41 = vld [vmem:[%s19313_s0 + $0x238] sm:$0xff] }
  0x61   :  { %12947 = vmatmul.mubr.msk.f32.vlgmr.msra.gmra.mrb[0].mxu0 %vm2457_vm0, %v14044_v21  ;;  %v2168_v21 = vsel %vm14768_vm3, 0.0, %v14067_v31  ;;  %v5092_v31 = vld [vmem:[%s19316_s3 + $0xe8] sm:$0xff] }
  0x62   :  { %13438 = vmatpush3.bf16.msra.mxu0 %v14321_v11  ;;  %12949 = vmatprep.mubr.msk.f32.mxu0 %vm2457_vm0, %v14057_v28  ;;  %v14797_v28 = vld [vmem:[%s19313_s0 + $0x218] sm:$0xff]  ;;  %v14802_v11 = vld [vmem:[%s19313_s0 + $0x220] sm:$0xff] }
  0x63   :  { %5286 = vperm.xlu1 %13742, %v5088_v29   ;;  %5281 = vperm.xlu0 %13741, %v5087_v32   ;;  %v5091_v29 = vld [vmem:[%s19316_s3 + $0xe0] sm:$0xff] }
  0x64   :  { %12898 = vmatmul.mubr.msk.f32.gmra.mrb[22].mxu1 %vm2457_vm0, %v14797_v28 }
  0x65   :  { %12950 = vmatmul.mubr.msk.f32.gmra.mrb[2].mxu0 %vm2457_vm0, %v14064_v30  ;;  %12900 = vmatprep.mubr.msk.f32.mxu1 %vm2457_vm0, %v14802_v11  ;;  %v14824_v30 = vld [vmem:[%s19313_s0 + $0x228] sm:$0xff] }
  0x66   :  { %12952 = vmatprep.mubr.msk.f32.mxu0 %vm2457_vm0, %v2168_v21  ;;  %v14832_v21 = vld [vmem:[%s19313_s0 + $0x230] sm:$0xff] }
  0x67   :  { %5296 = vperm.xlu1 %13742, %v5090_v6   ;;  %5291 = vperm.xlu0 %13741, %v5089_v15   ;;  %v5094_v6 = vld [vmem:[%s19316_s3 + $0xf8] sm:$0xff]  ;;  %v5093_v15 = vld [vmem:[%s19316_s3 + $0xf0] sm:$0xff] }
  0x68   :  { %12901 = vmatmul.mubr.msk.f32.gmra.mrb[24].mxu1 %vm2457_vm0, %v14824_v30 }
  0x69   :  { %12953 = vmatmul.mubr.msk.f32.gmra.mrb[4].mxu0 %vm2457_vm0, %v14079_v37  ;;  %12903 = vmatprep.mubr.msk.f32.mxu1 %vm2457_vm0, %v14832_v21  ;;  %v2172_v37 = vsel %vm14817_vm4, 0.0, %v14105_v47 }
  0x6a   :  { %12955 = vmatprep.mubr.msk.f32.mxu0 %vm2457_vm0, %v14086_v39  ;;  %v1004_v39 = vand.u32 31, %v14827_v26 }
  0x6b   :  { %5306 = vperm.xlu1 %13742, %v5092_v31   ;;  %5301 = vperm.xlu0 %13741, %v5091_v29   ;;  %v14860_v31 = vld [vmem:[%s19313_s0 + $0x240] sm:$0xff] }
  0x6c   :  { %12904 = vmatmul.mubr.msk.f32.gmra.mrb[26].mxu1 %vm2457_vm0, %v14854_v41 }
  0x6d   :  { %12956 = vmatmul.mubr.msk.f32.gmra.mrb[6].mxu0 %vm2457_vm0, %v14093_v43  ;;  %12906 = vmatprep.mubr.msk.f32.mxu1 %vm2457_vm0, %v14860_v31 }
  0x6e   :  { %19 = vsyncpa [#allocation9], 0  ;;  %12958 = vmatprep.mubr.msk.f32.mxu0 %vm2457_vm0, %v2172_v37  ;;  %v14872_v47 = vld [vmem:[%s19313_s0 + $0x248] sm:$0xff]  ;;  %v5759_v43 = vld [vmem:[%s19317_s4 + $0xc0] sm:$0xff]  ;;  %vm14880_vm5 = vcmp.eq.s32.totalorder %v1004_v39, 0  ;;  %vm530_vm11 = vcmask 1046528  }
  0x6f   :  { %5316 = vperm.xlu1 %13742, %v5094_v6   ;;  %5311 = vperm.xlu0 %13741, %v5093_v15   ;;  %v5760_v29 = vld [vmem:[%s19317_s4 + $0xc8] sm:$0xff]  ;;  %v14885_v6 = vadd.s32 128, %v14654_v38  ;;  %v14890_v15 = vld [vmem:[%s19313_s0 + $0x250] sm:$0xff]  ;;  %v2176_v37 = vsel %vm14880_vm5, 0.0, %v14141_v61  ;;  %v14906_v39 = vld [vmem:[%s19313_s0 + $0x258] sm:$0xff]  ;;  %s13915_s30 = smov 64  }
  0x70   :  { %12907 = vmatmul.mubr.msk.f32.gmra.mrb[28].mxu1 %vm2457_vm0, %v14872_v47  ;;  %v5761_v26 = vld [vmem:[%s19317_s4 + $0xd0] sm:$0xff]  ;;  %v14930_v61 = vld [vmem:[%s19313_s0 + $0x268] sm:$0xff]  ;;  %v5098_v27 = vld [vmem:[%s19316_s3 + $0x118] sm:$0xff] }
  0x71   :  { %19453 = vst [vmem:[#allocation28_spill] sm:$0xff] %v14885_v6  ;;  %12959 = vmatmul.mubr.msk.f32.gmra.mrb[8].mxu0 %vm2457_vm0, %v14113_v51  ;;  %12909 = vmatprep.mubr.msk.f32.mxu1 %vm2457_vm0, %v14890_v15  ;;  %v5762_v51 = vld [vmem:[%s19317_s4 + $0xd8] sm:$0xff]  ;;  %v5097_v50 = vld [vmem:[%s19316_s3 + $0x110] sm:$0xff]  ;;  %v15054_v32 = vld [vmem:[%s19313_s0 + $0x2a8] sm:$0xff] }
  0x72   :  { %12961 = vmatprep.mubr.msk.f32.mxu0 %vm2457_vm0, %v14119_v53  ;;  %v1032_v53 = vand.u32 31, %v14885_v6  ;;  %v5765_v6 = vld [vmem:[%s19317_s4 + $0xf0] sm:$0xff]  ;;  %19465 = vst [vmem:[#allocation36_spill] sm:$0xff] %v15054_v32 }
  0x73   :  { %5958 = vperm.xlu1 %13742, %v5760_v29   ;;  %5953 = vperm.xlu0 %13741, %v5759_v43   ;;  %v14918_v29 = vld [vmem:[%s19313_s0 + $0x260] sm:$0xff]  ;;  %v5764_v43 = vld [vmem:[%s19317_s4 + $0xe8] sm:$0xff] }
  0x74   :  { %12910 = vmatmul.mubr.msk.f32.gmra.mrb[30].mxu1 %vm2457_vm0, %v14906_v39  ;;  %vm14938_vm6 = vcmp.eq.s32.totalorder %v1032_v53, 0  ;;  %v14964_v53 = vld [vmem:[%s19313_s0 + $0x278] sm:$0xff] }
  0x75   :  { %12962 = vmatmul.mubr.msk.f32.gmra.mrb[10].mxu0 %vm2457_vm0, %v14132_v59  ;;  %12912 = vmatprep.mubr.msk.f32.mxu1 %vm2457_vm0, %v14918_v29  ;;  %v5763_v59 = vld [vmem:[%s19317_s4 + $0xe0] sm:$0xff] }
  0x76   :  { %12964 = vmatprep.mubr.msk.f32.mxu0 %vm2457_vm0, %v2176_v37  ;;  %v14943_v37 = vadd.s32 160, %v14654_v38 }
  0x77   :  { %5968 = vperm.xlu1 %13742, %v5762_v51   ;;  %5963 = vperm.xlu0 %13741, %v5761_v26   ;;  %v14948_v26 = vld [vmem:[%s19313_s0 + $0x270] sm:$0xff]  ;;  %v2180_v51 = vsel %vm14938_vm6, 0.0, %v14197_v17  ;;  %v14988_v17 = vld [vmem:[%s19313_s0 + $0x288] sm:$0xff] }
  0x78   :  { %19456 = vst [vmem:[#allocation29_spill] sm:$0xff] %v14943_v37  ;;  %12913 = vmatmul.mubr.msk.f32.gmra.mrb[32].mxu1 %vm2457_vm0, %v14930_v61 }
  0x79   :  { %12965 = vmatmul.mubr.msk.f32.gmra.mrb[12].mxu0 %vm2457_vm0, %v14157_v3  ;;  %12915 = vmatprep.mubr.msk.f32.mxu1 %vm2457_vm0, %v14948_v26  ;;  %v5766_v3 = vld [vmem:[%s19317_s4 + $0xf8] sm:$0xff] }
  0x7a   :  { %12967 = vmatprep.mubr.msk.f32.mxu0 %vm2457_vm0, %v14166_v5  ;;  %v1060_v5 = vand.u32 31, %v14943_v37 }
  0x7b   :  { %5978 = vperm.xlu1 %13742, %v5764_v43   ;;  %5973 = vperm.xlu0 %13741, %v5763_v59   ;;  %v14976_v43 = vld [vmem:[%s19313_s0 + $0x280] sm:$0xff]  ;;  %v5096_v59 = vld [vmem:[%s19316_s3 + $0x108] sm:$0xff] }
  0x7c   :  { %12916 = vmatmul.mubr.msk.f32.gmra.mrb[34].mxu1 %vm2457_vm0, %v14964_v53  ;;  %vm14996_vm7 = vcmp.eq.s32.totalorder %v1060_v5, 0 }
  0x7d   :  { %12968 = vmatmul.mubr.msk.f32.gmra.mrb[14].mxu0 %vm2457_vm0, %v14183_v12  ;;  %12918 = vmatprep.mubr.msk.f32.mxu1 %vm2457_vm0, %v14976_v43  ;;  %v5095_v12 = vld [vmem:[%s19316_s3 + $0x100] sm:$0xff]  ;;  %v2184_v37 = vsel %vm14996_vm7, 0.0, %v14242_v35 }
  0x7e   :  { %12970 = vmatprep.mubr.msk.f32.mxu0 %vm2457_vm0, %v2180_v51  ;;  %v15001_v51 = vadd.s32 192, %v14654_v38 }
  0x7f   :  { %5988 = vperm.xlu1 %13742, %v5766_v3   ;;  %5983 = vperm.xlu0 %13741, %v5765_v6   ;;  %v15006_v6 = vld [vmem:[%s19313_s0 + $0x290] sm:$0xff] }
  0x80   :  { %19459 = vst [vmem:[#allocation30_spill] sm:$0xff] %v15001_v51  ;;  %12919 = vmatmul.mubr.msk.f32.gmra.mrb[36].mxu1 %vm2457_vm0, %v14988_v17 }
  0x81   :  { %12971 = vmatmul.mubr.msk.f32.gmra.mrb[16].mxu0 %vm2457_vm0, %v14209_v22  ;;  %12921 = vmatprep.mubr.msk.f32.mxu1 %vm2457_vm0, %v15006_v6  ;;  %v15014_v3 = vpop.permute.xlu1 %5171  ;;  %v15016_v5 = vpop.permute.xlu0 %5161  ;;  %v15026_v22 = vld [vmem:[%s19313_s0 + $0x298] sm:$0xff] }
  0x82   :  { %19460 = vst [vmem:[#allocation31_spill] sm:$0xff] %v15014_v3  ;;  %19461 = vst [vmem:[#allocation32_spill] sm:$0xff] %v15016_v5  ;;  %12973 = vmatprep.mubr.msk.f32.mxu0 %vm2457_vm0, %v14217_v24  ;;  %v1088_v24 = vand.u32 31, %v15001_v51  ;;  %v5099_v51 = vld [vmem:[%s19316_s3 + $0x120] sm:$0xff]  ;;  %v19475_v3 = vld [vmem:[#allocation11_spill] sm:$0xff] }
  0x83   :  { %5326 = vperm.xlu1 %13742, %v5096_v59   ;;  %5321 = vperm.xlu0 %13741, %v5095_v12   ;;  %19462 = vst [vmem:[#allocation33_spill] sm:$0xff] %v15026_v22  ;;  %v15038_v59 = vld [vmem:[%s19313_s0 + $0x2a0] sm:$0xff] }
  0x84   :  { %12922 = vmatmul.mubr.msk.f32.gmra.mrb[38].mxu1 %vm2457_vm0, %v15026_v22  ;;  %vm15062_vm8 = vcmp.eq.s32.totalorder %v1088_v24, 0 }
  0x85   :  { %12974 = vmatmul.mubr.msk.f32.gmra.mrb[18].mxu0 %vm2457_vm0, %v14220_v25  ;;  %12924 = vmatprep.mubr.msk.f32.mxu1 %vm2457_vm0, %v15038_v59  ;;  %v5100_v25 = vld [vmem:[%s19316_s3 + $0x128] sm:$0xff] }
  0x86   :  { %v15046_v35 = vpop.permute.xlu1 %5176  ;;  %v15048_v12 = vpop.permute.xlu0 %5166  ;;  %12976 = vmatprep.mubr.msk.f32.mxu0 %vm2457_vm0, %v2184_v37 }
  0x87   :  { %19463 = vst [vmem:[#allocation34_spill] sm:$0xff] %v15046_v35  ;;  %19464 = vst [vmem:[#allocation35_spill] sm:$0xff] %v15048_v12  ;;  %5336 = vperm.xlu1 %13742, %v5098_v27   ;;  %5331 = vperm.xlu0 %13741, %v5097_v50   ;;  %v15067_v27 = vadd.s32 224, %v14654_v38  ;;  %v15072_v50 = vld [vmem:[%s19313_s0 + $0x2b0] sm:$0xff]  ;;  %v5767_v12 = vld [vmem:[%s19317_s4 + $0x100] sm:$0xff] }
  0x88   :  { %19469 = vst [vmem:[#allocation38_spill] sm:$0xff] %v15072_v50  ;;  %12925 = vmatmul.mubr.msk.f32.gmra.mrb[40].mxu1 %vm2457_vm0, %v15054_v32  ;;  %v19472_v35 = vld [vmem:[#allocation12_spill] sm:$0xff] }
  0x89   :  { %19468 = vst [vmem:[#allocation37_spill] sm:$0xff] %v15067_v27  ;;  %12977 = vmatmul.mubr.msk.f32.gmra.mrb[20].mxu0 %vm2457_vm0, %v14262_v42  ;;  %12927 = vmatprep.mubr.msk.f32.mxu1 %vm2457_vm0, %v15072_v50  ;;  %v2188_v5 = vsel %vm15062_vm8, 0.0, %v19472_v35  ;;  %v15092_v42 = vld [vmem:[%s19313_s0 + $0x2b8] sm:$0xff]  ;;  %v5773_v32 = vld [vmem:[%s19317_s4 + $0x130] sm:$0xff] }
  0x8a   :  { %v15080_v37 = vpop.permute.xlu1 %5186  ;;  %v15082_v24 = vpop.permute.xlu0 %5181  ;;  %12979 = vmatprep.mubr.msk.f32.mxu0 %vm2457_vm0, %v14290_v56  ;;  %19473 = vst [vmem:[#allocation12_spill] sm:$0xff] %v15092_v42  ;;  %v1116_v56 = vand.u32 31, %v15067_v27  ;;  %v15120_v27 = vld [vmem:[%s19313_s0 + $0x2c8] sm:$0xff] }
  0x8b   :  { %19470 = vst [vmem:[#allocation39_spill] sm:$0xff] %v15080_v37  ;;  %19471 = vst [vmem:[#allocation40_spill] sm:$0xff] %v15082_v24  ;;  %5346 = vperm.xlu1 %13742, %v5100_v25   ;;  %5341 = vperm.xlu0 %13741, %v5099_v51   ;;  %v5102_v37 = vld [vmem:[%s19316_s3 + $0x138] sm:$0xff]  ;;  %v5101_v24 = vld [vmem:[%s19316_s3 + $0x130] sm:$0xff] }
  0x8c   :  { %v15104_v51 = vld [vmem:[%s19313_s0 + $0x2c0] sm:$0xff]  ;;  %12928 = vmatmul.mubr.msk.f32.gmra.mrb[42].mxu1 %vm2457_vm0, %v15092_v42  ;;  %19478 = vst [vmem:[#allocation43_spill] sm:$0xff] %v15120_v27  ;;  %vm15128_vm9 = vcmp.eq.s32.totalorder %v1116_v56, 0 }
  0x8d   :  { %19474 = vst [vmem:[#allocation41_spill] sm:$0xff] %v15104_v51  ;;  %12980 = vmatmul.mubr.msk.f32.gmra.mrb[22].mxu0 %vm2457_vm0, %v19475_v3  ;;  %12930 = vmatprep.mubr.msk.f32.mxu1 %vm2457_vm0, %v15104_v51  ;;  %v5768_v3 = vld [vmem:[%s19317_s4 + $0x108] sm:$0xff]  ;;  %v19487_v51 = vld [vmem:[#allocation16_spill] sm:$0xff] }
  0x8e   :  { %v15112_v35 = vpop.permute.xlu1 %5196  ;;  %v15114_v25 = vpop.permute.xlu0 %5191  ;;  %12982 = vmatprep.mubr.msk.f32.mxu0 %vm2457_vm0, %v2188_v5  ;;  %v15133_v5 = vadd.s32 256, %v14654_v38  ;;  %v19486_v42 = vld [vmem:[#allocation14_spill] sm:$0xff]  ;;  %v2192_v50 = vsel %vm15128_vm9, 0.0, %v19487_v51  ;;  %v19490_v51 = vld [vmem:[#allocation15_spill] sm:$0xff] }
  0x8f   :  { %19476 = vst [vmem:[#allocation11_spill] sm:$0xff] %v15112_v35  ;;  %19477 = vst [vmem:[#allocation42_spill] sm:$0xff] %v15114_v25  ;;  %5356 = vperm.xlu1 %13742, %v5102_v37   ;;  %5351 = vperm.xlu0 %13741, %v5101_v24   ;;  %v15138_v37 = vld [vmem:[%s19313_s0 + $0x2d0] sm:$0xff]  ;;  %v19483_v24 = vld [vmem:[#allocation13_spill] sm:$0xff] }
  0x90   :  { %19481 = vst [vmem:[#allocation44_spill] sm:$0xff] %v15133_v5  ;;  %19482 = vst [vmem:[#allocation45_spill] sm:$0xff] %v15138_v37  ;;  %12931 = vmatmul.mubr.msk.f32.gmra.mrb[44].mxu1 %vm2457_vm0, %v15120_v27 }
  0x91   :  { %12983 = vmatmul.mubr.msk.f32.gmra.mrb[24].mxu0 %vm2457_vm0, %v19483_v24  ;;  %12933 = vmatprep.mubr.msk.f32.mxu1 %vm2457_vm0, %v15138_v37  ;;  %v15158_v24 = vld [vmem:[%s19313_s0 + $0x2d8] sm:$0xff]  ;;  %v13789_v37 = vld [vmem:[%s19313_s0] sm:$0xff] }
  0x92   :  { %v15146_v56 = vpop.permute.xlu1 %5838  ;;  %v15148_v25 = vpop.permute.xlu0 %5833  ;;  %12985 = vmatprep.mubr.msk.f32.mxu0 %vm2457_vm0, %v19486_v42  ;;  %19488 = vst [vmem:[#allocation14_spill] sm:$0xff] %v15158_v24  ;;  %v1144_v42 = vand.u32 31, %v15133_v5  ;;  %v15186_v5 = vld [vmem:[%s19313_s0 + $0x2e8] sm:$0xff]  ;;  %v531_v27 = vrot.slane %v13789_v37, 1  ;;  %v15233_v37 = vld [vmem:[%s19313_s0 + $0x2f8] sm:$0xff] }
  0x93   :  { %19484 = vst [vmem:[#allocation13_spill] sm:$0xff] %v15146_v56  ;;  %19485 = vst [vmem:[#allocation46_spill] sm:$0xff] %v15148_v25  ;;  %5998 = vperm.xlu1 %13742, %v5768_v3   ;;  %5993 = vperm.xlu0 %13741, %v5767_v12   ;;  %v5770_v56 = vld [vmem:[%s19317_s4 + $0x118] sm:$0xff]  ;;  %v5769_v25 = vld [vmem:[%s19317_s4 + $0x110] sm:$0xff] }
  0x94   :  { %v15170_v12 = vld [vmem:[%s19313_s0 + $0x2e0] sm:$0xff]  ;;  %12934 = vmatmul.mubr.msk.f32.gmra.mrb[46].mxu1 %vm2457_vm0, %v15158_v24  ;;  %19493 = vst [vmem:[#allocation48_spill] sm:$0xff] %v15186_v5  ;;  %vm15194_vm10 = vcmp.eq.s32.totalorder %v1144_v42, 0 }
  0x95   :  { %19489 = vst [vmem:[#allocation16_spill] sm:$0xff] %v15170_v12  ;;  %12986 = vmatmul.mubr.msk.f32.gmra.mrb[26].mxu0 %vm2457_vm0, %v19490_v51  ;;  %12936 = vmatprep.mubr.msk.f32.mxu1 %vm2457_vm0, %v15170_v12  ;;  %v5772_v51 = vld [vmem:[%s19317_s4 + $0x128] sm:$0xff]  ;;  %v5771_v24 = vld [vmem:[%s19317_s4 + $0x120] sm:$0xff] }
  0x96   :  { %v15178_v35 = vpop.permute.xlu1 %5848  ;;  %v15180_v3 = vpop.permute.xlu0 %5843  ;;  %12988 = vmatprep.mubr.msk.f32.mxu0 %vm2457_vm0, %v2192_v50  ;;  %v15199_v50 = vadd.s32 288, %v14654_v38  ;;  %v19501_v12 = vld [vmem:[#allocation18_spill] sm:$0xff] }
  0x97   :  { %19491 = vst [vmem:[#allocation15_spill] sm:$0xff] %v15178_v35  ;;  %19492 = vst [vmem:[#allocation47_spill] sm:$0xff] %v15180_v3  ;;  %6008 = vperm.xlu1 %13742, %v5770_v56   ;;  %6003 = vperm.xlu0 %13741, %v5769_v25   ;;  %v15204_v25 = vld [vmem:[%s19313_s0 + $0x2f0] sm:$0xff]  ;;  %v19498_v56 = vld [vmem:[#allocation17_spill] sm:$0xff] }
  0x98   :  { %19496 = vst [vmem:[#allocation49_spill] sm:$0xff] %v15199_v50  ;;  %19497 = vst [vmem:[#allocation50_spill] sm:$0xff] %v15204_v25  ;;  %12937 = vmatmul.mubr.msk.f32.gmra.mrb[48].mxu1 %vm2457_vm0, %v15186_v5  ;;  %v13790_v5 = vld [vmem:[%s19313_s0 + $0x8] sm:$0xff] }
  0x99   :  { %12989 = vmatmul.mubr.msk.f32.gmra.mrb[28].mxu0 %vm2457_vm0, %v19498_v56  ;;  %12939 = vmatprep.mubr.msk.f32.mxu1 %vm2457_vm0, %v15204_v25  ;;  %v532_v56 = vrot.slane %v13790_v5, 1  ;;  %v13791_v25 = vld [vmem:[%s19313_s0 + $0x10] sm:$0xff]  ;;  %19503 = vst [vmem:[#allocation18_spill] sm:$0xff] %v15233_v37  ;;  %v5774_v5 = vld [vmem:[%s19317_s4 + $0x138] sm:$0xff] }
  0x9a   :  { %v15212_v42 = vpop.permute.xlu1 %5858  ;;  %v15214_v3 = vpop.permute.xlu0 %5853  ;;  %12991 = vmatprep.mubr.msk.f32.mxu0 %vm2457_vm0, %v19501_v12 }
  0x9b   :  { %19499 = vst [vmem:[#allocation17_spill] sm:$0xff] %v15212_v42  ;;  %19500 = vst [vmem:[#allocation51_spill] sm:$0xff] %v15214_v3  ;;  %v534_v42 = vrot.slane %v13791_v25, 1  ;;  %6018 = vperm.xlu1 %13742, %v5772_v51   ;;  %6013 = vperm.xlu0 %13741, %v5771_v24   ;;  %v19502_v3 = vld [vmem:[#allocation20_spill] sm:$0xff]  ;;  %v1172_v51 = vand.u32 31, %v15199_v50  ;;  %v19504_v24 = vld [vmem:[#allocation19_spill] sm:$0xff] }
  0x9c   :  { %v2196_v12 = vsel %vm15194_vm10, 0.0, %v19502_v3  ;;  %12940 = vmatmul.mubr.msk.f32.gmra.mrb[50].mxu1 %vm2457_vm0, %v15233_v37  ;;  %v13792_v25 = vld [vmem:[%s19313_s0 + $0x18] sm:$0xff]  ;;  %v13793_v50 = vld [vmem:[%s19313_s0 + $0x20] sm:$0xff] }
  0x9d   :  { %12992 = vmatmul.mubr.msk.f32.gmra.mrb[30].mxu0 %vm2457_vm0, %v19504_v24  ;;  %v536_v22 = vrot.slane %v13792_v25, 1  ;;  %v538_v37 = vrot.slane %v13793_v50, 1  ;;  %v15258_v24 = vsel %vm530_vm11, %v531_v27, %v532_v56  ;;  %v5103_v25 = vld [vmem:[%s19316_s3 + $0x140] sm:$0xff]  ;;  %vm15269_vm12 = vcmp.eq.s32.totalorder %v1172_v51, 0  ;;  %v13794_v27 = vld [vmem:[%s19313_s0 + $0x28] sm:$0xff]  ;;  %v13795_v51 = vld [vmem:[%s19313_s0 + $0x30] sm:$0xff] }
  0x9e   :  { %v15246_v35 = vpop.permute.xlu1 %5868  ;;  %v15248_v3 = vpop.permute.xlu0 %5863  ;;  %12994 = vmatprep.mubr.msk.f32.mxu0 %vm2457_vm0, %v2196_v12  ;;  %v5104_v12 = vld [vmem:[%s19316_s3 + $0x148] sm:$0xff]  ;;  %v540_v50 = vrot.slane %v13794_v27, 1 }
  0x9f   :  { %19505 = vst [vmem:[#allocation20_spill] sm:$0xff] %v15246_v35  ;;  %19506 = vst [vmem:[#allocation19_spill] sm:$0xff] %v15248_v3  ;;  %6028 = vperm.xlu1 %13742, %v5774_v5   ;;  %6023 = vperm.xlu0 %13741, %v5773_v32   ;;  %v15261_v3 = vsel %vm530_vm11, %v532_v56, %v534_v42  ;;  %v15274_v32 = vadd.s32 320, %v14654_v38  ;;  %v15294_v27 = vsel %vm530_vm11, %v534_v42, %v536_v22 }
  0xa0   :  { %19507 = vst [vmem:[#allocation52_spill] sm:$0xff] %v15261_v3  ;;  %v542_v3 = vrot.slane %v13795_v51, 1  ;;  %v5105_v51 = vld [vmem:[%s19316_s3 + $0x150] sm:$0xff] }
  0xa1   :  { %19510 = vst [vmem:[#allocation53_spill] sm:$0xff] %v15274_v32  ;;  %12995 = vmatmul.mubr.msk.f32.gmra.mrb[32].mxu0 %vm2457_vm0, %v14420_v63  ;;  %v2200_v63 = vsel %vm15269_vm12, 0.0, %v14431_v48 }
  0xa2   :  { %v15281_v56 = vpop.permute.xlu1 %5206  ;;  %v15283_v5 = vpop.permute.xlu0 %5201  ;;  %12997 = vmatprep.mubr.msk.f32.mxu0 %vm2457_vm0, %v14423_v14  ;;  %v5106_v14 = vld [vmem:[%s19316_s3 + $0x158] sm:$0xff] }
  0xa3   :  { %19511 = vst [vmem:[#allocation54_spill] sm:$0xff] %v15281_v56  ;;  %19512 = vst [vmem:[#allocation55_spill] sm:$0xff] %v15283_v5  ;;  %5366 = vperm.xlu1 %13742, %v5104_v12   ;;  %5361 = vperm.xlu0 %13741, %v5103_v25   ;;  %v15297_v56 = vsel %vm530_vm11, %v536_v22, %v538_v37  ;;  %v1200_v12 = vand.u32 31, %v15274_v32  ;;  %v13796_v22 = vld [vmem:[%s19313_s0 + $0x38] sm:$0xff]  ;;  %v13797_v25 = vld [vmem:[%s19313_s0 + $0x40] sm:$0xff]  ;;  %v15323_v32 = vsel %vm530_vm11, %v540_v50, %v542_v3 }
  0xa4   :  { %v544_v35 = vrot.slane %v13796_v22, 1  ;;  %v546_v5 = vrot.slane %v13797_v25, 1  ;;  %19515 = vst [vmem:[#allocation58_spill] sm:$0xff] %v15323_v32  ;;  %v5107_v22 = vld [vmem:[%s19316_s3 + $0x160] sm:$0xff] }
  0xa5   :  { %12998 = vmatmul.mubr.msk.f32.gmra.mrb[34].mxu0 %vm2457_vm0, %v14428_v7  ;;  %v15320_v7 = vsel %vm530_vm11, %v538_v37, %v540_v50  ;;  %vm15331_vm13 = vcmp.eq.s32.totalorder %v1200_v12, 0  ;;  %v19519_v37 = vld [vmem:[#allocation21_spill] sm:$0xff]  ;;  %v13798_v50 = vld [vmem:[%s19313_s0 + $0x48] sm:$0xff]  ;;  %v13799_v12 = vld [vmem:[%s19313_s0 + $0x50] sm:$0xff] }
  0xa6   :  { %v15308_v48 = vpop.permute.xlu1 %5216  ;;  %v15310_v42 = vpop.permute.xlu0 %5211  ;;  %13000 = vmatprep.mubr.msk.f32.mxu0 %vm2457_vm0, %v2200_v63  ;;  %v5108_v63 = vld [vmem:[%s19316_s3 + $0x168] sm:$0xff]  ;;  %v550_v32 = vrot.slane %v13799_v12, 1  ;;  %v5109_v12 = vld [vmem:[%s19316_s3 + $0x170] sm:$0xff] }
  0xa7   :  { %19513 = vst [vmem:[#allocation56_spill] sm:$0xff] %v15308_v48  ;;  %19514 = vst [vmem:[#allocation57_spill] sm:$0xff] %v15310_v42  ;;  %5376 = vperm.xlu1 %13742, %v5106_v14   ;;  %5371 = vperm.xlu0 %13741, %v5105_v51   ;;  %v15336_v14 = vadd.s32 352, %v14654_v38  ;;  %v548_v51 = vrot.slane %v13798_v50, 1  ;;  %v15356_v50 = vsel %vm530_vm11, %v542_v3, %v544_v35  ;;  %v13800_v42 = vld [vmem:[%s19313_s0 + $0x58] sm:$0xff] }
  0xa9   :  { %19518 = vst [vmem:[#allocation59_spill] sm:$0xff] %v15336_v14  ;;  %13001 = vmatmul.mubr.msk.f32.gmra.mrb[36].mxu0 %vm2457_vm0, %v19519_v37  ;;  %v2204_v37 = vsel %vm15331_vm13, 0.0, %v14457_v0 }
  0xaa   :  { %v15343_v25 = vpop.permute.xlu1 %5226  ;;  %v15345_v48 = vpop.permute.xlu0 %5221  ;;  %13003 = vmatprep.mubr.msk.f32.mxu0 %vm2457_vm0, %v14449_v33  ;;  %v5110_v33 = vld [vmem:[%s19316_s3 + $0x178] sm:$0xff] }
  0xab   :  { %19520 = vst [vmem:[#allocation21_spill] sm:$0xff] %v15343_v25  ;;  %19521 = vst [vmem:[#allocation60_spill] sm:$0xff] %v15345_v48  ;;  %5386 = vperm.xlu1 %13742, %v5108_v63   ;;  %5381 = vperm.xlu0 %13741, %v5107_v22   ;;  %v15359_v25 = vsel %vm530_vm11, %v544_v35, %v546_v5  ;;  %v329_v63 = vrot.slane %v14483_v52, 7  ;;  %v1228_v22 = vand.u32 31, %v15336_v14  ;;  %v552_v35 = vrot.slane %v13800_v42, 1  ;;  %v13801_v52 = vld [vmem:[%s19313_s0 + $0x60] sm:$0xff] }
  0xac   :  { %v554_v48 = vrot.slane %v13801_v52, 1  ;;  %v15386_v14 = vsel %vm530_vm11, %v548_v51, %v550_v32  ;;  %v5775_v42 = vld [vmem:[%s19317_s4 + $0x140] sm:$0xff] }
  0xad   :  { %13004 = vmatmul.mubr.msk.f32.gmra.mrb[38].mxu0 %vm2457_vm0, %v14452_v44  ;;  %v15383_v44 = vsel %vm530_vm11, %v546_v5, %v548_v51  ;;  %19525 = vst [vmem:[#allocation64_spill] sm:$0xff] %v15386_v14  ;;  %vm15397_vm14 = vcmp.eq.s32.totalorder %v1228_v22, 0  ;;  %v868_v5 = vadd.s32 384, %v14654_v38  ;;  %v13802_v51 = vld [vmem:[%s19313_s0 + $0x68] sm:$0xff]  ;;  %v331_v14 = vrot.slane %v14498_v1, 7 }
  0xae   :  { %v15371_v0 = vpop.permute.xlu1 %5236  ;;  %v15373_v3 = vpop.permute.xlu0 %5231  ;;  %13006 = vmatprep.mubr.msk.f32.mxu0 %vm2457_vm0, %v2204_v37  ;;  %19524 = vst [vmem:[#allocation63_spill] sm:$0xff] %v15383_v44  ;;  %v5776_v37 = vld [vmem:[%s19317_s4 + $0x148] sm:$0xff]  ;;  %v15421_v44 = vsel %vm530_vm11, %v550_v32, %v552_v35  ;;  %v337_v1 = vrot.slane %v14534_v16, 7  ;;  %v13805_v16 = vld [vmem:[%s19313_s0 + $0x80] sm:$0xff] }
  0xaf   :  { %19522 = vst [vmem:[#allocation61_spill] sm:$0xff] %v15371_v0  ;;  %19523 = vst [vmem:[#allocation62_spill] sm:$0xff] %v15373_v3  ;;  %5396 = vperm.xlu1 %13742, %v5110_v33   ;;  %5391 = vperm.xlu0 %13741, %v5109_v12   ;;  %v19526_v3 = vrot.slane %v14446_v9, 7  ;;  %v556_v12 = vrot.slane %v13802_v51, 1  ;;  %v13803_v9 = vld [vmem:[%s19313_s0 + $0x70] sm:$0xff]  ;;  %v333_v51 = vrot.slane %v14513_v60, 7 }
  0xb0   :  { %v558_v0 = vrot.slane %v13803_v9, 1  ;;  %v15424_v9 = vsel %vm530_vm11, %v552_v35, %v554_v48  ;;  %v13804_v60 = vld [vmem:[%s19313_s0 + $0x78] sm:$0xff]  ;;  %v335_v33 = vrot.slane %v14520_v34, 7  ;;  %v5779_v34 = vld [vmem:[%s19317_s4 + $0x160] sm:$0xff] }
  0xb1   :  { %v330_v52 = vsel %vm241_vm1, %v19526_v3, %v329_v63  ;;  %13007 = vmatmul.mubr.msk.f32.gmra.mrb[40].mxu0 %vm2457_vm0, %v14466_v4  ;;  %v560_v32 = vrot.slane %v13804_v60, 1  ;;  %v15450_v60 = vsel %vm530_vm11, %v554_v48, %v556_v12  ;;  %v872_v48 = vadd.s32 416, %v14654_v38 }
  0xb2   :  { %v15410_v3 = vpop.permute.xlu1 %5878  ;;  %v15412_v22 = vpop.permute.xlu0 %5873  ;;  %13009 = vmatprep.mubr.msk.f32.mxu0 %vm2457_vm0, %v14473_v46  ;;  %v2208_v4 = vsel %vm15397_vm14, 0.0, %v330_v52  ;;  %v5777_v46 = vld [vmem:[%s19317_s4 + $0x150] sm:$0xff]  ;;  %v332_v52 = vsel %vm241_vm1, %v329_v63, %v331_v14  ;;  %19533 = vst [vmem:[#allocation69_spill] sm:$0xff] %v15450_v60  ;;  %v5780_v63 = vld [vmem:[%s19317_s4 + $0x168] sm:$0xff] }
  0xb3   :  { %19529 = vst [vmem:[#allocation65_spill] sm:$0xff] %v15410_v3  ;;  %19530 = vst [vmem:[#allocation66_spill] sm:$0xff] %v15412_v22  ;;  %6038 = vperm.xlu1 %13742, %v5776_v37   ;;  %6033 = vperm.xlu0 %13741, %v5775_v42   ;;  %v5778_v22 = vld [vmem:[%s19317_s4 + $0x158] sm:$0xff]  ;;  %v1256_v37 = vand.u32 31, %v868_v5  ;;  %v334_v5 = vsel %vm241_vm1, %v331_v14, %v333_v51  ;;  %v13806_v14 = vld [vmem:[%s19313_s0 + $0x88] sm:$0xff]  ;;  %v336_v3 = vsel %vm241_vm1, %v333_v51, %v335_v33 }
  0xb4   :  { %v15485_v60 = vsel %vm530_vm11, %v558_v0, %v560_v32  ;;  %v345_v51 = vrot.slane %v14582_v2, 7  ;;  %v13809_v2 = vld [vmem:[%s19313_s0 + $0xa0] sm:$0xff] }
  0xb5   :  { %13010 = vmatmul.mubr.msk.f32.gmra.mrb[42].mxu0 %vm2457_vm0, %v14478_v57  ;;  %v562_v57 = vrot.slane %v13805_v16, 1  ;;  %vm15462_vm15 = vcmp.eq.s32.totalorder %v1256_v37, 0 }
  0xb6   :  { %v15438_v35 = vpop.permute.xlu1 %5888  ;;  %v15440_v42 = vpop.permute.xlu0 %5883  ;;  %13012 = vmatprep.mubr.msk.f32.mxu0 %vm2457_vm0, %v2208_v4  ;;  %v338_v4 = vsel %vm241_vm1, %v335_v33, %v337_v1  ;;  %v1284_v33 = vand.u32 31, %v872_v48 }
  0xb7   :  { %19531 = vst [vmem:[#allocation67_spill] sm:$0xff] %v15438_v35  ;;  %19532 = vst [vmem:[#allocation68_spill] sm:$0xff] %v15440_v42  ;;  %6048 = vperm.xlu1 %13742, %v5778_v22   ;;  %6043 = vperm.xlu0 %13741, %v5777_v46   ;;  %v15453_v42 = vsel %vm530_vm11, %v556_v12, %v558_v0  ;;  %v564_v12 = vrot.slane %v13806_v14, 1  ;;  %v13807_v46 = vld [vmem:[%s19313_s0 + $0x90] sm:$0xff]  ;;  %v2212_v14 = vsel %vm15462_vm15, 0.0, %v338_v4  ;;  %v343_v4 = vrot.slane %v14568_v49, 7 }
  0xb8   :  { %19534 = vst [vmem:[#allocation70_spill] sm:$0xff] %v15453_v42  ;;  %v566_v16 = vrot.slane %v13807_v46, 1  ;;  %v341_v42 = vrot.slane %v14561_v23, 7  ;;  %v15488_v46 = vsel %vm530_vm11, %v560_v32, %v562_v57  ;;  %v13808_v23 = vld [vmem:[%s19313_s0 + $0x98] sm:$0xff]  ;;  %v5111_v49 = vld [vmem:[%s19316_s3 + $0x180] sm:$0xff]  ;;  %vm15525_vm2 = vcmp.eq.s32.totalorder %v1284_v33, 0 }
  0xb9   :  { %13013 = vmatmul.mubr.msk.f32.gmra.mrb[44].mxu0 %vm2457_vm0, %v332_v52  ;;  %v339_v52 = vrot.slane %v14546_v40, 7  ;;  %v5781_v40 = vld [vmem:[%s19317_s4 + $0x170] sm:$0xff]  ;;  %v568_v0 = vrot.slane %v13808_v23, 1  ;;  %v15513_v48 = vsel %vm530_vm11, %v562_v57, %v564_v12  ;;  %v876_v57 = vadd.s32 448, %v14654_v38 }
  0xba   :  { %v15474_v35 = vpop.permute.xlu1 %5898  ;;  %v15476_v37 = vpop.permute.xlu0 %5893  ;;  %13015 = vmatprep.mubr.msk.f32.mxu0 %vm2457_vm0, %v334_v5  ;;  %v5782_v5 = vld [vmem:[%s19317_s4 + $0x178] sm:$0xff]  ;;  %v15516_v23 = vsel %vm530_vm11, %v564_v12, %v566_v16  ;;  %v13810_v12 = vld [vmem:[%s19313_s0 + $0xa8] sm:$0xff] }
  0xbb   :  { %19537 = vst [vmem:[#allocation71_spill] sm:$0xff] %v15474_v35  ;;  %19538 = vst [vmem:[#allocation72_spill] sm:$0xff] %v15476_v37  ;;  %6058 = vperm.xlu1 %13742, %v5780_v63   ;;  %6053 = vperm.xlu0 %13741, %v5779_v34   ;;  %v340_v34 = vsel %vm241_vm1, %v337_v1, %v339_v52  ;;  %v342_v22 = vsel %vm241_vm1, %v339_v52, %v341_v42  ;;  %v5112_v1 = vld [vmem:[%s19316_s3 + $0x188] sm:$0xff]  ;;  %v572_v52 = vrot.slane %v13810_v12, 1 }
  0xbc   :  { %v349_v37 = vrot.slane %v14609_v13, 7  ;;  %v15548_v35 = vsel %vm530_vm11, %v566_v16, %v568_v0  ;;  %v13812_v13 = vld [vmem:[%s19313_s0 + $0xb8] sm:$0xff] }
  0xbd   :  { %13016 = vmatmul.mubr.msk.f32.gmra.mrb[46].mxu0 %vm2457_vm0, %v336_v3  ;;  %v570_v3 = vrot.slane %v13809_v2, 1  ;;  %v576_v16 = vrot.slane %v13812_v13, 1 }
  0xbe   :  { %v15501_v32 = vpop.permute.xlu1 %5908  ;;  %v15503_v63 = vpop.permute.xlu0 %5903  ;;  %13018 = vmatprep.mubr.msk.f32.mxu0 %vm2457_vm0, %v2212_v14  ;;  %v346_v14 = vsel %vm241_vm1, %v343_v4, %v345_v51 }
  0xbf   :  { %19539 = vst [vmem:[#allocation73_spill] sm:$0xff] %v15501_v32  ;;  %19540 = vst [vmem:[#allocation74_spill] sm:$0xff] %v15503_v63  ;;  %6068 = vperm.xlu1 %13742, %v5782_v5   ;;  %6063 = vperm.xlu0 %13741, %v5781_v40   ;;  %v13811_v40 = vld [vmem:[%s19313_s0 + $0xb0] sm:$0xff]  ;;  %v344_v32 = vsel %vm241_vm1, %v341_v42, %v343_v4  ;;  %v2216_v12 = vsel %vm15525_vm2, 0.0, %v346_v14  ;;  %v353_v42 = vrot.slane %v14630_v19, 7  ;;  %v1312_v4 = vand.u32 31, %v876_v57 }
  0xc0   :  { %v574_v2 = vrot.slane %v13811_v40, 1  ;;  %v15551_v40 = vsel %vm530_vm11, %v568_v0, %v570_v3  ;;  %v351_v14 = vrot.slane %v14616_v10, 7  ;;  %v13813_v19 = vld [vmem:[%s19313_s0 + $0xc0] sm:$0xff]  ;;  %v15576_v57 = vsel %vm530_vm11, %v570_v3, %v572_v52 }
  0xc1   :  { %13019 = vmatmul.mubr.msk.f32.gmra.mrb[48].mxu0 %vm2457_vm0, %v340_v34  ;;  %v347_v34 = vrot.slane %v14594_v55, 7  ;;  %v5113_v55 = vld [vmem:[%s19316_s3 + $0x190] sm:$0xff]  ;;  %v5115_v10 = vld [vmem:[%s19316_s3 + $0x1a0] sm:$0xff]  ;;  %vm15588_vm3 = vcmp.eq.s32.totalorder %v1312_v4, 0  ;;  %v880_v3 = vadd.s32 480, %v14654_v38 }
  0xc2   :  { %v15537_v63 = vpop.permute.xlu1 %5246  ;;  %v15539_v33 = vpop.permute.xlu0 %5241  ;;  %13021 = vmatprep.mubr.msk.f32.mxu0 %vm2457_vm0, %v342_v22  ;;  %v5114_v22 = vld [vmem:[%s19316_s3 + $0x198] sm:$0xff]  ;;  %v15579_v13 = vsel %vm530_vm11, %v572_v52, %v574_v2  ;;  %v13814_v52 = vld [vmem:[%s19313_s0 + $0xc8] sm:$0xff] }
  0xc3   :  { %19543 = vst [vmem:[#allocation75_spill] sm:$0xff] %v15537_v63  ;;  %19544 = vst [vmem:[#allocation76_spill] sm:$0xff] %v15539_v33  ;;  %5406 = vperm.xlu1 %13742, %v5112_v1   ;;  %5401 = vperm.xlu0 %13741, %v5111_v49   ;;  %v348_v49 = vsel %vm241_vm1, %v345_v51, %v347_v34  ;;  %v350_v5 = vsel %vm241_vm1, %v347_v34, %v349_v37  ;;  %v5116_v51 = vld [vmem:[%s19316_s3 + $0x1a8] sm:$0xff]  ;;  %v580_v34 = vrot.slane %v13814_v52, 1 }
  0xc4   :  { %v357_v33 = vrot.slane %v14659_v58, 7  ;;  %v15611_v63 = vsel %vm530_vm11, %v574_v2, %v576_v16  ;;  %v13816_v58 = vld [vmem:[%s19313_s0 + $0xd8] sm:$0xff] }
  0xc5   :  { %13022 = vmatmul.mubr.msk.f32.gmra.mrb[50].mxu0 %vm2457_vm0, %v344_v32  ;;  %v578_v32 = vrot.slane %v13813_v19, 1  ;;  %v584_v2 = vrot.slane %v13816_v58, 1 }
  0xc6   :  { %v15564_v0 = vpop.permute.xlu1 %5256  ;;  %v15566_v1 = vpop.permute.xlu0 %5251  ;;  %13024 = vmatprep.mubr.msk.f32.mxu0 %vm2457_vm0, %v2216_v12  ;;  %v354_v12 = vsel %vm241_vm1, %v351_v14, %v353_v42 }
  0xc7   :  { %19545 = vst [vmem:[#allocation77_spill] sm:$0xff] %v15564_v0  ;;  %19546 = vst [vmem:[#allocation78_spill] sm:$0xff] %v15566_v1  ;;  %5416 = vperm.xlu1 %13742, %v5114_v22   ;;  %5411 = vperm.xlu0 %13741, %v5113_v55   ;;  %v13815_v55 = vld [vmem:[%s19313_s0 + $0xd0] sm:$0xff]  ;;  %v352_v0 = vsel %vm241_vm1, %v349_v37, %v351_v14  ;;  %v2220_v52 = vsel %vm15588_vm3, 0.0, %v354_v12  ;;  %v15639_v58 = vsel %vm530_vm11, %v578_v32, %v580_v34 }
  0xc8   :  { %v582_v19 = vrot.slane %v13815_v55, 1  ;;  %v15614_v55 = vsel %vm530_vm11, %v576_v16, %v578_v32  ;;  %v19551_v37 = vld [vmem:[#allocation24_spill] sm:$0xff]  ;;  %v19554_v22 = vld [vmem:[#allocation23_spill] sm:$0xff]  ;;  %v884_v32 = vadd.s32 512, %v14654_v38 }
  0xc9   :  { %13025 = vmatmul.mubr.msk.f32.gmra.mrb[52].mxu0 %vm2457_vm0, %v348_v49  ;;  %v355_v49 = vrot.slane %v14642_v20, 7  ;;  %v5117_v20 = vld [vmem:[%s19316_s3 + $0x1b0] sm:$0xff]  ;;  %v361_v14 = vrot.slane %v19551_v37, 7  ;;  %19555 = vst [vmem:[#allocation23_spill] sm:$0xff] %v15639_v58 }
  0xca   :  { %v15600_v1 = vpop.permute.xlu1 %5266  ;;  %v15602_v4 = vpop.permute.xlu0 %5261  ;;  %13027 = vmatprep.mubr.msk.f32.mxu0 %vm2457_vm0, %v350_v5  ;;  %v5118_v5 = vld [vmem:[%s19316_s3 + $0x1b8] sm:$0xff]  ;;  %v15674_v58 = vsel %vm530_vm11, %v582_v19, %v584_v2 }
  0xcb   :  { %19549 = vst [vmem:[#allocation79_spill] sm:$0xff] %v15600_v1  ;;  %19550 = vst [vmem:[#allocation80_spill] sm:$0xff] %v15602_v4  ;;  %5426 = vperm.xlu1 %13742, %v5116_v51   ;;  %5421 = vperm.xlu0 %13741, %v5115_v10   ;;  %v1340_v51 = vand.u32 31, %v880_v3  ;;  %v356_v12 = vsel %vm241_vm1, %v353_v42, %v355_v49  ;;  %v359_v4 = vrot.slane %v19554_v22, 7  ;;  %v13817_v3 = vld [vmem:[%s19313_s0 + $0xe0] sm:$0xff]  ;;  %v5784_v42 = vld [vmem:[%s19317_s4 + $0x188] sm:$0xff] }
  0xcc   :  { %v358_v37 = vsel %vm241_vm1, %v355_v49, %v357_v33 }
  0xcd   :  { %13028 = vmatmul.mubr.msk.f32.gmra.mrb[54].mxu0 %vm2457_vm0, %v352_v0  ;;  %v586_v0 = vrot.slane %v13817_v3, 1  ;;  %v362_v22 = vsel %vm241_vm1, %v359_v4, %v361_v14  ;;  %vm15651_vm4 = vcmp.eq.s32.totalorder %v1340_v51, 0  ;;  %v360_v1 = vsel %vm241_vm1, %v357_v33, %v359_v4 }
  0xce   :  { %v15627_v16 = vpop.permute.xlu1 %5276  ;;  %v15629_v10 = vpop.permute.xlu0 %5271  ;;  %13030 = vmatprep.mubr.msk.f32.mxu0 %vm2457_vm0, %v2220_v52  ;;  %v5783_v52 = vld [vmem:[%s19317_s4 + $0x180] sm:$0xff]  ;;  %v369_v33 = vrot.slane %v14741_v62, 7  ;;  %v1368_v4 = vand.u32 31, %v884_v32 }
  0xcf   :  { %19552 = vst [vmem:[#allocation24_spill] sm:$0xff] %v15627_v16  ;;  %19553 = vst [vmem:[#allocation81_spill] sm:$0xff] %v15629_v10  ;;  %5436 = vperm.xlu1 %13742, %v5118_v5   ;;  %5431 = vperm.xlu0 %13741, %v5117_v20   ;;  %v15642_v10 = vsel %vm530_vm11, %v580_v34, %v582_v19  ;;  %v13818_v34 = vld [vmem:[%s19313_s0 + $0xe8] sm:$0xff]  ;;  %v13819_v20 = vld [vmem:[%s19313_s0 + $0xf0] sm:$0xff] }
  0xd0   :  { %19556 = vst [vmem:[#allocation82_spill] sm:$0xff] %v15642_v10  ;;  %v588_v49 = vrot.slane %v13818_v34, 1  ;;  %v590_v3 = vrot.slane %v13819_v20, 1  ;;  %v2224_v34 = vsel %vm15651_vm4, 0.0, %v362_v22  ;;  %v365_v10 = vrot.slane %v14718_v18, 7  ;;  %v13820_v18 = vld [vmem:[%s19313_s0 + $0xf8] sm:$0xff] }
  0xd1   :  { %13031 = vmatmul.mubr.msk.f32.gmra.mrb[56].mxu0 %vm2457_vm0, %v356_v12  ;;  %v363_v12 = vrot.slane %v14693_v54, 7  ;;  %v15677_v20 = vsel %vm530_vm11, %v584_v2, %v586_v0  ;;  %v5785_v54 = vld [vmem:[%s19317_s4 + $0x190] sm:$0xff]  ;;  %v592_v19 = vrot.slane %v13820_v18, 1  ;;  %v367_v22 = vrot.slane %v14725_v45, 7  ;;  %v13821_v62 = vld [vmem:[%s19313_s0 + $0x100] sm:$0xff] }
  0xd2   :  { %v15663_v16 = vpop.permute.xlu1 %5918  ;;  %v15665_v51 = vpop.permute.xlu0 %5913  ;;  %13033 = vmatprep.mubr.msk.f32.mxu0 %vm2457_vm0, %v358_v37  ;;  %v5786_v37 = vld [vmem:[%s19317_s4 + $0x198] sm:$0xff]  ;;  %v15702_v32 = vsel %vm530_vm11, %v586_v0, %v588_v49  ;;  %v15705_v18 = vsel %vm530_vm11, %v588_v49, %v590_v3  ;;  %v5787_v45 = vld [vmem:[%s19317_s4 + $0x1a0] sm:$0xff]  ;;  %vm15714_vm5 = vcmp.eq.s32.totalorder %v1368_v4, 0  ;;  %v888_v0 = vadd.s32 544, %v14654_v38  ;;  %v13822_v49 = vld [vmem:[%s19313_s0 + $0x108] sm:$0xff] }
  0xd3   :  { %19559 = vst [vmem:[#allocation83_spill] sm:$0xff] %v15663_v16  ;;  %19560 = vst [vmem:[#allocation84_spill] sm:$0xff] %v15665_v51  ;;  %6078 = vperm.xlu1 %13742, %v5784_v42   ;;  %6073 = vperm.xlu0 %13741, %v5783_v52   ;;  %v364_v52 = vsel %vm241_vm1, %v361_v14, %v363_v12  ;;  %v366_v5 = vsel %vm241_vm1, %v363_v12, %v365_v10  ;;  %v5788_v14 = vld [vmem:[%s19317_s4 + $0x1a8] sm:$0xff]  ;;  %v596_v12 = vrot.slane %v13822_v49, 1 }
  0xd4   :  { %v373_v51 = vrot.slane %v14775_v8, 7  ;;  %v15737_v16 = vsel %vm530_vm11, %v590_v3, %v592_v19  ;;  %v13824_v8 = vld [vmem:[%s19313_s0 + $0x118] sm:$0xff] }
  0xd5   :  { %13034 = vmatmul.mubr.msk.f32.gmra.mrb[58].mxu0 %vm2457_vm0, %v360_v1  ;;  %v594_v1 = vrot.slane %v13821_v62, 1  ;;  %v600_v3 = vrot.slane %v13824_v8, 1 }
  0xd6   :  { %v15690_v2 = vpop.permute.xlu1 %5928  ;;  %v15692_v42 = vpop.permute.xlu0 %5923  ;;  %13036 = vmatprep.mubr.msk.f32.mxu0 %vm2457_vm0, %v2224_v34  ;;  %v370_v34 = vsel %vm241_vm1, %v367_v22, %v369_v33 }
  0xd7   :  { %19561 = vst [vmem:[#allocation85_spill] sm:$0xff] %v15690_v2  ;;  %19562 = vst [vmem:[#allocation86_spill] sm:$0xff] %v15692_v42  ;;  %6088 = vperm.xlu1 %13742, %v5786_v37   ;;  %6083 = vperm.xlu0 %13741, %v5785_v54   ;;  %v13823_v54 = vld [vmem:[%s19313_s0 + $0x110] sm:$0xff]  ;;  %v368_v2 = vsel %vm241_vm1, %v365_v10, %v367_v22  ;;  %v2228_v49 = vsel %vm15714_vm5, 0.0, %v370_v34  ;;  %v377_v10 = vrot.slane %v14802_v11, 7  ;;  %v1396_v22 = vand.u32 31, %v888_v0 }
  0xd8   :  { %v598_v62 = vrot.slane %v13823_v54, 1  ;;  %v15740_v54 = vsel %vm530_vm11, %v592_v19, %v594_v1  ;;  %v375_v34 = vrot.slane %v14797_v28, 7  ;;  %v13825_v11 = vld [vmem:[%s19313_s0 + $0x120] sm:$0xff]  ;;  %v15765_v0 = vsel %vm530_vm11, %v594_v1, %v596_v12 }
  0xd9   :  { %13037 = vmatmul.mubr.msk.f32.gmra.mrb[60].mxu0 %vm2457_vm0, %v364_v52  ;;  %v371_v52 = vrot.slane %v14754_v36, 7  ;;  %v5789_v36 = vld [vmem:[%s19317_s4 + $0x1b0] sm:$0xff]  ;;  %v5119_v28 = vld [vmem:[%s19316_s3 + $0x1c0] sm:$0xff]  ;;  %vm15777_vm6 = vcmp.eq.s32.totalorder %v1396_v22, 0  ;;  %v892_v1 = vadd.s32 576, %v14654_v38 }
  0xda   :  { %v15726_v42 = vpop.permute.xlu1 %5938  ;;  %v15728_v4 = vpop.permute.xlu0 %5933  ;;  %13039 = vmatprep.mubr.msk.f32.mxu0 %vm2457_vm0, %v366_v5  ;;  %v5790_v5 = vld [vmem:[%s19317_s4 + $0x1b8] sm:$0xff]  ;;  %v15768_v8 = vsel %vm530_vm11, %v596_v12, %v598_v62  ;;  %v13826_v12 = vld [vmem:[%s19313_s0 + $0x128] sm:$0xff] }
  0xdb   :  { %19565 = vst [vmem:[#allocation87_spill] sm:$0xff] %v15726_v42  ;;  %19566 = vst [vmem:[#allocation88_spill] sm:$0xff] %v15728_v4  ;;  %6098 = vperm.xlu1 %13742, %v5788_v14   ;;  %6093 = vperm.xlu0 %13741, %v5787_v45   ;;  %v372_v45 = vsel %vm241_vm1, %v369_v33, %v371_v52  ;;  %v374_v37 = vsel %vm241_vm1, %v371_v52, %v373_v51  ;;  %v5120_v33 = vld [vmem:[%s19316_s3 + $0x1c8] sm:$0xff]  ;;  %v604_v52 = vrot.slane %v13826_v12, 1 }
  0xdc   :  { %v381_v4 = vrot.slane %v14832_v21, 7  ;;  %v15800_v42 = vsel %vm530_vm11, %v598_v62, %v600_v3  ;;  %v13828_v21 = vld [vmem:[%s19313_s0 + $0x138] sm:$0xff] }
  0xdd   :  { %13040 = vmatmul.mubr.msk.f32.gmra.mrb[62].mxu0 %vm2457_vm0, %v368_v2  ;;  %v602_v2 = vrot.slane %v13825_v11, 1  ;;  %v608_v62 = vrot.slane %v13828_v21, 1 }
  0xde   :  { %v15753_v19 = vpop.permute.xlu1 %5948  ;;  %v15755_v14 = vpop.permute.xlu0 %5943  ;;  %13042 = vmatprep.mubr.msk.f32.mxu0 %vm2457_vm0, %v2228_v49  ;;  %v378_v49 = vsel %vm241_vm1, %v375_v34, %v377_v10 }
  0xdf   :  { %19567 = vst [vmem:[#allocation89_spill] sm:$0xff] %v15753_v19  ;;  %19568 = vst [vmem:[#allocation90_spill] sm:$0xff] %v15755_v14  ;;  %6108 = vperm.xlu1 %13742, %v5790_v5   ;;  %6103 = vperm.xlu0 %13741, %v5789_v36   ;;  %v13827_v36 = vld [vmem:[%s19313_s0 + $0x130] sm:$0xff]  ;;  %v376_v19 = vsel %vm241_vm1, %v373_v51, %v375_v34  ;;  %v2232_v12 = vsel %vm15777_vm6, 0.0, %v378_v49  ;;  %v385_v51 = vrot.slane %v14860_v31, 7  ;;  %v1424_v34 = vand.u32 31, %v892_v1 }
  0xe0   :  { %v606_v11 = vrot.slane %v13827_v36, 1  ;;  %v15803_v36 = vsel %vm530_vm11, %v600_v3, %v602_v2  ;;  %v383_v49 = vrot.slane %v14854_v41, 7  ;;  %v13829_v31 = vld [vmem:[%s19313_s0 + $0x140] sm:$0xff]  ;;  %v15828_v1 = vsel %vm530_vm11, %v602_v2, %v604_v52 }
  0xe1   :  { %13043 = vmatmul.mubr.msk.f32.gmra.mrb[64].mxu0 %vm2457_vm0, %v372_v45  ;;  %v379_v45 = vrot.slane %v14824_v30, 7  ;;  %v5121_v30 = vld [vmem:[%s19316_s3 + $0x1d0] sm:$0xff]  ;;  %v5123_v41 = vld [vmem:[%s19316_s3 + $0x1e0] sm:$0xff]  ;;  %vm15840_vm7 = vcmp.eq.s32.totalorder %v1424_v34, 0  ;;  %v896_v2 = vadd.s32 608, %v14654_v38 }
  0xe2   :  { %v15789_v14 = vpop.permute.xlu1 %5286  ;;  %v15791_v22 = vpop.permute.xlu0 %5281  ;;  %13045 = vmatprep.mubr.msk.f32.mxu0 %vm2457_vm0, %v374_v37  ;;  %v5122_v37 = vld [vmem:[%s19316_s3 + $0x1d8] sm:$0xff]  ;;  %v15831_v21 = vsel %vm530_vm11, %v604_v52, %v606_v11  ;;  %v13830_v52 = vld [vmem:[%s19313_s0 + $0x148] sm:$0xff] }
  0xe3   :  { %19571 = vst [vmem:[#allocation91_spill] sm:$0xff] %v15789_v14  ;;  %19572 = vst [vmem:[#allocation92_spill] sm:$0xff] %v15791_v22  ;;  %5446 = vperm.xlu1 %13742, %v5120_v33   ;;  %5441 = vperm.xlu0 %13741, %v5119_v28   ;;  %v380_v28 = vsel %vm241_vm1, %v377_v10, %v379_v45  ;;  %v382_v5 = vsel %vm241_vm1, %v379_v45, %v381_v4  ;;  %v5124_v10 = vld [vmem:[%s19316_s3 + $0x1e8] sm:$0xff]  ;;  %v612_v45 = vrot.slane %v13830_v52, 1 }
  0xe4   :  { %v389_v22 = vrot.slane %v14890_v15, 7  ;;  %v15863_v14 = vsel %vm530_vm11, %v606_v11, %v608_v62 }
  0xe5   :  { %13046 = vmatmul.mubr.msk.f32.gmra.mrb[66].mxu0 %vm2457_vm0, %v376_v19  ;;  %v610_v19 = vrot.slane %v13829_v31, 1 }
  0xe6   :  { %v15816_v3 = vpop.permute.xlu1 %5296  ;;  %v15818_v33 = vpop.permute.xlu0 %5291  ;;  %13048 = vmatprep.mubr.msk.f32.mxu0 %vm2457_vm0, %v2232_v12  ;;  %v386_v12 = vsel %vm241_vm1, %v383_v49, %v385_v51 }
  0xe7   :  { %19573 = vst [vmem:[#allocation93_spill] sm:$0xff] %v15816_v3  ;;  %19574 = vst [vmem:[#allocation94_spill] sm:$0xff] %v15818_v33  ;;  %5456 = vperm.xlu1 %13742, %v5122_v37   ;;  %5451 = vperm.xlu0 %13741, %v5121_v30   ;;  %v13831_v30 = vld [vmem:[%s19313_s0 + $0x150] sm:$0xff]  ;;  %v384_v3 = vsel %vm241_vm1, %v381_v4, %v383_v49  ;;  %v2236_v52 = vsel %vm15840_vm7, 0.0, %v386_v12  ;;  %v393_v4 = vrot.slane %v14918_v29, 7  ;;  %v1452_v49 = vand.u32 31, %v896_v2 }
  0xe8   :  { %v614_v31 = vrot.slane %v13831_v30, 1  ;;  %v15866_v30 = vsel %vm530_vm11, %v608_v62, %v610_v19  ;;  %v15891_v12 = vsel %vm530_vm11, %v610_v19, %v612_v45  ;;  %v900_v19 = vadd.s32 640, %v14654_v38 }
  0xe9   :  { %13049 = vmatmul.mubr.msk.f32.gmra.mrb[68].mxu0 %vm2457_vm0, %v380_v28  ;;  %v387_v28 = vrot.slane %v14872_v47, 7  ;;  %v5125_v47 = vld [vmem:[%s19316_s3 + $0x1f0] sm:$0xff]  ;;  %vm15903_vm8 = vcmp.eq.s32.totalorder %v1452_v49, 0  ;;  %v397_v29 = vrot.slane %v14948_v26, 7 }
  0xea   :  { %v15852_v33 = vpop.permute.xlu1 %5306  ;;  %v15854_v34 = vpop.permute.xlu0 %5301  ;;  %13051 = vmatprep.mubr.msk.f32.mxu0 %vm2457_vm0, %v382_v5  ;;  %v5126_v5 = vld [vmem:[%s19316_s3 + $0x1f8] sm:$0xff]  ;;  %v15894_v37 = vsel %vm530_vm11, %v612_v45, %v614_v31 }
  0xeb   :  { %5466 = vperm.xlu1 %13742, %v5124_v10   ;;  %5461 = vperm.xlu0 %13741, %v5123_v41   ;;  %v388_v62 = vsel %vm241_vm1, %v385_v51, %v387_v28  ;;  %v391_v10 = vrot.slane %v14906_v39, 7  ;;  %v15886_v41 = vld [vmem:[%s19313_s0 + $0x158] sm:$0xff]  ;;  %v5792_v39 = vld [vmem:[%s19317_s4 + $0x1c8] sm:$0xff]  ;;  %v5791_v51 = vld [vmem:[%s19317_s4 + $0x1c0] sm:$0xff] }
  0xed   :  { %13052 = vmatmul.mubr.msk.f32.gmra.mrb[70].mxu0 %vm2457_vm0, %v384_v3  ;;  %v390_v3 = vsel %vm241_vm1, %v387_v28, %v389_v22  ;;  %v394_v2 = vsel %vm241_vm1, %v391_v10, %v393_v4 }
  0xee   :  { %v15876_v15 = vpop.permute.xlu1 %5316  ;;  %v15878_v11 = vpop.permute.xlu0 %5311  ;;  %13054 = vmatprep.mubr.msk.f32.mxu0 %vm2457_vm0, %v2236_v52  ;;  %v2240_v49 = vsel %vm15903_vm8, 0.0, %v394_v2  ;;  %v5795_v2 = vld [vmem:[%s19317_s4 + $0x1e0] sm:$0xff] }
  0xef   :  { %19577 = vst [vmem:[#allocation95_spill] sm:$0xff] %v15878_v11  ;;  %5476 = vperm.xlu1 %13742, %v5126_v5   ;;  %5471 = vperm.xlu0 %13741, %v5125_v47   ;;  %v392_v5 = vsel %vm241_vm1, %v389_v22, %v391_v10  ;;  %v395_v47 = vrot.slane %v14930_v61, 7  ;;  %v19580_v11 = vrot.slane %v15886_v41, 1  ;;  %v5793_v61 = vld [vmem:[%s19317_s4 + $0x1d0] sm:$0xff]  ;;  %v401_v22 = vrot.slane %v14976_v43, 7  ;;  %v5796_v43 = vld [vmem:[%s19317_s4 + $0x1e8] sm:$0xff] }
  0xf0   :  { %v1480_v10 = vand.u32 31, %v900_v19  ;;  %v5127_v19 = vld [vmem:[%s19316_s3 + $0x200] sm:$0xff] }
  0xf1   :  { %13055 = vmatmul.mubr.msk.f32.gmra.mrb[72].mxu0 %vm2457_vm0, %v388_v62  ;;  %v15922_v62 = vsel %vm530_vm11, %v614_v31, %v19580_v11  ;;  %v396_v31 = vsel %vm241_vm1, %v393_v4, %v395_v47  ;;  %v399_v11 = vrot.slane %v14964_v53, 7  ;;  %v904_v53 = vadd.s32 672, %v14654_v38 }
  0xf2   :  { %v15909_v45 = vpop.permute.xlu1 %5958  ;;  %v15911_v28 = vpop.permute.xlu0 %5953  ;;  %13057 = vmatprep.mubr.msk.f32.mxu0 %vm2457_vm0, %v390_v3  ;;  %v5794_v3 = vld [vmem:[%s19317_s4 + $0x1d8] sm:$0xff]  ;;  %vm15947_vm9 = vcmp.eq.s32.totalorder %v1480_v10, 0 }
  0xf3   :  { %6118 = vperm.xlu1 %13742, %v5792_v39   ;;  %6113 = vperm.xlu0 %13741, %v5791_v51   ;;  %v398_v51 = vsel %vm241_vm1, %v395_v47, %v397_v29  ;;  %v402_v52 = vsel %vm241_vm1, %v399_v11, %v401_v22  ;;  %v400_v47 = vsel %vm241_vm1, %v397_v29, %v399_v11  ;;  %v5798_v10 = vld [vmem:[%s19317_s4 + $0x1f8] sm:$0xff]  ;;  %v1508_v29 = vand.u32 31, %v904_v53 }
  0xf5   :  { %13058 = vmatmul.mubr.msk.f32.gmra.mrb[74].mxu0 %vm2457_vm0, %v392_v5  ;;  %vm15986_vm10 = vcmp.eq.s32.totalorder %v1508_v29, 0 }
  0xf6   :  { %v15932_v39 = vpop.permute.xlu1 %5968  ;;  %v15934_v26 = vpop.permute.xlu0 %5963  ;;  %13060 = vmatprep.mubr.msk.f32.mxu0 %vm2457_vm0, %v2240_v49  ;;  %v403_v49 = vrot.slane %v14988_v17, 7 }
  0xf7   :  { %6128 = vperm.xlu1 %13742, %v5794_v3   ;;  %6123 = vperm.xlu0 %13741, %v5793_v61   ;;  %v2244_v3 = vsel %vm15947_vm9, 0.0, %v402_v52  ;;  %v405_v61 = vrot.slane %v15006_v6, 7 }
  0xf8   :  { %v404_v6 = vsel %vm241_vm1, %v401_v22, %v403_v49  ;;  %v908_v22 = vadd.s32 704, %v14654_v38 }
  0xf9   :  { %13061 = vmatmul.mubr.msk.f32.gmra.mrb[76].mxu0 %vm2457_vm0, %v396_v31  ;;  %v5797_v31 = vld [vmem:[%s19317_s4 + $0x1f0] sm:$0xff]  ;;  %v406_v52 = vsel %vm241_vm1, %v403_v49, %v405_v61 }
  0xfa   :  { %v15953_v4 = vpop.permute.xlu1 %5978  ;;  %v15955_v5 = vpop.permute.xlu0 %5973  ;;  %13063 = vmatprep.mubr.msk.f32.mxu0 %vm2457_vm0, %v398_v51  ;;  %v409_v51 = vrot.slane %v15038_v59, 7  ;;  %v5128_v59 = vld [vmem:[%s19316_s3 + $0x208] sm:$0xff] }
  0xfb   :  { %6138 = vperm.xlu1 %13742, %v5796_v43   ;;  %6133 = vperm.xlu0 %13741, %v5795_v2   ;;  %v19585_v43 = vld [vmem:[#allocation33_spill] sm:$0xff] }
  0xfc   :  { %v407_v2 = vrot.slane %v19585_v43, 7 }
  0xfd   :  { %13064 = vmatmul.mubr.msk.f32.gmra.mrb[78].mxu0 %vm2457_vm0, %v400_v47 }
  0xfe   :  { %v15971_v17 = vpop.permute.xlu1 %5988  ;;  %v15973_v11 = vpop.permute.xlu0 %5983  ;;  %13066 = vmatprep.mubr.msk.f32.mxu0 %vm2457_vm0, %v2244_v3  ;;  %v410_v53 = vsel %vm241_vm1, %v407_v2, %v409_v51 }
  0xff   :  { %19583 = vst [vmem:[#allocation96_spill] sm:$0xff] %v15971_v17  ;;  %19584 = vst [vmem:[#allocation97_spill] sm:$0xff] %v15973_v11  ;;  %6148 = vperm.xlu1 %13742, %v5798_v10   ;;  %6143 = vperm.xlu0 %13741, %v5797_v31   ;;  %v408_v10 = vsel %vm241_vm1, %v405_v61, %v407_v2  ;;  %v19590_v31 = vld [vmem:[#allocation36_spill] sm:$0xff]  ;;  %v2248_v29 = vsel %vm15986_vm10, 0.0, %v410_v53  ;;  %v19591_v11 = vld [vmem:[#allocation38_spill] sm:$0xff]  ;;  %v1536_v61 = vand.u32 31, %v908_v22 }
 0x100   :  { %v411_v43 = vrot.slane %v19590_v31, 7  ;;  %v413_v17 = vrot.slane %v19591_v11, 7  ;;  %v5132_v22 = vld [vmem:[%s19316_s3 + $0x228] sm:$0xff] }
 0x101   :  { %13067 = vmatmul.mubr.msk.f32.gmra.mrb[80].mxu0 %vm2457_vm0, %v404_v6  ;;  %v5130_v6 = vld [vmem:[%s19316_s3 + $0x218] sm:$0xff]  ;;  %vm16025_vm12 = vcmp.eq.s32.totalorder %v1536_v61, 0 }
 0x102   :  { %v15992_v3 = vpop.permute.xlu1 %5326  ;;  %v15994_v49 = vpop.permute.xlu0 %5321  ;;  %13069 = vmatprep.mubr.msk.f32.mxu0 %vm2457_vm0, %v406_v52  ;;  %v19592_v52 = vld [vmem:[#allocation41_spill] sm:$0xff]  ;;  %v412_v11 = vsel %vm241_vm1, %v409_v51, %v411_v43  ;;  %v414_v47 = vsel %vm241_vm1, %v411_v43, %v413_v17  ;;  %v912_v51 = vadd.s32 736, %v14654_v38 }
 0x103   :  { %19588 = vst [vmem:[#allocation33_spill] sm:$0xff] %v15992_v3  ;;  %19589 = vst [vmem:[#allocation98_spill] sm:$0xff] %v15994_v49  ;;  %5486 = vperm.xlu1 %13742, %v5128_v59   ;;  %5481 = vperm.xlu0 %13741, %v5127_v19   ;;  %v5129_v49 = vld [vmem:[%s19316_s3 + $0x210] sm:$0xff]  ;;  %v417_v3 = vrot.slane %v19592_v52, 7 }
 0x104   :  { %v19595_v19 = vld [vmem:[#allocation12_spill] sm:$0xff]  ;;  %v19600_v52 = vld [vmem:[#allocation43_spill] sm:$0xff] }
 0x105   :  { %13070 = vmatmul.mubr.msk.f32.gmra.mrb[82].mxu0 %vm2457_vm0, %v408_v10  ;;  %v415_v53 = vrot.slane %v19595_v19, 7  ;;  %v5131_v10 = vld [vmem:[%s19316_s3 + $0x220] sm:$0xff]  ;;  %v419_v19 = vrot.slane %v19600_v52, 7 }
 0x106   :  { %v16010_v2 = vpop.permute.xlu1 %5336  ;;  %v16012_v59 = vpop.permute.xlu0 %5331  ;;  %13072 = vmatprep.mubr.msk.f32.mxu0 %vm2457_vm0, %v2248_v29 }
 0x107   :  { %19593 = vst [vmem:[#allocation36_spill] sm:$0xff] %v16010_v2  ;;  %19594 = vst [vmem:[#allocation38_spill] sm:$0xff] %v16012_v59  ;;  %5496 = vperm.xlu1 %13742, %v5130_v6   ;;  %5491 = vperm.xlu0 %13741, %v5129_v49   ;;  %v418_v31 = vsel %vm241_vm1, %v415_v53, %v417_v3  ;;  %v416_v6 = vsel %vm241_vm1, %v413_v17, %v415_v53  ;;  %v19601_v59 = vld [vmem:[#allocation45_spill] sm:$0xff]  ;;  %v1564_v17 = vand.u32 31, %v912_v51  ;;  %v5800_v51 = vld [vmem:[%s19317_s4 + $0x208] sm:$0xff] }
 0x108   :  { %v2252_v61 = vsel %vm16025_vm12, 0.0, %v418_v31  ;;  %v421_v2 = vrot.slane %v19601_v59, 7  ;;  %v420_v59 = vsel %vm241_vm1, %v417_v3, %v419_v19 }
 0x109   :  { %13073 = vmatmul.mubr.msk.f32.gmra.mrb[84].mxu0 %vm2457_vm0, %v412_v11  ;;  %v5134_v11 = vld [vmem:[%s19316_s3 + $0x238] sm:$0xff]  ;;  %vm16064_vm13 = vcmp.eq.s32.totalorder %v1564_v17, 0 }
 0x10a   :  { %v16031_v49 = vpop.permute.xlu1 %5346  ;;  %v16033_v43 = vpop.permute.xlu0 %5341  ;;  %13075 = vmatprep.mubr.msk.f32.mxu0 %vm2457_vm0, %v414_v47  ;;  %v19602_v47 = vld [vmem:[#allocation16_spill] sm:$0xff]  ;;  %v422_v29 = vsel %vm241_vm1, %v419_v19, %v421_v2 }
 0x10b   :  { %19598 = vst [vmem:[#allocation41_spill] sm:$0xff] %v16031_v49  ;;  %19599 = vst [vmem:[#allocation12_spill] sm:$0xff] %v16033_v43  ;;  %5506 = vperm.xlu1 %13742, %v5132_v22   ;;  %5501 = vperm.xlu0 %13741, %v5131_v10   ;;  %v5133_v43 = vld [vmem:[%s19316_s3 + $0x230] sm:$0xff]  ;;  %v425_v49 = vrot.slane %v19602_v47, 7  ;;  %v19605_v10 = vld [vmem:[#allocation14_spill] sm:$0xff] }
 0x10c   :  { %v423_v31 = vrot.slane %v19605_v10, 7  ;;  %v19609_v10 = vld [vmem:[#allocation50_spill] sm:$0xff] }
 0x10d   :  { %13076 = vmatmul.mubr.msk.f32.gmra.mrb[86].mxu0 %vm2457_vm0, %v416_v6  ;;  %v5799_v6 = vld [vmem:[%s19317_s4 + $0x200] sm:$0xff] }
 0x10e   :  { %v16049_v53 = vpop.permute.xlu1 %5356  ;;  %v16051_v22 = vpop.permute.xlu0 %5351  ;;  %13078 = vmatprep.mubr.msk.f32.mxu0 %vm2457_vm0, %v2252_v61  ;;  %v426_v52 = vsel %vm241_vm1, %v423_v31, %v425_v49  ;;  %v424_v19 = vsel %vm241_vm1, %v421_v2, %v423_v31  ;;  %v16095_v61 = vadd.s32 24, %v14654_v38 }
 0x10f   :  { %19603 = vst [vmem:[#allocation43_spill] sm:$0xff] %v16049_v53  ;;  %19604 = vst [vmem:[#allocation45_spill] sm:$0xff] %v16051_v22  ;;  %5516 = vperm.xlu1 %13742, %v5134_v11   ;;  %5511 = vperm.xlu0 %13741, %v5133_v43   ;;  %v19608_v11 = vld [vmem:[#allocation48_spill] sm:$0xff]  ;;  %v2256_v17 = vsel %vm16064_vm13, 0.0, %v426_v52  ;;  %v429_v22 = vrot.slane %v19609_v10, 7 }
 0x110   :  { %v427_v47 = vrot.slane %v19608_v11, 7  ;;  %v5801_v53 = vld [vmem:[%s19317_s4 + $0x210] sm:$0xff]  ;;  %19611 = vst [vmem:[#allocation16_spill] sm:$0xff] %v16095_v61  ;;  %v5803_v11 = vld [vmem:[%s19317_s4 + $0x220] sm:$0xff]  ;;  %v5806_v10 = vld [vmem:[%s19317_s4 + $0x238] sm:$0xff] }
 0x111   :  { %13079 = vmatmul.mubr.msk.f32.gmra.mrb[88].mxu0 %vm2457_vm0, %v420_v59  ;;  %v5802_v59 = vld [vmem:[%s19317_s4 + $0x218] sm:$0xff] }
 0x112   :  { %v16069_v3 = vpop.permute.xlu1 %5998  ;;  %v16071_v43 = vpop.permute.xlu0 %5993  ;;  %13081 = vmatprep.mubr.msk.f32.mxu0 %vm2457_vm0, %v422_v29  ;;  %v428_v29 = vsel %vm241_vm1, %v425_v49, %v427_v47  ;;  %v430_v52 = vsel %vm241_vm1, %v427_v47, %v429_v22  ;;  %v941_v47 = vand.u32 31, %v16095_v61 }
 0x113   :  { %6158 = vperm.xlu1 %13742, %v5800_v51   ;;  %6153 = vperm.xlu0 %13741, %v5799_v6   ;;  %v19610_v51 = vld [vmem:[#allocation18_spill] sm:$0xff] }
 0x114   :  { %v431_v6 = vrot.slane %v19610_v51, 7  ;;  %vm2263_vm14 = vcmp.eq.s32.totalorder %v941_v47, 31 }
 0x115   :  { %13082 = vmatmul.mubr.msk.f32.gmra.mrb[90].mxu0 %vm2457_vm0, %v424_v19  ;;  %v5804_v19 = vld [vmem:[%s19317_s4 + $0x228] sm:$0xff] }
 0x116   :  { %v16086_v2 = vpop.permute.xlu1 %6008  ;;  %v16088_v31 = vpop.permute.xlu0 %6003  ;;  %13084 = vmatprep.mubr.msk.f32.mxu0 %vm2457_vm0, %v2256_v17 }
 0x117   :  { %6168 = vperm.xlu1 %13742, %v5802_v59   ;;  %6163 = vperm.xlu0 %13741, %v5801_v53   ;;  %v432_v53 = vsel %vm241_vm1, %v429_v22, %v431_v6  ;;  %v5805_v59 = vld [vmem:[%s19317_s4 + $0x230] sm:$0xff]  ;;  %v16125_v22 = vadd.s32 56, %v14654_v38  ;;  %v5136_v6 = vld [vmem:[%s19316_s3 + $0x248] sm:$0xff] }
 0x119   :  { %13085 = vmatmul.mubr.msk.f32.gmra.mrb[92].mxu0 %vm2457_vm0, %v428_v29  ;;  %19612 = vst [vmem:[#allocation14_spill] sm:$0xff] %v16125_v22  ;;  %v969_v47 = vand.u32 31, %v16125_v22 }
 0x11a   :  { %v16104_v49 = vpop.permute.xlu1 %6018  ;;  %v16106_v17 = vpop.permute.xlu0 %6013  ;;  %13087 = vmatprep.mubr.msk.f32.mxu0 %vm2457_vm0, %v430_v52  ;;  %v5135_v52 = vld [vmem:[%s19316_s3 + $0x240] sm:$0xff] }
 0x11b   :  { %6178 = vperm.xlu1 %13742, %v5804_v19   ;;  %6173 = vperm.xlu0 %13741, %v5803_v11   ;;  %v19613_v19 = vld [vmem:[#allocation52_spill] sm:$0xff]  ;;  %vm2267_vm15 = vcmp.eq.s32.totalorder %v969_v47, 31 }
 0x11c   :  { %v2363_v47 = vsel %vm2267_vm15, 0.0, %v15359_v25  ;;  %v16189_v25 = vadd.s32 120, %v14654_v38 }
 0x11d   :  { %13088 = vmatmul.mubr.msk.f32.gmra.mrb[94].mxu0 %vm2457_vm0, %v432_v53  ;;  %v2359_v53 = vsel %vm2263_vm14, 0.0, %v15297_v56  ;;  %v16157_v56 = vadd.s32 88, %v14654_v38 }
 0x11e   :  { %v16118_v29 = vpop.permute.xlu1 %6028  ;;  %v16120_v51 = vpop.permute.xlu0 %6023  ;;  %13094 = vmatprep.mubr.msk.f32.mxu0 %vm2457_vm0, %v15258_v24 }
 0x11f   :  { %6188 = vperm.xlu1 %13742, %v5806_v10   ;;  %6183 = vperm.xlu0 %13741, %v5805_v59   ;;  %v5138_v10 = vld [vmem:[%s19316_s3 + $0x258] sm:$0xff]  ;;  %v5137_v59 = vld [vmem:[%s19316_s3 + $0x250] sm:$0xff]  ;;  %19614 = vst [vmem:[#allocation48_spill] sm:$0xff] %v16157_v56 }
 0x121   :  { %13095 = vmatmul.mubr.msk.f32.vlgmr.msra.gmra.mrb[0].mxu0 %vm2457_vm0, %v19613_v19 }
 0x122   :  { %v16135_v11 = vpop.permute.xlu1 %5366  ;;  %v16137_v24 = vpop.permute.xlu0 %5361  ;;  %13097 = vmatprep.mubr.msk.f32.mxu0 %vm2457_vm0, %v15294_v27  ;;  %v5140_v27 = vld [vmem:[%s19316_s3 + $0x268] sm:$0xff] }
 0x123   :  { %5526 = vperm.xlu1 %13742, %v5136_v6   ;;  %5521 = vperm.xlu0 %13741, %v5135_v52   ;;  %v5139_v6 = vld [vmem:[%s19316_s3 + $0x260] sm:$0xff] }
 0x124   :  { %v19615_v52 = vld [vmem:[#allocation58_spill] sm:$0xff] }
 0x125   :  { %13098 = vmatmul.mubr.msk.f32.gmra.mrb[2].mxu0 %vm2457_vm0, %v2359_v53  ;;  %19620 = vst [vmem:[#allocation58_spill] sm:$0xff] %v16189_v25 }
 0x126   :  { %v16150_v19 = vpop.permute.xlu1 %5376  ;;  %v16152_v61 = vpop.permute.xlu0 %5371  ;;  %13100 = vmatprep.mubr.msk.f32.mxu0 %vm2457_vm0, %v15320_v7 }
 0x127   :  { %5536 = vperm.xlu1 %13742, %v5138_v10   ;;  %5531 = vperm.xlu0 %13741, %v5137_v59   ;;  %v997_v10 = vand.u32 31, %v16157_v56  ;;  %v5142_v59 = vld [vmem:[%s19316_s3 + $0x278] sm:$0xff] }
 0x129   :  { %13101 = vmatmul.mubr.msk.f32.gmra.mrb[4].mxu0 %vm2457_vm0, %v19615_v52  ;;  %v5141_v52 = vld [vmem:[%s19316_s3 + $0x270] sm:$0xff]  ;;  %vm2271_vm2 = vcmp.eq.s32.totalorder %v997_v10, 31 }
 0x12a   :  { %v16167_v53 = vpop.permute.xlu1 %5386  ;;  %v16169_v7 = vpop.permute.xlu0 %5381  ;;  %13103 = vmatprep.mubr.msk.f32.mxu0 %vm2457_vm0, %v15356_v50  ;;  %v19619_v50 = vld [vmem:[#allocation63_spill] sm:$0xff]  ;;  %v2367_v10 = vsel %vm2271_vm2, 0.0, %v15424_v9  ;;  %v16221_v9 = vadd.s32 152, %v14654_v38 }
 0x12b   :  { %19616 = vst [vmem:[#allocation50_spill] sm:$0xff] %v16169_v7  ;;  %5546 = vperm.xlu1 %13742, %v5140_v27   ;;  %5541 = vperm.xlu0 %13741, %v5139_v6   ;;  %v5808_v27 = vld [vmem:[%s19317_s4 + $0x248] sm:$0xff]  ;;  %v5807_v6 = vld [vmem:[%s19317_s4 + $0x240] sm:$0xff] }
 0x12c   :  { %19623 = vst [vmem:[#allocation63_spill] sm:$0xff] %v16221_v9 }
 0x12d   :  { %13104 = vmatmul.mubr.msk.f32.gmra.mrb[6].mxu0 %vm2457_vm0, %v2363_v47  ;;  %v19621_v47 = vld [vmem:[#allocation64_spill] sm:$0xff] }
 0x12e   :  { %v16182_v22 = vpop.permute.xlu1 %5396  ;;  %v16184_v7 = vpop.permute.xlu0 %5391  ;;  %13106 = vmatprep.mubr.msk.f32.mxu0 %vm2457_vm0, %v19619_v50 }
 0x12f   :  { %19617 = vst [vmem:[#allocation18_spill] sm:$0xff] %v16182_v22  ;;  %19618 = vst [vmem:[#allocation52_spill] sm:$0xff] %v16184_v7  ;;  %5556 = vperm.xlu1 %13742, %v5142_v59   ;;  %5551 = vperm.xlu0 %13741, %v5141_v52   ;;  %v1025_v59 = vand.u32 31, %v16189_v25  ;;  %v5810_v52 = vld [vmem:[%s19317_s4 + $0x258] sm:$0xff] }
 0x131   :  { %13107 = vmatmul.mubr.msk.f32.gmra.mrb[8].mxu0 %vm2457_vm0, %v19621_v47  ;;  %v5809_v47 = vld [vmem:[%s19317_s4 + $0x250] sm:$0xff]  ;;  %vm2275_vm3 = vcmp.eq.s32.totalorder %v1025_v59, 31 }
 0x132   :  { %v16199_v56 = vpop.permute.xlu1 %6038  ;;  %v16201_v50 = vpop.permute.xlu0 %6033  ;;  %13109 = vmatprep.mubr.msk.f32.mxu0 %vm2457_vm0, %v15421_v44  ;;  %v19622_v44 = vld [vmem:[#allocation69_spill] sm:$0xff]  ;;  %v2371_v59 = vsel %vm2275_vm3, 0.0, %v15488_v46  ;;  %v5144_v46 = vld [vmem:[%s19316_s3 + $0x288] sm:$0xff] }
 0x133   :  { %6198 = vperm.xlu1 %13742, %v5808_v27   ;;  %6193 = vperm.xlu0 %13741, %v5807_v6   ;;  %v5812_v27 = vld [vmem:[%s19317_s4 + $0x268] sm:$0xff]  ;;  %v5811_v6 = vld [vmem:[%s19317_s4 + $0x260] sm:$0xff] }
 0x135   :  { %13110 = vmatmul.mubr.msk.f32.gmra.mrb[10].mxu0 %vm2457_vm0, %v2367_v10  ;;  %v19624_v10 = vld [vmem:[#allocation70_spill] sm:$0xff] }
 0x136   :  { %v16214_v7 = vpop.permute.xlu1 %6048  ;;  %v16216_v22 = vpop.permute.xlu0 %6043  ;;  %13112 = vmatprep.mubr.msk.f32.mxu0 %vm2457_vm0, %v19622_v44 }
 0x137   :  { %6208 = vperm.xlu1 %13742, %v5810_v52   ;;  %6203 = vperm.xlu0 %13741, %v5809_v47   ;;  %v1053_v52 = vand.u32 31, %v16221_v9  ;;  %v5814_v47 = vld [vmem:[%s19317_s4 + $0x278] sm:$0xff] }
 0x139   :  { %13113 = vmatmul.mubr.msk.f32.gmra.mrb[12].mxu0 %vm2457_vm0, %v19624_v10  ;;  %v5813_v10 = vld [vmem:[%s19317_s4 + $0x270] sm:$0xff]  ;;  %vm2279_vm4 = vcmp.eq.s32.totalorder %v1053_v52, 31 }
 0x13a   :  { %v16231_v25 = vpop.permute.xlu1 %6058  ;;  %v16233_v44 = vpop.permute.xlu0 %6053  ;;  %13115 = vmatprep.mubr.msk.f32.mxu0 %vm2457_vm0, %v15485_v60  ;;  %v16253_v60 = vadd.s32 184, %v14654_v38 }
 0x13b   :  { %19625 = vst [vmem:[#allocation64_spill] sm:$0xff] %v16231_v25  ;;  %19626 = vst [vmem:[#allocation69_spill] sm:$0xff] %v16233_v44  ;;  %6218 = vperm.xlu1 %13742, %v5812_v27   ;;  %6213 = vperm.xlu0 %13741, %v5811_v6   ;;  %v5143_v27 = vld [vmem:[%s19316_s3 + $0x280] sm:$0xff] }
 0x13c   :  { %19629 = vst [vmem:[#allocation100_spill] sm:$0xff] %v16253_v60  ;;  %v1081_v52 = vand.u32 31, %v16253_v60 }
 0x13d   :  { %13116 = vmatmul.mubr.msk.f32.gmra.mrb[14].mxu0 %vm2457_vm0, %v2371_v59  ;;  %v2375_v59 = vsel %vm2279_vm4, 0.0, %v15551_v40  ;;  %v5148_v40 = vld [vmem:[%s19316_s3 + $0x2a8] sm:$0xff] }
 0x13e   :  { %v16246_v44 = vpop.permute.xlu1 %6068  ;;  %v16248_v25 = vpop.permute.xlu0 %6063  ;;  %13118 = vmatprep.mubr.msk.f32.mxu0 %vm2457_vm0, %v15513_v48  ;;  %vm2283_vm5 = vcmp.eq.s32.totalorder %v1081_v52, 31 }
 0x13f   :  { %19627 = vst [vmem:[#allocation70_spill] sm:$0xff] %v16246_v44  ;;  %19628 = vst [vmem:[#allocation99_spill] sm:$0xff] %v16248_v25  ;;  %6228 = vperm.xlu1 %13742, %v5814_v47   ;;  %6223 = vperm.xlu0 %13741, %v5813_v10   ;;  %v5146_v47 = vld [vmem:[%s19316_s3 + $0x298] sm:$0xff] }
 0x141   :  { %13119 = vmatmul.mubr.msk.f32.gmra.mrb[16].mxu0 %vm2457_vm0, %v15516_v23  ;;  %v5145_v23 = vld [vmem:[%s19316_s3 + $0x290] sm:$0xff] }
 0x142   :  { %v16263_v6 = vpop.permute.xlu1 %5406  ;;  %v16265_v48 = vpop.permute.xlu0 %5401  ;;  %13121 = vmatprep.mubr.msk.f32.mxu0 %vm2457_vm0, %v15548_v35  ;;  %v16285_v35 = vadd.s32 216, %v14654_v38 }
 0x143   :  { %19630 = vst [vmem:[#allocation101_spill] sm:$0xff] %v16263_v6  ;;  %19631 = vst [vmem:[#allocation102_spill] sm:$0xff] %v16265_v48  ;;  %5566 = vperm.xlu1 %13742, %v5144_v46   ;;  %5561 = vperm.xlu0 %13741, %v5143_v27   ;;  %v5147_v46 = vld [vmem:[%s19316_s3 + $0x2a0] sm:$0xff] }
 0x144   :  { %19634 = vst [vmem:[#allocation105_spill] sm:$0xff] %v16285_v35  ;;  %v1109_v52 = vand.u32 31, %v16285_v35 }
 0x145   :  { %13122 = vmatmul.mubr.msk.f32.gmra.mrb[18].mxu0 %vm2457_vm0, %v2375_v59  ;;  %v2379_v59 = vsel %vm2283_vm5, 0.0, %v15614_v55  ;;  %v16317_v55 = vadd.s32 248, %v14654_v38 }
 0x146   :  { %v16278_v10 = vpop.permute.xlu1 %5416  ;;  %v16280_v9 = vpop.permute.xlu0 %5411  ;;  %13124 = vmatprep.mubr.msk.f32.mxu0 %vm2457_vm0, %v15576_v57  ;;  %vm2287_vm6 = vcmp.eq.s32.totalorder %v1109_v52, 31 }
 0x147   :  { %19632 = vst [vmem:[#allocation103_spill] sm:$0xff] %v16278_v10  ;;  %19633 = vst [vmem:[#allocation104_spill] sm:$0xff] %v16280_v9  ;;  %5576 = vperm.xlu1 %13742, %v5146_v47   ;;  %5571 = vperm.xlu0 %13741, %v5145_v23   ;;  %v5150_v47 = vld [vmem:[%s19316_s3 + $0x2b8] sm:$0xff]  ;;  %v2383_v52 = vsel %vm2287_vm6, 0.0, %v15677_v20  ;;  %v5820_v20 = vld [vmem:[%s19317_s4 + $0x2a8] sm:$0xff] }
 0x149   :  { %13125 = vmatmul.mubr.msk.f32.gmra.mrb[20].mxu0 %vm2457_vm0, %v15579_v13  ;;  %v5149_v13 = vld [vmem:[%s19316_s3 + $0x2b0] sm:$0xff] }
 0x14a   :  { %v16295_v27 = vpop.permute.xlu1 %5426  ;;  %v16297_v57 = vpop.permute.xlu0 %5421  ;;  %13127 = vmatprep.mubr.msk.f32.mxu0 %vm2457_vm0, %v15611_v63  ;;  %v19639_v63 = vld [vmem:[#allocation23_spill] sm:$0xff] }
 0x14b   :  { %19635 = vst [vmem:[#allocation106_spill] sm:$0xff] %v16295_v27  ;;  %19636 = vst [vmem:[#allocation107_spill] sm:$0xff] %v16297_v57  ;;  %5586 = vperm.xlu1 %13742, %v5148_v40   ;;  %5581 = vperm.xlu0 %13741, %v5147_v46   ;;  %v5816_v40 = vld [vmem:[%s19317_s4 + $0x288] sm:$0xff]  ;;  %v5815_v46 = vld [vmem:[%s19317_s4 + $0x280] sm:$0xff] }
 0x14c   :  { %19640 = vst [vmem:[#allocation23_spill] sm:$0xff] %v16317_v55  ;;  %v19753_v57 = vld [vmem:[#allocation34_spill] sm:$0xff] }
 0x14d   :  { %13128 = vmatmul.mubr.msk.f32.gmra.mrb[22].mxu0 %vm2457_vm0, %v2379_v59  ;;  %v19641_v59 = vld [vmem:[#allocation82_spill] sm:$0xff] }
 0x14e   :  { %v16310_v23 = vpop.permute.xlu1 %5436  ;;  %v16312_v60 = vpop.permute.xlu0 %5431  ;;  %13130 = vmatprep.mubr.msk.f32.mxu0 %vm2457_vm0, %v19639_v63 }
 0x14f   :  { %19637 = vst [vmem:[#allocation108_spill] sm:$0xff] %v16310_v23  ;;  %19638 = vst [vmem:[#allocation109_spill] sm:$0xff] %v16312_v60  ;;  %5596 = vperm.xlu1 %13742, %v5150_v47   ;;  %5591 = vperm.xlu0 %13741, %v5149_v13   ;;  %v1137_v47 = vand.u32 31, %v16317_v55  ;;  %v5818_v13 = vld [vmem:[%s19317_s4 + $0x298] sm:$0xff] }
 0x151   :  { %13131 = vmatmul.mubr.msk.f32.gmra.mrb[24].mxu0 %vm2457_vm0, %v19641_v59  ;;  %v5817_v59 = vld [vmem:[%s19317_s4 + $0x290] sm:$0xff]  ;;  %vm2291_vm7 = vcmp.eq.s32.totalorder %v1137_v47, 31 }
 0x152   :  { %v16327_v35 = vpop.permute.xlu1 %6078  ;;  %v16329_v63 = vpop.permute.xlu0 %6073  ;;  %13133 = vmatprep.mubr.msk.f32.mxu0 %vm2457_vm0, %v15674_v58  ;;  %v16349_v58 = vadd.s32 280, %v14654_v38 }
 0x153   :  { %19642 = vst [vmem:[#allocation82_spill] sm:$0xff] %v16327_v35  ;;  %19643 = vst [vmem:[#allocation110_spill] sm:$0xff] %v16329_v63  ;;  %6238 = vperm.xlu1 %13742, %v5816_v40   ;;  %6233 = vperm.xlu0 %13741, %v5815_v46   ;;  %v5819_v40 = vld [vmem:[%s19317_s4 + $0x2a0] sm:$0xff] }
 0x154   :  { %19646 = vst [vmem:[#allocation113_spill] sm:$0xff] %v16349_v58  ;;  %v1165_v47 = vand.u32 31, %v16349_v58  ;;  %v19775_v63 = vld [vmem:[#allocation54_spill] sm:$0xff] }
 0x155   :  { %13134 = vmatmul.mubr.msk.f32.gmra.mrb[26].mxu0 %vm2457_vm0, %v2383_v52  ;;  %v2387_v52 = vsel %vm2291_vm7, 0.0, %v15740_v54  ;;  %v5152_v54 = vld [vmem:[%s19316_s3 + $0x2c8] sm:$0xff] }
 0x156   :  { %v16342_v60 = vpop.permute.xlu1 %6088  ;;  %v16344_v23 = vpop.permute.xlu0 %6083  ;;  %13136 = vmatprep.mubr.msk.f32.mxu0 %vm2457_vm0, %v15702_v32  ;;  %vm2295_vm8 = vcmp.eq.s32.totalorder %v1165_v47, 31 }
 0x157   :  { %19644 = vst [vmem:[#allocation111_spill] sm:$0xff] %v16342_v60  ;;  %19645 = vst [vmem:[#allocation112_spill] sm:$0xff] %v16344_v23  ;;  %6248 = vperm.xlu1 %13742, %v5818_v13   ;;  %6243 = vperm.xlu0 %13741, %v5817_v59   ;;  %v5822_v13 = vld [vmem:[%s19317_s4 + $0x2b8] sm:$0xff] }
 0x159   :  { %13137 = vmatmul.mubr.msk.f32.gmra.mrb[28].mxu0 %vm2457_vm0, %v15705_v18  ;;  %v5821_v18 = vld [vmem:[%s19317_s4 + $0x2b0] sm:$0xff] }
 0x15a   :  { %v16359_v46 = vpop.permute.xlu1 %6098  ;;  %v16361_v32 = vpop.permute.xlu0 %6093  ;;  %13139 = vmatprep.mubr.msk.f32.mxu0 %vm2457_vm0, %v15737_v16  ;;  %v16381_v16 = vadd.s32 312, %v14654_v38 }
 0x15b   :  { %19647 = vst [vmem:[#allocation114_spill] sm:$0xff] %v16359_v46  ;;  %19648 = vst [vmem:[#allocation115_spill] sm:$0xff] %v16361_v32  ;;  %6258 = vperm.xlu1 %13742, %v5820_v20   ;;  %6253 = vperm.xlu0 %13741, %v5819_v40   ;;  %v5151_v20 = vld [vmem:[%s19316_s3 + $0x2c0] sm:$0xff] }
 0x15c   :  { %19651 = vst [vmem:[#allocation118_spill] sm:$0xff] %v16381_v16  ;;  %v1193_v47 = vand.u32 31, %v16381_v16  ;;  %v5158_v16 = vld [vmem:[%s19316_s3 + $0x2f8] sm:$0xff] }
 0x15d   :  { %13140 = vmatmul.mubr.msk.f32.gmra.mrb[30].mxu0 %vm2457_vm0, %v2387_v52  ;;  %v2391_v52 = vsel %vm2295_vm8, 0.0, %v15803_v36  ;;  %v16417_v36 = vadd.s32 344, %v14654_v38 }
 0x15e   :  { %v16374_v59 = vpop.permute.xlu1 %6108  ;;  %v16376_v55 = vpop.permute.xlu0 %6103  ;;  %13142 = vmatprep.mubr.msk.f32.mxu0 %vm2457_vm0, %v15765_v0  ;;  %vm16412_vm9 = vcmp.eq.s32.totalorder %v1193_v47, 31 }
 0x15f   :  { %19649 = vst [vmem:[#allocation116_spill] sm:$0xff] %v16374_v59  ;;  %19650 = vst [vmem:[#allocation117_spill] sm:$0xff] %v16376_v55  ;;  %6268 = vperm.xlu1 %13742, %v5822_v13   ;;  %6263 = vperm.xlu0 %13741, %v5821_v18   ;;  %v5154_v13 = vld [vmem:[%s19316_s3 + $0x2d8] sm:$0xff]  ;;  %v2395_v47 = vsel %vm16412_vm9, 0.0, %v15866_v30 }
 0x160   :  { %19658 = vst [vmem:[#allocation123_spill] sm:$0xff] %v16417_v36  ;;  %v19748_v59 = vld [vmem:[#allocation32_spill] sm:$0xff] }
 0x161   :  { %13143 = vmatmul.mubr.msk.f32.gmra.mrb[32].mxu0 %vm2457_vm0, %v15768_v8  ;;  %v5153_v8 = vld [vmem:[%s19316_s3 + $0x2d0] sm:$0xff] }
 0x162   :  { %v16391_v40 = vpop.permute.xlu1 %5446  ;;  %v16393_v0 = vpop.permute.xlu0 %5441  ;;  %13145 = vmatprep.mubr.msk.f32.mxu0 %vm2457_vm0, %v15800_v42 }
 0x163   :  { %19652 = vst [vmem:[#allocation119_spill] sm:$0xff] %v16391_v40  ;;  %19653 = vst [vmem:[#allocation120_spill] sm:$0xff] %v16393_v0  ;;  %5606 = vperm.xlu1 %13742, %v5152_v54   ;;  %5601 = vperm.xlu0 %13741, %v5151_v20   ;;  %v5156_v54 = vld [vmem:[%s19316_s3 + $0x2e8] sm:$0xff]  ;;  %v5155_v20 = vld [vmem:[%s19316_s3 + $0x2e0] sm:$0xff] }
 0x165   :  { %13146 = vmatmul.mubr.msk.f32.gmra.mrb[34].mxu0 %vm2457_vm0, %v2391_v52 }
 0x166   :  { %v16406_v18 = vpop.permute.xlu1 %5456  ;;  %v16408_v58 = vpop.permute.xlu0 %5451  ;;  %13148 = vmatprep.mubr.msk.f32.mxu0 %vm2457_vm0, %v15828_v1 }
 0x167   :  { %19654 = vst [vmem:[#allocation121_spill] sm:$0xff] %v16406_v18  ;;  %19655 = vst [vmem:[#allocation122_spill] sm:$0xff] %v16408_v58  ;;  %5616 = vperm.xlu1 %13742, %v5154_v13   ;;  %5611 = vperm.xlu0 %13741, %v5153_v8   ;;  %v13833_v13 = vld [vmem:[%s19313_s0 + $0x160] sm:$0xff]  ;;  %v9878_v18 = vld [vmem:[%s19321_s8 + $0x98] sm:$0xff] }
 0x168   :  { %v618_v8 = vrot.slane %v13833_v13, 1 }
 0x169   :  { %13149 = vmatmul.mubr.msk.f32.gmra.mrb[36].mxu0 %vm2457_vm0, %v15831_v21  ;;  %v1221_v21 = vand.u32 31, %v16417_v36 }
 0x16a   :  { %v16427_v1 = vpop.permute.xlu1 %5466  ;;  %v16429_v52 = vpop.permute.xlu0 %5461  ;;  %13151 = vmatprep.mubr.msk.f32.mxu0 %vm2457_vm0, %v15863_v14  ;;  %v5157_v14 = vld [vmem:[%s19316_s3 + $0x2f0] sm:$0xff] }
 0x16b   :  { %19659 = vst [vmem:[#allocation124_spill] sm:$0xff] %v16427_v1  ;;  %19660 = vst [vmem:[#allocation125_spill] sm:$0xff] %v16429_v52  ;;  %5626 = vperm.xlu1 %13742, %v5156_v54   ;;  %5621 = vperm.xlu0 %13741, %v5155_v20   ;;  %v19663_v54 = vrot.slane %v15886_v41, 1  ;;  %vm16456_vm10 = vcmp.eq.s32.totalorder %v1221_v21, 31  ;;  %v5823_v41 = vld [vmem:[%s19317_s4 + $0x2c0] sm:$0xff]  ;;  %v5825_v1 = vld [vmem:[%s19317_s4 + $0x2d0] sm:$0xff] }
 0x16d   :  { %13152 = vmatmul.mubr.msk.f32.gmra.mrb[38].mxu0 %vm2457_vm0, %v2395_v47  ;;  %v619_v20 = vsel %vm530_vm11, %v19663_v54, %v618_v8  ;;  %v13834_v47 = vld [vmem:[%s19313_s0 + $0x168] sm:$0xff]  ;;  %v13835_v54 = vld [vmem:[%s19313_s0 + $0x170] sm:$0xff] }
 0x16e   :  { %v16447_v30 = vpop.permute.xlu1 %5476  ;;  %v16449_v42 = vpop.permute.xlu0 %5471  ;;  %13154 = vmatprep.mubr.msk.f32.mxu0 %vm2457_vm0, %v15891_v12  ;;  %v620_v36 = vrot.slane %v13834_v47, 1  ;;  %v5824_v12 = vld [vmem:[%s19317_s4 + $0x2c8] sm:$0xff]  ;;  %v622_v47 = vrot.slane %v13835_v54, 1  ;;  %v5826_v54 = vld [vmem:[%s19317_s4 + $0x2d8] sm:$0xff] }
 0x16f   :  { %19661 = vst [vmem:[#allocation126_spill] sm:$0xff] %v16447_v30  ;;  %19662 = vst [vmem:[#allocation127_spill] sm:$0xff] %v16449_v42  ;;  %5636 = vperm.xlu1 %13742, %v5158_v16   ;;  %5631 = vperm.xlu0 %13741, %v5157_v14   ;;  %v16464_v42 = vadd.s32 376, %v14654_v38  ;;  %v2399_v14 = vsel %vm16456_vm10, 0.0, %v619_v20  ;;  %v13836_v30 = vld [vmem:[%s19313_s0 + $0x178] sm:$0xff] }
 0x170   :  { %v621_v52 = vsel %vm530_vm11, %v618_v8, %v620_v36 }
 0x171   :  { %19666 = vst [vmem:[#allocation128_spill] sm:$0xff] %v16464_v42  ;;  %13155 = vmatmul.mubr.msk.f32.gmra.mrb[40].mxu0 %vm2457_vm0, %v15894_v37  ;;  %v624_v37 = vrot.slane %v13836_v30, 1  ;;  %v1249_v20 = vand.u32 31, %v16464_v42  ;;  %v13841_v42 = vld [vmem:[%s19313_s0 + $0x1a0] sm:$0xff] }
 0x172   :  { %v16474_v16 = vpop.permute.xlu1 %6118  ;;  %v16476_v21 = vpop.permute.xlu0 %6113  ;;  %13157 = vmatprep.mubr.msk.f32.mxu0 %vm2457_vm0, %v15922_v62  ;;  %v13837_v62 = vld [vmem:[%s19313_s0 + $0x180] sm:$0xff] }
 0x173   :  { %19667 = vst [vmem:[#allocation129_spill] sm:$0xff] %v16474_v16  ;;  %19668 = vst [vmem:[#allocation130_spill] sm:$0xff] %v16476_v21  ;;  %6278 = vperm.xlu1 %13742, %v5824_v12   ;;  %6273 = vperm.xlu0 %13741, %v5823_v41   ;;  %v626_v13 = vrot.slane %v13837_v62, 1  ;;  %v623_v12 = vsel %vm530_vm11, %v620_v36, %v622_v47  ;;  %v625_v41 = vsel %vm530_vm11, %v622_v47, %v624_v37  ;;  %v5828_v36 = vld [vmem:[%s19317_s4 + $0x2e8] sm:$0xff] }
 0x174   :  { %vm16508_vm12 = vcmp.eq.s32.totalorder %v1249_v20, 31 }
 0x175   :  { %13158 = vmatmul.mubr.msk.f32.gmra.mrb[42].mxu0 %vm2457_vm0, %v2399_v14  ;;  %v627_v62 = vsel %vm530_vm11, %v624_v37, %v626_v13  ;;  %v13838_v14 = vld [vmem:[%s19313_s0 + $0x188] sm:$0xff]  ;;  %v13839_v37 = vld [vmem:[%s19313_s0 + $0x190] sm:$0xff] }
 0x176   :  { %v16500_v30 = vpop.permute.xlu1 %6128  ;;  %v16502_v8 = vpop.permute.xlu0 %6123  ;;  %13160 = vmatprep.mubr.msk.f32.mxu0 %vm2457_vm0, %v621_v52  ;;  %v628_v58 = vrot.slane %v13838_v14, 1  ;;  %v2403_v47 = vsel %vm16508_vm12, 0.0, %v627_v62  ;;  %v630_v20 = vrot.slane %v13839_v37, 1  ;;  %v5830_v37 = vld [vmem:[%s19317_s4 + $0x2f8] sm:$0xff] }
 0x177   :  { %19669 = vst [vmem:[#allocation131_spill] sm:$0xff] %v16500_v30  ;;  %19670 = vst [vmem:[#allocation132_spill] sm:$0xff] %v16502_v8  ;;  %6288 = vperm.xlu1 %13742, %v5826_v54   ;;  %6283 = vperm.xlu0 %13741, %v5825_v1   ;;  %v871_v8 = vadd.s32 408, %v14654_v38  ;;  %v5827_v1 = vld [vmem:[%s19317_s4 + $0x2e0] sm:$0xff]  ;;  %v13840_v54 = vld [vmem:[%s19313_s0 + $0x198] sm:$0xff] }
 0x178   :  { %v632_v14 = vrot.slane %v13840_v54, 1  ;;  %v5829_v54 = vld [vmem:[%s19317_s4 + $0x2f0] sm:$0xff] }
 0x179   :  { %13161 = vmatmul.mubr.msk.f32.gmra.mrb[44].mxu0 %vm2457_vm0, %v623_v12  ;;  %v629_v12 = vsel %vm530_vm11, %v626_v13, %v628_v58  ;;  %v1277_v62 = vand.u32 31, %v871_v8  ;;  %v631_v13 = vsel %vm530_vm11, %v628_v58, %v630_v20  ;;  %v9525_v58 = vld [vmem:[%s19320_s7 + $0x10] sm:$0xff] }
 0x17a   :  { %v16523_v52 = vpop.permute.xlu1 %6138  ;;  %13163 = vmatprep.mubr.msk.f32.mxu0 %vm2457_vm0, %v625_v41  ;;  %v16534_v30 = vpop.permute.xlu0 %6133  ;;  %v634_v41 = vrot.slane %v13841_v42, 1  ;;  %v9861_v42 = vld [vmem:[%s19321_s8 + $0x10] sm:$0xff] }
 0x17b   :  { %19673 = vst [vmem:[#allocation133_spill] sm:$0xff] %v16523_v52  ;;  %19674 = vst [vmem:[#allocation134_spill] sm:$0xff] %v16534_v30  ;;  %6298 = vperm.xlu1 %13742, %v5828_v36   ;;  %6293 = vperm.xlu0 %13741, %v5827_v1   ;;  %v633_v36 = vsel %vm530_vm11, %v630_v20, %v632_v14  ;;  %vm16553_vm13 = vcmp.eq.s32.totalorder %v1277_v62, 31  ;;  %v9523_v20 = vld [vmem:[%s19320_s7] sm:$0xff] }
 0x17c   :  { %v635_v8 = vsel %vm530_vm11, %v632_v14, %v634_v41 }
 0x17d   :  { %13164 = vmatmul.mubr.msk.f32.gmra.mrb[46].mxu0 %vm2457_vm0, %v2403_v47  ;;  %v13842_v47 = vld [vmem:[%s19313_s0 + $0x1a8] sm:$0xff]  ;;  %v2407_v62 = vsel %vm16553_vm13, 0.0, %v635_v8 }
 0x17e   :  { %13166 = vmatprep.mubr.msk.f32.mxu0 %vm2457_vm0, %v629_v12  ;;  %v16550_v1 = vpop.permute.xlu1 %6148  ;;  %v636_v30 = vrot.slane %v13842_v47, 1  ;;  %v875_v12 = vadd.s32 440, %v14654_v38  ;;  %v16567_v14 = vpop.permute.xlu0 %6143  ;;  %v13844_v47 = vld [vmem:[%s19313_s0 + $0x1b8] sm:$0xff] }
 0x17f   :  { %19675 = vst [vmem:[#allocation135_spill] sm:$0xff] %v16550_v1  ;;  %6308 = vperm.xlu1 %13742, %v5830_v37   ;;  %6303 = vperm.xlu0 %13741, %v5829_v54   ;;  %19678 = vst [vmem:[#allocation136_spill] sm:$0xff] %v16567_v14  ;;  %v13843_v37 = vld [vmem:[%s19313_s0 + $0x1b0] sm:$0xff]  ;;  %v640_v1 = vrot.slane %v13844_v47, 1 }
 0x180   :  { %v638_v54 = vrot.slane %v13843_v37, 1  ;;  %v637_v14 = vsel %vm530_vm11, %v634_v41, %v636_v30  ;;  %v1305_v8 = vand.u32 31, %v875_v12  ;;  %v9859_v37 = vld [vmem:[%s19321_s8] sm:$0xff] }
 0x181   :  { %13167 = vmatmul.mubr.msk.f32.gmra.mrb[48].mxu0 %vm2457_vm0, %v631_v13  ;;  %v13845_v13 = vld [vmem:[%s19313_s0 + $0x1c0] sm:$0xff] }
 0x182   :  { %13169 = vmatprep.mubr.msk.f32.mxu0 %vm2457_vm0, %v633_v36  ;;  %v642_v36 = vrot.slane %v13845_v13, 1  ;;  %v16589_v52 = vpop.permute.xlu1 %5486  ;;  %v639_v41 = vsel %vm530_vm11, %v636_v30, %v638_v54  ;;  %vm16598_vm14 = vcmp.eq.s32.totalorder %v1305_v8, 31  ;;  %v9529_v30 = vld [vmem:[%s19320_s7 + $0x30] sm:$0xff] }
 0x183   :  { %9583 = vperm.xlu1 %13742, %v9525_v58   ;;  %9573 = vperm.xlu0 %13741, %v9523_v20   ;;  %19679 = vst [vmem:[#allocation137_spill] sm:$0xff] %v16589_v52  ;;  %v641_v58 = vsel %vm530_vm11, %v638_v54, %v640_v1  ;;  %v16595_v20 = vpop.permute.xlu0 %5481  ;;  %v9527_v54 = vld [vmem:[%s19320_s7 + $0x20] sm:$0xff]  ;;  %v13847_v8 = vld [vmem:[%s19313_s0 + $0x1d0] sm:$0xff] }
 0x184   :  { %19680 = vst [vmem:[#allocation138_spill] sm:$0xff] %v16595_v20  ;;  %v643_v12 = vsel %vm530_vm11, %v640_v1, %v642_v36 }
 0x185   :  { %13170 = vmatmul.mubr.msk.f32.gmra.mrb[50].mxu0 %vm2457_vm0, %v2407_v62  ;;  %v13846_v62 = vld [vmem:[%s19313_s0 + $0x1c8] sm:$0xff]  ;;  %v2411_v1 = vsel %vm16598_vm14, 0.0, %v643_v12 }
 0x186   :  { %13172 = vmatprep.mubr.msk.f32.mxu0 %vm2457_vm0, %v637_v14  ;;  %v644_v13 = vrot.slane %v13846_v62, 1  ;;  %v879_v14 = vadd.s32 472, %v14654_v38  ;;  %v16622_v20 = vpop.permute.xlu1 %5496 }
 0x187   :  { %9919 = vperm.xlu1 %13742, %v9861_v42   ;;  %9909 = vperm.xlu0 %13741, %v9859_v37   ;;  %v646_v42 = vrot.slane %v13847_v8, 1  ;;  %v13848_v37 = vld [vmem:[%s19313_s0 + $0x1d8] sm:$0xff]  ;;  %19683 = vst [vmem:[#allocation139_spill] sm:$0xff] %v16622_v20  ;;  %v9865_v8 = vld [vmem:[%s19321_s8 + $0x30] sm:$0xff]  ;;  %v16634_v52 = vpop.permute.xlu0 %5491 }
 0x188   :  { %v648_v62 = vrot.slane %v13848_v37, 1  ;;  %v1333_v47 = vand.u32 31, %v879_v14  ;;  %v9863_v37 = vld [vmem:[%s19321_s8 + $0x20] sm:$0xff]  ;;  %19684 = vst [vmem:[#allocation140_spill] sm:$0xff] %v16634_v52  ;;  %v13743_v14 = vld [vmem:[%s19318_s5 + $0x10] sm:$0xff]   ;;  %v13852_v52 = vld [vmem:[%s19313_s0 + $0x1f8] sm:$0xff] }
 0x189   :  { %13173 = vmatmul.mubr.msk.f32.gmra.mrb[52].mxu0 %vm2457_vm0, %v639_v41  ;;  %v645_v41 = vsel %vm530_vm11, %v642_v36, %v644_v13  ;;  %v647_v36 = vsel %vm530_vm11, %v644_v13, %v646_v42  ;;  %v883_v13 = vadd.s32 504, %v14654_v38  ;;  %13238 = vmatprep.subr.bf16.mxu1 %v13743_v14  ;;  %v656_v20 = vrot.slane %v13852_v52, 1  ;;  %v9869_v52 = vld [vmem:[%s19321_s8 + $0x50] sm:$0xff] }
 0x18a   :  { %13175 = vmatprep.mubr.msk.f32.mxu0 %vm2457_vm0, %v641_v58  ;;  %v13849_v58 = vld [vmem:[%s19313_s0 + $0x1e0] sm:$0xff]  ;;  %vm16644_vm15 = vcmp.eq.s32.totalorder %v1333_v47, 31  ;;  %13239 = vmatpush3.bf16.msra.mxu1 %v13743_v14 }
 0x18b   :  { %9603 = vperm.xlu1 %13742, %v9529_v30   ;;  %9593 = vperm.xlu0 %13741, %v9527_v54   ;;  %v650_v12 = vrot.slane %v13849_v58, 1  ;;  %v649_v30 = vsel %vm530_vm11, %v646_v42, %v648_v62  ;;  %v9533_v42 = vld [vmem:[%s19320_s7 + $0x50] sm:$0xff]  ;;  %v16670_v21 = vpop.permute.xlu0 %5501  ;;  %v13744_v58 = vld [vmem:[%s19318_s5 + $0x18] sm:$0xff]  }
 0x18c   :  { %19688 = vst [vmem:[#allocation142_spill] sm:$0xff] %v16670_v21  ;;  %13240 = vmatprep.subr.bf16.mxu1 %v13744_v58 }
 0x18d   :  { %13176 = vmatmul.mubr.msk.f32.gmra.mrb[54].mxu0 %vm2457_vm0, %v2411_v1  ;;  %v651_v54 = vsel %vm530_vm11, %v648_v62, %v650_v12  ;;  %v13850_v1 = vld [vmem:[%s19313_s0 + $0x1e8] sm:$0xff]  ;;  %v16658_v62 = vpop.permute.xlu1 %5506 }
 0x18e   :  { %13178 = vmatprep.mubr.msk.f32.mxu0 %vm2457_vm0, %v645_v41  ;;  %v652_v41 = vrot.slane %v13850_v1, 1  ;;  %19687 = vst [vmem:[#allocation141_spill] sm:$0xff] %v16658_v62  ;;  %v2415_v47 = vsel %vm16644_vm15, 0.0, %v651_v54  ;;  %v1361_v54 = vand.u32 31, %v883_v13  ;;  %13241 = vmatpush3.bf16.msra.mxu1 %v13744_v58  ;;  %v9535_v58 = vld [vmem:[%s19320_s7 + $0x60] sm:$0xff] }
 0x18f   :  { %9939 = vperm.xlu1 %13742, %v9865_v8   ;;  %9929 = vperm.xlu0 %13741, %v9863_v37   ;;  %v9531_v8 = vld [vmem:[%s19320_s7 + $0x40] sm:$0xff]  ;;  %v13851_v37 = vld [vmem:[%s19313_s0 + $0x1f0] sm:$0xff] }
 0x190   :  { %v654_v1 = vrot.slane %v13851_v37, 1  ;;  %vm16692_vm2 = vcmp.eq.s32.totalorder %v1361_v54, 31 }
 0x191   :  { %13179 = vmatmul.mubr.msk.f32.gmra.mrb[56].mxu0 %vm2457_vm0, %v647_v36  ;;  %v653_v36 = vsel %vm530_vm11, %v650_v12, %v652_v41 }
 0x192   :  { %13181 = vmatprep.mubr.msk.f32.mxu0 %vm2457_vm0, %v649_v30  ;;  %v13853_v30 = vld [vmem:[%s19313_s0 + $0x200] sm:$0xff]  ;;  %v655_v12 = vsel %vm530_vm11, %v652_v41, %v654_v1  ;;  %v657_v13 = vsel %vm530_vm11, %v654_v1, %v656_v20  ;;  %v887_v41 = vadd.s32 536, %v14654_v38  ;;  %v9537_v1 = vld [vmem:[%s19320_s7 + $0x70] sm:$0xff] }
 0x193   :  { %9623 = vperm.xlu1 %13742, %v9533_v42   ;;  %9613 = vperm.xlu0 %13741, %v9531_v8   ;;  %v658_v14 = vrot.slane %v13853_v30, 1  ;;  %v9867_v42 = vld [vmem:[%s19321_s8 + $0x40] sm:$0xff]  ;;  %v16689_v8 = vpop.permute.xlu1 %5516  ;;  %v9873_v30 = vld [vmem:[%s19321_s8 + $0x70] sm:$0xff] }
 0x194   :  { %19689 = vst [vmem:[#allocation143_spill] sm:$0xff] %v16689_v8 }
 0x195   :  { %13182 = vmatmul.mubr.msk.f32.gmra.mrb[58].mxu0 %vm2457_vm0, %v2415_v47  ;;  %v659_v37 = vsel %vm530_vm11, %v656_v20, %v658_v14  ;;  %v13854_v47 = vld [vmem:[%s19313_s0 + $0x208] sm:$0xff]  ;;  %v16706_v20 = vpop.permute.xlu0 %5511 }
 0x196   :  { %13184 = vmatprep.mubr.msk.f32.mxu0 %vm2457_vm0, %v653_v36  ;;  %v660_v36 = vrot.slane %v13854_v47, 1  ;;  %19692 = vst [vmem:[#allocation144_spill] sm:$0xff] %v16706_v20  ;;  %v2419_v54 = vsel %vm16692_vm2, 0.0, %v659_v37  ;;  %v13856_v47 = vld [vmem:[%s19313_s0 + $0x218] sm:$0xff]  ;;  %v1389_v37 = vand.u32 31, %v887_v41 }
 0x197   :  { %9959 = vperm.xlu1 %13742, %v9869_v52   ;;  %9949 = vperm.xlu0 %13741, %v9867_v42   ;;  %v13855_v52 = vld [vmem:[%s19313_s0 + $0x210] sm:$0xff]  ;;  %v664_v8 = vrot.slane %v13856_v47, 1  ;;  %v16728_v21 = vpop.permute.xlu1 %6158 }
 0x198   :  { %v662_v42 = vrot.slane %v13855_v52, 1  ;;  %v661_v20 = vsel %vm530_vm11, %v658_v14, %v660_v36  ;;  %v9871_v52 = vld [vmem:[%s19321_s8 + $0x60] sm:$0xff]  ;;  %19693 = vst [vmem:[#allocation145_spill] sm:$0xff] %v16728_v21  ;;  %vm16737_vm3 = vcmp.eq.s32.totalorder %v1389_v37, 31  ;;  %v13859_v37 = vld [vmem:[%s19313_s0 + $0x230] sm:$0xff] }
 0x199   :  { %13185 = vmatmul.mubr.msk.f32.gmra.mrb[60].mxu0 %vm2457_vm0, %v655_v12  ;;  %v13857_v12 = vld [vmem:[%s19313_s0 + $0x220] sm:$0xff] }
 0x19a   :  { %13187 = vmatprep.mubr.msk.f32.mxu0 %vm2457_vm0, %v657_v13  ;;  %v666_v13 = vrot.slane %v13857_v12, 1  ;;  %v663_v14 = vsel %vm530_vm11, %v660_v36, %v662_v42  ;;  %v9541_v36 = vld [vmem:[%s19320_s7 + $0x90] sm:$0xff]  ;;  %v17131_v21 = vld [vmem:[%s19315_s2] ss:$0 sm:$0xff] }
 0x19b   :  { %9643 = vperm.xlu1 %13742, %v9537_v1   ;;  %9633 = vperm.xlu0 %13741, %v9535_v58   ;;  %v665_v1 = vsel %vm530_vm11, %v662_v42, %v664_v8  ;;  %v16734_v58 = vpop.permute.xlu0 %6153  ;;  %v9539_v42 = vld [vmem:[%s19320_s7 + $0x80] sm:$0xff]  ;;  %v16761_v62 = vpop.permute.xlu1 %6168 }
 0x19c   :  { %19694 = vst [vmem:[#allocation146_spill] sm:$0xff] %v16734_v58  ;;  %v667_v41 = vsel %vm530_vm11, %v664_v8, %v666_v13  ;;  %19697 = vst [vmem:[#allocation147_spill] sm:$0xff] %v16761_v62 }
 0x19d   :  { %13188 = vmatmul.mubr.msk.f32.gmra.mrb[62].mxu0 %vm2457_vm0, %v2419_v54  ;;  %v13858_v54 = vld [vmem:[%s19313_s0 + $0x228] sm:$0xff]  ;;  %v2423_v8 = vsel %vm16737_vm3, 0.0, %v667_v41 }
 0x19e   :  { %13190 = vmatprep.mubr.msk.f32.mxu0 %vm2457_vm0, %v661_v20  ;;  %v668_v12 = vrot.slane %v13858_v54, 1  ;;  %v891_v20 = vadd.s32 568, %v14654_v38 }
 0x19f   :  { %9979 = vperm.xlu1 %13742, %v9873_v30   ;;  %9969 = vperm.xlu0 %13741, %v9871_v52   ;;  %v670_v30 = vrot.slane %v13859_v37, 1  ;;  %v13860_v52 = vld [vmem:[%s19313_s0 + $0x238] sm:$0xff]  ;;  %v9877_v37 = vld [vmem:[%s19321_s8 + $0x90] sm:$0xff]  ;;  %v16773_v58 = vpop.permute.xlu0 %6163 }
 0x1a0   :  { %v672_v54 = vrot.slane %v13860_v52, 1  ;;  %v1417_v47 = vand.u32 31, %v891_v20  ;;  %v9875_v52 = vld [vmem:[%s19321_s8 + $0x80] sm:$0xff]  ;;  %19698 = vst [vmem:[#allocation148_spill] sm:$0xff] %v16773_v58 }
 0x1a1   :  { %13191 = vmatmul.mubr.msk.f32.gmra.mrb[64].mxu0 %vm2457_vm0, %v663_v14  ;;  %v669_v14 = vsel %vm530_vm11, %v666_v13, %v668_v12  ;;  %v671_v13 = vsel %vm530_vm11, %v668_v12, %v670_v30  ;;  %v9545_v12 = vld [vmem:[%s19320_s7 + $0xb0] sm:$0xff] }
 0x1a2   :  { %13193 = vmatprep.mubr.msk.f32.mxu0 %vm2457_vm0, %v665_v1  ;;  %v13861_v1 = vld [vmem:[%s19313_s0 + $0x240] sm:$0xff]  ;;  %vm16780_vm4 = vcmp.eq.s32.totalorder %v1417_v47, 31  ;;  %v13863_v47 = vld [vmem:[%s19313_s0 + $0x250] sm:$0xff] }
 0x1a3   :  { %9663 = vperm.xlu1 %13742, %v9541_v36   ;;  %9653 = vperm.xlu0 %13741, %v9539_v42   ;;  %v674_v41 = vrot.slane %v13861_v1, 1  ;;  %v673_v36 = vsel %vm530_vm11, %v670_v30, %v672_v54  ;;  %v13862_v1 = vld [vmem:[%s19313_s0 + $0x248] sm:$0xff]  ;;  %v9543_v30 = vld [vmem:[%s19320_s7 + $0xa0] sm:$0xff]  ;;  %v16806_v62 = vpop.permute.xlu0 %6173 }
 0x1a4   :  { %v676_v58 = vrot.slane %v13862_v1, 1  ;;  %19702 = vst [vmem:[#allocation150_spill] sm:$0xff] %v16806_v62 }
 0x1a5   :  { %13194 = vmatmul.mubr.msk.f32.gmra.mrb[66].mxu0 %vm2457_vm0, %v2423_v8  ;;  %v675_v20 = vsel %vm530_vm11, %v672_v54, %v674_v41  ;;  %v895_v8 = vadd.s32 600, %v14654_v38  ;;  %v16794_v54 = vpop.permute.xlu1 %6178 }
 0x1a6   :  { %13196 = vmatprep.mubr.msk.f32.mxu0 %vm2457_vm0, %v669_v14  ;;  %19701 = vst [vmem:[#allocation149_spill] sm:$0xff] %v16794_v54  ;;  %v2427_v14 = vsel %vm16780_vm4, 0.0, %v675_v20 }
 0x1a7   :  { %9999 = vperm.xlu1 %13742, %v9877_v37   ;;  %9989 = vperm.xlu0 %13741, %v9875_v52   ;;  %v678_v37 = vrot.slane %v13863_v47, 1  ;;  %v13864_v52 = vld [vmem:[%s19313_s0 + $0x258] sm:$0xff]  ;;  %v1445_v42 = vand.u32 31, %v895_v8  ;;  %v9881_v47 = vld [vmem:[%s19321_s8 + $0xb0] sm:$0xff] }
 0x1a8   :  { %v680_v1 = vrot.slane %v13864_v52, 1  ;;  %v9879_v52 = vld [vmem:[%s19321_s8 + $0xa0] sm:$0xff] }
 0x1a9   :  { %13197 = vmatmul.mubr.msk.f32.gmra.mrb[68].mxu0 %vm2457_vm0, %v671_v13  ;;  %v677_v13 = vsel %vm530_vm11, %v674_v41, %v676_v58  ;;  %v679_v41 = vsel %vm530_vm11, %v676_v58, %v678_v37  ;;  %vm16825_vm5 = vcmp.eq.s32.totalorder %v1445_v42, 31  ;;  %v9526_v58 = vld [vmem:[%s19320_s7 + $0x18] sm:$0xff] }
 0x1aa   :  { %13199 = vmatprep.mubr.msk.f32.mxu0 %vm2457_vm0, %v673_v36  ;;  %v13865_v36 = vld [vmem:[%s19313_s0 + $0x260] sm:$0xff] }
 0x1ab   :  { %9683 = vperm.xlu1 %13742, %v9545_v12   ;;  %9673 = vperm.xlu0 %13741, %v9543_v30   ;;  %v682_v20 = vrot.slane %v13865_v36, 1  ;;  %v681_v12 = vsel %vm530_vm11, %v678_v37, %v680_v1  ;;  %v16822_v30 = vpop.permute.xlu1 %6188  ;;  %v9524_v37 = vld [vmem:[%s19320_s7 + $0x8] sm:$0xff]  ;;  %v9549_v36 = vld [vmem:[%s19320_s7 + $0xd0] sm:$0xff] }
 0x1ac   :  { %19703 = vst [vmem:[#allocation151_spill] sm:$0xff] %v16822_v30 }
 0x1ad   :  { %13200 = vmatmul.mubr.msk.f32.gmra.mrb[70].mxu0 %vm2457_vm0, %v2427_v14  ;;  %v683_v8 = vsel %vm530_vm11, %v680_v1, %v682_v20  ;;  %v13866_v14 = vld [vmem:[%s19313_s0 + $0x268] sm:$0xff]  ;;  %v16839_v1 = vpop.permute.xlu0 %6183 }
 0x1ae   :  { %13202 = vmatprep.mubr.msk.f32.mxu0 %vm2457_vm0, %v677_v13  ;;  %v684_v62 = vrot.slane %v13866_v14, 1  ;;  %v899_v13 = vadd.s32 632, %v14654_v38  ;;  %19706 = vst [vmem:[#allocation152_spill] sm:$0xff] %v16839_v1  ;;  %v2431_v42 = vsel %vm16825_vm5, 0.0, %v683_v8  ;;  %v13868_v14 = vld [vmem:[%s19313_s0 + $0x278] sm:$0xff] }
 0x1af   :  { %10019 = vperm.xlu1 %13742, %v9881_v47   ;;  %10009 = vperm.xlu0 %13741, %v9879_v52   ;;  %v13867_v47 = vld [vmem:[%s19313_s0 + $0x270] sm:$0xff]  ;;  %v688_v30 = vrot.slane %v13868_v14, 1  ;;  %v16861_v54 = vpop.permute.xlu1 %5526 }
 0x1b0   :  { %v686_v52 = vrot.slane %v13867_v47, 1  ;;  %v685_v1 = vsel %vm530_vm11, %v682_v20, %v684_v62  ;;  %v1473_v8 = vand.u32 31, %v899_v13  ;;  %v9547_v47 = vld [vmem:[%s19320_s7 + $0xc0] sm:$0xff]  ;;  %19707 = vst [vmem:[#allocation153_spill] sm:$0xff] %v16861_v54 }
 0x1b1   :  { %13203 = vmatmul.mubr.msk.f32.gmra.mrb[72].mxu0 %vm2457_vm0, %v679_v41  ;;  %v13869_v41 = vld [vmem:[%s19313_s0 + $0x280] sm:$0xff] }
 0x1b2   :  { %13205 = vmatprep.mubr.msk.f32.mxu0 %vm2457_vm0, %v681_v12  ;;  %v690_v12 = vrot.slane %v13869_v41, 1  ;;  %v687_v20 = vsel %vm530_vm11, %v684_v62, %v686_v52  ;;  %vm16870_vm6 = vcmp.eq.s32.totalorder %v1473_v8, 31  ;;  %v9862_v62 = vld [vmem:[%s19321_s8 + $0x18] sm:$0xff]  ;;  %v13871_v8 = vld [vmem:[%s19313_s0 + $0x290] sm:$0xff] }
 0x1b3   :  { %9588 = vperm.xlu1 %13742, %v9526_v58   ;;  %9578 = vperm.xlu0 %13741, %v9524_v37   ;;  %v689_v58 = vsel %vm530_vm11, %v686_v52, %v688_v30  ;;  %v16867_v37 = vpop.permute.xlu0 %5521  ;;  %v9860_v52 = vld [vmem:[%s19321_s8 + $0x8] sm:$0xff] }
 0x1b4   :  { %19708 = vst [vmem:[#allocation154_spill] sm:$0xff] %v16867_v37  ;;  %v691_v13 = vsel %vm530_vm11, %v688_v30, %v690_v12  ;;  %v16894_v37 = vpop.permute.xlu1 %5536 }
 0x1b5   :  { %13206 = vmatmul.mubr.msk.f32.gmra.mrb[74].mxu0 %vm2457_vm0, %v2431_v42  ;;  %v13870_v42 = vld [vmem:[%s19313_s0 + $0x288] sm:$0xff]  ;;  %v2435_v30 = vsel %vm16870_vm6, 0.0, %v691_v13  ;;  %19711 = vst [vmem:[#allocation155_spill] sm:$0xff] %v16894_v37 }
 0x1b6   :  { %13208 = vmatprep.mubr.msk.f32.mxu0 %vm2457_vm0, %v685_v1  ;;  %v692_v41 = vrot.slane %v13870_v42, 1  ;;  %v903_v1 = vadd.s32 664, %v14654_v38 }
 0x1b7   :  { %9703 = vperm.xlu1 %13742, %v9549_v36   ;;  %9693 = vperm.xlu0 %13741, %v9547_v47   ;;  %v694_v36 = vrot.slane %v13871_v8, 1  ;;  %v13872_v47 = vld [vmem:[%s19313_s0 + $0x298] sm:$0xff]  ;;  %v16906_v54 = vpop.permute.xlu0 %5531 }
 0x1b8   :  { %v696_v42 = vrot.slane %v13872_v47, 1  ;;  %v1501_v14 = vand.u32 31, %v903_v1  ;;  %v9530_v8 = vld [vmem:[%s19320_s7 + $0x38] sm:$0xff]  ;;  %v9528_v47 = vld [vmem:[%s19320_s7 + $0x28] sm:$0xff]  ;;  %19712 = vst [vmem:[#allocation156_spill] sm:$0xff] %v16906_v54 }
 0x1b9   :  { %13209 = vmatmul.mubr.msk.f32.gmra.mrb[76].mxu0 %vm2457_vm0, %v687_v20  ;;  %v693_v20 = vsel %vm530_vm11, %v690_v12, %v692_v41  ;;  %v695_v12 = vsel %vm530_vm11, %v692_v41, %v694_v36  ;;  %v9885_v41 = vld [vmem:[%s19321_s8 + $0xd0] sm:$0xff] }
 0x1ba   :  { %13211 = vmatprep.mubr.msk.f32.mxu0 %vm2457_vm0, %v689_v58  ;;  %v13873_v58 = vld [vmem:[%s19313_s0 + $0x2a0] sm:$0xff]  ;;  %vm16913_vm7 = vcmp.eq.s32.totalorder %v1501_v14, 31  ;;  %v13875_v14 = vld [vmem:[%s19313_s0 + $0x2b0] sm:$0xff] }
 0x1bb   :  { %9924 = vperm.xlu1 %13742, %v9862_v62   ;;  %9914 = vperm.xlu0 %13741, %v9860_v52   ;;  %v698_v13 = vrot.slane %v13873_v58, 1  ;;  %v697_v62 = vsel %vm530_vm11, %v694_v36, %v696_v42  ;;  %v13874_v58 = vld [vmem:[%s19313_s0 + $0x2a8] sm:$0xff]  ;;  %v9883_v36 = vld [vmem:[%s19321_s8 + $0xc0] sm:$0xff]  ;;  %v16939_v37 = vpop.permute.xlu0 %5541 }
 0x1bc   :  { %v700_v54 = vrot.slane %v13874_v58, 1  ;;  %19716 = vst [vmem:[#allocation158_spill] sm:$0xff] %v16939_v37 }
 0x1bd   :  { %13212 = vmatmul.mubr.msk.f32.gmra.mrb[78].mxu0 %vm2457_vm0, %v2435_v30  ;;  %v699_v1 = vsel %vm530_vm11, %v696_v42, %v698_v13  ;;  %v907_v30 = vadd.s32 696, %v14654_v38  ;;  %v16927_v42 = vpop.permute.xlu1 %5546 }
 0x1be   :  { %13214 = vmatprep.mubr.msk.f32.mxu0 %vm2457_vm0, %v693_v20  ;;  %19715 = vst [vmem:[#allocation157_spill] sm:$0xff] %v16927_v42  ;;  %v2439_v20 = vsel %vm16913_vm7, 0.0, %v699_v1 }
 0x1bf   :  { %9608 = vperm.xlu1 %13742, %v9530_v8   ;;  %9598 = vperm.xlu0 %13741, %v9528_v47   ;;  %v702_v8 = vrot.slane %v13875_v14, 1  ;;  %v13876_v47 = vld [vmem:[%s19313_s0 + $0x2b8] sm:$0xff]  ;;  %v1529_v52 = vand.u32 31, %v907_v30 }
 0x1c0   :  { %v704_v58 = vrot.slane %v13876_v47, 1  ;;  %v9866_v14 = vld [vmem:[%s19321_s8 + $0x38] sm:$0xff]  ;;  %v9864_v47 = vld [vmem:[%s19321_s8 + $0x28] sm:$0xff] }
 0x1c1   :  { %13215 = vmatmul.mubr.msk.f32.gmra.mrb[80].mxu0 %vm2457_vm0, %v695_v12  ;;  %v701_v12 = vsel %vm530_vm11, %v698_v13, %v700_v54  ;;  %v703_v13 = vsel %vm530_vm11, %v700_v54, %v702_v8  ;;  %vm16958_vm8 = vcmp.eq.s32.totalorder %v1529_v52, 31  ;;  %v9553_v54 = vld [vmem:[%s19320_s7 + $0xf0] sm:$0xff] }
 0x1c2   :  { %13217 = vmatprep.mubr.msk.f32.mxu0 %vm2457_vm0, %v697_v62  ;;  %v13877_v62 = vld [vmem:[%s19313_s0 + $0x2c0] sm:$0xff] }
 0x1c3   :  { %10039 = vperm.xlu1 %13742, %v9885_v41   ;;  %10029 = vperm.xlu0 %13741, %v9883_v36   ;;  %v706_v1 = vrot.slane %v13877_v62, 1  ;;  %v705_v41 = vsel %vm530_vm11, %v702_v8, %v704_v58  ;;  %v16955_v36 = vpop.permute.xlu1 %5556  ;;  %v9551_v8 = vld [vmem:[%s19320_s7 + $0xe0] sm:$0xff]  ;;  %v9534_v62 = vld [vmem:[%s19320_s7 + $0x58] sm:$0xff] }
 0x1c4   :  { %19717 = vst [vmem:[#allocation159_spill] sm:$0xff] %v16955_v36 }
 0x1c5   :  { %13218 = vmatmul.mubr.msk.f32.gmra.mrb[82].mxu0 %vm2457_vm0, %v2439_v20  ;;  %v707_v30 = vsel %vm530_vm11, %v704_v58, %v706_v1  ;;  %v13878_v20 = vld [vmem:[%s19313_s0 + $0x2c8] sm:$0xff]  ;;  %v16972_v58 = vpop.permute.xlu0 %5551 }
 0x1c6   :  { %13220 = vmatprep.mubr.msk.f32.mxu0 %vm2457_vm0, %v701_v12  ;;  %v708_v37 = vrot.slane %v13878_v20, 1  ;;  %v911_v12 = vadd.s32 728, %v14654_v38  ;;  %19720 = vst [vmem:[#allocation160_spill] sm:$0xff] %v16972_v58  ;;  %v2443_v52 = vsel %vm16958_vm8, 0.0, %v707_v30  ;;  %v13880_v20 = vld [vmem:[%s19313_s0 + $0x2d8] sm:$0xff] }
 0x1c7   :  { %9944 = vperm.xlu1 %13742, %v9866_v14   ;;  %9934 = vperm.xlu0 %13741, %v9864_v47   ;;  %v13879_v14 = vld [vmem:[%s19313_s0 + $0x2d0] sm:$0xff]  ;;  %v712_v36 = vrot.slane %v13880_v20, 1  ;;  %v16994_v42 = vpop.permute.xlu1 %6198  ;;  %v9868_v20 = vld [vmem:[%s19321_s8 + $0x48] sm:$0xff] }
 0x1c8   :  { %v710_v47 = vrot.slane %v13879_v14, 1  ;;  %v709_v58 = vsel %vm530_vm11, %v706_v1, %v708_v37  ;;  %v1557_v30 = vand.u32 31, %v911_v12  ;;  %v9532_v14 = vld [vmem:[%s19320_s7 + $0x48] sm:$0xff]  ;;  %19721 = vst [vmem:[#allocation161_spill] sm:$0xff] %v16994_v42 }
 0x1c9   :  { %13221 = vmatmul.mubr.msk.f32.gmra.mrb[84].mxu0 %vm2457_vm0, %v703_v13  ;;  %v13881_v13 = vld [vmem:[%s19313_s0 + $0x2e0] sm:$0xff] }
 0x1ca   :  { %13223 = vmatprep.mubr.msk.f32.mxu0 %vm2457_vm0, %v705_v41  ;;  %v714_v41 = vrot.slane %v13881_v13, 1  ;;  %v711_v1 = vsel %vm530_vm11, %v708_v37, %v710_v47  ;;  %vm17003_vm9 = vcmp.eq.s32.totalorder %v1557_v30, 31  ;;  %v9889_v37 = vld [vmem:[%s19321_s8 + $0xf0] sm:$0xff] }
 0x1cb   :  { %9723 = vperm.xlu1 %13742, %v9553_v54   ;;  %9713 = vperm.xlu0 %13741, %v9551_v8   ;;  %v713_v54 = vsel %vm530_vm11, %v710_v47, %v712_v36  ;;  %v17000_v8 = vpop.permute.xlu0 %6193  ;;  %v9887_v47 = vld [vmem:[%s19321_s8 + $0xe0] sm:$0xff]  ;;  %v13883_v30 = vld [vmem:[%s19313_s0 + $0x2f0] sm:$0xff] }
 0x1cc   :  { %19722 = vst [vmem:[#allocation162_spill] sm:$0xff] %v17000_v8  ;;  %v715_v12 = vsel %vm530_vm11, %v712_v36, %v714_v41 }
 0x1cd   :  { %13224 = vmatmul.mubr.msk.f32.gmra.mrb[86].mxu0 %vm2457_vm0, %v2443_v52  ;;  %v13882_v52 = vld [vmem:[%s19313_s0 + $0x2e8] sm:$0xff]  ;;  %v2447_v36 = vsel %vm17003_vm9, 0.0, %v715_v12  ;;  %v9870_v12 = vld [vmem:[%s19321_s8 + $0x58] sm:$0xff] }
 0x1ce   :  { %13226 = vmatprep.mubr.msk.f32.mxu0 %vm2457_vm0, %v709_v58  ;;  %v716_v13 = vrot.slane %v13882_v52, 1  ;;  %v915_v58 = vadd.s32 760, %v14654_v38 }
 0x1cf   :  { %9628 = vperm.xlu1 %13742, %v9534_v62   ;;  %9618 = vperm.xlu0 %13741, %v9532_v14   ;;  %v718_v62 = vrot.slane %v13883_v30, 1  ;;  %v17024_v14 = vpop.permute.xlu1 %6208  ;;  %v17036_v30 = vpop.permute.xlu0 %6203 }
 0x1d0   :  { %19725 = vst [vmem:[#allocation163_spill] sm:$0xff] %v17024_v14  ;;  %v717_v52 = vsel %vm530_vm11, %v714_v41, %v716_v13  ;;  %19726 = vst [vmem:[#allocation164_spill] sm:$0xff] %v17036_v30 }
 0x1d1   :  { %13227 = vmatmul.mubr.msk.f32.gmra.mrb[88].mxu0 %vm2457_vm0, %v711_v1  ;;  %v13884_v1 = vld [vmem:[%s19313_s0 + $0x2f8] sm:$0xff]  ;;  %v719_v41 = vsel %vm530_vm11, %v716_v13, %v718_v62 }
 0x1d2   :  { %13229 = vmatprep.mubr.msk.f32.mxu0 %vm2457_vm0, %v713_v54  ;;  %v720_v38 = vrot.slane %v13884_v1, 1  ;;  %v1585_v54 = vand.u32 31, %v915_v58  ;;  %v9555_v1 = vld [vmem:[%s19320_s7 + $0x100] sm:$0xff] }
 0x1d3   :  { %10059 = vperm.xlu1 %13742, %v9889_v37   ;;  %10049 = vperm.xlu0 %13741, %v9887_v47   ;;  %v9557_v47 = vld [vmem:[%s19320_s7 + $0x110] sm:$0xff] }
 0x1d4   :  { %v721_v58 = vsel %vm530_vm11, %v718_v62, %v720_v38  ;;  %v818_v37 = vsel %vm530_vm11, %v720_v38, 0.0  ;;  %vm2355_vm10 = vcmp.eq.s32.totalorder %v1585_v54, 31  ;;  %v17055_v38 = vpop.f32.mrb[0].mxu1  ;;  %v9538_v62 = vld [vmem:[%s19320_s7 + $0x78] sm:$0xff]  ;;  %v9536_v54 = vld [vmem:[%s19320_s7 + $0x68] sm:$0xff] }
 0x1d5   :  { %13230 = vmatmul.mubr.msk.f32.gmra.mrb[90].mxu0 %vm2457_vm0, %v2447_v36  ;;  %v17049_v36 = vpop.permute.xlu1 %6218  ;;  %v2451_v13 = vsel %vm2355_vm10, 0.0, %v818_v37  ;;  %v9891_v37 = vld [vmem:[%s19321_s8 + $0x100] sm:$0xff] }
 0x1d6   :  { %13232 = vmatprep.mubr.msk.f32.mxu0 %vm2457_vm0, %v717_v52  ;;  %19727 = vst [vmem:[#allocation165_spill] sm:$0xff] %v17049_v36  ;;  %v17053_v52 = vpop.permute.xlu0 %6213 }
 0x1d7   :  { %9964 = vperm.xlu1 %13742, %v9870_v12   ;;  %9954 = vperm.xlu0 %13741, %v9868_v20   ;;  %19728 = vst [vmem:[#allocation166_spill] sm:$0xff] %v17053_v52  ;;  %v17063_v12 = vpop.f32.mrb[1].mxu1 }
 0x1d9   :  { %13233 = vmatmul.mubr.msk.f32.gmra.mrb[92].mxu0 %vm2457_vm0, %v719_v41  ;;  %v17066_v20 = vpop.permute.xlu1 %6228  ;;  %v17068_v41 = vpop.f32.mrb[2].mxu1 }
 0x1da   :  { %13235 = vmatprep.mubr.msk.f32.mxu0 %vm2457_vm0, %v721_v58  ;;  %19729 = vst [vmem:[#allocation167_spill] sm:$0xff] %v17066_v20  ;;  %v9893_v58 = vld [vmem:[%s19321_s8 + $0x110] sm:$0xff] }
 0x1db   :  { %9743 = vperm.xlu1 %13742, %v9557_v47   ;;  %9733 = vperm.xlu0 %13741, %v9555_v1   ;;  %v17076_v47 = vpop.f32.mrb[3].mxu1  ;;  %v17078_v1 = vpop.permute.xlu0 %6223 }
 0x1dc   :  { %19730 = vst [vmem:[#allocation168_spill] sm:$0xff] %v17078_v1  ;;  %v9559_v1 = vld [vmem:[%s19320_s7 + $0x120] sm:$0xff] }
 0x1dd   :  { %13236 = vmatmul.mubr.msk.f32.gmra.mrb[94].mxu0 %vm2457_vm0, %v2451_v13  ;;  %v17080_v13 = vpop.f32.mrb[4].mxu1  ;;  %v17090_v52 = vpop.permute.xlu1 %5566  ;;  %vm6439_vm0 = vcmask 261120  }
 0x1de   :  { %19731 = vst [vmem:[#allocation169_spill] sm:$0xff] %v17080_v13  ;;  %v17088_v20 = vpop.f32.mrb[5].mxu1  ;;  %19733 = vst [vmem:[#allocation171_spill] sm:$0xff] %v17090_v52 }
 0x1df   :  { %9648 = vperm.xlu1 %13742, %v9538_v62   ;;  %9638 = vperm.xlu0 %13741, %v9536_v54   ;;  %v9874_v62 = vld [vmem:[%s19321_s8 + $0x78] sm:$0xff]  ;;  %v9872_v54 = vld [vmem:[%s19321_s8 + $0x68] sm:$0xff]  ;;  %19732 = vst [vmem:[#allocation170_spill] sm:$0xff] %v17088_v20  ;;  %v17092_v36 = vpop.permute.xlu0 %5561 }
 0x1e0   :  { %19734 = vst [vmem:[#allocation172_spill] sm:$0xff] %v17092_v36 }
 0x1e1   :  { %v17104_v14 = vpop.permute.xlu1 %5576 }
 0x1e2   :  { %19737 = vst [vmem:[#allocation175_spill] sm:$0xff] %v17104_v14 }
 0x1e3   :  { %10079 = vperm.xlu1 %13742, %v9893_v58   ;;  %10069 = vperm.xlu0 %13741, %v9891_v37   ;;  %v17094_v58 = vpop.f32.mrb[6].mxu1  ;;  %v9561_v37 = vld [vmem:[%s19320_s7 + $0x130] sm:$0xff]  ;;  %v17116_v8 = vpop.permute.xlu0 %5571 }
 0x1e4   :  { %19735 = vst [vmem:[#allocation173_spill] sm:$0xff] %v17094_v58  ;;  %v17102_v30 = vpop.f32.mrb[7].mxu1  ;;  %19740 = vst [vmem:[#allocation178_spill] sm:$0xff] %v17116_v8 }
 0x1e5   :  { %19736 = vst [vmem:[#allocation174_spill] sm:$0xff] %v17102_v30  ;;  %v17106_v52 = vpop.f32.mrb[8].mxu1  ;;  %v17126_v14 = vpop.permute.xlu1 %5586 }
 0x1e6   :  { %19738 = vst [vmem:[#allocation176_spill] sm:$0xff] %v17106_v52  ;;  %v17114_v36 = vpop.f32.mrb[9].mxu1  ;;  %19742 = vst [vmem:[#allocation180_spill] sm:$0xff] %v17126_v14  ;;  %v9876_v14 = vld [vmem:[%s19321_s8 + $0x88] sm:$0xff] }
 0x1e7   :  { %9984 = vperm.xlu1 %13742, %v9874_v62   ;;  %9974 = vperm.xlu0 %13741, %v9872_v54   ;;  %v9542_v62 = vld [vmem:[%s19320_s7 + $0x98] sm:$0xff]  ;;  %v9540_v54 = vld [vmem:[%s19320_s7 + $0x88] sm:$0xff]  ;;  %19739 = vst [vmem:[#allocation177_spill] sm:$0xff] %v17114_v36  ;;  %v17118_v42 = vpop.f32.mrb[10].mxu1  ;;  %v17133_v8 = vpop.permute.xlu0 %5581 }
 0x1e8   :  { %19741 = vst [vmem:[#allocation179_spill] sm:$0xff] %v17118_v42  ;;  %19743 = vst [vmem:[#allocation181_spill] sm:$0xff] %v17133_v8 }
 0x1e9   :  { %v17145_v55 = vpop.permute.xlu1 %5596 }
 0x1ea   :  { %19745 = vst [vmem:[#allocation183_spill] sm:$0xff] %v17145_v55 }
 0x1eb   :  { %9763 = vperm.xlu1 %13742, %v9561_v37   ;;  %9753 = vperm.xlu0 %13741, %v9559_v1   ;;  %v9897_v1 = vld [vmem:[%s19321_s8 + $0x130] sm:$0xff]  ;;  %v9895_v37 = vld [vmem:[%s19321_s8 + $0x120] sm:$0xff]  ;;  %v17159_v55 = vpop.permute.xlu0 %5591 }
 0x1ec   :  { %19750 = vst [vmem:[#allocation184_spill] sm:$0xff] %v17159_v55 }
 0x1ef   :  { %9668 = vperm.xlu1 %13742, %v9542_v62   ;;  %9658 = vperm.xlu0 %13741, %v9540_v54   ;;  %v17135_v62 = vpop.f32.mrb[11].mxu1  ;;  %v17189_v36 = vpop.permute.xlu0 %6233 }
 0x1f0   :  { %19744 = vst [vmem:[#allocation182_spill] sm:$0xff] %v17135_v62  ;;  %v17148_v8 = vpop.f32.mrb[12].mxu1  ;;  %v9565_v62 = vld [vmem:[%s19320_s7 + $0x150] sm:$0xff] }
 0x1f3   :  { %10099 = vperm.xlu1 %13742, %v9897_v1   ;;  %10089 = vperm.xlu0 %13741, %v9895_v37   ;;  %v19746_v1 = vld [vmem:[#allocation35_spill] sm:$0xff] }
 0x1f4   :  { %v13096_v54 = vpop.f32.mrb[0].mxu0  ;;  %19747 = vst [vmem:[#allocation35_spill] sm:$0xff] %v17148_v8 }
 0x1f5   :  { %v4968_v0 = vadd.f32 %v13096_v54, %v17131_v21  ;;  %v4385_v16 = vpop.f32.mrb[1].mxu0  ;;  %v9563_v54 = vld [vmem:[%s19320_s7 + $0x140] sm:$0xff] }
 0x1f6   :  { %v4967_v40 = vadd.f32 %v17131_v21, %v4385_v16  ;;  %v17157_v16 = vpop.f32.mrb[13].mxu1 }
 0x1f7   :  { %v5640_v37 = vmul.f32 %v19746_v1, %v4968_v0  ;;  %10004 = vperm.xlu1 %13742, %v9878_v18   ;;  %9994 = vperm.xlu0 %13741, %v9876_v14   ;;  %19749 = vst [vmem:[#allocation32_spill] sm:$0xff] %v17157_v16  ;;  %v19751_v0 = vld [vmem:[#allocation13_spill] sm:$0xff]  ;;  %v17166_v42 = vpop.f32.mrb[14].mxu1  ;;  %v19369_v16 = vmov 0.0  }
 0x1f8   :  { %v5639_v32 = vmul.f32 %v19748_v59, %v4967_v40  ;;  %v13099_v46 = vpop.f32.mrb[2].mxu0  ;;  %v19752_v59 = vld [vmem:[#allocation46_spill] sm:$0xff]  ;;  %19754 = vst [vmem:[#allocation13_spill] sm:$0xff] %v17166_v42 }
 0x1f9   :  { %v6312_v18 = vadd.f32 %v19751_v0, %v5640_v37  ;;  %v4970_v14 = vadd.f32 %v13099_v46, %v17131_v21  ;;  %v4395_v1 = vpop.f32.mrb[3].mxu0  ;;  %v19755_v37 = vld [vmem:[#allocation31_spill] sm:$0xff] }
 0x1fa   :  { %v6311_v40 = vadd.f32 %v19752_v59, %v5639_v32  ;;  %v4969_v8 = vadd.f32 %v17131_v21, %v4395_v1  ;;  %v9546_v32 = vld [vmem:[%s19320_s7 + $0xb8] sm:$0xff]  ;;  %v19758_v1 = vld [vmem:[#allocation15_spill] sm:$0xff]  ;;  %19760 = vst [vmem:[#allocation31_spill] sm:$0xff] %v17189_v36 }
 0x1fb   :  { %vm6416_vm12 = vcmp.ge.f32.partialorder %v6312_v18, 1.0  ;;  %v5642_v27 = vmul.f32 %v19753_v57, %v4970_v14  ;;  %9783 = vperm.xlu1 %13742, %v9565_v62   ;;  %9773 = vperm.xlu0 %13741, %v9563_v54   ;;  %v9544_v57 = vld [vmem:[%s19320_s7 + $0xa8] sm:$0xff]  ;;  %v17177_v62 = vpop.f32.mrb[15].mxu1  ;;  %v17179_v54 = vpop.permute.xlu1 %6238 }
 0x1fc   :  { %v12065_v55 = vsel %vm6416_vm12, 1.0, %v19369_v16  ;;  %vm6415_vm13 = vcmp.ge.f32.partialorder %v6311_v40, 1.0  ;;  %v5641_v46 = vmul.f32 %v19755_v37, %v4969_v8  ;;  %v13102_v0 = vpop.f32.mrb[4].mxu0  ;;  %19756 = vst [vmem:[#allocation46_spill] sm:$0xff] %v17177_v62  ;;  %19757 = vst [vmem:[#allocation34_spill] sm:$0xff] %v17179_v54  ;;  %v19759_v37 = vld [vmem:[#allocation47_spill] sm:$0xff] }
 0x1fd   :  { %6441 = vst.msk [vmem:[#allocation2 + $0x8] sm:$0xff] %vm6439_vm0, %v12065_v55  ;;  %v12064_v14 = vsel %vm6415_vm13, 1.0, %v19369_v16  ;;  %v6314_v8 = vadd.f32 %v19758_v1, %v5642_v27  ;;  %v4405_v59 = vpop.f32.mrb[5].mxu0  ;;  %v4972_v23 = vadd.f32 %v13102_v0, %v17131_v21  ;;  %v19761_v54 = vld [vmem:[#allocation39_spill] sm:$0xff]  ;;  %v9899_v0 = vld [vmem:[%s19321_s8 + $0x140] sm:$0xff] }
 0x1fe   :  { %6440 = vst.msk [vmem:[#allocation2] sm:$0xff] %vm6439_vm0, %v12064_v14  ;;  %v6313_v42 = vadd.f32 %v19759_v37, %v5641_v46  ;;  %v4971_v9 = vadd.f32 %v17131_v21, %v4405_v59  ;;  %v9901_v46 = vld [vmem:[%s19321_s8 + $0x150] sm:$0xff]  ;;  %v17200_v14 = vpop.f32.mrb[16].mxu1 }
 0x1ff   :  { %vm6418_vm14 = vcmp.ge.f32.partialorder %v6314_v8, 1.0  ;;  %9688 = vperm.xlu1 %13742, %v9546_v32   ;;  %9678 = vperm.xlu0 %13741, %v9544_v57   ;;  %v5644_v27 = vmul.f32 %v19761_v54, %v4972_v23  ;;  %19762 = vst [vmem:[#allocation15_spill] sm:$0xff] %v17200_v14  ;;  %v19763_v57 = vld [vmem:[#allocation40_spill] sm:$0xff]  ;;  %v17206_v23 = vpop.f32.mrb[17].mxu1  ;;  %v19765_v54 = vld [vmem:[#allocation17_spill] sm:$0xff]  ;;  %v17212_v30 = vpop.permute.xlu1 %6248  ;;  %v6448_v14 = vsel %vm6415_vm13, 0.0, %v6311_v40 }
 0x200   :  { %v12067_v55 = vsel %vm6418_vm14, 1.0, %v19369_v16  ;;  %vm6417_vm15 = vcmp.ge.f32.partialorder %v6313_v42, 1.0  ;;  %v13105_v1 = vpop.f32.mrb[6].mxu0  ;;  %v5643_v59 = vmul.f32 %v19763_v57, %v4971_v9  ;;  %19764 = vst [vmem:[#allocation47_spill] sm:$0xff] %v17206_v23  ;;  %19766 = vst [vmem:[#allocation39_spill] sm:$0xff] %v17212_v30  ;;  %v6451_v9 = vsel %vm6418_vm14, 0.0, %v6314_v8 }
 0x201   :  { %6443 = vst.msk [vmem:[#allocation2 + $0x18] sm:$0xff] %vm6439_vm0, %v12067_v55  ;;  %v12066_v32 = vsel %vm6417_vm15, 1.0, %v19369_v16  ;;  %v4415_v37 = vpop.f32.mrb[7].mxu0  ;;  %v6316_v36 = vadd.f32 %v19765_v54, %v5644_v27  ;;  %v4974_v62 = vadd.f32 %v13105_v1, %v17131_v21  ;;  %v6449_v55 = vsel %vm6416_vm12, 0.0, %v6312_v18  ;;  %v19767_v16 = vld [vmem:[#allocation51_spill] sm:$0xff]  ;;  %v19769_v27 = vld [vmem:[#allocation42_spill] sm:$0xff] }
 0x202   :  { %6442 = vst.msk [vmem:[#allocation2 + $0x10] sm:$0xff] %vm6439_vm0, %v12066_v32  ;;  %v4973_v52 = vadd.f32 %v17131_v21, %v4415_v37  ;;  %v6315_v60 = vadd.f32 %v19767_v16, %v5643_v59  ;;  %v19768_v32 = vld [vmem:[#allocation11_spill] sm:$0xff]  ;;  %v9882_v37 = vld [vmem:[%s19321_s8 + $0xb8] sm:$0xff]  ;;  %v17226_v40 = vpop.f32.mrb[18].mxu1  ;;  %v17228_v16 = vpop.permute.xlu0 %6243  ;;  %v6450_v8 = vsel %vm6417_vm15, 0.0, %v6313_v42  ;;  %v6457_v59 = vmul.f32 0.5, %v6449_v55 }
 0x203   :  { %10119 = vperm.xlu1 %13742, %v9901_v46   ;;  %10109 = vperm.xlu0 %13741, %v9899_v0   ;;  %vm6420_vm2 = vcmp.ge.f32.partialorder %v6316_v36, 1.0  ;;  %v5646_v57 = vmul.f32 %v19768_v32, %v4974_v62  ;;  %v9880_v18 = vld [vmem:[%s19321_s8 + $0xa8] sm:$0xff]  ;;  %19770 = vst [vmem:[#allocation40_spill] sm:$0xff] %v17226_v40  ;;  %19771 = vst [vmem:[#allocation17_spill] sm:$0xff] %v17228_v16  ;;  %v19772_v46 = vmov 0.0   ;;  %v6456_v32 = vmul.f32 0.5, %v6448_v14 }
 0x204   :  { %v5645_v54 = vmul.f32 %v19769_v27, %v4973_v52  ;;  %v13108_v1 = vpop.f32.mrb[8].mxu0  ;;  %v12069_v62 = vsel %vm6420_vm2, 1.0, %v19772_v46  ;;  %vm6419_vm3 = vcmp.ge.f32.partialorder %v6315_v60, 1.0  ;;  %v19773_v30 = vld [vmem:[#allocation20_spill] sm:$0xff]  ;;  %v6453_v16 = vsel %vm6420_vm2, 0.0, %v6316_v36  ;;  %v19774_v23 = vld [vmem:[#allocation19_spill] sm:$0xff] }
 0x205   :  { %v4976_v52 = vadd.f32 %v13108_v1, %v17131_v21  ;;  %v4425_v0 = vpop.f32.mrb[9].mxu0  ;;  %6445 = vst.msk [vmem:[#allocation2 + $0x28] sm:$0xff] %vm6439_vm0, %v12069_v62  ;;  %v12068_v27 = vsel %vm6419_vm3, 1.0, %v19772_v46  ;;  %v6318_v40 = vadd.f32 %v19773_v30, %v5646_v57  ;;  %v9569_v42 = vld [vmem:[%s19320_s7 + $0x170] sm:$0xff]  ;;  %v7064_v62 = vld [vmem:[#allocation2] ss:$2 sm:$0xff] }
 0x206   :  { %6444 = vst.msk [vmem:[#allocation2 + $0x20] sm:$0xff] %vm6439_vm0, %v12068_v27  ;;  %v6317_v1 = vadd.f32 %v19774_v23, %v5645_v54  ;;  %v4975_v14 = vadd.f32 %v17131_v21, %v4425_v0  ;;  %v7160_v10 = vld [vmem:[#allocation2 + $0x1] ss:$2 sm:$0xff]  ;;  %v17246_v48 = vpop.f32.mrb[19].mxu1  ;;  %v17248_v30 = vmul.f32 0.5, %v6451_v9  ;;  %v17250_v57 = vmul.f32 0.5, %v6450_v8  ;;  %v17258_v9 = vpop.permute.xlu1 %6258 }
 0x207   :  { %v5648_v55 = vmul.f32 %v19775_v63, %v4976_v52  ;;  %10024 = vperm.xlu1 %13742, %v9882_v37   ;;  %10014 = vperm.xlu0 %13741, %v9880_v18   ;;  %19776 = vst [vmem:[#allocation51_spill] sm:$0xff] %v17246_v48  ;;  %v6452_v36 = vsel %vm6419_vm3, 0.0, %v6315_v60  ;;  %vm6422_vm4 = vcmp.ge.f32.partialorder %v6318_v40, 1.0  ;;  %v9567_v63 = vld [vmem:[%s19320_s7 + $0x160] sm:$0xff]  ;;  %19778 = vst [vmem:[#allocation11_spill] sm:$0xff] %v17258_v9  ;;  %v17260_v8 = vmul.f32 0.5, %v6453_v16 }
 0x208   :  { %v13111_v27 = vpop.f32.mrb[10].mxu0  ;;  %v12071_v23 = vsel %vm6422_vm4, 1.0, %v19772_v46  ;;  %v6455_v54 = vsel %vm6422_vm4, 0.0, %v6318_v40  ;;  %vm6421_vm5 = vcmp.ge.f32.partialorder %v6317_v1, 1.0  ;;  %v19777_v37 = vld [vmem:[#allocation65_spill] sm:$0xff]  ;;  %v19779_v48 = vld [vmem:[#allocation55_spill] sm:$0xff]  ;;  %v17266_v6 = vmax.f32 %v7064_v62, %v7160_v10  ;;  %v17268_v40 = vpop.permute.xlu0 %6253 }
 0x209   :  { %v6320_v18 = vadd.f32 %v19777_v37, %v5648_v55  ;;  %v4435_v52 = vpop.f32.mrb[11].mxu0  ;;  %v7066_v0 = vld [vmem:[#allocation2 + $0x10] ss:$2 sm:$0xff]  ;;  %6447 = vst.msk [vmem:[#allocation2 + $0x38] sm:$0xff] %vm6439_vm0, %v12071_v23  ;;  %v12070_v60 = vsel %vm6421_vm5, 1.0, %v19772_v46  ;;  %v5647_v35 = vmul.f32 %v19779_v48, %v4975_v14  ;;  %19781 = vst [vmem:[#allocation20_spill] sm:$0xff] %v17268_v40  ;;  %v4978_v16 = vadd.f32 %v13111_v27, %v17131_v21 }
 0x20a   :  { %v7162_v25 = vld [vmem:[#allocation2 + $0x11] ss:$2 sm:$0xff]  ;;  %19780 = vst [vmem:[#allocation42_spill] sm:$0xff] %v17266_v6  ;;  %v17270_v44 = vmul.f32 0.5, %v6452_v36  ;;  %6446 = vst.msk [vmem:[#allocation2 + $0x30] sm:$0xff] %vm6439_vm0, %v12070_v60  ;;  %v4977_v37 = vadd.f32 %v17131_v21, %v4435_v52  ;;  %v17275_v23 = vpop.f32.mrb[20].mxu1 }
 0x20b   :  { %v6465_v55 = vadd.f32 %v6457_v59, %v6320_v18  ;;  %9803 = vperm.xlu1 %13742, %v9569_v42   ;;  %9793 = vperm.xlu0 %13741, %v9567_v63   ;;  %19782 = vst [vmem:[#allocation19_spill] sm:$0xff] %v17275_v23  ;;  %v17277_v9 = vmul.f32 0.5, %v6455_v54  ;;  %v6454_v48 = vsel %vm6421_vm5, 0.0, %v6317_v1  ;;  %v19783_v10 = vld [vmem:[#allocation66_spill] sm:$0xff]  ;;  %v17281_v36 = vmax.f32 %v7066_v0, %v7162_v25  ;;  %v9550_v59 = vld [vmem:[%s19320_s7 + $0xd8] sm:$0xff]  ;;  %v17291_v27 = vpop.f32.mrb[21].mxu1 }
 0x20c   :  { %v6319_v14 = vadd.f32 %v19783_v10, %v5647_v35  ;;  %v13114_v62 = vpop.f32.mrb[12].mxu0  ;;  %v17289_v42 = vld [vmem:[%s19318_s5] sm:$0xff]   ;;  %19785 = vst [vmem:[#allocation65_spill] sm:$0xff] %v17291_v27  ;;  %v19786_v63 = vld [vmem:[#allocation56_spill] sm:$0xff]  ;;  %v9548_v52 = vld [vmem:[%s19320_s7 + $0xc8] sm:$0xff]  ;;  %v17299_v0 = vpop.f32.mrb[22].mxu1 }
 0x20d   :  { %19784 = vst [vmem:[#allocation54_spill] sm:$0xff] %v17281_v36  ;;  %vm6473_vm6 = vcmp.ge.f32.partialorder %v6465_v55, 1.0  ;;  %v5650_v54 = vmul.f32 %v19786_v63, %v4978_v16  ;;  %v19787_v1 = vld [vmem:[#allocation57_spill] sm:$0xff]  ;;  %v4980_v35 = vadd.f32 %v13114_v62, %v17131_v21  ;;  %v4445_v25 = vpop.f32.mrb[13].mxu0  ;;  %19788 = vst [vmem:[#allocation55_spill] sm:$0xff] %v17299_v0  ;;  %13290 = vmatprep.subr.bf16.mxu1 %v17289_v42  ;;  %v19789_v16 = vld [vmem:[#allocation67_spill] sm:$0xff] }
 0x20e   :  { %v5649_v18 = vmul.f32 %v19787_v1, %v4977_v37  ;;  %v12073_v60 = vsel %vm6473_vm6, 1.0, %v19772_v46  ;;  %v6505_v10 = vsel %vm6473_vm6, 0.0, %v6465_v55  ;;  %v6464_v40 = vadd.f32 %v6456_v32, %v6319_v14  ;;  %v19790_v62 = vld [vmem:[#allocation68_spill] sm:$0xff]  ;;  %v19791_v1 = vld [vmem:[#allocation21_spill] sm:$0xff]  ;;  %v17313_v14 = vpop.f32.mrb[23].mxu1 }
 0x20f   :  { %v4979_v27 = vadd.f32 %v17131_v21, %v4445_v25  ;;  %6497 = vst.msk [vmem:[#allocation2 + $0x48] sm:$0xff] %vm6439_vm0, %v12073_v60  ;;  %v6322_v37 = vadd.f32 %v19789_v16, %v5650_v54  ;;  %v5652_v23 = vmul.f32 %v19791_v1, %v4980_v35  ;;  %v8459_v58 = vpack.c.bf16 %v17281_v36, %v17266_v6  ;;  %v9905_v32 = vld [vmem:[%s19321_s8 + $0x170] sm:$0xff]  ;;  %v7068_v55 = vld [vmem:[#allocation2 + $0x20] ss:$2 sm:$0xff]  ;;  %v7164_v35 = vld [vmem:[#allocation2 + $0x21] ss:$2 sm:$0xff] }
 0x210   :  { %v6321_v63 = vadd.f32 %v19790_v62, %v5649_v18  ;;  %9708 = vperm.xlu1 %13742, %v9550_v59   ;;  %19792 = vst [vmem:[#allocation66_spill] sm:$0xff] %v17313_v14  ;;  %v17315_v25 = vmul.f32 0.5, %v6454_v48  ;;  %vm6472_vm7 = vcmp.ge.f32.partialorder %v6464_v40, 1.0  ;;  %v19793_v60 = vld [vmem:[#allocation60_spill] sm:$0xff]  ;;  %9698 = vperm.xlu0 %13741, %v9548_v52   ;;  %v13117_v18 = vpop.f32.mrb[14].mxu0  ;;  %v17318_v16 = vmul.f32 0.5, %v6505_v10  ;;  %v17320_v62 = vpop.permute.xlu1 %6268 }
 0x211   :  { %v5651_v54 = vmul.f32 %v19793_v60, %v4979_v27  ;;  %19794 = vst [vmem:[#allocation56_spill] sm:$0xff] %v17320_v62  ;;  %v12072_v59 = vsel %vm6472_vm7, 1.0, %v19772_v46  ;;  %v6504_v1 = vsel %vm6472_vm7, 0.0, %v6464_v40  ;;  %v6467_v36 = vadd.f32 %v17248_v30, %v6322_v37  ;;  %13242 = vmatprep.mubr.msk.bf16.mxu1 %vm6439_vm0, %v8459_v58  ;;  %v4455_v48 = vpop.f32.mrb[15].mxu0  ;;  %v9903_v27 = vld [vmem:[%s19321_s8 + $0x160] sm:$0xff]  ;;  %v19795_v52 = vld [vmem:[#allocation71_spill] sm:$0xff] }
 0x212   :  { %v6466_v6 = vadd.f32 %v17250_v57, %v6321_v63  ;;  %6496 = vst.msk [vmem:[#allocation2 + $0x40] sm:$0xff] %vm6439_vm0, %v12072_v59  ;;  %v6324_v10 = vadd.f32 %v19795_v52, %v5652_v23  ;;  %v19796_v60 = vld [vmem:[#allocation72_spill] sm:$0xff]  ;;  %v4982_v14 = vadd.f32 %v13117_v18, %v17131_v21  ;;  %v4981_v40 = vadd.f32 %v17131_v21, %v4455_v48  ;;  %v17334_v57 = vpop.permute.xlu0 %6263 }
 0x213   :  { %v6323_v62 = vadd.f32 %v19796_v60, %v5651_v54  ;;  %v7070_v30 = vld [vmem:[#allocation2 + $0x30] ss:$2 sm:$0xff]  ;;  %v7166_v37 = vld [vmem:[#allocation2 + $0x31] ss:$2 sm:$0xff]  ;;  %19797 = vst [vmem:[#allocation57_spill] sm:$0xff] %v17334_v57  ;;  %vm6475_vm8 = vcmp.ge.f32.partialorder %v6467_v36, 1.0  ;;  %v17336_v58 = vmax.f32 %v7068_v55, %v7164_v35 }
 0x214   :  { %vm6474_vm9 = vcmp.ge.f32.partialorder %v6466_v6, 1.0  ;;  %10139 = vperm.xlu1 %13742, %v9905_v32   ;;  %v17338_v63 = vmax.f32 %v7070_v30, %v7166_v37  ;;  %v9886_v23 = vld [vmem:[%s19321_s8 + $0xd8] sm:$0xff]  ;;  %v12075_v54 = vsel %vm6475_vm8, 1.0, %v19772_v46  ;;  %v6507_v18 = vsel %vm6475_vm8, 0.0, %v6467_v36  ;;  %10129 = vperm.xlu0 %13741, %v9903_v27   ;;  %v13120_v48 = vpop.f32.mrb[16].mxu0  ;;  %v17346_v60 = vpop.f32.mrb[24].mxu1 }
 0x215   :  { %19798 = vst [vmem:[#allocation67_spill] sm:$0xff] %v17336_v58  ;;  %v12074_v59 = vsel %vm6474_vm9, 1.0, %v19772_v46  ;;  %v6512_v52 = vmul.f32 0.5, %v6504_v1  ;;  %19800 = vst [vmem:[#allocation21_spill] sm:$0xff] %v17346_v60  ;;  %v6469_v32 = vadd.f32 %v17260_v8, %v6324_v10  ;;  %v6468_v55 = vadd.f32 %v17270_v44, %v6323_v62  ;;  %v19801_v35 = vld [vmem:[#allocation61_spill] sm:$0xff]  ;;  %v19802_v37 = vld [vmem:[#allocation62_spill] sm:$0xff]  ;;  %v17362_v10 = vpop.permute.xlu1 %5606 }
 0x216   :  { %19799 = vst [vmem:[#allocation68_spill] sm:$0xff] %v17338_v63  ;;  %6499 = vst.msk [vmem:[#allocation2 + $0x58] sm:$0xff] %vm6439_vm0, %v12075_v54  ;;  %v5654_v30 = vmul.f32 %v19801_v35, %v4982_v14  ;;  %v5653_v36 = vmul.f32 %v19802_v37, %v4981_v40  ;;  %v4465_v57 = vpop.f32.mrb[17].mxu0  ;;  %v9884_v27 = vld [vmem:[%s19321_s8 + $0xc8] sm:$0xff]  ;;  %v6506_v1 = vsel %vm6474_vm9, 0.0, %v6466_v6  ;;  %v4984_v60 = vadd.f32 %v13120_v48, %v17131_v21  ;;  %v19804_v44 = vld [vmem:[#allocation73_spill] sm:$0xff] }
 0x217   :  { %6498 = vst.msk [vmem:[#allocation2 + $0x50] sm:$0xff] %vm6439_vm0, %v12074_v59  ;;  %v4983_v54 = vadd.f32 %v17131_v21, %v4465_v57  ;;  %v8460_v8 = vpack.c.bf16 %v17338_v63, %v17336_v58  ;;  %19803 = vst [vmem:[#allocation60_spill] sm:$0xff] %v17362_v10  ;;  %vm6477_vm10 = vcmp.ge.f32.partialorder %v6469_v32, 1.0  ;;  %vm6476_vm12 = vcmp.ge.f32.partialorder %v6468_v55, 1.0  ;;  %v19805_v62 = vld [vmem:[#allocation74_spill] sm:$0xff]  ;;  %v17366_v59 = vpop.f32.mrb[25].mxu1 }
 0x218   :  { %v6326_v14 = vadd.f32 %v19804_v44, %v5654_v30  ;;  %v6325_v40 = vadd.f32 %v19805_v62, %v5653_v36  ;;  %10044 = vperm.xlu1 %13742, %v9886_v23   ;;  %19806 = vst [vmem:[#allocation71_spill] sm:$0xff] %v17366_v59  ;;  %v12077_v6 = vsel %vm6477_vm10, 1.0, %v19772_v46  ;;  %v6509_v35 = vsel %vm6477_vm10, 0.0, %v6469_v32  ;;  %10034 = vperm.xlu0 %13741, %v9884_v27   ;;  %v13123_v48 = vpop.f32.mrb[18].mxu0  ;;  %v9554_v30 = vld [vmem:[%s19320_s7 + $0xf8] sm:$0xff]  ;;  %v17375_v44 = vpop.permute.xlu0 %5601  ;;  %v19808_v36 = vld [vmem:[#allocation75_spill] sm:$0xff] }
 0x219   :  { %v12076_v57 = vsel %vm6476_vm12, 1.0, %v19772_v46  ;;  %13243 = vmatmul.mubr.msk.bf16.vlgmr.msra.gmra.mrb[52].mxu1 %vm6439_vm0, %v8460_v8  ;;  %v6515_v37 = vmul.f32 0.5, %v6507_v18  ;;  %19807 = vst [vmem:[#allocation72_spill] sm:$0xff] %v17375_v44  ;;  %6501 = vst.msk [vmem:[#allocation2 + $0x68] sm:$0xff] %vm6439_vm0, %v12077_v6  ;;  %v5656_v62 = vmul.f32 %v19808_v36, %v4984_v60  ;;  %v19809_v8 = vld [vmem:[#allocation76_spill] sm:$0xff]  ;;  %v4475_v63 = vpop.f32.mrb[19].mxu0  ;;  %v4986_v6 = vadd.f32 %v13123_v48, %v17131_v21 }
 0x21a   :  { %6500 = vst.msk [vmem:[#allocation2 + $0x60] sm:$0xff] %vm6439_vm0, %v12076_v57  ;;  %v6471_v23 = vadd.f32 %v17277_v9, %v6326_v14  ;;  %v6470_v32 = vadd.f32 %v17315_v25, %v6325_v40  ;;  %v5655_v27 = vmul.f32 %v19809_v8, %v4983_v54  ;;  %v9552_v18 = vld [vmem:[%s19320_s7 + $0xe8] sm:$0xff]  ;;  %13291 = vmatpush3.bf16.msra.mxu1 %v17289_v42  ;;  %v6508_v58 = vsel %vm6476_vm12, 0.0, %v6468_v55  ;;  %v19811_v14 = vld [vmem:[#allocation84_spill] sm:$0xff]  ;;  %v17395_v36 = vpop.f32.mrb[26].mxu1  ;;  %v17404_v8 = vpop.permute.xlu1 %5616 }
 0x21b   :  { %v4985_v57 = vadd.f32 %v17131_v21, %v4475_v63  ;;  %v6514_v9 = vmul.f32 0.5, %v6506_v1  ;;  %v19810_v25 = vld [vmem:[#allocation83_spill] sm:$0xff]  ;;  %v9890_v40 = vld [vmem:[%s19321_s8 + $0xf8] sm:$0xff]  ;;  %19812 = vst [vmem:[#allocation61_spill] sm:$0xff] %v17395_v36  ;;  %v17400_v48 = vmul.f32 0.5, %v6509_v35  ;;  %19814 = vst [vmem:[#allocation73_spill] sm:$0xff] %v17404_v8 }
 0x21c   :  { %vm6479_vm13 = vcmp.ge.f32.partialorder %v6471_v23, 1.0  ;;  %vm6478_vm14 = vcmp.ge.f32.partialorder %v6470_v32, 1.0  ;;  %v6328_v60 = vadd.f32 %v19810_v25, %v5656_v62  ;;  %v6327_v54 = vadd.f32 %v19811_v14, %v5655_v27  ;;  %9728 = vperm.xlu1 %13742, %v9554_v30   ;;  %9718 = vperm.xlu0 %13741, %v9552_v18   ;;  %v13126_v1 = vpop.f32.mrb[20].mxu0  ;;  %v17402_v62 = vpop.f32.mrb[27].mxu1  ;;  %v19815_v25 = vld [vmem:[#allocation77_spill] sm:$0xff]  ;;  %v19816_v14 = vld [vmem:[#allocation78_spill] sm:$0xff] }
 0x21d   :  { %v12079_v42 = vsel %vm6479_vm13, 1.0, %v19772_v46  ;;  %v6511_v55 = vsel %vm6479_vm13, 0.0, %v6471_v23  ;;  %v12078_v63 = vsel %vm6478_vm14, 1.0, %v19772_v46  ;;  %19813 = vst [vmem:[#allocation62_spill] sm:$0xff] %v17402_v62  ;;  %v5658_v23 = vmul.f32 %v19815_v25, %v4986_v6  ;;  %v4485_v10 = vpop.f32.mrb[21].mxu0  ;;  %v9888_v35 = vld [vmem:[%s19321_s8 + $0xe8] sm:$0xff]  ;;  %v17417_v36 = vpop.permute.xlu0 %5611 }
 0x21e   :  { %6503 = vst.msk [vmem:[#allocation2 + $0x78] sm:$0xff] %vm6439_vm0, %v12079_v42  ;;  %6502 = vst.msk [vmem:[#allocation2 + $0x70] sm:$0xff] %vm6439_vm0, %v12078_v63  ;;  %v6521_v30 = vadd.f32 %v17318_v16, %v6328_v60  ;;  %v6520_v27 = vadd.f32 %v6512_v52, %v6327_v54  ;;  %v5657_v44 = vmul.f32 %v19816_v14, %v4985_v57  ;;  %v6510_v18 = vsel %vm6478_vm14, 0.0, %v6470_v32  ;;  %v7074_v63 = vld [vmem:[#allocation2 + $0x50] ss:$2 sm:$0xff]  ;;  %v19819_v6 = vld [vmem:[#allocation86_spill] sm:$0xff] }
 0x21f   :  { %v4988_v8 = vadd.f32 %v13126_v1, %v17131_v21  ;;  %v4987_v42 = vadd.f32 %v17131_v21, %v4485_v10  ;;  %v6516_v62 = vmul.f32 0.5, %v6508_v58  ;;  %19817 = vst [vmem:[#allocation74_spill] sm:$0xff] %v17417_v36  ;;  %v19818_v16 = vld [vmem:[#allocation85_spill] sm:$0xff]  ;;  %v17424_v54 = vpop.f32.mrb[28].mxu1  ;;  %v17429_v14 = vmul.f32 0.5, %v6511_v55  ;;  %v19823_v36 = vld [vmem:[#allocation80_spill] sm:$0xff] }
 0x220   :  { %vm6529_vm15 = vcmp.ge.f32.partialorder %v6521_v30, 1.0  ;;  %vm6528_vm2 = vcmp.ge.f32.partialorder %v6520_v27, 1.0  ;;  %v6330_v52 = vadd.f32 %v19818_v16, %v5658_v23  ;;  %v6329_v57 = vadd.f32 %v19819_v6, %v5657_v44  ;;  %10064 = vperm.xlu1 %13742, %v9890_v40   ;;  %v7170_v60 = vld [vmem:[#allocation2 + $0x51] ss:$2 sm:$0xff]  ;;  %19820 = vst [vmem:[#allocation75_spill] sm:$0xff] %v17424_v54  ;;  %10054 = vperm.xlu0 %13741, %v9888_v35   ;;  %v13129_v25 = vpop.f32.mrb[22].mxu0 }
 0x221   :  { %v9558_v32 = vld [vmem:[%s19320_s7 + $0x118] sm:$0xff]  ;;  %v12081_v10 = vsel %vm6529_vm15, 1.0, %v19772_v46  ;;  %v6561_v58 = vsel %vm6529_vm15, 0.0, %v6521_v30  ;;  %v12080_v1 = vsel %vm6528_vm2, 1.0, %v19772_v46  ;;  %v17431_v23 = vpop.f32.mrb[29].mxu1  ;;  %v19822_v16 = vld [vmem:[#allocation79_spill] sm:$0xff]  ;;  %v5659_v54 = vmul.f32 %v19823_v36, %v4987_v42 }
 0x222   :  { %19821 = vst [vmem:[#allocation76_spill] sm:$0xff] %v17431_v23  ;;  %6553 = vst.msk [vmem:[#allocation2 + $0x88] sm:$0xff] %vm6439_vm0, %v12081_v10  ;;  %v6523_v44 = vadd.f32 %v6515_v37, %v6330_v52  ;;  %v6522_v40 = vadd.f32 %v6514_v9, %v6329_v57  ;;  %v5660_v6 = vmul.f32 %v19822_v16, %v4988_v8  ;;  %v7072_v30 = vld [vmem:[#allocation2 + $0x40] ss:$2 sm:$0xff]  ;;  %v7168_v59 = vld [vmem:[#allocation2 + $0x41] ss:$2 sm:$0xff]  ;;  %v17445_v9 = vpop.permute.xlu1 %5626 }
 0x223   :  { %6552 = vst.msk [vmem:[#allocation2 + $0x80] sm:$0xff] %vm6439_vm0, %v12080_v1  ;;  %v4495_v0 = vpop.f32.mrb[23].mxu0  ;;  %v9556_v55 = vld [vmem:[%s19320_s7 + $0x108] sm:$0xff]  ;;  %v6560_v35 = vsel %vm6528_vm2, 0.0, %v6520_v27  ;;  %v4990_v23 = vadd.f32 %v13129_v25, %v17131_v21  ;;  %v17442_v10 = vmax.f32 %v7074_v63, %v7170_v60  ;;  %19825 = vst [vmem:[#allocation84_spill] sm:$0xff] %v17445_v9  ;;  %v19827_v42 = vld [vmem:[#allocation88_spill] sm:$0xff]  ;;  %v17454_v60 = vmax.f32 %v7072_v30, %v7168_v59 }
 0x224   :  { %v4989_v37 = vadd.f32 %v17131_v21, %v4495_v0  ;;  %vm6531_vm3 = vcmp.ge.f32.partialorder %v6523_v44, 1.0  ;;  %vm6530_vm4 = vcmp.ge.f32.partialorder %v6522_v40, 1.0  ;;  %v19826_v36 = vld [vmem:[#allocation87_spill] sm:$0xff]  ;;  %v6331_v52 = vadd.f32 %v19827_v42, %v5659_v54  ;;  %9748 = vperm.xlu1 %13742, %v9558_v32   ;;  %v17449_v57 = vpop.f32.mrb[30].mxu1  ;;  %9738 = vperm.xlu0 %13741, %v9556_v55   ;;  %v13132_v0 = vpop.f32.mrb[24].mxu0  ;;  %v9894_v25 = vld [vmem:[%s19321_s8 + $0x118] sm:$0xff] }
 0x225   :  { %19824 = vst [vmem:[#allocation83_spill] sm:$0xff] %v17442_v10  ;;  %v6332_v8 = vadd.f32 %v19826_v36, %v5660_v6  ;;  %19828 = vst [vmem:[#allocation77_spill] sm:$0xff] %v17449_v57  ;;  %v12083_v1 = vsel %vm6531_vm3, 1.0, %v19772_v46  ;;  %v6563_v27 = vsel %vm6531_vm3, 0.0, %v6523_v44  ;;  %v12082_v63 = vsel %vm6530_vm4, 1.0, %v19772_v46  ;;  %v17459_v16 = vpop.f32.mrb[31].mxu1  ;;  %v17461_v54 = vpop.permute.xlu0 %5621 }
 0x226   :  { %19829 = vst [vmem:[#allocation78_spill] sm:$0xff] %v17454_v60  ;;  %19830 = vst [vmem:[#allocation85_spill] sm:$0xff] %v17459_v16  ;;  %v17466_v32 = vsel %vm6530_vm4, 0.0, %v6522_v40  ;;  %v6524_v44 = vadd.f32 %v6516_v62, %v6331_v52  ;;  %v19832_v6 = vld [vmem:[#allocation24_spill] sm:$0xff]  ;;  %v4505_v55 = vpop.f32.mrb[25].mxu0  ;;  %v9892_v36 = vld [vmem:[%s19321_s8 + $0x108] sm:$0xff]  ;;  %v8461_v42 = vpack.c.bf16 %v17442_v10, %v17454_v60 }
 0x227   :  { %19831 = vst [vmem:[#allocation86_spill] sm:$0xff] %v17461_v54  ;;  %6555 = vst.msk [vmem:[#allocation2 + $0x98] sm:$0xff] %vm6439_vm0, %v12083_v1  ;;  %v6525_v59 = vadd.f32 %v17400_v48, %v6332_v8  ;;  %v5662_v30 = vmul.f32 %v19832_v6, %v4990_v23  ;;  %v19833_v54 = vld [vmem:[#allocation81_spill] sm:$0xff]  ;;  %v6518_v9 = vmul.f32 0.5, %v6510_v18  ;;  %v6569_v8 = vmul.f32 0.5, %v6561_v58  ;;  %v9560_v6 = vld [vmem:[%s19320_s7 + $0x128] sm:$0xff] }
 0x228   :  { %6554 = vst.msk [vmem:[#allocation2 + $0x90] sm:$0xff] %vm6439_vm0, %v12082_v63  ;;  %v5661_v1 = vmul.f32 %v19833_v54, %v4989_v37  ;;  %v4992_v63 = vadd.f32 %v13132_v0, %v17131_v21  ;;  %v7076_v40 = vld [vmem:[#allocation2 + $0x60] ss:$2 sm:$0xff]  ;;  %v9562_v48 = vld [vmem:[%s19320_s7 + $0x138] sm:$0xff]  ;;  %vm6532_vm6 = vcmp.ge.f32.partialorder %v6524_v44, 1.0  ;;  %10084 = vperm.xlu1 %13742, %v9894_v25   ;;  %13246 = vmatprep.mubr.msk.bf16.mxu1 %vm6439_vm0, %v8461_v42  ;;  %v13135_v10 = vpop.f32.mrb[26].mxu0 }
 0x229   :  { %vm6533_vm5 = vcmp.ge.f32.partialorder %v6525_v59, 1.0  ;;  %v19834_v62 = vld [vmem:[#allocation89_spill] sm:$0xff]  ;;  %v12084_v0 = vsel %vm6532_vm6, 1.0, %v19772_v46  ;;  %v17488_v54 = vsel %vm6532_vm6, 0.0, %v6524_v44  ;;  %10074 = vperm.xlu0 %13741, %v9892_v36   ;;  %v19836_v25 = vld [vmem:[#allocation90_spill] sm:$0xff]  ;;  %v4991_v16 = vadd.f32 %v17131_v21, %v4505_v55  ;;  %v4515_v20 = vpop.f32.mrb[27].mxu0 }
 0x22a   :  { %v6334_v23 = vadd.f32 %v19834_v62, %v5662_v30  ;;  %v7172_v52 = vld [vmem:[#allocation2 + $0x61] ss:$2 sm:$0xff]  ;;  %v12085_v18 = vsel %vm6533_vm5, 1.0, %v19772_v46  ;;  %v17485_v37 = vsel %vm6533_vm5, 0.0, %v6525_v59  ;;  %v17491_v30 = vpop.f32.mrb[32].mxu1  ;;  %6556 = vst.msk [vmem:[#allocation2 + $0xa0] sm:$0xff] %vm6439_vm0, %v12084_v0  ;;  %v6333_v62 = vadd.f32 %v19836_v25, %v5661_v1  ;;  %v17504_v0 = vpop.permute.xlu1 %5636 }
 0x22b   :  { %19835 = vst [vmem:[#allocation79_spill] sm:$0xff] %v17491_v30  ;;  %6557 = vst.msk [vmem:[#allocation2 + $0xa8] sm:$0xff] %vm6439_vm0, %v12085_v18  ;;  %v19837_v59 = vld [vmem:[#allocation91_spill] sm:$0xff]  ;;  %v17499_v42 = vpop.f32.mrb[33].mxu1  ;;  %v6568_v36 = vmul.f32 0.5, %v6560_v35  ;;  %v4994_v30 = vadd.f32 %v13135_v10, %v17131_v21  ;;  %v6571_v13 = vmul.f32 0.5, %v6563_v27  ;;  %v17502_v18 = vmax.f32 %v7076_v40, %v7172_v52 }
 0x22c   :  { %v6527_v58 = vadd.f32 %v17429_v14, %v6334_v23  ;;  %v5664_v60 = vmul.f32 %v19837_v59, %v4992_v63  ;;  %v7078_v44 = vld [vmem:[#allocation2 + $0x70] ss:$2 sm:$0xff]  ;;  %v7174_v57 = vld [vmem:[#allocation2 + $0x71] ss:$2 sm:$0xff]  ;;  %19838 = vst [vmem:[#allocation80_spill] sm:$0xff] %v17499_v42  ;;  %19840 = vst [vmem:[#allocation88_spill] sm:$0xff] %v17504_v0  ;;  %v17506_v14 = vpop.permute.xlu0 %5631  ;;  %v6526_v1 = vadd.f32 %v6518_v9, %v6333_v62  ;;  %9768 = vperm.xlu1 %13742, %v9562_v48  }
 0x22d   :  { %19839 = vst [vmem:[#allocation87_spill] sm:$0xff] %v17502_v18  ;;  %19841 = vst [vmem:[#allocation24_spill] sm:$0xff] %v17506_v14  ;;  %v19842_v55 = vld [vmem:[#allocation92_spill] sm:$0xff]  ;;  %v19843_v35 = vld [vmem:[#allocation93_spill] sm:$0xff]  ;;  %v17512_v10 = vmax.f32 %v7078_v44, %v7174_v57  ;;  %9758 = vperm.xlu0 %13741, %v9560_v6   ;;  %v13138_v27 = vpop.f32.mrb[28].mxu0  ;;  %v17517_v52 = vpop.f32.mrb[34].mxu1 }
 0x22e   :  { %vm6535_vm7 = vcmp.ge.f32.partialorder %v6527_v58, 1.0  ;;  %v6336_v63 = vadd.f32 %v15909_v45, %v5664_v60  ;;  %v5663_v23 = vmul.f32 %v19842_v55, %v4991_v16  ;;  %v5666_v42 = vmul.f32 %v19843_v35, %v4994_v30  ;;  %v9898_v40 = vld [vmem:[%s19321_s8 + $0x138] sm:$0xff]  ;;  %v4525_v16 = vpop.f32.mrb[29].mxu0  ;;  %v9896_v57 = vld [vmem:[%s19321_s8 + $0x128] sm:$0xff]  ;;  %v17525_v48 = vpop.f32.mrb[35].mxu1 }
 0x22f   :  { %v12087_v25 = vsel %vm6535_vm7, 1.0, %v19772_v46  ;;  %v6567_v59 = vsel %vm6535_vm7, 0.0, %v6527_v58  ;;  %19844 = vst [vmem:[#allocation81_spill] sm:$0xff] %v17512_v10  ;;  %vm6534_vm8 = vcmp.ge.f32.partialorder %v6526_v1, 1.0  ;;  %v4993_v60 = vadd.f32 %v17131_v21, %v4515_v20  ;;  %v19845_v20 = vld [vmem:[#allocation94_spill] sm:$0xff]  ;;  %v17545_v35 = vpop.f32.mrb[36].mxu1 }
 0x230   :  { %6559 = vst.msk [vmem:[#allocation2 + $0xb8] sm:$0xff] %vm6439_vm0, %v12087_v25  ;;  %v6577_v45 = vadd.f32 %v6569_v8, %v6336_v63  ;;  %v6335_v9 = vadd.f32 %v15911_v28, %v5663_v23  ;;  %v12086_v6 = vsel %vm6534_vm8, 1.0, %v19772_v46  ;;  %v17528_v30 = vsel %vm6534_vm8, 0.0, %v6526_v1  ;;  %10104 = vperm.xlu1 %13742, %v9898_v40   ;;  %v9566_v63 = vld [vmem:[%s19320_s7 + $0x158] sm:$0xff]  ;;  %v13141_v23 = vpop.f32.mrb[30].mxu0 }
 0x231   :  { %v6338_v58 = vadd.f32 %v15932_v39, %v5666_v42  ;;  %v8462_v8 = vpack.c.bf16 %v17512_v10, %v17502_v18  ;;  %6558 = vst.msk [vmem:[#allocation2 + $0xb0] sm:$0xff] %vm6439_vm0, %v12086_v6  ;;  %v5665_v62 = vmul.f32 %v19845_v20, %v4993_v60  ;;  %v6570_v44 = vmul.f32 0.5, %v17466_v32  ;;  %v9564_v39 = vld [vmem:[%s19320_s7 + $0x148] sm:$0xff]  ;;  %10094 = vperm.xlu0 %13741, %v9896_v57   ;;  %v4535_v60 = vpop.f32.mrb[31].mxu0  ;;  %v17551_v6 = vpop.f32.mrb[37].mxu1 }
 0x232   :  { %vm6585_vm9 = vcmp.ge.f32.partialorder %v6577_v45, 1.0  ;;  %v6576_v28 = vadd.f32 %v6568_v36, %v6335_v9  ;;  %v4996_v36 = vadd.f32 %v13138_v27, %v17131_v21  ;;  %v7080_v32 = vld [vmem:[#allocation2 + $0x80] ss:$2 sm:$0xff]  ;;  %v7176_v25 = vld [vmem:[#allocation2 + $0x81] ss:$2 sm:$0xff]  ;;  %v6573_v9 = vmul.f32 0.5, %v17485_v37  ;;  %v17553_v27 = vpop.permute.xlu1 %6278 }
 0x233   :  { %v12089_v42 = vsel %vm6585_vm9, 1.0, %v19772_v46  ;;  %v6617_v1 = vsel %vm6585_vm9, 0.0, %v6577_v45  ;;  %v6579_v55 = vadd.f32 %v6571_v13, %v6338_v58  ;;  %13247 = vmatmul.mubr.msk.bf16.gmra.mrb[56].mxu1 %vm6439_vm0, %v8462_v8  ;;  %v6337_v40 = vadd.f32 %v15934_v26, %v5665_v62  ;;  %v7082_v13 = vld [vmem:[#allocation2 + $0x90] ss:$2 sm:$0xff]  ;;  %19846 = vst [vmem:[#allocation89_spill] sm:$0xff] %v17553_v27 }
 0x234   :  { %6609 = vst.msk [vmem:[#allocation2 + $0xc8] sm:$0xff] %vm6439_vm0, %v12089_v42  ;;  %vm6584_vm10 = vcmp.ge.f32.partialorder %v6576_v28, 1.0  ;;  %v4995_v45 = vadd.f32 %v17131_v21, %v4525_v16  ;;  %v5668_v8 = vmul.f32 %v15852_v33, %v4996_v36  ;;  %v7178_v20 = vld [vmem:[#allocation2 + $0x91] ss:$2 sm:$0xff]  ;;  %v17559_v42 = vpop.permute.xlu0 %6273  ;;  %9788 = vperm.xlu1 %13742, %v9566_v63   ;;  %v6572_v10 = vmul.f32 0.5, %v17488_v54  ;;  %v13144_v18 = vpop.f32.mrb[32].mxu0 }
 0x235   :  { %v12088_v57 = vsel %vm6584_vm10, 1.0, %v19772_v46  ;;  %v17556_v58 = vsel %vm6584_vm10, 0.0, %v6576_v28  ;;  %vm6587_vm12 = vcmp.ge.f32.partialorder %v6579_v55, 1.0  ;;  %19847 = vst [vmem:[#allocation90_spill] sm:$0xff] %v17559_v42  ;;  %v6578_v16 = vadd.f32 %v6570_v44, %v6337_v40  ;;  %9778 = vperm.xlu0 %13741, %v9564_v39   ;;  %v9900_v54 = vld [vmem:[%s19321_s8 + $0x148] sm:$0xff] }
 0x236   :  { %6608 = vst.msk [vmem:[#allocation2 + $0xc0] sm:$0xff] %vm6439_vm0, %v12088_v57  ;;  %v12091_v26 = vsel %vm6587_vm12, 1.0, %v19772_v46  ;;  %v17563_v37 = vsel %vm6587_vm12, 0.0, %v6579_v55  ;;  %v5667_v62 = vmul.f32 %v15854_v34, %v4995_v45  ;;  %v6340_v28 = vadd.f32 %v15953_v4, %v5668_v8  ;;  %v9902_v55 = vld [vmem:[%s19321_s8 + $0x158] sm:$0xff]  ;;  %v17573_v57 = vpop.f32.mrb[38].mxu1  ;;  %v4545_v4 = vpop.f32.mrb[33].mxu0 }
 0x237   :  { %6611 = vst.msk [vmem:[#allocation2 + $0xd8] sm:$0xff] %vm6439_vm0, %v12091_v26  ;;  %v4998_v33 = vadd.f32 %v13141_v23, %v17131_v21  ;;  %v6575_v36 = vmul.f32 0.5, %v6567_v59  ;;  %vm6586_vm13 = vcmp.ge.f32.partialorder %v6578_v16, 1.0  ;;  %v17576_v44 = vmax.f32 %v7080_v32, %v7176_v25  ;;  %v17583_v59 = vpop.f32.mrb[39].mxu1  ;;  %v9570_v8 = vld [vmem:[%s19320_s7 + $0x178] sm:$0xff] }
 0x238   :  { %v6339_v34 = vadd.f32 %v15955_v5, %v5667_v62  ;;  %v17578_v63 = vmax.f32 %v7082_v13, %v7178_v20  ;;  %v12090_v39 = vsel %vm6586_vm13, 1.0, %v19772_v46  ;;  %v17586_v23 = vsel %vm6586_vm13, 0.0, %v6578_v16  ;;  %10124 = vperm.xlu1 %13742, %v9902_v55   ;;  %v17597_v20 = vpop.permute.xlu1 %6288  ;;  %v13147_v16 = vpop.f32.mrb[34].mxu0  ;;  %v7084_v62 = vld [vmem:[#allocation2 + $0xa0] ss:$2 sm:$0xff] }
 0x239   :  { %19848 = vst [vmem:[#allocation91_spill] sm:$0xff] %v17576_v44  ;;  %v6581_v40 = vadd.f32 %v6573_v9, %v6340_v28  ;;  %v5670_v45 = vmul.f32 %v15876_v15, %v4998_v33  ;;  %6610 = vst.msk [vmem:[#allocation2 + $0xd0] sm:$0xff] %vm6439_vm0, %v12090_v39  ;;  %v4997_v25 = vadd.f32 %v17131_v21, %v4535_v60  ;;  %v6574_v13 = vmul.f32 0.5, %v17528_v30  ;;  %v19851_v9 = vld [vmem:[#allocation96_spill] sm:$0xff]  ;;  %v9568_v30 = vld [vmem:[%s19320_s7 + $0x168] sm:$0xff]  ;;  %v17604_v60 = vpop.permute.xlu0 %6283 }
 0x23a   :  { %19849 = vst [vmem:[#allocation92_spill] sm:$0xff] %v17578_v63  ;;  %v6580_v5 = vadd.f32 %v6572_v10, %v6339_v34  ;;  %v8463_v32 = vpack.c.bf16 %v17578_v63, %v17576_v44  ;;  %19850 = vst [vmem:[#allocation93_spill] sm:$0xff] %v17597_v20  ;;  %v5000_v26 = vadd.f32 %v13144_v18, %v17131_v21  ;;  %v6625_v10 = vmul.f32 0.5, %v6617_v1  ;;  %v19853_v55 = vld [vmem:[#allocation95_spill] sm:$0xff]  ;;  %v4555_v1 = vpop.f32.mrb[35].mxu0 }
 0x23b   :  { %vm6589_vm14 = vcmp.ge.f32.partialorder %v6581_v40, 1.0  ;;  %v6342_v15 = vadd.f32 %v19851_v9, %v5670_v45  ;;  %10114 = vperm.xlu0 %13741, %v9900_v54   ;;  %19852 = vst [vmem:[#allocation94_spill] sm:$0xff] %v17604_v60  ;;  %v5669_v34 = vmul.f32 %v19853_v55, %v4997_v25  ;;  %v7180_v18 = vld [vmem:[#allocation2 + $0xa1] ss:$2 sm:$0xff]  ;;  %v4999_v14 = vadd.f32 %v17131_v21, %v4545_v4  ;;  %v7086_v55 = vld [vmem:[#allocation2 + $0xb0] ss:$2 sm:$0xff] }
 0x23c   :  { %v12093_v28 = vsel %vm6589_vm14, 1.0, %v19772_v46  ;;  %v17607_v33 = vsel %vm6589_vm14, 0.0, %v6581_v40  ;;  %vm6588_vm15 = vcmp.ge.f32.partialorder %v6580_v5, 1.0  ;;  %13250 = vmatprep.mubr.msk.bf16.mxu1 %vm6439_vm0, %v8463_v32  ;;  %v19854_v9 = vld [vmem:[#allocation33_spill] sm:$0xff]  ;;  %v6624_v32 = vmul.f32 0.5, %v17556_v58  ;;  %9808 = vperm.xlu1 %13742, %v9570_v8  }
 0x23d   :  { %6613 = vst.msk [vmem:[#allocation2 + $0xe8] sm:$0xff] %vm6439_vm0, %v12093_v28  ;;  %v12092_v54 = vsel %vm6588_vm15, 1.0, %v19772_v46  ;;  %v17613_v39 = vsel %vm6588_vm15, 0.0, %v6580_v5  ;;  %v6583_v45 = vadd.f32 %v6575_v36, %v6342_v15  ;;  %v5672_v63 = vmul.f32 %v19854_v9, %v5000_v26  ;;  %v19855_v40 = vld [vmem:[#allocation97_spill] sm:$0xff]  ;;  %v17621_v28 = vpop.f32.mrb[40].mxu1  ;;  %v13150_v26 = vpop.f32.mrb[36].mxu0 }
 0x23e   :  { %6612 = vst.msk [vmem:[#allocation2 + $0xe0] sm:$0xff] %vm6439_vm0, %v12092_v54  ;;  %v6341_v44 = vadd.f32 %v19855_v40, %v5669_v34  ;;  %v5002_v25 = vadd.f32 %v13147_v16, %v17131_v21  ;;  %v7182_v0 = vld [vmem:[#allocation2 + $0xb1] ss:$2 sm:$0xff]  ;;  %v6627_v5 = vmul.f32 0.5, %v17563_v37  ;;  %v17625_v15 = vmax.f32 %v7084_v62, %v7180_v18  ;;  %v17630_v4 = vpop.f32.mrb[41].mxu1  ;;  %v19857_v54 = vld [vmem:[#allocation98_spill] sm:$0xff]  ;;  %v17646_v60 = vpop.permute.xlu0 %6293 }
 0x23f   :  { %vm6591_vm2 = vcmp.ge.f32.partialorder %v6583_v45, 1.0  ;;  %v6344_v36 = vadd.f32 %v16069_v3, %v5672_v63  ;;  %9798 = vperm.xlu0 %13741, %v9568_v30   ;;  %v9906_v58 = vld [vmem:[%s19321_s8 + $0x178] sm:$0xff]  ;;  %v5671_v9 = vmul.f32 %v19857_v54, %v4999_v14  ;;  %v4565_v3 = vpop.f32.mrb[37].mxu0  ;;  %v9904_v37 = vld [vmem:[%s19321_s8 + $0x168] sm:$0xff]  ;;  %v17639_v63 = vpop.permute.xlu1 %6298  ;;  %v17643_v40 = vmax.f32 %v7086_v55, %v7182_v0  ;;  %19861 = vst [vmem:[#allocation97_spill] sm:$0xff] %v17646_v60 }
 0x240   :  { %19856 = vst [vmem:[#allocation96_spill] sm:$0xff] %v17625_v15  ;;  %v12095_v16 = vsel %vm6591_vm2, 1.0, %v19772_v46  ;;  %v17633_v8 = vsel %vm6591_vm2, 0.0, %v6583_v45  ;;  %v6582_v34 = vadd.f32 %v6574_v13, %v6341_v44  ;;  %19858 = vst [vmem:[#allocation95_spill] sm:$0xff] %v17639_v63  ;;  %v19859_v30 = vld [vmem:[#allocation36_spill] sm:$0xff]  ;;  %v5001_v45 = vadd.f32 %v17131_v21, %v4555_v1  ;;  %10144 = vperm.xlu1 %13742, %v9906_v58   ;;  %v17651_v54 = vpop.f32.mrb[42].mxu1 }
 0x241   :  { %6615 = vst.msk [vmem:[#allocation2 + $0xf8] sm:$0xff] %vm6439_vm0, %v12095_v16  ;;  %v6633_v62 = vadd.f32 %v6625_v10, %v6344_v36  ;;  %v5674_v18 = vmul.f32 %v19859_v30, %v5002_v25  ;;  %19860 = vst [vmem:[#allocation33_spill] sm:$0xff] %v17643_v40  ;;  %v6343_v14 = vadd.f32 %v16071_v43, %v5671_v9  ;;  %v6626_v44 = vmul.f32 0.5, %v17586_v23  ;;  %v13153_v1 = vpop.f32.mrb[38].mxu0  ;;  %v17655_v25 = vpop.f32.mrb[43].mxu1  ;;  %v19863_v9 = vld [vmem:[#allocation41_spill] sm:$0xff] }
 0x242   :  { %vm6590_vm3 = vcmp.ge.f32.partialorder %v6582_v34, 1.0  ;;  %v5004_v13 = vadd.f32 %v13150_v26, %v17131_v21  ;;  %v8464_v55 = vpack.c.bf16 %v17643_v40, %v17625_v15  ;;  %v7088_v26 = vld [vmem:[#allocation2 + $0xc0] ss:$2 sm:$0xff]  ;;  %v4575_v58 = vpop.f32.mrb[39].mxu0  ;;  %v6629_v30 = vmul.f32 0.5, %v17607_v33  ;;  %v19864_v40 = vld [vmem:[#allocation12_spill] sm:$0xff] }
 0x243   :  { %v12094_v10 = vsel %vm6590_vm3, 1.0, %v19772_v46  ;;  %v6622_v36 = vsel %vm6590_vm3, 0.0, %v6582_v34  ;;  %vm6641_vm4 = vcmp.ge.f32.partialorder %v6633_v62, 1.0  ;;  %v6346_v0 = vadd.f32 %v16086_v2, %v5674_v18  ;;  %10134 = vperm.xlu0 %13741, %v9904_v37   ;;  %v19862_v2 = vld [vmem:[#allocation38_spill] sm:$0xff]  ;;  %v7090_v18 = vld [vmem:[#allocation2 + $0xd0] ss:$2 sm:$0xff] }
 0x244   :  { %6614 = vst.msk [vmem:[#allocation2 + $0xf0] sm:$0xff] %vm6439_vm0, %v12094_v10  ;;  %v12097_v43 = vsel %vm6641_vm4, 1.0, %v19772_v46  ;;  %v17659_v23 = vsel %vm6641_vm4, 0.0, %v6633_v62  ;;  %v6632_v21 = vadd.f32 %v6624_v32, %v6343_v14  ;;  %v5673_v34 = vmul.f32 %v19862_v2, %v5001_v45  ;;  %v7184_v10 = vld [vmem:[#allocation2 + $0xc1] ss:$2 sm:$0xff]  ;;  %13251 = vmatmul.mubr.msk.bf16.gmra.mrb[60].mxu1 %vm6439_vm0, %v8464_v55  ;;  %v13156_v55 = vpop.f32.mrb[40].mxu0 }
 0x245   :  { %6665 = vst.msk [vmem:[#allocation2 + $0x108] sm:$0xff] %vm6439_vm0, %v12097_v43  ;;  %v6635_v16 = vadd.f32 %v6627_v5, %v6346_v0  ;;  %v5676_v37 = vmul.f32 %v19863_v9, %v5004_v13  ;;  %v17671_v32 = vld [vmem:[%s19315_s2] ss:$0 sm:$0xff]  ;;  %v6628_v5 = vmul.f32 0.5, %v17613_v39  ;;  %v7186_v14 = vld [vmem:[#allocation2 + $0xd1] ss:$2 sm:$0xff]  ;;  %v17694_v20 = vmax.f32 %v7088_v26, %v7184_v10 }
 0x246   :  { %vm6640_vm5 = vcmp.ge.f32.partialorder %v6632_v21, 1.0  ;;  %v5003_v62 = vadd.f32 %v17671_v32, %v4565_v3  ;;  %v5006_v45 = vadd.f32 %v17671_v32, %v13153_v1  ;;  %v17676_v13 = vpop.f32.mrb[44].mxu1  ;;  %v6345_v43 = vadd.f32 %v16088_v31, %v5673_v34  ;;  %v13746_v2 = vld [vmem:[%s19318_s5 + $0x8] sm:$0xff]   ;;  %v4585_v15 = vpop.f32.mrb[41].mxu0 }
 0x247   :  { %v12096_v33 = vsel %vm6640_vm5, 1.0, %v19772_v46  ;;  %v17679_v0 = vsel %vm6640_vm5, 0.0, %v6632_v21  ;;  %vm6643_vm6 = vcmp.ge.f32.partialorder %v6635_v16, 1.0  ;;  %v17685_v3 = vpop.f32.mrb[45].mxu1  ;;  %v6348_v9 = vadd.f32 %v16104_v49, %v5676_v37  ;;  %v19865_v34 = vld [vmem:[#allocation43_spill] sm:$0xff]  ;;  %13292 = vmatprep.subr.bf16.mxu1 %v13746_v2 }
 0x248   :  { %6664 = vst.msk [vmem:[#allocation2 + $0x100] sm:$0xff] %vm6439_vm0, %v12096_v33  ;;  %v12099_v39 = vsel %vm6643_vm6, 1.0, %v19772_v46  ;;  %v6675_v1 = vsel %vm6643_vm6, 0.0, %v6635_v16  ;;  %v5675_v21 = vmul.f32 %v19864_v40, %v5003_v62  ;;  %v6634_v31 = vadd.f32 %v6626_v44, %v6345_v43  ;;  %13293 = vmatpush3.bf16.msra.mxu1 %v13746_v2  ;;  %v17700_v40 = vpop.f32.mrb[46].mxu1  ;;  %v7188_v2 = vld [vmem:[#allocation2 + $0xe1] ss:$2 sm:$0xff] }
 0x249   :  { %6667 = vst.msk [vmem:[#allocation2 + $0x118] sm:$0xff] %vm6439_vm0, %v12099_v39  ;;  %v5678_v60 = vmul.f32 %v19865_v34, %v5006_v45  ;;  %v6631_v63 = vmul.f32 0.5, %v17633_v8  ;;  %v6637_v42 = vadd.f32 %v6629_v30, %v6348_v9  ;;  %v17697_v27 = vmax.f32 %v7090_v18, %v7186_v14  ;;  %v13159_v8 = vpop.f32.mrb[42].mxu0  ;;  %v17704_v26 = vpop.f32.mrb[47].mxu1  ;;  %v19866_v14 = vld [vmem:[#allocation45_spill] sm:$0xff] }
 0x24a   :  { %v6347_v33 = vadd.f32 %v16106_v17, %v5675_v21  ;;  %v5005_v49 = vadd.f32 %v17671_v32, %v4575_v58  ;;  %vm6642_vm7 = vcmp.ge.f32.partialorder %v6634_v31, 1.0  ;;  %v6630_v16 = vmul.f32 0.5, %v6622_v36  ;;  %v4595_v18 = vpop.f32.mrb[43].mxu0 }
 0x24b   :  { %v6350_v44 = vadd.f32 %v16118_v29, %v5678_v60  ;;  %v5008_v37 = vadd.f32 %v17671_v32, %v13156_v55  ;;  %v12098_v30 = vsel %vm6642_vm7, 1.0, %v19772_v46  ;;  %v6674_v10 = vsel %vm6642_vm7, 0.0, %v6634_v31  ;;  %v7092_v60 = vld [vmem:[#allocation2 + $0xe0] ss:$2 sm:$0xff]  ;;  %v7094_v55 = vld [vmem:[#allocation2 + $0xf0] ss:$2 sm:$0xff] }
 0x24c   :  { %vm6645_vm8 = vcmp.ge.f32.partialorder %v6637_v42, 1.0  ;;  %v6636_v17 = vadd.f32 %v6628_v5, %v6347_v33  ;;  %6666 = vst.msk [vmem:[#allocation2 + $0x110] sm:$0xff] %vm6439_vm0, %v12098_v30  ;;  %v8465_v29 = vpack.c.bf16 %v17697_v27, %v17694_v20  ;;  %v5677_v43 = vmul.f32 %v19866_v14, %v5005_v49  ;;  %v7190_v33 = vld [vmem:[#allocation2 + $0xf1] ss:$2 sm:$0xff] }
 0x24d   :  { %v12101_v58 = vsel %vm6645_vm8, 1.0, %v19772_v46  ;;  %v6677_v62 = vsel %vm6645_vm8, 0.0, %v6637_v42  ;;  %v6639_v45 = vadd.f32 %v6631_v63, %v6350_v44  ;;  %v5680_v5 = vmul.f32 %v16135_v11, %v5008_v37  ;;  %v13162_v63 = vpop.f32.mrb[44].mxu0 }
 0x24e   :  { %6669 = vst.msk [vmem:[#allocation2 + $0x128] sm:$0xff] %vm6439_vm0, %v12101_v58  ;;  %v17712_v36 = vmul.f32 0.5, %v6677_v62  ;;  %vm6644_vm9 = vcmp.ge.f32.partialorder %v6636_v17, 1.0  ;;  %13254 = vmatprep.mubr.msk.bf16.mxu1 %vm6439_vm0, %v8465_v29  ;;  %v6681_v42 = vmul.f32 0.5, %v17659_v23  ;;  %v6349_v11 = vadd.f32 %v16120_v51, %v5677_v43  ;;  %v4605_v49 = vpop.f32.mrb[45].mxu0 }
 0x24f   :  { %v12100_v39 = vsel %vm6644_vm9, 1.0, %v19772_v46  ;;  %v6676_v9 = vsel %vm6644_vm9, 0.0, %v6636_v17  ;;  %vm6647_vm10 = vcmp.ge.f32.partialorder %v6639_v45, 1.0  ;;  %v6352_v37 = vadd.f32 %v16199_v56, %v5680_v5 }
 0x250   :  { %6668 = vst.msk [vmem:[#allocation2 + $0x120] sm:$0xff] %vm6439_vm0, %v12100_v39  ;;  %v17720_v21 = vmul.f32 0.5, %v6676_v9  ;;  %v12103_v31 = vsel %vm6647_vm10, 1.0, %v19772_v46  ;;  %v6679_v34 = vsel %vm6647_vm10, 0.0, %v6639_v45  ;;  %v5007_v23 = vadd.f32 %v17671_v32, %v4585_v15  ;;  %v17733_v45 = vpop.f32.mrb[48].mxu1  ;;  %v13165_v56 = vpop.f32.mrb[46].mxu0 }
 0x251   :  { %6671 = vst.msk [vmem:[#allocation2 + $0x138] sm:$0xff] %vm6439_vm0, %v12103_v31  ;;  %v17725_v44 = vmul.f32 0.5, %v6679_v34  ;;  %v6680_v30 = vmul.f32 0.5, %v17679_v0  ;;  %v6638_v17 = vadd.f32 %v6630_v16, %v6349_v11  ;;  %v5010_v58 = vadd.f32 %v17671_v32, %v13159_v8  ;;  %v17739_v5 = vpop.f32.mrb[49].mxu1  ;;  %v7096_v16 = vld [vmem:[#allocation2 + $0x100] ss:$2 sm:$0xff] }
 0x252   :  { %v6683_v62 = vmul.f32 0.5, %v6675_v1  ;;  %v17731_v29 = vmax.f32 %v7092_v60, %v7188_v2  ;;  %v6689_v51 = vadd.f32 %v6681_v42, %v6352_v37  ;;  %v5679_v14 = vmul.f32 %v16137_v24, %v5007_v23  ;;  %v7192_v8 = vld [vmem:[#allocation2 + $0x101] ss:$2 sm:$0xff]  ;;  %v4615_v9 = vpop.f32.mrb[47].mxu0 }
 0x253   :  { %v17736_v43 = vmax.f32 %v7094_v55, %v7190_v33  ;;  %v5009_v39 = vadd.f32 %v17671_v32, %v4595_v18  ;;  %vm6646_vm12 = vcmp.ge.f32.partialorder %v6638_v17, 1.0  ;;  %v5682_v15 = vmul.f32 %v16150_v19, %v5010_v58  ;;  %v7098_v55 = vld [vmem:[#allocation2 + $0x110] ss:$2 sm:$0xff] }
 0x254   :  { %v6682_v0 = vmul.f32 0.5, %v6674_v10  ;;  %v13447_v1 = vadd.f32 %v13162_v63, %v17055_v38  ;;  %v12102_v60 = vsel %vm6646_vm12, 1.0, %v19772_v46  ;;  %v6678_v2 = vsel %vm6646_vm12, 0.0, %v6638_v17  ;;  %v7194_v38 = vld [vmem:[#allocation2 + $0x111] ss:$2 sm:$0xff]  ;;  %v17750_v63 = vpop.f32.mrb[50].mxu1 }
 0x255   :  { %19867 = vst [vmem:[#allocation98_spill] sm:$0xff] %v17736_v43  ;;  %vm6697_vm13 = vcmp.ge.f32.partialorder %v6689_v51, 1.0  ;;  %v6351_v24 = vadd.f32 %v16201_v50, %v5679_v14  ;;  %6670 = vst.msk [vmem:[#allocation2 + $0x130] sm:$0xff] %vm6439_vm0, %v12102_v60  ;;  %v17746_v18 = vmul.f32 0.5, %v6678_v2  ;;  %v6354_v10 = vadd.f32 %v16214_v7, %v5682_v15  ;;  %v13168_v33 = vpop.f32.mrb[48].mxu0 }
 0x256   :  { %v12105_v42 = vsel %vm6697_vm13, 1.0, %v19772_v46  ;;  %v6729_v19 = vsel %vm6697_vm13, 0.0, %v6689_v51  ;;  %v8466_v50 = vpack.c.bf16 %v17736_v43, %v17731_v29  ;;  %v5681_v11 = vmul.f32 %v16152_v61, %v5009_v39  ;;  %v4625_v58 = vpop.f32.mrb[49].mxu0  ;;  %v17761_v51 = vpop.f32.mrb[51].mxu1 }
 0x257   :  { %6721 = vst.msk [vmem:[#allocation2 + $0x148] sm:$0xff] %vm6439_vm0, %v12105_v42  ;;  %v17753_v31 = vmul.f32 0.5, %v6729_v19  ;;  %v6688_v34 = vadd.f32 %v6680_v30, %v6351_v24  ;;  %v6691_v37 = vadd.f32 %v6683_v62, %v6354_v10  ;;  %v5012_v23 = vadd.f32 %v17671_v32, %v13447_v1  ;;  %v19871_v42 = vld [vmem:[#allocation169_spill] sm:$0xff] }
 0x258   :  { %v13448_v17 = vadd.f32 %v4605_v49, %v17063_v12  ;;  %v13449_v7 = vadd.f32 %v13165_v56, %v17068_v41  ;;  %13255 = vmatmul.mubr.msk.bf16.gmra.mrb[64].mxu1 %vm6439_vm0, %v8466_v50  ;;  %v6353_v30 = vadd.f32 %v16216_v22, %v5681_v11  ;;  %v17765_v14 = vmax.f32 %v7096_v16, %v7192_v8  ;;  %v13171_v1 = vpop.f32.mrb[50].mxu0  ;;  %v19870_v16 = vld [vmem:[#allocation64_spill] sm:$0xff] }
 0x259   :  { %vm6696_vm14 = vcmp.ge.f32.partialorder %v6688_v34, 1.0  ;;  %v17767_v15 = vmax.f32 %v7098_v55, %v7194_v38  ;;  %vm6699_vm15 = vcmp.ge.f32.partialorder %v6691_v37, 1.0  ;;  %v5684_v12 = vmul.f32 %v16167_v53, %v5012_v23  ;;  %v4635_v53 = vpop.f32.mrb[51].mxu0 }
 0x25a   :  { %19868 = vst [vmem:[#allocation36_spill] sm:$0xff] %v17765_v14  ;;  %v12104_v61 = vsel %vm6696_vm14, 1.0, %v19772_v46  ;;  %v6728_v62 = vsel %vm6696_vm14, 0.0, %v6688_v34  ;;  %v12107_v49 = vsel %vm6699_vm15, 1.0, %v19772_v46  ;;  %v6731_v39 = vsel %vm6699_vm15, 0.0, %v6691_v37  ;;  %v19872_v34 = vld [vmem:[#allocation50_spill] sm:$0xff] }
 0x25b   :  { %19869 = vst [vmem:[#allocation38_spill] sm:$0xff] %v17767_v15  ;;  %6720 = vst.msk [vmem:[#allocation2 + $0x140] sm:$0xff] %vm6439_vm0, %v12104_v61  ;;  %v17772_v41 = vmul.f32 0.5, %v6728_v62  ;;  %v6690_v56 = vadd.f32 %v6682_v0, %v6353_v30  ;;  %v17776_v22 = vmul.f32 0.5, %v6731_v39  ;;  %v6356_v8 = vadd.f32 %v19870_v16, %v5684_v12  ;;  %v19873_v37 = vld [vmem:[#allocation18_spill] sm:$0xff]  ;;  %v19874_v30 = vld [vmem:[#allocation69_spill] sm:$0xff] }
 0x25c   :  { %6723 = vst.msk [vmem:[#allocation2 + $0x158] sm:$0xff] %vm6439_vm0, %v12107_v49  ;;  %v5011_v60 = vadd.f32 %v17671_v32, %v13448_v17  ;;  %v5014_v2 = vadd.f32 %v17671_v32, %v13449_v7  ;;  %v8467_v24 = vpack.c.bf16 %v17767_v15, %v17765_v14  ;;  %v13450_v55 = vadd.f32 %v4615_v9, %v17076_v47  ;;  %v7100_v9 = vld [vmem:[#allocation2 + $0x120] ss:$2 sm:$0xff]  ;;  %v13174_v7 = vpop.f32.mrb[52].mxu0  ;;  %v7102_v39 = vld [vmem:[#allocation2 + $0x130] ss:$2 sm:$0xff] }
 0x25d   :  { %vm6698_vm2 = vcmp.ge.f32.partialorder %v6690_v56, 1.0  ;;  %v13451_v0 = vadd.f32 %v13168_v33, %v19871_v42  ;;  %v6693_v38 = vadd.f32 %v17712_v36, %v6356_v8  ;;  %v7196_v33 = vld [vmem:[#allocation2 + $0x121] ss:$2 sm:$0xff]  ;;  %v4645_v16 = vpop.f32.mrb[53].mxu0 }
 0x25e   :  { %v12106_v19 = vsel %vm6698_vm2, 1.0, %v19772_v46  ;;  %v6730_v10 = vsel %vm6698_vm2, 0.0, %v6690_v56  ;;  %v5683_v50 = vmul.f32 %v19872_v34, %v5011_v60  ;;  %v5686_v23 = vmul.f32 %v19873_v37, %v5014_v2  ;;  %13258 = vmatprep.mubr.msk.bf16.mxu1 %vm6439_vm0, %v8467_v24  ;;  %v19875_v61 = vld [vmem:[#allocation170_spill] sm:$0xff]  ;;  %v19876_v12 = vld [vmem:[#allocation173_spill] sm:$0xff] }
 0x25f   :  { %6722 = vst.msk [vmem:[#allocation2 + $0x150] sm:$0xff] %vm6439_vm0, %v12106_v19  ;;  %v17789_v11 = vmul.f32 0.5, %v6730_v10  ;;  %v5013_v17 = vadd.f32 %v17671_v32, %v13450_v55  ;;  %v5016_v47 = vadd.f32 %v17671_v32, %v13451_v0  ;;  %vm6701_vm3 = vcmp.ge.f32.partialorder %v6693_v38, 1.0  ;;  %v7198_v56 = vld [vmem:[#allocation2 + $0x131] ss:$2 sm:$0xff]  ;;  %v19877_v2 = vld [vmem:[#allocation70_spill] sm:$0xff] }
 0x260   :  { %v6355_v36 = vadd.f32 %v19874_v30, %v5683_v50  ;;  %v13452_v62 = vadd.f32 %v4625_v58, %v19875_v61  ;;  %v13453_v49 = vadd.f32 %v13171_v1, %v19876_v12  ;;  %v12109_v8 = vsel %vm6701_vm3, 1.0, %v19772_v46  ;;  %v19878_v55 = vld [vmem:[#allocation52_spill] sm:$0xff]  ;;  %v19879_v19 = vld [vmem:[#allocation101_spill] sm:$0xff]  ;;  %v19880_v50 = vld [vmem:[#allocation99_spill] sm:$0xff] }
 0x261   :  { %v6733_v60 = vsel %vm6701_vm3, 0.0, %v6693_v38  ;;  %v6358_v24 = vadd.f32 %v19877_v2, %v5686_v23  ;;  %v5685_v42 = vmul.f32 %v19878_v55, %v5013_v17  ;;  %6725 = vst.msk [vmem:[#allocation2 + $0x168] sm:$0xff] %vm6439_vm0, %v12109_v8  ;;  %v5688_v10 = vmul.f32 %v19879_v19, %v5016_v47  ;;  %v13177_v23 = vpop.f32.mrb[54].mxu0  ;;  %v19883_v17 = vld [vmem:[#allocation82_spill] sm:$0xff] }
 0x262   :  { %v6692_v0 = vadd.f32 %v17720_v21, %v6355_v36  ;;  %v5015_v58 = vadd.f32 %v17671_v32, %v13452_v62  ;;  %v5018_v1 = vadd.f32 %v17671_v32, %v13453_v49  ;;  %v17808_v30 = vmax.f32 %v7100_v9, %v7196_v33  ;;  %v19884_v12 = vld [vmem:[#allocation102_spill] sm:$0xff]  ;;  %v19885_v36 = vld [vmem:[#allocation103_spill] sm:$0xff]  ;;  %v4655_v8 = vpop.f32.mrb[55].mxu0 }
 0x263   :  { %v6695_v34 = vadd.f32 %v17725_v44, %v6358_v24  ;;  %v6357_v37 = vadd.f32 %v19880_v50, %v5685_v42  ;;  %v17810_v38 = vmax.f32 %v7102_v39, %v7198_v56  ;;  %v6360_v61 = vadd.f32 %v19883_v17, %v5688_v10  ;;  %v19886_v56 = vld [vmem:[#allocation110_spill] sm:$0xff]  ;;  %v19887_v24 = vld [vmem:[#allocation111_spill] sm:$0xff] }
 0x264   :  { %19881 = vst [vmem:[#allocation41_spill] sm:$0xff] %v17808_v30  ;;  %vm6700_vm4 = vcmp.ge.f32.partialorder %v6692_v0, 1.0  ;;  %v5687_v21 = vmul.f32 %v19884_v12, %v5015_v58  ;;  %v5690_v47 = vmul.f32 %v19885_v36, %v5018_v1 }
 0x265   :  { %19882 = vst [vmem:[#allocation12_spill] sm:$0xff] %v17810_v38  ;;  %v12108_v62 = vsel %vm6700_vm4, 1.0, %v19772_v46  ;;  %v6732_v49 = vsel %vm6700_vm4, 0.0, %v6692_v0  ;;  %vm6703_vm5 = vcmp.ge.f32.partialorder %v6695_v34, 1.0  ;;  %v6694_v44 = vadd.f32 %v17746_v18, %v6357_v37  ;;  %v19888_v0 = vld [vmem:[#allocation174_spill] sm:$0xff]  ;;  %v13180_v18 = vpop.f32.mrb[56].mxu0 }
 0x266   :  { %6724 = vst.msk [vmem:[#allocation2 + $0x160] sm:$0xff] %vm6439_vm0, %v12108_v62  ;;  %v12111_v9 = vsel %vm6703_vm5, 1.0, %v19772_v46  ;;  %v6735_v33 = vsel %vm6703_vm5, 0.0, %v6695_v34  ;;  %v6745_v39 = vadd.f32 %v17753_v31, %v6360_v61  ;;  %v6359_v2 = vadd.f32 %v19886_v56, %v5687_v21  ;;  %v4665_v31 = vpop.f32.mrb[57].mxu0  ;;  %v19889_v61 = vld [vmem:[#allocation176_spill] sm:$0xff] }
 0x267   :  { %6727 = vst.msk [vmem:[#allocation2 + $0x178] sm:$0xff] %vm6439_vm0, %v12111_v9  ;;  %vm6702_vm6 = vcmp.ge.f32.partialorder %v6694_v44, 1.0  ;;  %v6362_v55 = vadd.f32 %v19887_v24, %v5690_v47  ;;  %v8468_v42 = vpack.c.bf16 %v17810_v38, %v17808_v30  ;;  %v13454_v19 = vadd.f32 %v4635_v53, %v19888_v0  ;;  %v7104_v53 = vld [vmem:[#allocation2 + $0x140] ss:$2 sm:$0xff]  ;;  %v7106_v47 = vld [vmem:[#allocation2 + $0x150] ss:$2 sm:$0xff] }
 0x268   :  { %v12110_v10 = vsel %vm6702_vm6, 1.0, %v19772_v46  ;;  %v6734_v58 = vsel %vm6702_vm6, 0.0, %v6694_v44  ;;  %vm6753_vm7 = vcmp.ge.f32.partialorder %v6745_v39, 1.0  ;;  %v6744_v1 = vadd.f32 %v17772_v41, %v6359_v2  ;;  %v19890_v41 = vld [vmem:[#allocation177_spill] sm:$0xff]  ;;  %v13183_v2 = vpop.f32.mrb[58].mxu0  ;;  %v19957_v30 = vld [vmem:[#allocation75_spill] sm:$0xff] }
 0x269   :  { %6726 = vst.msk [vmem:[#allocation2 + $0x170] sm:$0xff] %vm6439_vm0, %v12110_v10  ;;  %v12113_v34 = vsel %vm6753_vm7, 1.0, %v19772_v46  ;;  %v6785_v50 = vsel %vm6753_vm7, 0.0, %v6745_v39  ;;  %v6747_v37 = vadd.f32 %v17776_v22, %v6362_v55  ;;  %13259 = vmatmul.mubr.msk.bf16.gmra.mrb[68].mxu1 %vm6439_vm0, %v8468_v42  ;;  %v5017_v17 = vadd.f32 %v17671_v32, %v13454_v19  ;;  %v7200_v62 = vld [vmem:[#allocation2 + $0x141] ss:$2 sm:$0xff]  ;;  %v19891_v22 = vld [vmem:[#allocation104_spill] sm:$0xff] }
 0x26a   :  { %6777 = vst.msk [vmem:[#allocation2 + $0x188] sm:$0xff] %vm6439_vm0, %v12113_v34  ;;  %vm6752_vm8 = vcmp.ge.f32.partialorder %v6744_v1, 1.0  ;;  %v13455_v12 = vadd.f32 %v13174_v7, %v19889_v61  ;;  %v6741_v21 = vmul.f32 0.5, %v6733_v60  ;;  %v13456_v36 = vadd.f32 %v4645_v16, %v19890_v41  ;;  %v7202_v56 = vld [vmem:[#allocation2 + $0x151] ss:$2 sm:$0xff]  ;;  %v4675_v16 = vpop.f32.mrb[59].mxu0 }
 0x26b   :  { %v12112_v44 = vsel %vm6752_vm8, 1.0, %v19772_v46  ;;  %v6784_v9 = vsel %vm6752_vm8, 0.0, %v6744_v1  ;;  %vm6755_vm9 = vcmp.ge.f32.partialorder %v6747_v37, 1.0  ;;  %v5689_v39 = vmul.f32 %v19891_v22, %v5017_v17  ;;  %v19892_v42 = vld [vmem:[#allocation112_spill] sm:$0xff]  ;;  %v19893_v10 = vld [vmem:[#allocation179_spill] sm:$0xff]  ;;  %v19894_v17 = vld [vmem:[#allocation106_spill] sm:$0xff] }
 0x26c   :  { %6776 = vst.msk [vmem:[#allocation2 + $0x180] sm:$0xff] %vm6439_vm0, %v12112_v44  ;;  %v12115_v24 = vsel %vm6755_vm9, 1.0, %v19772_v46  ;;  %v6787_v55 = vsel %vm6755_vm9, 0.0, %v6747_v37  ;;  %v5020_v7 = vadd.f32 %v17671_v32, %v13455_v12  ;;  %v5019_v60 = vadd.f32 %v17671_v32, %v13456_v36  ;;  %v19895_v41 = vld [vmem:[#allocation107_spill] sm:$0xff]  ;;  %v13747_v12 = vld [vmem:[%s19318_s5 + $0x20] sm:$0xff]  }
 0x26d   :  { %6779 = vst.msk [vmem:[#allocation2 + $0x198] sm:$0xff] %vm6439_vm0, %v12115_v24  ;;  %v6361_v0 = vadd.f32 %v19892_v42, %v5689_v39  ;;  %v6740_v19 = vmul.f32 0.5, %v6732_v49  ;;  %v13457_v1 = vadd.f32 %v13177_v23, %v19893_v10  ;;  %v6743_v34 = vmul.f32 0.5, %v6735_v33  ;;  %v19898_v49 = vld [vmem:[#allocation182_spill] sm:$0xff]  ;;  %v17857_v33 = vpop.f32.mrb[60].mxu0  ;;  %13342 = vmatprep.subr.bf16.mxu1 %v13747_v12 }
 0x26e   :  { %v5692_v61 = vmul.f32 %v19894_v17, %v5020_v7  ;;  %v5691_v44 = vmul.f32 %v19895_v41, %v5019_v60  ;;  %v17847_v22 = vmax.f32 %v7104_v53, %v7200_v62  ;;  %v17849_v37 = vmax.f32 %v7106_v47, %v7202_v56  ;;  %v19899_v7 = vld [vmem:[#allocation114_spill] sm:$0xff]  ;;  %v19900_v60 = vld [vmem:[#allocation115_spill] sm:$0xff]  ;;  %v17864_v10 = vpop.f32.mrb[61].mxu0 }
 0x26f   :  { %v6746_v36 = vadd.f32 %v17789_v11, %v6361_v0  ;;  %v5022_v39 = vadd.f32 %v17671_v32, %v13457_v1  ;;  %v13458_v24 = vadd.f32 %v4655_v8, %v19898_v49  ;;  %v6742_v23 = vmul.f32 0.5, %v6734_v58  ;;  %v19901_v62 = vld [vmem:[#allocation35_spill] sm:$0xff]  ;;  %v19902_v11 = vld [vmem:[#allocation108_spill] sm:$0xff]  ;;  %v19904_v49 = vld [vmem:[#allocation109_spill] sm:$0xff] }
 0x270   :  { %19896 = vst [vmem:[#allocation43_spill] sm:$0xff] %v17847_v22  ;;  %19897 = vst [vmem:[#allocation45_spill] sm:$0xff] %v17849_v37  ;;  %v6364_v42 = vadd.f32 %v19899_v7, %v5692_v61  ;;  %v6363_v53 = vadd.f32 %v19900_v60, %v5691_v44  ;;  %v8469_v47 = vpack.c.bf16 %v17849_v37, %v17847_v22  ;;  %v6793_v58 = vmul.f32 0.5, %v6785_v50  ;;  %v19903_v44 = vld [vmem:[#allocation116_spill] sm:$0xff] }
 0x271   :  { %v13459_v56 = vadd.f32 %v13180_v18, %v19901_v62  ;;  %vm6754_vm10 = vcmp.ge.f32.partialorder %v6746_v36, 1.0  ;;  %v5694_v0 = vmul.f32 %v19902_v11, %v5022_v39  ;;  %v5021_v8 = vadd.f32 %v17671_v32, %v13458_v24  ;;  %v19905_v60 = vld [vmem:[#allocation32_spill] sm:$0xff]  ;;  %v17875_v62 = vpop.f32.mrb[62].mxu0 }
 0x272   :  { %v12114_v1 = vsel %vm6754_vm10, 1.0, %v19772_v46  ;;  %v6786_v17 = vsel %vm6754_vm10, 0.0, %v6746_v36  ;;  %v6749_v61 = vadd.f32 %v6741_v21, %v6364_v42  ;;  %v6748_v41 = vadd.f32 %v6740_v19, %v6363_v53  ;;  %13262 = vmatprep.mubr.msk.bf16.mxu1 %vm6439_vm0, %v8469_v47  ;;  %v19906_v36 = vld [vmem:[#allocation13_spill] sm:$0xff]  ;;  %v17878_v19 = vpop.f32.mrb[63].mxu0 }
 0x273   :  { %6778 = vst.msk [vmem:[#allocation2 + $0x190] sm:$0xff] %vm6439_vm0, %v12114_v1  ;;  %v6366_v18 = vadd.f32 %v19903_v44, %v5694_v0  ;;  %v5693_v7 = vmul.f32 %v19904_v49, %v5021_v8  ;;  %v5024_v12 = vadd.f32 %v17671_v32, %v13459_v56  ;;  %v13460_v39 = vadd.f32 %v4665_v31, %v19905_v60  ;;  %v19907_v56 = vld [vmem:[#allocation117_spill] sm:$0xff]  ;;  %v19908_v0 = vld [vmem:[#allocation119_spill] sm:$0xff] }
 0x274   :  { %vm6757_vm12 = vcmp.ge.f32.partialorder %v6749_v61, 1.0  ;;  %vm6756_vm13 = vcmp.ge.f32.partialorder %v6748_v41, 1.0  ;;  %v6792_v50 = vmul.f32 0.5, %v6784_v9  ;;  %v13461_v21 = vadd.f32 %v13183_v2, %v19906_v36  ;;  %v7108_v8 = vld [vmem:[#allocation2 + $0x160] ss:$2 sm:$0xff]  ;;  %v17891_v36 = vpop.f32.mrb[64].mxu0 }
 0x275   :  { %v12117_v24 = vsel %vm6757_vm12, 1.0, %v19772_v46  ;;  %v6789_v42 = vsel %vm6757_vm12, 0.0, %v6749_v61  ;;  %v12116_v53 = vsel %vm6756_vm13, 1.0, %v19772_v46  ;;  %v17882_v47 = vsel %vm6756_vm13, 0.0, %v6748_v41  ;;  %v19909_v61 = vld [vmem:[#allocation46_spill] sm:$0xff] }
 0x276   :  { %6781 = vst.msk [vmem:[#allocation2 + $0x1a8] sm:$0xff] %vm6439_vm0, %v12117_v24  ;;  %6780 = vst.msk [vmem:[#allocation2 + $0x1a0] sm:$0xff] %vm6439_vm0, %v12116_v53  ;;  %v6751_v31 = vadd.f32 %v6743_v34, %v6366_v18  ;;  %v6365_v11 = vadd.f32 %v19907_v56, %v5693_v7  ;;  %v5696_v9 = vmul.f32 %v19908_v0, %v5024_v12  ;;  %v6795_v44 = vmul.f32 0.5, %v6787_v55  ;;  %v7204_v41 = vld [vmem:[#allocation2 + $0x161] ss:$2 sm:$0xff]  ;;  %v19911_v18 = vld [vmem:[#allocation120_spill] sm:$0xff] }
 0x277   :  { %v5023_v2 = vadd.f32 %v17671_v32, %v13460_v39  ;;  %v5026_v1 = vadd.f32 %v17671_v32, %v13461_v21  ;;  %v13462_v49 = vadd.f32 %v4675_v16, %v19909_v61  ;;  %v6794_v60 = vmul.f32 0.5, %v6786_v17  ;;  %v19910_v53 = vld [vmem:[#allocation129_spill] sm:$0xff]  ;;  %v17895_v56 = vpop.f32.mrb[65].mxu0 }
 0x278   :  { %vm6759_vm14 = vcmp.ge.f32.partialorder %v6751_v31, 1.0  ;;  %v6750_v24 = vadd.f32 %v6742_v23, %v6365_v11  ;;  %v6368_v34 = vadd.f32 %v19910_v53, %v5696_v9  ;;  %v19912_v0 = vld [vmem:[#allocation121_spill] sm:$0xff]  ;;  %v19913_v23 = vld [vmem:[#allocation130_spill] sm:$0xff]  ;;  %v17902_v9 = vmax.f32 %v7108_v8, %v7204_v41 }
 0x279   :  { %v5695_v7 = vmul.f32 %v19911_v18, %v5023_v2  ;;  %v12119_v12 = vsel %vm6759_vm14, 1.0, %v19772_v46  ;;  %v6791_v39 = vsel %vm6759_vm14, 0.0, %v6751_v31  ;;  %v5698_v21 = vmul.f32 %v19912_v0, %v5026_v1  ;;  %v7110_v16 = vld [vmem:[#allocation2 + $0x170] ss:$2 sm:$0xff]  ;;  %v7206_v17 = vld [vmem:[#allocation2 + $0x171] ss:$2 sm:$0xff] }
 0x27a   :  { %v5025_v55 = vadd.f32 %v17671_v32, %v13462_v49  ;;  %6783 = vst.msk [vmem:[#allocation2 + $0x1b8] sm:$0xff] %vm6439_vm0, %v12119_v12  ;;  %vm6758_vm15 = vcmp.ge.f32.partialorder %v6750_v24, 1.0  ;;  %v6801_v61 = vadd.f32 %v6793_v58, %v6368_v34  ;;  %19914 = vst [vmem:[#allocation64_spill] sm:$0xff] %v17902_v9  ;;  %v19915_v18 = vld [vmem:[#allocation131_spill] sm:$0xff]  ;;  %v19916_v31 = vld [vmem:[#allocation122_spill] sm:$0xff]  ;;  %v17907_v1 = vpop.f32.mrb[66].mxu0  ;;  %v17910_v12 = vmax.f32 %v7110_v16, %v7206_v17 }
 0x27b   :  { %v6367_v11 = vadd.f32 %v19913_v23, %v5695_v7  ;;  %v12118_v2 = vsel %vm6758_vm15, 1.0, %v19772_v46  ;;  %v6790_v53 = vsel %vm6758_vm15, 0.0, %v6750_v24  ;;  %v6370_v37 = vadd.f32 %v19915_v18, %v5698_v21  ;;  %v19918_v58 = vld [vmem:[#allocation15_spill] sm:$0xff]  ;;  %v17914_v8 = vpop.f32.mrb[67].mxu0  ;;  %v19919_v0 = vld [vmem:[#allocation132_spill] sm:$0xff] }
 0x27c   :  { %v5697_v22 = vmul.f32 %v19916_v31, %v5025_v55  ;;  %6782 = vst.msk [vmem:[#allocation2 + $0x1b0] sm:$0xff] %vm6439_vm0, %v12118_v2  ;;  %vm6809_vm2 = vcmp.ge.f32.partialorder %v6801_v61, 1.0  ;;  %19917 = vst [vmem:[#allocation169_spill] sm:$0xff] %v17910_v12  ;;  %v13463_v34 = vadd.f32 %v17857_v33, %v19918_v58  ;;  %v8470_v55 = vpack.c.bf16 %v17910_v12, %v17902_v9  ;;  %v7112_v17 = vld [vmem:[#allocation2 + $0x180] ss:$2 sm:$0xff] }
 0x27d   :  { %v6800_v49 = vadd.f32 %v6792_v50, %v6367_v11  ;;  %v12121_v41 = vsel %vm6809_vm2, 1.0, %v19772_v46  ;;  %v6841_v24 = vsel %vm6809_vm2, 0.0, %v6801_v61  ;;  %v6803_v7 = vadd.f32 %v6795_v44, %v6370_v37  ;;  %v7208_v2 = vld [vmem:[#allocation2 + $0x181] ss:$2 sm:$0xff]  ;;  %v17923_v61 = vpop.f32.mrb[68].mxu0  ;;  %v19920_v44 = vld [vmem:[#allocation124_spill] sm:$0xff] }
 0x27e   :  { %v6369_v21 = vadd.f32 %v19919_v0, %v5697_v22  ;;  %6833 = vst.msk [vmem:[#allocation2 + $0x1c8] sm:$0xff] %vm6439_vm0, %v12121_v41  ;;  %v5028_v50 = vadd.f32 %v17671_v32, %v13463_v34  ;;  %v6797_v16 = vmul.f32 0.5, %v6789_v42  ;;  %13263 = vmatmul.mubr.msk.bf16.gmra.mrb[72].mxu1 %vm6439_vm0, %v8470_v55  ;;  %v19921_v31 = vld [vmem:[#allocation47_spill] sm:$0xff]  ;;  %v17931_v34 = vpop.f32.mrb[69].mxu0  ;;  %v6799_v0 = vmul.f32 0.5, %v6791_v39 }
 0x27f   :  { %vm6808_vm3 = vcmp.ge.f32.partialorder %v6800_v49, 1.0  ;;  %vm6811_vm4 = vcmp.ge.f32.partialorder %v6803_v7, 1.0  ;;  %v13464_v42 = vadd.f32 %v17864_v10, %v19921_v31  ;;  %v7114_v58 = vld [vmem:[#allocation2 + $0x190] ss:$2 sm:$0xff]  ;;  %v17944_v12 = vmax.f32 %v7112_v17, %v7208_v2  ;;  %v19931_v2 = vld [vmem:[#allocation134_spill] sm:$0xff] }
 0x280   :  { %v12120_v33 = vsel %vm6808_vm3, 1.0, %v19772_v46  ;;  %v6840_v23 = vsel %vm6808_vm3, 0.0, %v6800_v49  ;;  %v6802_v11 = vadd.f32 %v6794_v60, %v6369_v21  ;;  %v12123_v22 = vsel %vm6811_vm4, 1.0, %v19772_v46  ;;  %v19922_v49 = vld [vmem:[#allocation40_spill] sm:$0xff] }
 0x281   :  { %6832 = vst.msk [vmem:[#allocation2 + $0x1c0] sm:$0xff] %vm6439_vm0, %v12120_v33  ;;  %v6843_v37 = vsel %vm6811_vm4, 0.0, %v6803_v7  ;;  %v5700_v18 = vmul.f32 %v19920_v44, %v5028_v50  ;;  %6835 = vst.msk [vmem:[#allocation2 + $0x1d8] sm:$0xff] %vm6439_vm0, %v12123_v22  ;;  %v6796_v60 = vmul.f32 0.5, %v17882_v47  ;;  %v13465_v41 = vadd.f32 %v17875_v62, %v19922_v49  ;;  %v7210_v7 = vld [vmem:[#allocation2 + $0x191] ss:$2 sm:$0xff] }
 0x282   :  { %vm6810_vm5 = vcmp.ge.f32.partialorder %v6802_v11, 1.0  ;;  %v19923_v50 = vld [vmem:[#allocation133_spill] sm:$0xff]  ;;  %v5027_v10 = vadd.f32 %v17671_v32, %v13464_v42  ;;  %v19924_v22 = vld [vmem:[#allocation51_spill] sm:$0xff]  ;;  %v6798_v47 = vmul.f32 0.5, %v6790_v53  ;;  %19925 = vst [vmem:[#allocation50_spill] sm:$0xff] %v17944_v12  ;;  %v17946_v62 = vpop.f32.mrb[70].mxu0 }
 0x283   :  { %v12122_v21 = vsel %vm6810_vm5, 1.0, %v19772_v46  ;;  %v6842_v55 = vsel %vm6810_vm5, 0.0, %v6802_v11  ;;  %v6372_v33 = vadd.f32 %v19923_v50, %v5700_v18  ;;  %v5030_v44 = vadd.f32 %v17671_v32, %v13465_v41  ;;  %v19926_v49 = vld [vmem:[#allocation125_spill] sm:$0xff]  ;;  %v19928_v18 = vld [vmem:[#allocation19_spill] sm:$0xff]  ;;  %v17953_v50 = vpop.f32.mrb[71].mxu0 }
 0x284   :  { %6834 = vst.msk [vmem:[#allocation2 + $0x1d0] sm:$0xff] %vm6439_vm0, %v12122_v21  ;;  %v13466_v31 = vadd.f32 %v17878_v19, %v19924_v22  ;;  %v5699_v9 = vmul.f32 %v19926_v49, %v5027_v10  ;;  %v17949_v11 = vmax.f32 %v7114_v58, %v7210_v7  ;;  %v13467_v42 = vadd.f32 %v17891_v36, %v19928_v18  ;;  %v19929_v21 = vld [vmem:[#allocation126_spill] sm:$0xff]  ;;  %v19930_v53 = vld [vmem:[#allocation65_spill] sm:$0xff]  ;;  %v19932_v10 = vld [vmem:[#allocation135_spill] sm:$0xff] }
 0x285   :  { %v6805_v39 = vadd.f32 %v6797_v16, %v6372_v33  ;;  %v5702_v41 = vmul.f32 %v19929_v21, %v5030_v44  ;;  %v6849_v19 = vmul.f32 0.5, %v6841_v24  ;;  %v13468_v17 = vadd.f32 %v17895_v56, %v19930_v53  ;;  %v19933_v44 = vld [vmem:[#allocation127_spill] sm:$0xff]  ;;  %v19934_v56 = vld [vmem:[#allocation137_spill] sm:$0xff]  ;;  %v17970_v21 = vpop.f32.mrb[72].mxu0  ;;  %v19935_v53 = vld [vmem:[#allocation136_spill] sm:$0xff] }
 0x286   :  { %19927 = vst [vmem:[#allocation18_spill] sm:$0xff] %v17949_v11  ;;  %v5029_v38 = vadd.f32 %v17671_v32, %v13466_v31  ;;  %v6371_v16 = vadd.f32 %v19931_v2, %v5699_v9  ;;  %v8471_v58 = vpack.c.bf16 %v17949_v11, %v17944_v12  ;;  %v5032_v7 = vadd.f32 %v17671_v32, %v13467_v42  ;;  %v19949_v12 = vld [vmem:[#allocation61_spill] sm:$0xff] }
 0x287   :  { %vm6813_vm6 = vcmp.ge.f32.partialorder %v6805_v39, 1.0  ;;  %v6374_v22 = vadd.f32 %v19932_v10, %v5702_v41  ;;  %v5031_v9 = vadd.f32 %v17671_v32, %v13468_v17  ;;  %v6848_v18 = vmul.f32 0.5, %v6840_v23 }
 0x288   :  { %v12125_v36 = vsel %vm6813_vm6, 1.0, %v19772_v46  ;;  %v6845_v33 = vsel %vm6813_vm6, 0.0, %v6805_v39  ;;  %v5701_v49 = vmul.f32 %v19933_v44, %v5029_v38  ;;  %v6804_v24 = vadd.f32 %v6796_v60, %v6371_v16  ;;  %13266 = vmatprep.mubr.msk.bf16.mxu1 %vm6439_vm0, %v8471_v58  ;;  %v19936_v39 = vld [vmem:[#allocation55_spill] sm:$0xff]  ;;  %v17975_v38 = vpop.f32.mrb[73].mxu0  ;;  %v19937_v60 = vld [vmem:[#allocation145_spill] sm:$0xff]  ;;  %v19938_v58 = vld [vmem:[#allocation138_spill] sm:$0xff] }
 0x289   :  { %6837 = vst.msk [vmem:[#allocation2 + $0x1e8] sm:$0xff] %vm6439_vm0, %v12125_v36  ;;  %v5704_v31 = vmul.f32 %v19934_v56, %v5032_v7  ;;  %v6807_v42 = vadd.f32 %v6799_v0, %v6374_v22  ;;  %v13469_v41 = vadd.f32 %v17907_v1, %v19936_v39  ;;  %v6851_v10 = vmul.f32 0.5, %v6843_v37  ;;  %v19939_v7 = vld [vmem:[#allocation66_spill] sm:$0xff] }
 0x28a   :  { %v6373_v2 = vadd.f32 %v19935_v53, %v5701_v49  ;;  %vm6812_vm7 = vcmp.ge.f32.partialorder %v6804_v24, 1.0  ;;  %v5703_v36 = vmul.f32 %v19938_v58, %v5031_v9  ;;  %v13470_v17 = vadd.f32 %v17914_v8, %v19939_v7  ;;  %v7116_v22 = vld [vmem:[#allocation2 + $0x1a0] ss:$2 sm:$0xff]  ;;  %v17982_v49 = vpop.f32.mrb[74].mxu0  ;;  %v7212_v9 = vld [vmem:[#allocation2 + $0x1a1] ss:$2 sm:$0xff] }
 0x28b   :  { %v6376_v16 = vadd.f32 %v19937_v60, %v5704_v31  ;;  %v12124_v23 = vsel %vm6812_vm7, 1.0, %v19772_v46  ;;  %v6844_v44 = vsel %vm6812_vm7, 0.0, %v6804_v24  ;;  %vm6815_vm8 = vcmp.ge.f32.partialorder %v6807_v42, 1.0  ;;  %v19940_v31 = vld [vmem:[#allocation146_spill] sm:$0xff]  ;;  %v17987_v39 = vpop.f32.mrb[75].mxu0 }
 0x28c   :  { %v6806_v0 = vadd.f32 %v6798_v47, %v6373_v2  ;;  %6836 = vst.msk [vmem:[#allocation2 + $0x1e0] sm:$0xff] %vm6439_vm0, %v12124_v23  ;;  %v12127_v1 = vsel %vm6815_vm8, 1.0, %v19772_v46  ;;  %v6847_v37 = vsel %vm6815_vm8, 0.0, %v6807_v42  ;;  %v6375_v53 = vadd.f32 %v19940_v31, %v5703_v36  ;;  %v7118_v2 = vld [vmem:[#allocation2 + $0x1b0] ss:$2 sm:$0xff] }
 0x28d   :  { %v6857_v56 = vadd.f32 %v6849_v19, %v6376_v16  ;;  %6839 = vst.msk [vmem:[#allocation2 + $0x1f8] sm:$0xff] %vm6439_vm0, %v12127_v1  ;;  %v5034_v8 = vadd.f32 %v17671_v32, %v13469_v41  ;;  %v5033_v47 = vadd.f32 %v17671_v32, %v13470_v17  ;;  %v6850_v24 = vmul.f32 0.5, %v6842_v55  ;;  %v7214_v60 = vld [vmem:[#allocation2 + $0x1b1] ss:$2 sm:$0xff]  ;;  %v17997_v41 = vpop.f32.mrb[76].mxu0 }
 0x28e   :  { %vm6814_vm9 = vcmp.ge.f32.partialorder %v6806_v0, 1.0  ;;  %v6856_v19 = vadd.f32 %v6848_v18, %v6375_v53  ;;  %v19941_v36 = vld [vmem:[#allocation139_spill] sm:$0xff]  ;;  %v19942_v1 = vld [vmem:[#allocation140_spill] sm:$0xff]  ;;  %v18000_v55 = vmax.f32 %v7116_v22, %v7212_v9  ;;  %v18002_v17 = vmax.f32 %v7118_v2, %v7214_v60  ;;  %v18006_v53 = vpop.f32.mrb[77].mxu0 }
 0x28f   :  { %v12126_v58 = vsel %vm6814_vm9, 1.0, %v19772_v46  ;;  %v6846_v7 = vsel %vm6814_vm9, 0.0, %v6806_v0  ;;  %vm6865_vm10 = vcmp.ge.f32.partialorder %v6857_v56, 1.0  ;;  %v5706_v23 = vmul.f32 %v19941_v36, %v5034_v8  ;;  %v19945_v0 = vld [vmem:[#allocation21_spill] sm:$0xff]  ;;  %v19946_v8 = vld [vmem:[#allocation147_spill] sm:$0xff] }
 0x290   :  { %6838 = vst.msk [vmem:[#allocation2 + $0x1f0] sm:$0xff] %vm6439_vm0, %v12126_v58  ;;  %v12129_v42 = vsel %vm6865_vm10, 1.0, %v19772_v46  ;;  %v6897_v16 = vsel %vm6865_vm10, 0.0, %v6857_v56  ;;  %v5705_v31 = vmul.f32 %v19942_v1, %v5033_v47  ;;  %vm6864_vm12 = vcmp.ge.f32.partialorder %v6856_v19, 1.0  ;;  %19943 = vst [vmem:[#allocation69_spill] sm:$0xff] %v18000_v55  ;;  %v19947_v47 = vld [vmem:[#allocation148_spill] sm:$0xff] }
 0x291   :  { %6889 = vst.msk [vmem:[#allocation2 + $0x208] sm:$0xff] %vm6439_vm0, %v12129_v42  ;;  %19944 = vst [vmem:[#allocation170_spill] sm:$0xff] %v18002_v17  ;;  %v13471_v18 = vadd.f32 %v17923_v61, %v19945_v0  ;;  %v12128_v56 = vsel %vm6864_vm12, 1.0, %v19772_v46  ;;  %v6896_v58 = vsel %vm6864_vm12, 0.0, %v6856_v19  ;;  %v6378_v36 = vadd.f32 %v19946_v8, %v5706_v23  ;;  %v19948_v60 = vld [vmem:[#allocation71_spill] sm:$0xff]  ;;  %v18019_v8 = vpop.f32.mrb[78].mxu0 }
 0x292   :  { %v6377_v1 = vadd.f32 %v19947_v47, %v5705_v31  ;;  %6888 = vst.msk [vmem:[#allocation2 + $0x200] sm:$0xff] %vm6439_vm0, %v12128_v56  ;;  %v8472_v22 = vpack.c.bf16 %v18002_v17, %v18000_v55  ;;  %v6853_v2 = vmul.f32 0.5, %v6845_v33  ;;  %v13472_v61 = vadd.f32 %v17931_v34, %v19948_v60  ;;  %v7120_v23 = vld [vmem:[#allocation2 + $0x1c0] ss:$2 sm:$0xff]  ;;  %v7122_v34 = vld [vmem:[#allocation2 + $0x1d0] ss:$2 sm:$0xff] }
 0x293   :  { %v5036_v9 = vadd.f32 %v17671_v32, %v13471_v18  ;;  %v6859_v42 = vadd.f32 %v6851_v10, %v6378_v36  ;;  %v6852_v11 = vmul.f32 0.5, %v6844_v44  ;;  %v13473_v19 = vadd.f32 %v17946_v62, %v19949_v12  ;;  %v19950_v31 = vld [vmem:[#allocation141_spill] sm:$0xff]  ;;  %v19951_v33 = vld [vmem:[#allocation62_spill] sm:$0xff] }
 0x294   :  { %v6858_v0 = vadd.f32 %v6850_v24, %v6377_v1  ;;  %13267 = vmatmul.mubr.msk.bf16.gmra.mrb[76].mxu1 %vm6439_vm0, %v8472_v22  ;;  %v5035_v47 = vadd.f32 %v17671_v32, %v13472_v61  ;;  %v6855_v18 = vmul.f32 0.5, %v6847_v37  ;;  %v13474_v17 = vadd.f32 %v17953_v50, %v19951_v33  ;;  %v7216_v10 = vld [vmem:[#allocation2 + $0x1c1] ss:$2 sm:$0xff]  ;;  %v18026_v24 = vpop.f32.mrb[79].mxu0  ;;  %v7218_v44 = vld [vmem:[#allocation2 + $0x1d1] ss:$2 sm:$0xff] }
 0x295   :  { %v5708_v56 = vmul.f32 %v19950_v31, %v5036_v9  ;;  %vm6867_vm13 = vcmp.ge.f32.partialorder %v6859_v42, 1.0  ;;  %v5038_v12 = vadd.f32 %v17671_v32, %v13473_v19  ;;  %v6854_v62 = vmul.f32 0.5, %v6846_v7  ;;  %v19952_v50 = vld [vmem:[#allocation149_spill] sm:$0xff]  ;;  %v19953_v60 = vld [vmem:[#allocation142_spill] sm:$0xff]  ;;  %v19954_v31 = vld [vmem:[#allocation143_spill] sm:$0xff]  ;;  %v18037_v7 = vpop.f32.mrb[80].mxu0 }
 0x296   :  { %vm6866_vm14 = vcmp.ge.f32.partialorder %v6858_v0, 1.0  ;;  %v12131_v36 = vsel %vm6867_vm13, 1.0, %v19772_v46  ;;  %v6899_v1 = vsel %vm6867_vm13, 0.0, %v6859_v42  ;;  %v5707_v61 = vmul.f32 %v19953_v60, %v5035_v47  ;;  %v18045_v15 = vpop.f32.mrb[81].mxu0  ;;  %v19959_v47 = vld [vmem:[#allocation151_spill] sm:$0xff] }
 0x297   :  { %v12130_v22 = vsel %vm6866_vm14, 1.0, %v19772_v46  ;;  %v6898_v9 = vsel %vm6866_vm14, 0.0, %v6858_v0  ;;  %6891 = vst.msk [vmem:[#allocation2 + $0x218] sm:$0xff] %vm6439_vm0, %v12131_v36  ;;  %v6380_v37 = vadd.f32 %v19952_v50, %v5708_v56  ;;  %v5710_v33 = vmul.f32 %v19954_v31, %v5038_v12  ;;  %v19958_v56 = vld [vmem:[#allocation150_spill] sm:$0xff]  ;;  %v19960_v12 = vld [vmem:[#allocation144_spill] sm:$0xff] }
 0x298   :  { %6890 = vst.msk [vmem:[#allocation2 + $0x210] sm:$0xff] %vm6439_vm0, %v12130_v22  ;;  %v5037_v19 = vadd.f32 %v17671_v32, %v13474_v17  ;;  %v18039_v55 = vmax.f32 %v7120_v23, %v7216_v10  ;;  %v18041_v42 = vmax.f32 %v7122_v34, %v7218_v44  ;;  %v13475_v0 = vadd.f32 %v17970_v21, %v19957_v30  ;;  %v19961_v34 = vld [vmem:[#allocation76_spill] sm:$0xff] }
 0x299   :  { %v6905_v36 = vmul.f32 0.5, %v6897_v16  ;;  %v6861_v22 = vadd.f32 %v6853_v2, %v6380_v37  ;;  %v6379_v50 = vadd.f32 %v19958_v56, %v5707_v61  ;;  %v6382_v60 = vadd.f32 %v19959_v47, %v5710_v33  ;;  %v19962_v16 = vld [vmem:[#allocation152_spill] sm:$0xff]  ;;  %v18056_v37 = vpop.f32.mrb[82].mxu0 }
 0x29a   :  { %19955 = vst [vmem:[#allocation173_spill] sm:$0xff] %v18039_v55  ;;  %19956 = vst [vmem:[#allocation70_spill] sm:$0xff] %v18041_v42  ;;  %v5709_v31 = vmul.f32 %v19960_v12, %v5037_v19  ;;  %v8473_v17 = vpack.c.bf16 %v18041_v42, %v18039_v55  ;;  %v5040_v23 = vadd.f32 %v17671_v32, %v13475_v0  ;;  %v6904_v44 = vmul.f32 0.5, %v6896_v58  ;;  %v19963_v19 = vld [vmem:[#allocation153_spill] sm:$0xff]  ;;  %v18062_v47 = vpop.f32.mrb[83].mxu0 }
 0x29b   :  { %v13476_v10 = vadd.f32 %v17975_v38, %v19961_v34  ;;  %vm6869_vm15 = vcmp.ge.f32.partialorder %v6861_v22, 1.0  ;;  %v6860_v30 = vadd.f32 %v6852_v11, %v6379_v50  ;;  %v6863_v21 = vadd.f32 %v6855_v18, %v6382_v60  ;;  %v19964_v38 = vld [vmem:[#allocation77_spill] sm:$0xff]  ;;  %v19966_v34 = vld [vmem:[#allocation154_spill] sm:$0xff] }
 0x29c   :  { %v6381_v2 = vadd.f32 %v19962_v16, %v5709_v31  ;;  %v12133_v61 = vsel %vm6869_vm15, 1.0, %v19772_v46  ;;  %v6901_v33 = vsel %vm6869_vm15, 0.0, %v6861_v22  ;;  %13270 = vmatprep.mubr.msk.bf16.mxu1 %vm6439_vm0, %v8473_v17  ;;  %v5712_v56 = vmul.f32 %v19963_v19, %v5040_v23  ;;  %v7124_v18 = vld [vmem:[#allocation2 + $0x1e0] ss:$2 sm:$0xff]  ;;  %v7220_v31 = vld [vmem:[#allocation2 + $0x1e1] ss:$2 sm:$0xff] }
 0x29d   :  { %v5039_v0 = vadd.f32 %v17671_v32, %v13476_v10  ;;  %6893 = vst.msk [vmem:[#allocation2 + $0x228] sm:$0xff] %vm6439_vm0, %v12133_v61  ;;  %vm6868_vm2 = vcmp.ge.f32.partialorder %v6860_v30, 1.0  ;;  %vm6871_vm3 = vcmp.ge.f32.partialorder %v6863_v21, 1.0  ;;  %v13477_v58 = vadd.f32 %v17982_v49, %v19964_v38  ;;  %v19965_v17 = vld [vmem:[#allocation161_spill] sm:$0xff] }
 0x29e   :  { %v6862_v11 = vadd.f32 %v6854_v62, %v6381_v2  ;;  %v12132_v50 = vsel %vm6868_vm2, 1.0, %v19772_v46  ;;  %v6900_v22 = vsel %vm6868_vm2, 0.0, %v6860_v30  ;;  %v12135_v60 = vsel %vm6871_vm3, 1.0, %v19772_v46  ;;  %v7126_v49 = vld [vmem:[#allocation2 + $0x1f0] ss:$2 sm:$0xff]  ;;  %v18074_v2 = vpop.f32.mrb[84].mxu0 }
 0x29f   :  { %v6903_v12 = vsel %vm6871_vm3, 0.0, %v6863_v21  ;;  %6892 = vst.msk [vmem:[#allocation2 + $0x220] sm:$0xff] %vm6439_vm0, %v12132_v50  ;;  %6895 = vst.msk [vmem:[#allocation2 + $0x238] sm:$0xff] %vm6439_vm0, %v12135_v60  ;;  %v6384_v23 = vadd.f32 %v19965_v17, %v5712_v56  ;;  %v5711_v62 = vmul.f32 %v19966_v34, %v5039_v0  ;;  %v5042_v10 = vadd.f32 %v17671_v32, %v13477_v58  ;;  %v7222_v16 = vld [vmem:[#allocation2 + $0x1f1] ss:$2 sm:$0xff]  ;;  %v18079_v50 = vpop.f32.mrb[85].mxu0 }
 0x2a0   :  { %vm6870_vm4 = vcmp.ge.f32.partialorder %v6862_v11, 1.0  ;;  %v6907_v21 = vmul.f32 0.5, %v6899_v1  ;;  %v19967_v19 = vld [vmem:[#allocation85_spill] sm:$0xff]  ;;  %v19968_v60 = vld [vmem:[#allocation162_spill] sm:$0xff]  ;;  %v19969_v17 = vld [vmem:[#allocation155_spill] sm:$0xff]  ;;  %v6906_v34 = vmul.f32 0.5, %v6898_v9  ;;  %v18085_v55 = vmax.f32 %v7124_v18, %v7220_v31 }
 0x2a1   :  { %v12134_v30 = vsel %vm6870_vm4, 1.0, %v19772_v46  ;;  %v6902_v61 = vsel %vm6870_vm4, 0.0, %v6862_v11  ;;  %v13478_v38 = vadd.f32 %v17987_v39, %v19967_v19  ;;  %v6913_v56 = vadd.f32 %v6905_v36, %v6384_v23  ;;  %v19970_v1 = vld [vmem:[#allocation79_spill] sm:$0xff]  ;;  %v18092_v36 = vpop.f32.mrb[86].mxu0  ;;  %v19972_v9 = vld [vmem:[#allocation156_spill] sm:$0xff] }
 0x2a2   :  { %6894 = vst.msk [vmem:[#allocation2 + $0x230] sm:$0xff] %vm6439_vm0, %v12134_v30  ;;  %v6383_v0 = vadd.f32 %v19968_v60, %v5711_v62  ;;  %v5714_v58 = vmul.f32 %v19969_v17, %v5042_v10  ;;  %v18087_v14 = vmax.f32 %v7126_v49, %v7222_v16  ;;  %v13479_v11 = vadd.f32 %v17997_v41, %v19970_v1  ;;  %v19971_v19 = vld [vmem:[#allocation163_spill] sm:$0xff]  ;;  %v18098_v18 = vpop.f32.mrb[87].mxu0  ;;  %v19973_v31 = vld [vmem:[#allocation80_spill] sm:$0xff] }
 0x2a3   :  { %v5041_v42 = vadd.f32 %v17671_v32, %v13478_v38  ;;  %vm6921_vm5 = vcmp.ge.f32.partialorder %v6913_v56, 1.0  ;;  %v6909_v30 = vmul.f32 0.5, %v6901_v33  ;;  %v13480_v49 = vadd.f32 %v18006_v53, %v19973_v31  ;;  %v7130_v1 = vld [vmem:[#allocation2 + $0x210] ss:$2 sm:$0xff]  ;;  %v19977_v31 = vld [vmem:[#allocation158_spill] sm:$0xff] }
 0x2a4   :  { %v6912_v39 = vadd.f32 %v6904_v44, %v6383_v0  ;;  %v6386_v43 = vadd.f32 %v19971_v19, %v5714_v58  ;;  %v12137_v23 = vsel %vm6921_vm5, 1.0, %v19772_v46  ;;  %v6953_v62 = vsel %vm6921_vm5, 0.0, %v6913_v56  ;;  %v18104_v44 = vld [vmem:[%s19315_s2] ss:$0 sm:$0xff]  ;;  %v19974_v56 = vld [vmem:[#allocation164_spill] sm:$0xff]  ;;  %v18117_v19 = vpop.f32.mrb[88].mxu0 }
 0x2a5   :  { %v5713_v10 = vmul.f32 %v19972_v9, %v5041_v42  ;;  %v8474_v32 = vpack.c.bf16 %v18087_v14, %v18085_v55  ;;  %6945 = vst.msk [vmem:[#allocation2 + $0x248] sm:$0xff] %vm6439_vm0, %v12137_v23  ;;  %v5044_v33 = vadd.f32 %v18104_v44, %v13479_v11  ;;  %v7128_v42 = vld [vmem:[#allocation2 + $0x200] ss:$2 sm:$0xff]  ;;  %v6908_v0 = vmul.f32 0.5, %v6900_v22  ;;  %v7226_v11 = vld [vmem:[#allocation2 + $0x211] ss:$2 sm:$0xff] }
 0x2a6   :  { %vm6920_vm6 = vcmp.ge.f32.partialorder %v6912_v39, 1.0  ;;  %v6915_v41 = vadd.f32 %v6907_v21, %v6386_v43  ;;  %v7224_v43 = vld [vmem:[#allocation2 + $0x201] ss:$2 sm:$0xff]  ;;  %v5043_v58 = vadd.f32 %v18104_v44, %v13480_v49  ;;  %v13481_v53 = vadd.f32 %v18019_v8, %v17517_v52 }
 0x2a7   :  { %v12136_v16 = vsel %vm6920_vm6, 1.0, %v19772_v46  ;;  %v6952_v38 = vsel %vm6920_vm6, 0.0, %v6912_v39  ;;  %v6385_v60 = vadd.f32 %v19974_v56, %v5713_v10  ;;  %13271 = vmatmul.mubr.msk.bf16.gmra.mrb[80].mxu1 %vm6439_vm0, %v8474_v32  ;;  %v19975_v21 = vld [vmem:[#allocation157_spill] sm:$0xff]  ;;  %v6911_v22 = vmul.f32 0.5, %v6903_v12  ;;  %v18120_v10 = vpop.f32.mrb[89].mxu0 }
 0x2a8   :  { %6944 = vst.msk [vmem:[#allocation2 + $0x240] sm:$0xff] %vm6439_vm0, %v12136_v16  ;;  %vm6923_vm7 = vcmp.ge.f32.partialorder %v6915_v41, 1.0  ;;  %v5716_v17 = vmul.f32 %v19975_v21, %v5044_v33  ;;  %v19976_v32 = vld [vmem:[#allocation165_spill] sm:$0xff]  ;;  %v5715_v49 = vmul.f32 %v19977_v31, %v5043_v58  ;;  %v5046_v16 = vadd.f32 %v18104_v44, %v13481_v53  ;;  %v19978_v21 = vld [vmem:[#allocation166_spill] sm:$0xff]  ;;  %v19979_v58 = vld [vmem:[#allocation159_spill] sm:$0xff] }
 0x2a9   :  { %v12139_v39 = vsel %vm6923_vm7, 1.0, %v19772_v46  ;;  %v6955_v23 = vsel %vm6923_vm7, 0.0, %v6915_v41  ;;  %v6914_v9 = vadd.f32 %v6906_v34, %v6385_v60  ;;  %v13482_v52 = vadd.f32 %v18026_v24, %v17525_v48  ;;  %v19981_v31 = vld [vmem:[#allocation160_spill] sm:$0xff] }
 0x2aa   :  { %6947 = vst.msk [vmem:[#allocation2 + $0x258] sm:$0xff] %vm6439_vm0, %v12139_v39  ;;  %v6388_v33 = vadd.f32 %v19976_v32, %v5716_v17  ;;  %v6910_v8 = vmul.f32 0.5, %v6902_v61  ;;  %v18128_v56 = vmax.f32 %v7128_v42, %v7224_v43  ;;  %v18130_v41 = vmax.f32 %v7130_v1, %v7226_v11  ;;  %v18134_v17 = vpop.f32.mrb[90].mxu0  ;;  %v19980_v32 = vld [vmem:[#allocation167_spill] sm:$0xff] }
 0x2ab   :  { %vm6922_vm8 = vcmp.ge.f32.partialorder %v6914_v9, 1.0  ;;  %v6387_v39 = vadd.f32 %v19978_v21, %v5715_v49  ;;  %v5718_v53 = vmul.f32 %v19979_v58, %v5046_v16  ;;  %v5045_v48 = vadd.f32 %v18104_v44, %v13482_v52  ;;  %v18143_v42 = vpop.f32.mrb[91].mxu0  ;;  %v19982_v52 = vld [vmem:[#allocation168_spill] sm:$0xff]  ;;  %v19983_v21 = vld [vmem:[#allocation171_spill] sm:$0xff] }
 0x2ac   :  { %v12138_v12 = vsel %vm6922_vm8, 1.0, %v19772_v46  ;;  %v6954_v34 = vsel %vm6922_vm8, 0.0, %v6914_v9  ;;  %v6917_v60 = vadd.f32 %v6909_v30, %v6388_v33  ;;  %v8475_v24 = vpack.c.bf16 %v18130_v41, %v18128_v56  ;;  %v19984_v58 = vld [vmem:[#allocation172_spill] sm:$0xff] }
 0x2ad   :  { %6946 = vst.msk [vmem:[#allocation2 + $0x250] sm:$0xff] %vm6439_vm0, %v12138_v12  ;;  %v13483_v61 = vadd.f32 %v18037_v7, %v17545_v35  ;;  %v6916_v30 = vadd.f32 %v6908_v0, %v6387_v39  ;;  %v6961_v43 = vmul.f32 0.5, %v6953_v62  ;;  %v13484_v1 = vadd.f32 %v18045_v15, %v17551_v6  ;;  %v18154_v0 = vpop.f32.mrb[92].mxu0 }
 0x2ae   :  { %vm6925_vm9 = vcmp.ge.f32.partialorder %v6917_v60, 1.0  ;;  %v6390_v33 = vadd.f32 %v19980_v32, %v5718_v53  ;;  %v5717_v49 = vmul.f32 %v19981_v31, %v5045_v48  ;;  %13274 = vmatprep.mubr.msk.bf16.mxu1 %vm6439_vm0, %v8475_v24  ;;  %v6960_v62 = vmul.f32 0.5, %v6952_v38  ;;  %v7132_v24 = vld [vmem:[#allocation2 + $0x220] ss:$2 sm:$0xff] }
 0x2af   :  { %v12141_v11 = vsel %vm6925_vm9, 1.0, %v19772_v46  ;;  %v6957_v9 = vsel %vm6925_vm9, 0.0, %v6917_v60  ;;  %vm6924_vm10 = vcmp.ge.f32.partialorder %v6916_v30, 1.0  ;;  %v5048_v35 = vadd.f32 %v18104_v44, %v13483_v61  ;;  %v18158_v60 = vpop.f32.mrb[93].mxu0  ;;  %v7228_v61 = vld [vmem:[#allocation2 + $0x221] ss:$2 sm:$0xff] }
 0x2b0   :  { %6949 = vst.msk [vmem:[#allocation2 + $0x268] sm:$0xff] %vm6439_vm0, %v12141_v11  ;;  %v5047_v7 = vadd.f32 %v18104_v44, %v13484_v1  ;;  %v12140_v6 = vsel %vm6924_vm10, 1.0, %v19772_v46  ;;  %v6956_v15 = vsel %vm6924_vm10, 0.0, %v6916_v30  ;;  %v6919_v16 = vadd.f32 %v6911_v22, %v6390_v33  ;;  %v19985_v33 = vld [vmem:[#allocation34_spill] sm:$0xff] }
 0x2b1   :  { %v6389_v12 = vadd.f32 %v19982_v52, %v5717_v49  ;;  %6948 = vst.msk [vmem:[#allocation2 + $0x260] sm:$0xff] %vm6439_vm0, %v12140_v6  ;;  %v5720_v39 = vmul.f32 %v19983_v21, %v5048_v35  ;;  %v13485_v48 = vadd.f32 %v18056_v37, %v17573_v57  ;;  %v6963_v38 = vmul.f32 0.5, %v6955_v23  ;;  %v19986_v49 = vld [vmem:[#allocation31_spill] sm:$0xff] }
 0x2b2   :  { %v5719_v53 = vmul.f32 %v19984_v58, %v5047_v7  ;;  %vm6927_vm12 = vcmp.ge.f32.partialorder %v6919_v16, 1.0  ;;  %v13486_v22 = vadd.f32 %v18062_v47, %v17583_v59  ;;  %v6962_v30 = vmul.f32 0.5, %v6954_v34  ;;  %v7134_v7 = vld [vmem:[#allocation2 + $0x230] ss:$2 sm:$0xff]  ;;  %v7230_v6 = vld [vmem:[#allocation2 + $0x231] ss:$2 sm:$0xff] }
 0x2b3   :  { %v6918_v1 = vadd.f32 %v6910_v8, %v6389_v12  ;;  %v12143_v11 = vsel %vm6927_vm12, 1.0, %v19772_v46  ;;  %v6959_v32 = vsel %vm6927_vm12, 0.0, %v6919_v16  ;;  %v6392_v31 = vadd.f32 %v19985_v33, %v5720_v39  ;;  %v18175_v59 = vpop.f32.mrb[94].mxu0  ;;  %v19987_v12 = vld [vmem:[#allocation175_spill] sm:$0xff]  ;;  %v19988_v39 = vld [vmem:[#allocation178_spill] sm:$0xff] }
 0x2b4   :  { %v6391_v35 = vadd.f32 %v19986_v49, %v5719_v53  ;;  %6951 = vst.msk [vmem:[#allocation2 + $0x278] sm:$0xff] %vm6439_vm0, %v12143_v11  ;;  %v5050_v57 = vadd.f32 %v18104_v44, %v13485_v48  ;;  %v5049_v37 = vadd.f32 %v18104_v44, %v13486_v22  ;;  %v18173_v23 = vmax.f32 %v7132_v24, %v7228_v61  ;;  %v18178_v52 = vpop.f32.mrb[95].mxu0  ;;  %v19989_v11 = vld [vmem:[#allocation39_spill] sm:$0xff] }
 0x2b5   :  { %vm6926_vm13 = vcmp.ge.f32.partialorder %v6918_v1, 1.0  ;;  %v6969_v34 = vadd.f32 %v6961_v43, %v6392_v31  ;;  %v18183_v53 = vmax.f32 %v7134_v7, %v7230_v6  ;;  %v13487_v48 = vadd.f32 %v18074_v2, %v17621_v28  ;;  %v19990_v31 = vld [vmem:[#allocation17_spill] sm:$0xff] }
 0x2b6   :  { %v12142_v47 = vsel %vm6926_vm13, 1.0, %v19772_v46  ;;  %v6958_v8 = vsel %vm6926_vm13, 0.0, %v6918_v1  ;;  %v6968_v16 = vadd.f32 %v6960_v62, %v6391_v35  ;;  %v5722_v21 = vmul.f32 %v19987_v12, %v5050_v57  ;;  %v19992_v12 = vld [vmem:[#allocation181_spill] sm:$0xff] }
 0x2b7   :  { %6950 = vst.msk [vmem:[#allocation2 + $0x270] sm:$0xff] %vm6439_vm0, %v12142_v47  ;;  %v5721_v58 = vmul.f32 %v19988_v39, %v5049_v37  ;;  %vm6977_vm14 = vcmp.ge.f32.partialorder %v6969_v34, 1.0  ;;  %v6965_v24 = vmul.f32 0.5, %v6957_v9  ;;  %v13488_v43 = vadd.f32 %v18079_v50, %v17630_v4  ;;  %v7136_v4 = vld [vmem:[#allocation2 + $0x240] ss:$2 sm:$0xff]  ;;  %v19991_v47 = vld [vmem:[#allocation180_spill] sm:$0xff] }
 0x2b8   :  { %vm6976_vm15 = vcmp.ge.f32.partialorder %v6968_v16, 1.0  ;;  %v12145_v62 = vsel %vm6977_vm14, 1.0, %v19772_v46  ;;  %v7009_v61 = vsel %vm6977_vm14, 0.0, %v6969_v34  ;;  %v6394_v33 = vadd.f32 %v19989_v11, %v5722_v21  ;;  %v7232_v50 = vld [vmem:[#allocation2 + $0x241] ss:$2 sm:$0xff] }
 0x2b9   :  { %v12144_v1 = vsel %vm6976_vm15, 1.0, %v19772_v46  ;;  %v7008_v22 = vsel %vm6976_vm15, 0.0, %v6968_v16  ;;  %7001 = vst.msk [vmem:[#allocation2 + $0x288] sm:$0xff] %vm6439_vm0, %v12145_v62  ;;  %v6393_v28 = vadd.f32 %v19990_v31, %v5721_v58  ;;  %v8476_v2 = vpack.c.bf16 %v18183_v53, %v18173_v23  ;;  %v19994_v62 = vld [vmem:[#allocation20_spill] sm:$0xff]  ;;  %v19995_v11 = vld [vmem:[#allocation183_spill] sm:$0xff] }
 0x2ba   :  { %7000 = vst.msk [vmem:[#allocation2 + $0x280] sm:$0xff] %vm6439_vm0, %v12144_v1  ;;  %v5052_v9 = vadd.f32 %v18104_v44, %v13487_v48  ;;  %v5051_v49 = vadd.f32 %v18104_v44, %v13488_v43  ;;  %v6964_v35 = vmul.f32 0.5, %v6956_v15  ;;  %v13489_v7 = vadd.f32 %v18092_v36, %v17651_v54  ;;  %v19993_v54 = vld [vmem:[#allocation11_spill] sm:$0xff]  ;;  %v19996_v31 = vld [vmem:[#allocation184_spill] sm:$0xff] }
 0x2bb   :  { %v6967_v6 = vmul.f32 0.5, %v6959_v32  ;;  %v6971_v57 = vadd.f32 %v6963_v38, %v6394_v33  ;;  %v6970_v37 = vadd.f32 %v6962_v30, %v6393_v28  ;;  %13275 = vmatmul.mubr.msk.bf16.gmra.mrb[84].mxu1 %vm6439_vm0, %v8476_v2  ;;  %v13490_v16 = vadd.f32 %v18098_v18, %v17655_v25  ;;  %v7138_v38 = vld [vmem:[#allocation2 + $0x250] ss:$2 sm:$0xff]  ;;  %v7234_v30 = vld [vmem:[#allocation2 + $0x251] ss:$2 sm:$0xff] }
 0x2bc   :  { %v5724_v34 = vmul.f32 %v19991_v47, %v5052_v9  ;;  %v5723_v21 = vmul.f32 %v19992_v12, %v5051_v49  ;;  %v5054_v39 = vadd.f32 %v18104_v44, %v13489_v7  ;;  %v6966_v58 = vmul.f32 0.5, %v6958_v8  ;;  %v19997_v7 = vld [vmem:[#allocation56_spill] sm:$0xff] }
 0x2bd   :  { %v18207_v48 = vmax.f32 %v7136_v4, %v7232_v50  ;;  %vm6979_vm2 = vcmp.ge.f32.partialorder %v6971_v57, 1.0  ;;  %vm6978_vm3 = vcmp.ge.f32.partialorder %v6970_v37, 1.0  ;;  %v5053_v15 = vadd.f32 %v18104_v44, %v13490_v16 }
 0x2be   :  { %v6396_v36 = vadd.f32 %v19993_v54, %v5724_v34  ;;  %v12147_v32 = vsel %vm6979_vm2, 1.0, %v19772_v46  ;;  %v7011_v43 = vsel %vm6979_vm2, 0.0, %v6971_v57  ;;  %v12146_v25 = vsel %vm6978_vm3, 1.0, %v19772_v46 }
 0x2bf   :  { %v7010_v18 = vsel %vm6978_vm3, 0.0, %v6970_v37  ;;  %7003 = vst.msk [vmem:[#allocation2 + $0x298] sm:$0xff] %vm6439_vm0, %v12147_v32  ;;  %7002 = vst.msk [vmem:[#allocation2 + $0x290] sm:$0xff] %vm6439_vm0, %v12146_v25  ;;  %v6395_v1 = vadd.f32 %v19994_v62, %v5723_v21  ;;  %v5726_v33 = vmul.f32 %v19995_v11, %v5054_v39  ;;  %v5725_v28 = vmul.f32 %v19996_v31, %v5053_v15  ;;  %v19999_v21 = vld [vmem:[#allocation60_spill] sm:$0xff]  ;;  %v20002_v11 = vld [vmem:[#allocation90_spill] sm:$0xff] }
 0x2c0   :  { %v6973_v8 = vadd.f32 %v6965_v24, %v6396_v36  ;;  %v18218_v2 = vmax.f32 %v7138_v38, %v7234_v30  ;;  %v13491_v9 = vadd.f32 %v18117_v19, %v17676_v13  ;;  %v7017_v4 = vmul.f32 0.5, %v7009_v61  ;;  %v19998_v24 = vld [vmem:[#allocation57_spill] sm:$0xff]  ;;  %v20000_v15 = vld [vmem:[#allocation72_spill] sm:$0xff] }
 0x2c1   :  { %v13492_v50 = vadd.f32 %v18120_v10, %v17685_v3  ;;  %v6972_v49 = vadd.f32 %v6964_v35, %v6395_v1  ;;  %v6398_v57 = vadd.f32 %v19997_v7, %v5726_v33  ;;  %v6397_v37 = vadd.f32 %v19998_v24, %v5725_v28  ;;  %v7140_v10 = vld [vmem:[#allocation2 + $0x260] ss:$2 sm:$0xff]  ;;  %v7236_v36 = vld [vmem:[#allocation2 + $0x261] ss:$2 sm:$0xff]  ;;  %v7238_v30 = vld [vmem:[#allocation2 + $0x271] ss:$2 sm:$0xff] }
 0x2c2   :  { %vm6981_vm4 = vcmp.ge.f32.partialorder %v6973_v8, 1.0  ;;  %v8477_v16 = vpack.c.bf16 %v18218_v2, %v18207_v48  ;;  %v5056_v12 = vadd.f32 %v18104_v44, %v13491_v9  ;;  %v7016_v54 = vmul.f32 0.5, %v7008_v22  ;;  %v20001_v22 = vld [vmem:[#allocation89_spill] sm:$0xff] }
 0x2c3   :  { %v12149_v47 = vsel %vm6981_vm4, 1.0, %v19772_v46  ;;  %v7013_v34 = vsel %vm6981_vm4, 0.0, %v6973_v8  ;;  %vm6980_vm5 = vcmp.ge.f32.partialorder %v6972_v49, 1.0  ;;  %v6975_v13 = vadd.f32 %v6967_v6, %v6398_v57  ;;  %v20003_v57 = vld [vmem:[#allocation73_spill] sm:$0xff] }
 0x2c4   :  { %7005 = vst.msk [vmem:[#allocation2 + $0x2a8] sm:$0xff] %vm6439_vm0, %v12149_v47  ;;  %v6974_v19 = vadd.f32 %v6966_v58, %v6397_v37  ;;  %v5055_v3 = vadd.f32 %v18104_v44, %v13492_v50  ;;  %v12148_v61 = vsel %vm6980_vm5, 1.0, %v19772_v46  ;;  %v7012_v35 = vsel %vm6980_vm5, 0.0, %v6972_v49  ;;  %13278 = vmatprep.mubr.msk.bf16.mxu1 %vm6439_vm0, %v8477_v16  ;;  %v7142_v58 = vld [vmem:[#allocation2 + $0x270] ss:$2 sm:$0xff] }
 0x2c5   :  { %v5728_v39 = vmul.f32 %v19999_v21, %v5056_v12  ;;  %7004 = vst.msk [vmem:[#allocation2 + $0x2a0] sm:$0xff] %vm6439_vm0, %v12148_v61  ;;  %vm6983_vm6 = vcmp.ge.f32.partialorder %v6975_v13, 1.0  ;;  %v13493_v6 = vadd.f32 %v18134_v17, %v17700_v40  ;;  %v7019_v28 = vmul.f32 0.5, %v7011_v43  ;;  %v7144_v61 = vld [vmem:[#allocation2 + $0x280] ss:$2 sm:$0xff] }
 0x2c6   :  { %vm6982_vm7 = vcmp.ge.f32.partialorder %v6974_v19, 1.0  ;;  %v5727_v38 = vmul.f32 %v20000_v15, %v5055_v3  ;;  %v12151_v32 = vsel %vm6983_vm6, 1.0, %v19772_v46  ;;  %v7015_v25 = vsel %vm6983_vm6, 0.0, %v6975_v13  ;;  %v7240_v21 = vld [vmem:[#allocation2 + $0x281] ss:$2 sm:$0xff] }
 0x2c7   :  { %v12150_v8 = vsel %vm6982_vm7, 1.0, %v19772_v46  ;;  %v7014_v62 = vsel %vm6982_vm7, 0.0, %v6974_v19  ;;  %7007 = vst.msk [vmem:[#allocation2 + $0x2b8] sm:$0xff] %vm6439_vm0, %v12151_v32  ;;  %v6400_v1 = vadd.f32 %v20001_v22, %v5728_v39  ;;  %v5058_v31 = vadd.f32 %v18104_v44, %v13493_v6  ;;  %v20007_v39 = vld [vmem:[#allocation94_spill] sm:$0xff]  ;;  %v20009_v32 = vld [vmem:[#allocation95_spill] sm:$0xff] }
 0x2c8   :  { %7006 = vst.msk [vmem:[#allocation2 + $0x2b0] sm:$0xff] %vm6439_vm0, %v12150_v8  ;;  %v6399_v33 = vadd.f32 %v20002_v11, %v5727_v38  ;;  %v13494_v40 = vadd.f32 %v18143_v42, %v17704_v26  ;;  %v7018_v17 = vmul.f32 0.5, %v7010_v18  ;;  %v18248_v9 = vmax.f32 %v7140_v10, %v7236_v36  ;;  %v20004_v42 = vld [vmem:[#allocation93_spill] sm:$0xff]  ;;  %v20008_v36 = vld [vmem:[#allocation86_spill] sm:$0xff] }
 0x2c9   :  { %v18250_v50 = vmax.f32 %v7142_v58, %v7238_v30  ;;  %v7025_v49 = vadd.f32 %v7017_v4, %v6400_v1  ;;  %v5730_v24 = vmul.f32 %v20003_v57, %v5058_v31  ;;  %v13495_v37 = vadd.f32 %v18154_v0, %v17733_v45  ;;  %v20005_v45 = vld [vmem:[#allocation74_spill] sm:$0xff]  ;;  %v7146_v58 = vld [vmem:[#allocation2 + $0x290] ss:$2 sm:$0xff]  ;;  %v7242_v30 = vld [vmem:[#allocation2 + $0x291] ss:$2 sm:$0xff]  ;;  %v6309_v57 = vpop.permute.xlu1 %6308 }
 0x2ca   :  { %v7024_v7 = vadd.f32 %v7016_v54, %v6399_v33  ;;  %v5057_v47 = vadd.f32 %v18104_v44, %v13494_v40  ;;  %v7021_v16 = vmul.f32 0.5, %v7013_v34  ;;  %v13496_v26 = vadd.f32 %v18158_v60, %v17739_v5  ;;  %v20006_v60 = vld [vmem:[#allocation84_spill] sm:$0xff]  ;;  %v20010_v33 = vld [vmem:[#allocation97_spill] sm:$0xff] }
 0x2cb   :  { %v8478_v43 = vpack.c.bf16 %v18250_v50, %v18248_v9  ;;  %vm7033_vm8 = vcmp.ge.f32.partialorder %v7025_v49, 1.0  ;;  %v6402_v18 = vadd.f32 %v20004_v42, %v5730_v24  ;;  %v5060_v4 = vadd.f32 %v18104_v44, %v13495_v37  ;;  %v20012_v37 = vld [vmem:[#allocation24_spill] sm:$0xff] }
 0x2cc   :  { %vm7032_vm9 = vcmp.ge.f32.partialorder %v7024_v7, 1.0  ;;  %v12153_v12 = vsel %vm7033_vm8, 1.0, %v19772_v46  ;;  %v5729_v0 = vmul.f32 %v20005_v45, %v5057_v47  ;;  %v5059_v19 = vadd.f32 %v18104_v44, %v13496_v26  ;;  %v7148_v1 = vld [vmem:[#allocation2 + $0x2a0] ss:$2 sm:$0xff] }
 0x2cd   :  { %v12152_v13 = vsel %vm7032_vm9, 1.0, %v19772_v46  ;;  %13279 = vmatmul.mubr.msk.bf16.gmra.mrb[88].mxu1 %vm6439_vm0, %v8478_v43  ;;  %7057 = vst.msk [vmem:[#allocation2 + $0x2c8] sm:$0xff] %vm6439_vm0, %v12153_v12  ;;  %v7027_v5 = vadd.f32 %v7019_v28, %v6402_v18  ;;  %v5732_v34 = vmul.f32 %v20006_v60, %v5060_v4  ;;  %v7020_v3 = vmul.f32 0.5, %v7012_v35  ;;  %v6304_v43 = vpop.permute.xlu0 %6303 }
 0x2ce   :  { %7056 = vst.msk [vmem:[#allocation2 + $0x2c0] sm:$0xff] %vm6439_vm0, %v12152_v13  ;;  %v13497_v10 = vadd.f32 %v18175_v59, %v17750_v63  ;;  %v6401_v54 = vadd.f32 %v20007_v39, %v5729_v0  ;;  %v5731_v15 = vmul.f32 %v20008_v36, %v5059_v19  ;;  %v7023_v38 = vmul.f32 0.5, %v7015_v25  ;;  %v7244_v63 = vld [vmem:[#allocation2 + $0x2a1] ss:$2 sm:$0xff] }
 0x2cf   :  { %v13498_v6 = vadd.f32 %v18178_v52, %v17761_v51  ;;  %vm7035_vm10 = vcmp.ge.f32.partialorder %v7027_v5, 1.0  ;;  %v6404_v8 = vadd.f32 %v20009_v32, %v5732_v34  ;;  %v7022_v22 = vmul.f32 0.5, %v7014_v62  ;;  %v20011_v52 = vld [vmem:[#allocation88_spill] sm:$0xff]  ;;  %v20014_v39 = vld [vmem:[#allocation42_spill] sm:$0xff] }
 0x2d0   :  { %v5062_v35 = vadd.f32 %v18104_v44, %v13497_v10  ;;  %v12155_v59 = vsel %vm7035_vm10, 1.0, %v19772_v46  ;;  %v7026_v11 = vadd.f32 %v7018_v17, %v6401_v54  ;;  %v6403_v31 = vadd.f32 %v20010_v33, %v5731_v15  ;;  %v7150_v7 = vld [vmem:[#allocation2 + $0x2b0] ss:$2 sm:$0xff]  ;;  %v7246_v62 = vld [vmem:[#allocation2 + $0x2b1] ss:$2 sm:$0xff]  ;;  %v20015_v36 = vld [vmem:[#allocation22_spill] sm:$0xff] }
 0x2d1   :  { %v5061_v25 = vadd.f32 %v18104_v44, %v13498_v6  ;;  %7059 = vst.msk [vmem:[#allocation2 + $0x2d8] sm:$0xff] %vm6439_vm0, %v12155_v59  ;;  %v7029_v51 = vadd.f32 %v7021_v16, %v6404_v8  ;;  %v18283_v40 = vmax.f32 %v7144_v61, %v7240_v21  ;;  %v18285_v49 = vmax.f32 %v7146_v58, %v7242_v30  ;;  %v20016_v6 = vld [vmem:[#allocation54_spill] sm:$0xff] }
 0x2d2   :  { %v5734_v28 = vmul.f32 %v20011_v52, %v5062_v35  ;;  %vm7034_vm12 = vcmp.ge.f32.partialorder %v7026_v11, 1.0  ;;  %v7028_v24 = vadd.f32 %v7020_v3, %v6403_v31  ;;  %v18288_v47 = vmax.f32 %v7148_v1, %v7244_v63  ;;  %v20017_v31 = vld [vmem:[#allocation67_spill] sm:$0xff] }
 0x2d3   :  { %v5733_v17 = vmul.f32 %v20012_v37, %v5061_v25  ;;  %v12154_v44 = vsel %vm7034_vm12, 1.0, %v19772_v46  ;;  %vm7037_vm13 = vcmp.ge.f32.partialorder %v7029_v51, 1.0  ;;  %v8479_v26 = vpack.c.bf16 %v18285_v49, %v18283_v40  ;;  %v20020_v37 = vld [vmem:[#allocation78_spill] sm:$0xff] }
 0x2d4   :  { %v6406_v16 = vadd.f32 %v6309_v57, %v5734_v28  ;;  %7058 = vst.msk [vmem:[#allocation2 + $0x2d0] sm:$0xff] %vm6439_vm0, %v12154_v44  ;;  %v12157_v42 = vsel %vm7037_vm13, 1.0, %v19772_v46  ;;  %vm7036_vm14 = vcmp.ge.f32.partialorder %v7028_v24, 1.0  ;;  %v18295_v4 = vmax.f32 %v7150_v7, %v7246_v62  ;;  %v20018_v28 = vld [vmem:[#allocation25_spill] sm:$0xff]  ;;  %v20019_v57 = vld [vmem:[#allocation68_spill] sm:$0xff] }
 0x2d5   :  { %v6405_v18 = vadd.f32 %v6304_v43, %v5733_v17  ;;  %7061 = vst.msk [vmem:[#allocation2 + $0x2e8] sm:$0xff] %vm6439_vm0, %v12157_v42  ;;  %v12156_v12 = vsel %vm7036_vm14, 1.0, %v19772_v46  ;;  %13282 = vmatprep.mubr.msk.bf16.mxu1 %vm6439_vm0, %v8479_v26  ;;  %v7152_v60 = vld [vmem:[#allocation2 + $0x2c0] ss:$2 sm:$0xff]  ;;  %v7248_v34 = vld [vmem:[#allocation2 + $0x2c1] ss:$2 sm:$0xff] }
 0x2d6   :  { %v7031_v13 = vadd.f32 %v7023_v38, %v6406_v16  ;;  %7060 = vst.msk [vmem:[#allocation2 + $0x2e0] sm:$0xff] %vm6439_vm0, %v12156_v12  ;;  %v8480_v0 = vpack.c.bf16 %v18295_v4, %v18288_v47  ;;  %v18308_v61 = vmax.f32 %v7152_v60, %v7248_v34  ;;  %v7351_v54 = vrot.slane %v20014_v39, 7  ;;  %v20021_v43 = vld [vmem:[#allocation83_spill] sm:$0xff] }
 0x2d7   :  { %v7030_v45 = vadd.f32 %v7022_v22, %v6405_v18  ;;  %v7643_v15 = vand.u32 15, %v20015_v36  ;;  %v7352_v58 = vrot.slane %v20016_v6, 7  ;;  %v822_v8 = vadd.s32 16, %v20015_v36  ;;  %v13748_v34 = vld [vmem:[%s19318_s5 + $0x28] sm:$0xff]  }
 0x2d8   :  { %vm7039_vm15 = vcmp.ge.f32.partialorder %v7031_v13, 1.0  ;;  %13283 = vmatmul.mubr.msk.bf16.gmra.mrb[92].mxu1 %vm6439_vm0, %v8480_v0  ;;  %v7494_v1 = vsel %vm241_vm1, 0.0, %v7351_v54  ;;  %v7354_v25 = vrot.slane %v20017_v31, 7  ;;  %v7671_v7 = vand.u32 15, %v20018_v28 }
 0x2d9   :  { %v12159_v19 = vsel %vm7039_vm15, 1.0, %v19772_v46  ;;  %vm7038_vm2 = vcmp.ge.f32.partialorder %v7030_v45, 1.0  ;;  %vm8215_vm3 = vcmp.eq.s32.totalorder %v7643_v15, 0  ;;  %v7353_v11 = vsel %vm241_vm1, %v7351_v54, %v7352_v58  ;;  %v20024_v15 = vld [vmem:[#allocation81_spill] sm:$0xff] }
 0x2da   :  { %7063 = vst.msk [vmem:[#allocation2 + $0x2f8] sm:$0xff] %vm6439_vm0, %v12159_v19  ;;  %v12158_v5 = vsel %vm7038_vm2, 1.0, %v19772_v46  ;;  %v8263_v51 = vsel %vm8215_vm3, 0.0, %v7494_v1  ;;  %v7657_v52 = vand.u32 15, %v822_v8  ;;  %v7356_v24 = vrot.slane %v20019_v57, 7  ;;  %v20022_v19 = vld [vmem:[#allocation87_spill] sm:$0xff] }
 0x2db   :  { %7062 = vst.msk [vmem:[#allocation2 + $0x2f0] sm:$0xff] %vm6439_vm0, %v12158_v5  ;;  %v7154_v3 = vld [vmem:[#allocation2 + $0x2d0] ss:$2 sm:$0xff]  ;;  %v7250_v10 = vld [vmem:[#allocation2 + $0x2d1] ss:$2 sm:$0xff]  ;;  %v8311_v62 = vpack.c.bf16 %v7353_v11, %v8263_v51  ;;  %v7358_v17 = vrot.slane %v20020_v37, 7  ;;  %v7355_v16 = vsel %vm241_vm1, %v7352_v58, %v7354_v25 }
 0x2dc   :  { %v18310_v21 = vmax.f32 %v7154_v3, %v7250_v10  ;;  %v7360_v44 = vrot.slane %v20021_v43, 7  ;;  %vm8217_vm4 = vcmp.eq.s32.totalorder %v7657_v52, 0  ;;  %v826_v26 = vadd.s32 48, %v20015_v36  ;;  %v20023_v3 = vld [vmem:[#allocation26_spill] sm:$0xff]  ;;  %v20025_v58 = vld [vmem:[#allocation91_spill] sm:$0xff] }
 0x2dd   :  { %v7156_v30 = vld [vmem:[#allocation2 + $0x2e0] ss:$2 sm:$0xff]  ;;  %v7252_v32 = vld [vmem:[#allocation2 + $0x2e1] ss:$2 sm:$0xff]  ;;  %v7357_v42 = vsel %vm241_vm1, %v7354_v25, %v7356_v24  ;;  %v7359_v18 = vsel %vm241_vm1, %v7356_v24, %v7358_v17  ;;  %vm8219_vm5 = vcmp.eq.s32.totalorder %v7671_v7, 0  ;;  %v8265_v13 = vsel %vm8217_vm4, 0.0, %v7355_v16 }
 0x2de   :  { %20013 = vst [vmem:[#allocation52_spill] sm:$0xff] %v18310_v21  ;;  %v8481_v38 = vpack.c.bf16 %v18310_v21, %v18308_v61  ;;  %v18320_v63 = vmax.f32 %v7156_v30, %v7252_v32  ;;  %v7361_v12 = vsel %vm241_vm1, %v7358_v17, %v7360_v44  ;;  %v8312_v45 = vpack.c.bf16 %v7357_v42, %v8265_v13  ;;  %v20026_v32 = vld [vmem:[#allocation92_spill] sm:$0xff]  ;;  %v20028_v17 = vld [vmem:[#allocation27_spill] sm:$0xff] }
 0x2df   :  { %v8267_v0 = vsel %vm8219_vm5, 0.0, %v7359_v18  ;;  %v7362_v5 = vrot.slane %v20022_v19, 7  ;;  %v7685_v60 = vand.u32 15, %v826_v26  ;;  %v7699_v10 = vand.u32 15, %v20023_v3  ;;  %v20027_v7 = vld [vmem:[#allocation96_spill] sm:$0xff]  ;;  %v20029_v26 = vld [vmem:[#allocation33_spill] sm:$0xff] }
 0x2e0   :  { %13286 = vmatprep.mubr.msk.bf16.mxu1 %vm6439_vm0, %v8481_v38  ;;  %v8313_v54 = vpack.c.bf16 %v7361_v12, %v8267_v0  ;;  %v7364_v38 = vrot.slane %v20024_v15, 7  ;;  %v7366_v30 = vrot.slane %v20025_v58, 7  ;;  %v7368_v8 = vrot.slane %v20026_v32, 7 }
 0x2e1   :  { %vm8221_vm6 = vcmp.eq.s32.totalorder %v7685_v60, 0  ;;  %v830_v1 = vadd.s32 80, %v20015_v36  ;;  %vm8223_vm7 = vcmp.eq.s32.totalorder %v7699_v10, 0  ;;  %v7372_v42 = vrot.slane %v20029_v26, 7 }
 0x2e2   :  { %v7158_v35 = vld [vmem:[#allocation2 + $0x2f0] ss:$2 sm:$0xff]  ;;  %v7254_v22 = vld [vmem:[#allocation2 + $0x2f1] ss:$2 sm:$0xff]  ;;  %v7365_v11 = vsel %vm241_vm1, %v7362_v5, %v7364_v38  ;;  %v7369_v25 = vsel %vm241_vm1, %v7366_v30, %v7368_v8  ;;  %v7374_v18 = vrot.slane %v17694_v20, 7  ;;  %v7376_v12 = vrot.slane %v17697_v27, 7 }
 0x2e3   :  { %v18322_v59 = vmax.f32 %v7158_v35, %v7254_v22  ;;  %v13887_v35 = vld [vmem:[%s19318_s5 + $0x20] sm:$0xff]   ;;  %v7363_v22 = vsel %vm241_vm1, %v7360_v44, %v7362_v5  ;;  %v7713_v24 = vand.u32 15, %v830_v1  ;;  %v7727_v44 = vand.u32 15, %v20028_v17 }
 0x2e4   :  { %v8269_v51 = vsel %vm8221_vm6, 0.0, %v7363_v22  ;;  %v7375_v5 = vsel %vm241_vm1, %v7372_v42, %v7374_v18  ;;  %v7377_v60 = vsel %vm241_vm1, %v7374_v18, %v7376_v12  ;;  %v20034_v18 = vld [vmem:[#allocation41_spill] sm:$0xff] }
 0x2e5   :  { %v8482_v33 = vpack.c.bf16 %v18322_v59, %v18320_v63  ;;  %v8314_v52 = vpack.c.bf16 %v7365_v11, %v8269_v51  ;;  %vm8225_vm8 = vcmp.eq.s32.totalorder %v7713_v24, 0  ;;  %vm8227_vm9 = vcmp.eq.s32.totalorder %v7727_v44, 0  ;;  %v20032_v11 = vld [vmem:[#allocation36_spill] sm:$0xff] }
 0x2e6   :  { %v8275_v10 = vsel %vm8227_vm9, 0.0, %v7375_v5 }
 0x2e7   :  { %13287 = vmatmul.mubr.msk.bf16.gmra.mrb[96].mxu1 %vm6439_vm0, %v8482_v33  ;;  %v7367_v33 = vsel %vm241_vm1, %v7364_v38, %v7366_v30  ;;  %v20030_v30 = vld [vmem:[#allocation28_spill] sm:$0xff]  ;;  %v8317_v22 = vpack.c.bf16 %v7377_v60, %v8275_v10 }
 0x2e8   :  { %13294 = vmatprep.mubr.msk.bf16.mxu1 %vm6439_vm0, %v8311_v62  ;;  %v8271_v28 = vsel %vm8223_vm7, 0.0, %v7367_v33  ;;  %v7370_v62 = vrot.slane %v20027_v7, 7  ;;  %v7382_v33 = vrot.slane %v20032_v11, 7 }
 0x2e9   :  { %v8315_v16 = vpack.c.bf16 %v7369_v25, %v8271_v28  ;;  %v20033_v25 = vld [vmem:[#allocation38_spill] sm:$0xff]  ;;  %v838_v28 = vadd.s32 144, %v20015_v36 }
 0x2ea   :  { %v7371_v13 = vsel %vm241_vm1, %v7368_v8, %v7370_v62  ;;  %v7373_v0 = vsel %vm241_vm1, %v7370_v62, %v7372_v42  ;;  %v20031_v8 = vld [vmem:[#allocation98_spill] sm:$0xff]  ;;  %v7384_v51 = vrot.slane %v20033_v25, 7 }
 0x2eb   :  { %v7380_v1 = vrot.slane %v20031_v8, 7 }
 0x2ec   :  { %v7385_v17 = vsel %vm241_vm1, %v7382_v33, %v7384_v51 }
 0x2ed   :  { %v7383_v24 = vsel %vm241_vm1, %v7380_v1, %v7382_v33 }
 0x2ef   :  { %13295 = vmatmul.mubr.msk.bf16.vlgmr.msra.gmra.mrb[52].mxu1 %vm6439_vm0, %v8312_v45  ;;  %v834_v45 = vadd.s32 112, %v20015_v36 }
 0x2f0   :  { %13298 = vmatprep.mubr.msk.bf16.mxu1 %vm6439_vm0, %v8313_v54  ;;  %13343 = vmatpush3.bf16.msra.mxu1 %v13887_v35  ;;  %v7378_v54 = vrot.slane %v17731_v29, 7  ;;  %v7755_v35 = vand.u32 15, %v20030_v30 }
 0x2f1   :  { %13344 = vmatprep.subr.bf16.mxu1 %v13748_v34  ;;  %v7741_v38 = vand.u32 15, %v834_v45  ;;  %v7769_v45 = vand.u32 15, %v838_v28 }
 0x2f2   :  { %v7381_v62 = vsel %vm241_vm1, %v7378_v54, %v7380_v1  ;;  %vm8231_vm12 = vcmp.eq.s32.totalorder %v7755_v35, 0  ;;  %v842_v35 = vadd.s32 176, %v20015_v36 }
 0x2f3   :  { %vm8229_vm10 = vcmp.eq.s32.totalorder %v7741_v38, 0  ;;  %v8279_v42 = vsel %vm8231_vm12, 0.0, %v7383_v24  ;;  %vm8233_vm13 = vcmp.eq.s32.totalorder %v7769_v45, 0  ;;  %v20039_v24 = vld [vmem:[#allocation64_spill] sm:$0xff] }
 0x2f4   :  { %13345 = vmatpush3.bf16.msra.mxu1 %v13748_v34  ;;  %v8273_v34 = vsel %vm8225_vm8, 0.0, %v7371_v13  ;;  %v7386_v13 = vrot.slane %v20034_v18, 7  ;;  %v8319_v60 = vpack.c.bf16 %v7385_v17, %v8279_v42  ;;  %v7394_v17 = vrot.slane %v20039_v24, 7 }
 0x2f5   :  { %v8316_v3 = vpack.c.bf16 %v7373_v0, %v8273_v34  ;;  %v20035_v0 = vld [vmem:[#allocation29_spill] sm:$0xff] }
 0x2f6   :  { %v7783_v5 = vand.u32 15, %v20035_v0  ;;  %v7387_v30 = vsel %vm241_vm1, %v7384_v51, %v7386_v13  ;;  %v20041_v51 = vld [vmem:[#allocation169_spill] sm:$0xff] }
 0x2f7   :  { %13299 = vmatmul.mubr.msk.bf16.gmra.mrb[56].mxu1 %vm6439_vm0, %v8314_v52  ;;  %v7379_v52 = vsel %vm241_vm1, %v7376_v12, %v7378_v54  ;;  %v20036_v12 = vld [vmem:[#allocation12_spill] sm:$0xff]  ;;  %v20038_v54 = vld [vmem:[#allocation45_spill] sm:$0xff]  ;;  %v7396_v45 = vrot.slane %v20041_v51, 7 }
 0x2f8   :  { %13302 = vmatprep.mubr.msk.bf16.mxu1 %vm6439_vm0, %v8315_v16  ;;  %v8277_v44 = vsel %vm8229_vm10, 0.0, %v7379_v52  ;;  %v7388_v34 = vrot.slane %v20036_v12, 7  ;;  %v7392_v38 = vrot.slane %v20038_v54, 7  ;;  %vm8235_vm14 = vcmp.eq.s32.totalorder %v7783_v5, 0 }
 0x2f9   :  { %v8318_v16 = vpack.c.bf16 %v7381_v62, %v8277_v44  ;;  %v8281_v52 = vsel %vm8233_vm13, 0.0, %v7387_v30  ;;  %v7797_v44 = vand.u32 15, %v842_v35  ;;  %v7397_v30 = vsel %vm241_vm1, %v7394_v17, %v7396_v45 }
 0x2fa   :  { %v7395_v5 = vsel %vm241_vm1, %v7392_v38, %v7394_v17  ;;  %v20048_v17 = vld [vmem:[#allocation70_spill] sm:$0xff] }
 0x2fb   :  { %vm8237_vm15 = vcmp.eq.s32.totalorder %v7797_v44, 0 }
 0x2ff   :  { %13303 = vmatmul.mubr.msk.bf16.gmra.mrb[60].mxu1 %vm6439_vm0, %v8316_v3  ;;  %v20037_v3 = vld [vmem:[#allocation43_spill] sm:$0xff] }
 0x300   :  { %13306 = vmatprep.mubr.msk.bf16.mxu1 %vm6439_vm0, %v8317_v22  ;;  %v7390_v10 = vrot.slane %v20037_v3, 7  ;;  %v7389_v22 = vsel %vm241_vm1, %v7386_v13, %v7388_v34  ;;  %v20043_v13 = vld [vmem:[#allocation18_spill] sm:$0xff] }
 0x301   :  { %v8320_v28 = vpack.c.bf16 %v7389_v22, %v8281_v52 }
 0x302   :  { %v7391_v1 = vsel %vm241_vm1, %v7388_v34, %v7390_v10  ;;  %v7393_v33 = vsel %vm241_vm1, %v7390_v10, %v7392_v38  ;;  %v7400_v34 = vrot.slane %v20043_v13, 7  ;;  %v846_v10 = vadd.s32 208, %v20015_v36  ;;  %v20045_v13 = vld [vmem:[#allocation37_spill] sm:$0xff]  ;;  %v20046_v38 = vld [vmem:[#allocation170_spill] sm:$0xff] }
 0x303   :  { %v8283_v62 = vsel %vm8235_vm14, 0.0, %v7391_v1  ;;  %v8285_v1 = vsel %vm8237_vm15, 0.0, %v7395_v5  ;;  %v7404_v44 = vrot.slane %v20046_v38, 7 }
 0x304   :  { %v8321_v0 = vpack.c.bf16 %v7393_v33, %v8283_v62  ;;  %v8322_v33 = vpack.c.bf16 %v7397_v30, %v8285_v1  ;;  %v7410_v1 = vrot.slane %v18085_v55, 7 }
 0x307   :  { %13307 = vmatmul.mubr.msk.bf16.gmra.mrb[64].mxu1 %vm6439_vm0, %v8318_v16  ;;  %v20040_v16 = vld [vmem:[#allocation30_spill] sm:$0xff] }
 0x308   :  { %13310 = vmatprep.mubr.msk.bf16.mxu1 %vm6439_vm0, %v8319_v60  ;;  %v7811_v42 = vand.u32 15, %v20040_v16  ;;  %v20042_v60 = vld [vmem:[#allocation50_spill] sm:$0xff]  ;;  %v7825_v16 = vand.u32 15, %v846_v10 }
 0x309   :  { %v7398_v46 = vrot.slane %v20042_v60, 7  ;;  %v20047_v60 = vld [vmem:[#allocation173_spill] sm:$0xff] }
 0x30a   :  { %vm8239_vm2 = vcmp.eq.s32.totalorder %v7811_v42, 0  ;;  %v7406_v54 = vrot.slane %v20047_v60, 7  ;;  %vm8241_vm3 = vcmp.eq.s32.totalorder %v7825_v16, 0  ;;  %v850_v42 = vadd.s32 240, %v20015_v36 }
 0x30b   :  { %v7399_v35 = vsel %vm241_vm1, %v7396_v45, %v7398_v46  ;;  %v7401_v22 = vsel %vm241_vm1, %v7398_v46, %v7400_v34  ;;  %v7408_v45 = vrot.slane %v20048_v17, 7  ;;  %v7414_v16 = vrot.slane %v18128_v56, 7 }
 0x30c   :  { %v8287_v52 = vsel %vm8239_vm2, 0.0, %v7399_v35 }
 0x30d   :  { %v8323_v51 = vpack.c.bf16 %v7401_v22, %v8287_v52  ;;  %v7409_v10 = vsel %vm241_vm1, %v7406_v54, %v7408_v45  ;;  %v20049_v52 = vld [vmem:[#allocation44_spill] sm:$0xff] }
 0x30f   :  { %13311 = vmatmul.mubr.msk.bf16.gmra.mrb[68].mxu1 %vm6439_vm0, %v8320_v28  ;;  %v20044_v28 = vld [vmem:[#allocation69_spill] sm:$0xff] }
 0x310   :  { %13314 = vmatprep.mubr.msk.bf16.mxu1 %vm6439_vm0, %v8321_v0  ;;  %v7402_v62 = vrot.slane %v20044_v28, 7  ;;  %v7839_v0 = vand.u32 15, %v20045_v13  ;;  %v7407_v13 = vsel %vm241_vm1, %v7404_v44, %v7406_v54  ;;  %v7411_v54 = vsel %vm241_vm1, %v7408_v45, %v7410_v1 }
 0x311   :  { %v7420_v45 = vrot.slane %v18183_v53, 7 }
 0x312   :  { %v7403_v46 = vsel %vm241_vm1, %v7400_v34, %v7402_v62  ;;  %v7405_v5 = vsel %vm241_vm1, %v7402_v62, %v7404_v44  ;;  %vm8243_vm4 = vcmp.eq.s32.totalorder %v7839_v0, 0  ;;  %v7412_v34 = vrot.slane %v18087_v14, 7 }
 0x313   :  { %v8289_v30 = vsel %vm8241_vm3, 0.0, %v7403_v46  ;;  %v8291_v22 = vsel %vm8243_vm4, 0.0, %v7407_v13  ;;  %v7416_v62 = vrot.slane %v18130_v41, 7  ;;  %v854_v0 = vadd.s32 272, %v20015_v36 }
 0x314   :  { %v8324_v35 = vpack.c.bf16 %v7405_v5, %v8289_v30  ;;  %v8325_v17 = vpack.c.bf16 %v7409_v10, %v8291_v22  ;;  %v7413_v44 = vsel %vm241_vm1, %v7410_v1, %v7412_v34  ;;  %v7415_v46 = vsel %vm241_vm1, %v7412_v34, %v7414_v16  ;;  %v20050_v22 = vld [vmem:[#allocation49_spill] sm:$0xff] }
 0x315   :  { %v7418_v30 = vrot.slane %v18173_v23, 7  ;;  %v7424_v1 = vrot.slane %v18218_v2, 7  ;;  %v858_v34 = vadd.s32 304, %v20015_v36 }
 0x317   :  { %13315 = vmatmul.mubr.msk.bf16.gmra.mrb[72].mxu1 %vm6439_vm0, %v8322_v33  ;;  %v7853_v33 = vand.u32 15, %v850_v42  ;;  %v7417_v42 = vsel %vm241_vm1, %v7414_v16, %v7416_v62  ;;  %v7421_v16 = vsel %vm241_vm1, %v7418_v30, %v7420_v45 }
 0x318   :  { %13318 = vmatprep.mubr.msk.bf16.mxu1 %vm6439_vm0, %v8323_v51  ;;  %v7867_v51 = vand.u32 15, %v20049_v52 }
 0x319   :  { %vm8245_vm5 = vcmp.eq.s32.totalorder %v7853_v33, 0  ;;  %v7422_v33 = vrot.slane %v18207_v48, 7 }
 0x31a   :  { %vm8247_vm6 = vcmp.eq.s32.totalorder %v7867_v51, 0  ;;  %v8293_v5 = vsel %vm8245_vm5, 0.0, %v7411_v54  ;;  %v7419_v51 = vsel %vm241_vm1, %v7416_v62, %v7418_v30  ;;  %v7428_v62 = vrot.slane %v18250_v50, 7 }
 0x31b   :  { %v8326_v13 = vpack.c.bf16 %v7413_v44, %v8293_v5  ;;  %v8295_v10 = vsel %vm8247_vm6, 0.0, %v7415_v46  ;;  %v7423_v54 = vsel %vm241_vm1, %v7420_v45, %v7422_v33  ;;  %v7426_v5 = vrot.slane %v18248_v9, 7 }
 0x31c   :  { %v8327_v52 = vpack.c.bf16 %v7417_v42, %v8295_v10  ;;  %v20051_v10 = vld [vmem:[#allocation53_spill] sm:$0xff]  ;;  %v7432_v30 = vrot.slane %v18285_v49, 7  ;;  %v862_v45 = vadd.s32 336, %v20015_v36 }
 0x31f   :  { %13319 = vmatmul.mubr.msk.bf16.gmra.mrb[76].mxu1 %vm6439_vm0, %v8324_v35  ;;  %v7881_v35 = vand.u32 15, %v854_v0  ;;  %v7425_v0 = vsel %vm241_vm1, %v7422_v33, %v7424_v1  ;;  %v7429_v33 = vsel %vm241_vm1, %v7426_v5, %v7428_v62 }
 0x320   :  { %13322 = vmatprep.mubr.msk.bf16.mxu1 %vm6439_vm0, %v8325_v17  ;;  %v7895_v17 = vand.u32 15, %v20050_v22  ;;  %v7923_v22 = vand.u32 15, %v20051_v10 }
 0x321   :  { %vm8249_vm7 = vcmp.eq.s32.totalorder %v7881_v35, 0  ;;  %v7430_v35 = vrot.slane %v18283_v40, 7 }
 0x322   :  { %vm8251_vm8 = vcmp.eq.s32.totalorder %v7895_v17, 0  ;;  %v8297_v44 = vsel %vm8249_vm7, 0.0, %v7419_v51  ;;  %v7427_v17 = vsel %vm241_vm1, %v7424_v1, %v7426_v5  ;;  %vm8255_vm10 = vcmp.eq.s32.totalorder %v7923_v22, 0 }
 0x323   :  { %v8328_v46 = vpack.c.bf16 %v7421_v16, %v8297_v44  ;;  %v8299_v42 = vsel %vm8251_vm8, 0.0, %v7423_v54  ;;  %v7431_v51 = vsel %vm241_vm1, %v7428_v62, %v7430_v35  ;;  %v7434_v44 = vrot.slane %v18288_v47, 7 }
 0x324   :  { %v7436_v1 = vrot.slane %v18295_v4, 7  ;;  %v7440_v5 = vrot.slane %v18310_v21, 7  ;;  %v821_v22 = vadd.s32 8, %v20015_v36  ;;  %v7496_v21 = vrot.slane %v20016_v6, 1 }
 0x325   :  { %v7435_v62 = vsel %vm241_vm1, %v7432_v30, %v7434_v44  ;;  %v7495_v6 = vrot.slane %v20014_v39, 1 }
 0x327   :  { %13323 = vmatmul.mubr.msk.bf16.gmra.mrb[80].mxu1 %vm6439_vm0, %v8326_v13  ;;  %v7909_v13 = vand.u32 15, %v858_v34  ;;  %v7433_v34 = vsel %vm241_vm1, %v7430_v35, %v7432_v30  ;;  %v866_v35 = vadd.s32 368, %v20015_v36 }
 0x328   :  { %13326 = vmatprep.mubr.msk.bf16.mxu1 %vm6439_vm0, %v8327_v52  ;;  %v8329_v52 = vpack.c.bf16 %v7425_v0, %v8299_v42  ;;  %v8303_v0 = vsel %vm8255_vm10, 0.0, %v7431_v51  ;;  %v20052_v42 = vld [vmem:[#allocation59_spill] sm:$0xff] }
 0x329   :  { %vm8253_vm9 = vcmp.eq.s32.totalorder %v7909_v13, 0  ;;  %v7951_v10 = vand.u32 15, %v20052_v42  ;;  %v7438_v13 = vrot.slane %v18308_v61, 7  ;;  %v7442_v42 = vrot.slane %v18320_v63, 7 }
 0x32a   :  { %v8301_v16 = vsel %vm8253_vm9, 0.0, %v7427_v17  ;;  %v7437_v17 = vsel %vm241_vm1, %v7434_v44, %v7436_v1 }
 0x32b   :  { %v8330_v54 = vpack.c.bf16 %v7429_v33, %v8301_v16  ;;  %vm8259_vm13 = vcmp.eq.s32.totalorder %v7951_v10, 0  ;;  %v7441_v33 = vsel %vm241_vm1, %v7438_v13, %v7440_v5  ;;  %v7650_v16 = vand.u32 15, %v821_v22 }
 0x32c   :  { %v7443_v10 = vsel %vm241_vm1, %v7440_v5, %v7442_v42 }
 0x32d   :  { %vm8336_vm14 = vcmp.eq.s32.totalorder %v7650_v16, 15  ;;  %v7497_v16 = vsel %vm530_vm11, %v7495_v6, %v7496_v21 }
 0x32f   :  { %13327 = vmatmul.mubr.msk.bf16.gmra.mrb[84].mxu1 %vm6439_vm0, %v8328_v46  ;;  %v7937_v46 = vand.u32 15, %v862_v45  ;;  %v7439_v45 = vsel %vm241_vm1, %v7436_v1, %v7438_v13  ;;  %v20053_v13 = vld [vmem:[#allocation16_spill] sm:$0xff] }
 0x330   :  { %13330 = vmatprep.mubr.msk.bf16.mxu1 %vm6439_vm0, %v8329_v52  ;;  %v8331_v52 = vpack.c.bf16 %v7433_v34, %v8303_v0  ;;  %v7498_v34 = vrot.slane %v20017_v31, 1  ;;  %v8307_v0 = vsel %vm8259_vm13, 0.0, %v7439_v45  ;;  %v825_v31 = vadd.s32 40, %v20015_v36 }
 0x331   :  { %vm8257_vm12 = vcmp.eq.s32.totalorder %v7937_v46, 0  ;;  %v8333_v30 = vpack.c.bf16 %v7441_v33, %v8307_v0  ;;  %v7444_v46 = vrot.slane %v18322_v59, 7  ;;  %v7664_v22 = vand.u32 15, %v20053_v13 }
 0x332   :  { %v8305_v51 = vsel %vm8257_vm12, 0.0, %v7435_v62  ;;  %v7499_v44 = vsel %vm530_vm11, %v7496_v21, %v7498_v34  ;;  %v7502_v62 = vrot.slane %v20020_v37, 1  ;;  %v7506_v45 = vrot.slane %v20022_v19, 1 }
 0x333   :  { %v7445_v1 = vsel %vm241_vm1, %v7442_v42, %v7444_v46  ;;  %v7678_v33 = vand.u32 15, %v825_v31  ;;  %v7504_v0 = vrot.slane %v20021_v43, 1  ;;  %vm8338_vm1 = vcmp.eq.s32.totalorder %v7664_v22, 15 }
 0x334   :  { %v829_v19 = vadd.s32 72, %v20015_v36  ;;  %v7514_v46 = vrot.slane %v20027_v7, 1  ;;  %v7512_v22 = vrot.slane %v20026_v32, 1  ;;  %v833_v7 = vadd.s32 104, %v20015_v36 }
 0x335   :  { %v7507_v39 = vsel %vm530_vm11, %v7504_v0, %v7506_v45  ;;  %vm8340_vm2 = vcmp.eq.s32.totalorder %v7678_v33, 15  ;;  %v7522_v33 = vrot.slane %v17731_v29, 1  ;;  %v837_v29 = vadd.s32 136, %v20015_v36 }
 0x337   :  { %13331 = vmatmul.mubr.msk.bf16.gmra.mrb[88].mxu1 %vm6439_vm0, %v8330_v54  ;;  %v8332_v54 = vpack.c.bf16 %v7437_v17, %v8305_v51 }
 0x338   :  { %13334 = vmatprep.mubr.msk.bf16.mxu1 %vm6439_vm0, %v8331_v52  ;;  %v7965_v52 = vand.u32 15, %v866_v35  ;;  %v8384_v35 = vsel %vm8336_vm14, 0.0, %v7499_v44  ;;  %v7706_v44 = vand.u32 15, %v829_v19  ;;  %v20056_v19 = vld [vmem:[#allocation58_spill] sm:$0xff] }
 0x339   :  { %v8431_v5 = vpack.c.bf16 %v8384_v35, %v7497_v16  ;;  %v20055_v35 = vld [vmem:[#allocation48_spill] sm:$0xff] }
 0x33a   :  { %vm8261_vm15 = vcmp.eq.s32.totalorder %v7965_v52, 0  ;;  %v20054_v52 = vld [vmem:[#allocation14_spill] sm:$0xff]  ;;  %vm8344_vm4 = vcmp.eq.s32.totalorder %v7706_v44, 15  ;;  %v7524_v44 = vrot.slane %v20031_v8, 1  ;;  %v7534_v8 = vrot.slane %v20037_v3, 1 }
 0x33b   :  { %v8309_v17 = vsel %vm8261_vm15, 0.0, %v7443_v10  ;;  %v7692_v21 = vand.u32 15, %v20054_v52  ;;  %v7505_v10 = vsel %vm530_vm11, %v7502_v62, %v7504_v0 }
 0x33c   :  { %v8334_v51 = vpack.c.bf16 %v7445_v1, %v8309_v17  ;;  %v7508_v1 = vrot.slane %v20024_v15, 1  ;;  %v7518_v15 = vrot.slane %v17694_v20, 1 }
 0x33d   :  { %vm8342_vm3 = vcmp.eq.s32.totalorder %v7692_v21, 15  ;;  %v7530_v21 = vrot.slane %v20034_v18, 1  ;;  %v841_v18 = vadd.s32 168, %v20015_v36 }
 0x33e   :  { %v7509_v32 = vsel %vm530_vm11, %v7506_v45, %v7508_v1 }
 0x33f   :  { %13335 = vmatmul.mubr.msk.bf16.gmra.mrb[92].mxu1 %vm6439_vm0, %v8332_v54  ;;  %v7500_v54 = vrot.slane %v20019_v57, 1  ;;  %v7510_v57 = vrot.slane %v20025_v58, 1  ;;  %v7515_v58 = vsel %vm530_vm11, %v7512_v22, %v7514_v46 }
 0x340   :  { %13338 = vmatprep.mubr.msk.bf16.mxu1 %vm6439_vm0, %v8333_v30  ;;  %v8388_v30 = vsel %vm8340_vm2, 0.0, %v7507_v39  ;;  %v8392_v17 = vsel %vm8344_vm4, 0.0, %v7515_v58  ;;  %v7538_v58 = vrot.slane %v20039_v24, 1  ;;  %v845_v24 = vadd.s32 200, %v20015_v36 }
 0x341   :  { %v7503_v37 = vsel %vm530_vm11, %v7500_v54, %v7502_v62  ;;  %v7501_v43 = vsel %vm530_vm11, %v7498_v34, %v7500_v54  ;;  %v8433_v13 = vpack.c.bf16 %v8388_v30, %v7505_v10  ;;  %v7511_v6 = vsel %vm530_vm11, %v7508_v1, %v7510_v57 }
 0x342   :  { %v8386_v42 = vsel %vm8338_vm1, 0.0, %v7503_v37  ;;  %v8390_v34 = vsel %vm8342_vm3, 0.0, %v7511_v6  ;;  %v7720_v62 = vand.u32 15, %v20055_v35  ;;  %v7513_v54 = vsel %vm530_vm11, %v7510_v57, %v7512_v22 }
 0x343   :  { %v8432_v31 = vpack.c.bf16 %v8386_v42, %v7501_v43  ;;  %v8434_v16 = vpack.c.bf16 %v8390_v34, %v7509_v32  ;;  %v8435_v0 = vpack.c.bf16 %v8392_v17, %v7513_v54  ;;  %v7520_v37 = vrot.slane %v17697_v27, 1 }
 0x344   :  { %vm8346_vm5 = vcmp.eq.s32.totalorder %v7720_v62, 15  ;;  %v7748_v42 = vand.u32 15, %v20056_v19  ;;  %v7762_v30 = vand.u32 15, %v837_v29  ;;  %v7528_v10 = vrot.slane %v20033_v25, 1  ;;  %v20061_v19 = vld [vmem:[#allocation169_spill] sm:$0xff] }
 0x345   :  { %v7523_v20 = vsel %vm530_vm11, %v7520_v37, %v7522_v33  ;;  %v7521_v43 = vsel %vm530_vm11, %v7518_v15, %v7520_v37  ;;  %v7525_v25 = vsel %vm530_vm11, %v7522_v33, %v7524_v44  ;;  %v7532_v62 = vrot.slane %v20036_v12, 1  ;;  %v20060_v12 = vld [vmem:[#allocation50_spill] sm:$0xff] }
 0x346   :  { %vm8350_vm7 = vcmp.eq.s32.totalorder %v7748_v42, 15  ;;  %vm8352_vm8 = vcmp.eq.s32.totalorder %v7762_v30, 15  ;;  %v7540_v42 = vrot.slane %v20061_v19, 1 }
 0x347   :  { %13339 = vmatmul.mubr.msk.bf16.gmra.mrb[96].mxu1 %vm6439_vm0, %v8334_v51  ;;  %v7734_v51 = vand.u32 15, %v833_v7  ;;  %v7790_v7 = vand.u32 15, %v841_v18  ;;  %v7533_v37 = vsel %vm530_vm11, %v7530_v21, %v7532_v62 }
 0x348   :  { %13346 = vmatprep.mubr.msk.bf16.mxu1 %vm6439_vm0, %v8431_v5  ;;  %v7516_v5 = vrot.slane %v20029_v26, 1  ;;  %v7526_v26 = vrot.slane %v20032_v11, 1  ;;  %v7531_v11 = vsel %vm530_vm11, %v7528_v10, %v7530_v21  ;;  %v7541_v18 = vsel %vm530_vm11, %v7538_v58, %v7540_v42 }
 0x349   :  { %vm8348_vm6 = vcmp.eq.s32.totalorder %v7734_v51, 15  ;;  %v8400_v6 = vsel %vm8352_vm8, 0.0, %v7531_v11  ;;  %v7535_v51 = vsel %vm530_vm11, %v7532_v62, %v7534_v8  ;;  %vm8356_vm10 = vcmp.eq.s32.totalorder %v7790_v7, 15  ;;  %v20064_v7 = vld [vmem:[#allocation70_spill] sm:$0xff] }
 0x34a   :  { %v7519_v39 = vsel %vm530_vm11, %v7516_v5, %v7518_v15  ;;  %v8396_v52 = vsel %vm8348_vm6, 0.0, %v7523_v20  ;;  %v7517_v27 = vsel %vm530_vm11, %v7514_v46, %v7516_v5  ;;  %v7527_v1 = vsel %vm530_vm11, %v7524_v44, %v7526_v26  ;;  %v20058_v15 = vld [vmem:[#allocation45_spill] sm:$0xff] }
 0x34b   :  { %v8394_v45 = vsel %vm8346_vm5, 0.0, %v7519_v39  ;;  %v8398_v46 = vsel %vm8350_vm7, 0.0, %v7527_v1  ;;  %v7529_v35 = vsel %vm530_vm11, %v7526_v26, %v7528_v10  ;;  %v7536_v32 = vrot.slane %v20058_v15, 1  ;;  %v20062_v26 = vld [vmem:[#allocation18_spill] sm:$0xff] }
 0x34c   :  { %v8436_v57 = vpack.c.bf16 %v8394_v45, %v7517_v27  ;;  %v8438_v34 = vpack.c.bf16 %v8398_v46, %v7525_v25  ;;  %v8439_v17 = vpack.c.bf16 %v8400_v6, %v7529_v35  ;;  %v7546_v39 = vrot.slane %v20044_v28, 1 }
 0x34d   :  { %v7539_v3 = vsel %vm530_vm11, %v7536_v32, %v7538_v58  ;;  %v7818_v20 = vand.u32 15, %v845_v24  ;;  %v7537_v45 = vsel %vm530_vm11, %v7534_v8, %v7536_v32  ;;  %v7544_v27 = vrot.slane %v20062_v26, 1 }
 0x34e   :  { %v8404_v5 = vsel %vm8356_vm10, 0.0, %v7539_v3  ;;  %v849_v28 = vadd.s32 232, %v20015_v36  ;;  %v7550_v11 = vrot.slane %v20047_v60, 1  ;;  %v7554_v46 = vrot.slane %v18085_v55, 1 }
 0x34f   :  { %13347 = vmatmul.mubr.msk.bf16.vlgmr.msra.gmra.mrb[52].mxu1 %vm6439_vm0, %v8432_v31  ;;  %v8437_v31 = vpack.c.bf16 %v8396_v52, %v7521_v43  ;;  %v8441_v52 = vpack.c.bf16 %v8404_v5, %v7537_v45  ;;  %v7547_v21 = vsel %vm530_vm11, %v7544_v27, %v7546_v39  ;;  %vm8360_vm13 = vcmp.eq.s32.totalorder %v7818_v20, 15  ;;  %v18550_v43 = vpop.permute.xlu0 %9573  ;;  %v20066_v45 = vld [vmem:[#allocation113_spill] sm:$0xff] }
 0x350   :  { %13350 = vmatprep.mubr.msk.bf16.mxu1 %vm6439_vm0, %v8433_v13  ;;  %v20057_v13 = vld [vmem:[#allocation63_spill] sm:$0xff]  ;;  %v8408_v1 = vsel %vm8360_vm13, 0.0, %v7547_v21  ;;  %v7548_v8 = vrot.slane %v20046_v38, 1  ;;  %v853_v58 = vadd.s32 264, %v20015_v36  ;;  %v7562_v24 = vrot.slane %v18173_v23, 1 }
 0x351   :  { %v7776_v22 = vand.u32 15, %v20057_v13  ;;  %v7846_v13 = vand.u32 15, %v849_v28  ;;  %v7560_v20 = vrot.slane %v18130_v41, 1  ;;  %v7566_v41 = vrot.slane %v18207_v48, 1 }
 0x352   :  { %v7551_v62 = vsel %vm530_vm11, %v7548_v8, %v7550_v11  ;;  %v7549_v3 = vsel %vm530_vm11, %v7546_v39, %v7548_v8  ;;  %v857_v39 = vadd.s32 296, %v20015_v36  ;;  %v7578_v8 = vrot.slane %v18288_v47, 1 }
 0x353   :  { %vm8354_vm9 = vcmp.eq.s32.totalorder %v7776_v22, 15  ;;  %v18563_v60 = vpop.permute.xlu0 %9909  ;;  %vm8364_vm15 = vcmp.eq.s32.totalorder %v7846_v13, 15  ;;  %v7563_v23 = vsel %vm530_vm11, %v7560_v20, %v7562_v24 }
 0x354   :  { %v8402_v33 = vsel %vm8354_vm9, 0.0, %v7535_v51  ;;  %v7558_v51 = vrot.slane %v18128_v56, 1 }
 0x355   :  { %v8440_v29 = vpack.c.bf16 %v8402_v33, %v7533_v37  ;;  %v7874_v33 = vand.u32 15, %v853_v58  ;;  %v7576_v58 = vrot.slane %v18285_v49, 1 }
 0x356   :  { %v7561_v28 = vsel %vm530_vm11, %v7558_v51, %v7560_v20  ;;  %v7580_v20 = vrot.slane %v18295_v4, 1 }
 0x357   :  { %13351 = vmatmul.mubr.msk.bf16.gmra.mrb[56].mxu1 %vm6439_vm0, %v8434_v16  ;;  %v20059_v16 = vld [vmem:[#allocation100_spill] sm:$0xff]  ;;  %vm8368_vm2 = vcmp.eq.s32.totalorder %v7874_v33, 15  ;;  %v7579_v47 = vsel %vm530_vm11, %v7576_v58, %v7578_v8  ;;  %v7586_v33 = vrot.slane %v18320_v63, 1 }
 0x358   :  { %13354 = vmatprep.mubr.msk.bf16.mxu1 %vm6439_vm0, %v8435_v0  ;;  %v7804_v54 = vand.u32 15, %v20059_v16  ;;  %v7542_v0 = vrot.slane %v20060_v12, 1  ;;  %v7556_v12 = vrot.slane %v18087_v14, 1  ;;  %v7888_v14 = vand.u32 15, %v20066_v45  ;;  %v20070_v45 = vld [vmem:[#allocation128_spill] sm:$0xff] }
 0x35a   :  { %v7543_v30 = vsel %vm530_vm11, %v7540_v42, %v7542_v0  ;;  %vm8358_vm12 = vcmp.eq.s32.totalorder %v7804_v54, 15  ;;  %v7545_v6 = vsel %vm530_vm11, %v7542_v0, %v7544_v27  ;;  %v18576_v0 = vpop.permute.xlu0 %9593  ;;  %v7559_v56 = vsel %vm530_vm11, %v7556_v12, %v7558_v51 }
 0x35b   :  { %v8406_v44 = vsel %vm8358_vm12, 0.0, %v7543_v30  ;;  %v8443_v25 = vpack.c.bf16 %v8408_v1, %v7545_v6  ;;  %v8416_v42 = vsel %vm8368_vm2, 0.0, %v7563_v23  ;;  %v7557_v26 = vsel %vm530_vm11, %v7554_v46, %v7556_v12  ;;  %v20069_v23 = vld [vmem:[#allocation52_spill] sm:$0xff] }
 0x35c   :  { %v8442_v22 = vpack.c.bf16 %v8406_v44, %v7541_v18  ;;  %v7570_v27 = vrot.slane %v18248_v9, 1  ;;  %v7902_v30 = vand.u32 15, %v857_v39  ;;  %v7564_v44 = vrot.slane %v18183_v53, 1 }
 0x35d   :  { %vm8370_vm3 = vcmp.eq.s32.totalorder %v7888_v14, 15  ;;  %v861_v9 = vadd.s32 328, %v20015_v36  ;;  %v7584_v39 = vrot.slane %v20069_v23, 1  ;;  %v7972_v14 = vand.u32 15, %v20070_v45 }
 0x35e   :  { %v7567_v1 = vsel %vm530_vm11, %v7564_v44, %v7566_v41  ;;  %vm8372_vm4 = vcmp.eq.s32.totalorder %v7902_v30, 15  ;;  %v7565_v6 = vsel %vm530_vm11, %v7562_v24, %v7564_v44 }
 0x35f   :  { %13355 = vmatmul.mubr.msk.bf16.gmra.mrb[60].mxu1 %vm6439_vm0, %v8436_v57  ;;  %v18548_v57 = vpop.permute.xlu1 %9583  ;;  %v8418_v53 = vsel %vm8370_vm3, 0.0, %v7567_v1  ;;  %v7587_v63 = vsel %vm530_vm11, %v7584_v39, %v7586_v33  ;;  %vm8382_vm9 = vcmp.eq.s32.totalorder %v7972_v14, 15 }
 0x360   :  { %13358 = vmatprep.mubr.msk.bf16.mxu1 %vm6439_vm0, %v8437_v31  ;;  %v20063_v31 = vld [vmem:[#allocation105_spill] sm:$0xff] }
 0x361   :  { %v7832_v10 = vand.u32 15, %v20063_v31  ;;  %v8447_v31 = vpack.c.bf16 %v8416_v42, %v7561_v28 }
 0x363   :  { %v18559_v35 = vpop.permute.xlu1 %9919  ;;  %vm8362_vm14 = vcmp.eq.s32.totalorder %v7832_v10, 15  ;;  %v7568_v10 = vrot.slane %v18218_v2, 1 }
 0x364   :  { %v8410_v38 = vsel %vm8362_vm14, 0.0, %v7551_v62  ;;  %v7572_v62 = vrot.slane %v18250_v50, 1 }
 0x365   :  { %v8444_v54 = vpack.c.bf16 %v8410_v38, %v7549_v3  ;;  %v7571_v48 = vsel %vm530_vm11, %v7568_v10, %v7570_v27  ;;  %v7582_v3 = vrot.slane %v18308_v61, 1 }
 0x366   :  { %v8420_v2 = vsel %vm8372_vm4, 0.0, %v7571_v48  ;;  %v7573_v24 = vsel %vm530_vm11, %v7570_v27, %v7572_v62  ;;  %v7581_v27 = vsel %vm530_vm11, %v7578_v8, %v7580_v20 }
 0x367   :  { %13359 = vmatmul.mubr.msk.bf16.gmra.mrb[64].mxu1 %vm6439_vm0, %v8438_v34  ;;  %v7552_v34 = vrot.slane %v20064_v7, 1  ;;  %v18572_v16 = vpop.permute.xlu1 %9603  ;;  %v8448_v7 = vpack.c.bf16 %v8418_v53, %v7565_v6  ;;  %v7583_v61 = vsel %vm530_vm11, %v7580_v20, %v7582_v3 }
 0x368   :  { %13362 = vmatprep.mubr.msk.bf16.mxu1 %vm6439_vm0, %v8439_v17  ;;  %v20065_v17 = vld [vmem:[#allocation23_spill] sm:$0xff] }
 0x369   :  { %v7555_v55 = vsel %vm530_vm11, %v7552_v34, %v7554_v46  ;;  %v7860_v15 = vand.u32 15, %v20065_v17  ;;  %v7553_v5 = vsel %vm530_vm11, %v7550_v11, %v7552_v34  ;;  %v20067_v46 = vld [vmem:[#allocation118_spill] sm:$0xff]  ;;  %v7569_v34 = vsel %vm530_vm11, %v7566_v41, %v7568_v10 }
 0x36a   :  { %v8412_v32 = vsel %vm8364_vm15, 0.0, %v7555_v55  ;;  %v7916_v13 = vand.u32 15, %v20067_v46  ;;  %v8449_v55 = vpack.c.bf16 %v8420_v2, %v7569_v34  ;;  %v7588_v41 = vrot.slane %v18322_v59, 1 }
 0x36b   :  { %v8445_v37 = vpack.c.bf16 %v8412_v32, %v7553_v5  ;;  %vm8366_vm1 = vcmp.eq.s32.totalorder %v7860_v15, 15  ;;  %v18585_v19 = vpop.permute.xlu1 %9939  ;;  %v865_v15 = vadd.s32 360, %v20015_v36  ;;  %v20068_v32 = vld [vmem:[#allocation123_spill] sm:$0xff] }
 0x36c   :  { %vm8374_vm5 = vcmp.eq.s32.totalorder %v7916_v13, 15  ;;  %v7944_v51 = vand.u32 15, %v20068_v32  ;;  %v7638_v44 = vsel %vm530_vm11, %v7588_v41, 0.0  ;;  %v7589_v59 = vsel %vm530_vm11, %v7586_v33, %v7588_v41 }
 0x36d   :  { %v8430_v1 = vsel %vm8382_vm9, 0.0, %v7638_v44  ;;  %v18731_v44 = vld [vmem:[%s19319_s6] ss:$0 sm:$0xff] }
 0x36e   :  { %vm8378_vm7 = vcmp.eq.s32.totalorder %v7944_v51, 15  ;;  %v8454_v48 = vpack.c.bf16 %v8430_v1, %v7589_v59  ;;  %v13749_v59 = vld [vmem:[%s19322_s9 + $0x40] sm:$0xff]  }
 0x36f   :  { %13363 = vmatmul.mubr.msk.bf16.gmra.mrb[68].mxu1 %vm6439_vm0, %v8440_v29  ;;  %v8414_v29 = vsel %vm8366_vm1, 0.0, %v7559_v56  ;;  %v18600_v11 = vpop.permute.xlu1 %9623  ;;  %v13750_v1 = vld [vmem:[%s19322_s9] sm:$0xff]   ;;  %12722 = vmatprep.subr.bf16.mxu1 %v13749_v59 }
 0x370   :  { %13366 = vmatprep.mubr.msk.bf16.mxu1 %vm6439_vm0, %v8441_v52  ;;  %v18588_v52 = vpop.permute.xlu0 %9929  ;;  %v8446_v21 = vpack.c.bf16 %v8414_v29, %v7557_v26  ;;  %v8426_v29 = vsel %vm8378_vm7, 0.0, %v7583_v61  ;;  %12723 = vmatpush3.bf16.msra.mxu1 %v13750_v1 }
 0x371   :  { %v8452_v30 = vpack.c.bf16 %v8426_v29, %v7581_v27 }
 0x373   :  { %v18611_v38 = vpop.permute.xlu1 %9959 }
 0x374   :  { %v18602_v18 = vpop.permute.xlu0 %9613 }
 0x377   :  { %13367 = vmatmul.mubr.msk.bf16.gmra.mrb[72].mxu1 %vm6439_vm0, %v8442_v22  ;;  %v7574_v22 = vrot.slane %v18283_v40, 1  ;;  %v18624_v5 = vpop.permute.xlu1 %9643 }
 0x378   :  { %13370 = vmatprep.mubr.msk.bf16.mxu1 %vm6439_vm0, %v8443_v25  ;;  %v7930_v25 = vand.u32 15, %v861_v9  ;;  %v18615_v40 = vpop.permute.xlu0 %9949 }
 0x379   :  { %v7575_v17 = vsel %vm530_vm11, %v7572_v62, %v7574_v22 }
 0x37a   :  { %vm8376_vm6 = vcmp.eq.s32.totalorder %v7930_v25, 15  ;;  %v8422_v50 = vsel %vm8374_vm5, 0.0, %v7575_v17 }
 0x37b   :  { %v8424_v49 = vsel %vm8376_vm6, 0.0, %v7579_v47  ;;  %v8450_v12 = vpack.c.bf16 %v8422_v50, %v7573_v24  ;;  %v18636_v42 = vpop.permute.xlu1 %9979 }
 0x37c   :  { %v18628_v56 = vpop.permute.xlu0 %9633 }
 0x37f   :  { %13371 = vmatmul.mubr.msk.bf16.gmra.mrb[76].mxu1 %vm6439_vm0, %v8444_v54  ;;  %v7958_v54 = vand.u32 15, %v865_v15 }
 0x380   :  { %13374 = vmatprep.mubr.msk.bf16.mxu1 %vm6439_vm0, %v8445_v37  ;;  %v7577_v37 = vsel %vm530_vm11, %v7574_v22, %v7576_v58  ;;  %v18639_v26 = vpop.permute.xlu0 %9969 }
 0x381   :  { %v8451_v36 = vpack.c.bf16 %v8424_v49, %v7577_v37  ;;  %vm8380_vm8 = vcmp.eq.s32.totalorder %v7958_v54, 15 }
 0x382   :  { %v8428_v4 = vsel %vm8380_vm8, 0.0, %v7587_v63 }
 0x384   :  { %v18648_v10 = vpop.permute.xlu0 %9653 }
 0x387   :  { %13375 = vmatmul.mubr.msk.bf16.gmra.mrb[80].mxu1 %vm6439_vm0, %v8446_v21  ;;  %v7585_v21 = vsel %vm530_vm11, %v7582_v3, %v7584_v39  ;;  %vm10211_vm11 = vcmask 523264  }
 0x388   :  { %13378 = vmatprep.mubr.msk.bf16.mxu1 %vm6439_vm0, %v8447_v31  ;;  %v8453_v28 = vpack.c.bf16 %v8428_v4, %v7585_v21  ;;  %v18646_v31 = vpop.permute.xlu1 %9663  ;;  %v18654_v53 = vpop.permute.xlu0 %9989 }
 0x38c   :  { %v18651_v9 = vpop.permute.xlu1 %9999  ;;  %v18658_v13 = vpop.permute.xlu0 %9673 }
 0x38f   :  { %13379 = vmatmul.mubr.msk.bf16.gmra.mrb[84].mxu1 %vm6439_vm0, %v8448_v7 }
 0x390   :  { %13382 = vmatprep.mubr.msk.bf16.mxu1 %vm6439_vm0, %v8449_v55  ;;  %v18656_v46 = vpop.permute.xlu1 %9683  ;;  %v18662_v22 = vpop.permute.xlu0 %10009 }
 0x394   :  { %v18660_v2 = vpop.permute.xlu1 %10019  ;;  %v9579_v8 = vpop.permute.xlu0 %9578 }
 0x397   :  { %13383 = vmatmul.mubr.msk.bf16.gmra.mrb[88].mxu1 %vm6439_vm0, %v8450_v12 }
 0x398   :  { %13386 = vmatprep.mubr.msk.bf16.mxu1 %vm6439_vm0, %v8451_v36  ;;  %v9589_v6 = vpop.permute.xlu1 %9588  ;;  %v18666_v7 = vpop.permute.xlu0 %9693 }
 0x39c   :  { %v18664_v25 = vpop.permute.xlu1 %9703  ;;  %v9915_v62 = vpop.permute.xlu0 %9914 }
 0x39f   :  { %13387 = vmatmul.mubr.msk.bf16.gmra.mrb[92].mxu1 %vm6439_vm0, %v8452_v30 }
 0x3a0   :  { %13390 = vmatprep.mubr.msk.bf16.mxu1 %vm6439_vm0, %v8453_v28  ;;  %v9925_v34 = vpop.permute.xlu1 %9924  ;;  %v18670_v58 = vpop.permute.xlu0 %9598 }
 0x3a4   :  { %v18668_v55 = vpop.permute.xlu1 %9608  ;;  %v18674_v47 = vpop.permute.xlu0 %10029 }
 0x3a5   :  { %20071 = vst [vmem:[#allocation101_spill] sm:$0xff] %v18674_v47 }
 0x3a7   :  { %13391 = vmatmul.mubr.msk.bf16.gmra.mrb[96].mxu1 %vm6439_vm0, %v8454_v48 }
 0x3a8   :  { %v18672_v17 = vpop.permute.xlu1 %10039  ;;  %v18678_v50 = vpop.permute.xlu0 %9934 }
 0x3ac   :  { %v18676_v15 = vpop.permute.xlu1 %9944  ;;  %v18682_v51 = vpop.permute.xlu0 %9713 }
 0x3ad   :  { %20073 = vst [vmem:[#allocation82_spill] sm:$0xff] %v18682_v51 }
 0x3b0   :  { %v18680_v32 = vpop.permute.xlu1 %9723  ;;  %v18686_v3 = vpop.permute.xlu0 %9618 }
 0x3b1   :  { %20072 = vst [vmem:[#allocation99_spill] sm:$0xff] %v18680_v32 }
 0x3b4   :  { %v18684_v49 = vpop.permute.xlu1 %9628  ;;  %v18690_v33 = vpop.permute.xlu0 %10049 }
 0x3b5   :  { %20075 = vst [vmem:[#allocation103_spill] sm:$0xff] %v18690_v33 }
 0x3b8   :  { %v18688_v24 = vpop.permute.xlu1 %10059  ;;  %v18694_v12 = vpop.permute.xlu0 %9954 }
 0x3b9   :  { %20074 = vst [vmem:[#allocation102_spill] sm:$0xff] %v18688_v24 }
 0x3bc   :  { %v18692_v54 = vpop.permute.xlu1 %9964  ;;  %v18698_v20 = vpop.permute.xlu0 %9733 }
 0x3bd   :  { %20077 = vst [vmem:[#allocation111_spill] sm:$0xff] %v18698_v20 }
 0x3c0   :  { %v18696_v37 = vpop.permute.xlu1 %9743  ;;  %v18702_v23 = vpop.permute.xlu0 %9638 }
 0x3c1   :  { %20076 = vst [vmem:[#allocation110_spill] sm:$0xff] %v18696_v37 }
 0x3c4   :  { %v18700_v36 = vpop.permute.xlu1 %9648  ;;  %v18706_v61 = vpop.permute.xlu0 %10069 }
 0x3c5   :  { %20079 = vst [vmem:[#allocation176_spill] sm:$0xff] %v18706_v61 }
 0x3c8   :  { %v18704_v39 = vpop.permute.xlu1 %10079  ;;  %v18710_v29 = vpop.permute.xlu0 %9974 }
 0x3c9   :  { %20078 = vst [vmem:[#allocation174_spill] sm:$0xff] %v18704_v39 }
 0x3cc   :  { %v18708_v63 = vpop.permute.xlu1 %9984  ;;  %v18714_v14 = vpop.permute.xlu0 %9753 }
 0x3cd   :  { %20081 = vst [vmem:[#allocation104_spill] sm:$0xff] %v18714_v14 }
 0x3d0   :  { %v18712_v45 = vpop.permute.xlu1 %9763  ;;  %v18718_v41 = vpop.permute.xlu0 %9658 }
 0x3d1   :  { %20080 = vst [vmem:[#allocation177_spill] sm:$0xff] %v18712_v45 }
 0x3d4   :  { %v18716_v4 = vpop.permute.xlu1 %9668  ;;  %v18722_v30 = vpop.permute.xlu0 %10089 }
 0x3d5   :  { %20083 = vst [vmem:[#allocation179_spill] sm:$0xff] %v18722_v30 }
 0x3d8   :  { %v18720_v27 = vpop.permute.xlu1 %10099  ;;  %v18726_v28 = vpop.permute.xlu0 %9994 }
 0x3d9   :  { %20082 = vst [vmem:[#allocation112_spill] sm:$0xff] %v18720_v27 }
 0x3dc   :  { %v18724_v21 = vpop.permute.xlu1 %10004  ;;  %v18745_v33 = vpop.permute.xlu0 %9773 }
 0x3dd   :  { %20085 = vst [vmem:[#allocation107_spill] sm:$0xff] %v18745_v33 }
 0x3e0   :  { %v18741_v61 = vpop.permute.xlu1 %9783 }
 0x3e1   :  { %20084 = vst [vmem:[#allocation106_spill] sm:$0xff] %v18741_v61 }
 0x422   :  { %v13348_v48 = vpop.f32.mrb[52].mxu1 }
 0x423   :  { %v9477_v30 = vadd.f32 %v13348_v48, %v18731_v44  ;;  %v9229_v27 = vpop.f32.mrb[53].mxu1 }
 0x424   :  { %v9475_v14 = vadd.f32 %v18731_v44, %v9229_v27  ;;  %v13349_v45 = vpop.f32.mrb[54].mxu1 }
 0x425   :  { %v9813_v39 = vmul.f32 %v18548_v57, %v9477_v30  ;;  %v9478_v20 = vadd.f32 %v13349_v45, %v18731_v44  ;;  %v9232_v37 = vpop.f32.mrb[55].mxu1  ;;  %v13751_v57 = vld [vmem:[%s19322_s9 + $0x48] sm:$0xff]   ;;  %v13755_v30 = vld [vmem:[%s19322_s9 + $0x58] sm:$0xff]  }
 0x426   :  { %v9811_v24 = vmul.f32 %v18550_v43, %v9475_v14  ;;  %v9476_v59 = vadd.f32 %v18731_v44, %v9232_v37  ;;  %v13752_v45 = vld [vmem:[%s19322_s9 + $0x8] sm:$0xff]   ;;  %v13753_v43 = vld [vmem:[%s19322_s9 + $0x50] sm:$0xff]   ;;  %12724 = vmatprep.subr.bf16.mxu1 %v13751_v57 }
 0x427   :  { %v10149_v48 = vadd.f32 %v18559_v35, %v9813_v39  ;;  %v9814_v51 = vmul.f32 %v9589_v6, %v9478_v20  ;;  %v20086_v35 = vmov 0.0   ;;  %12725 = vmatpush3.bf16.msra.mxu1 %v13752_v45 }
 0x428   :  { %v10147_v27 = vadd.f32 %v18563_v60, %v9811_v24  ;;  %v9812_v1 = vmul.f32 %v9579_v8, %v9476_v59  ;;  %v18762_v24 = vpop.permute.xlu1 %9688  ;;  %12726 = vmatprep.subr.bf16.mxu1 %v13753_v43 }
 0x429   :  { %vm10201_vm0 = vcmp.ge.f32.partialorder %v10149_v48, 1.0  ;;  %v10150_v37 = vadd.f32 %v9925_v34, %v9814_v51  ;;  %v13754_v34 = vld [vmem:[%s19322_s9 + $0x10] sm:$0xff]   ;;  %v18770_v51 = vpop.permute.xlu0 %9678 }
 0x42a   :  { %v12249_v6 = vsel %vm10201_vm0, 1.0, %v20086_v35  ;;  %vm10199_vm10 = vcmp.ge.f32.partialorder %v10147_v27, 1.0  ;;  %v10148_v60 = vadd.f32 %v9915_v62, %v9812_v1  ;;  %v13352_v8 = vpop.f32.mrb[56].mxu1  ;;  %v10218_v59 = vsel %vm10201_vm0, 0.0, %v10149_v48 }
 0x42b   :  { %10214 = vst.msk [vmem:[#allocation3 + $0x10] sm:$0xff] %vm10211_vm11, %v12249_v6  ;;  %v12247_v20 = vsel %vm10199_vm10, 1.0, %v20086_v35  ;;  %vm10202_vm12 = vcmp.ge.f32.partialorder %v10150_v37, 1.0  ;;  %v9245_v39 = vpop.f32.mrb[57].mxu1  ;;  %v10216_v1 = vsel %vm10199_vm10, 0.0, %v10147_v27  ;;  %v9481_v45 = vadd.f32 %v13352_v8, %v18731_v44  ;;  %12727 = vmatpush3.bf16.msra.mxu1 %v13754_v34 }
 0x42c   :  { %10212 = vst.msk [vmem:[#allocation3] sm:$0xff] %vm10211_vm11, %v12247_v20  ;;  %v12250_v62 = vsel %vm10202_vm12, 1.0, %v20086_v35  ;;  %vm10200_vm13 = vcmp.ge.f32.partialorder %v10148_v60, 1.0  ;;  %v13353_v14 = vpop.f32.mrb[58].mxu1  ;;  %v10219_v20 = vsel %vm10202_vm12, 0.0, %v10150_v37  ;;  %v9479_v43 = vadd.f32 %v18731_v44, %v9245_v39  ;;  %12728 = vmatprep.subr.bf16.mxu1 %v13755_v30  ;;  %v18795_v39 = vpop.permute.xlu1 %10119 }
 0x42d   :  { %10215 = vst.msk [vmem:[#allocation3 + $0x18] sm:$0xff] %vm10211_vm11, %v12250_v62  ;;  %v12248_v57 = vsel %vm10200_vm13, 1.0, %v20086_v35  ;;  %v9248_v6 = vpop.f32.mrb[59].mxu1  ;;  %v9482_v33 = vadd.f32 %v13353_v14, %v18731_v44  ;;  %v10217_v48 = vsel %vm10200_vm13, 0.0, %v10148_v60  ;;  %v9817_v27 = vmul.f32 %v18572_v16, %v9481_v45  ;;  %v13756_v62 = vld [vmem:[%s19322_s9 + $0x18] sm:$0xff]   ;;  %v18798_v16 = vpop.permute.xlu0 %10109 }
 0x42e   :  { %10213 = vst.msk [vmem:[#allocation3 + $0x8] sm:$0xff] %vm10211_vm11, %v12248_v57  ;;  %v9480_v61 = vadd.f32 %v18731_v44, %v9248_v6  ;;  %v9815_v8 = vmul.f32 %v18576_v0, %v9479_v43  ;;  %v10222_v14 = vmul.f32 0.5, %v10218_v59  ;;  %v10220_v32 = vmul.f32 0.5, %v10216_v1 }
 0x42f   :  { %v9818_v37 = vmul.f32 %v18668_v55, %v9482_v33  ;;  %v10223_v6 = vmul.f32 0.5, %v10219_v20  ;;  %v10153_v60 = vadd.f32 %v18585_v19, %v9817_v27  ;;  %v10221_v34 = vmul.f32 0.5, %v10217_v48  ;;  %12729 = vmatpush3.bf16.msra.mxu1 %v13756_v62 }
 0x430   :  { %v9816_v57 = vmul.f32 %v18670_v58, %v9480_v61  ;;  %v10151_v45 = vadd.f32 %v18588_v52, %v9815_v8  ;;  %v18808_v27 = vpop.permute.xlu1 %10024 }
 0x431   :  { %v10154_v47 = vadd.f32 %v18676_v15, %v9818_v37  ;;  %v10226_v33 = vadd.f32 %v10222_v14, %v10153_v60  ;;  %v18813_v37 = vpop.permute.xlu0 %10014 }
 0x432   :  { %v10152_v0 = vadd.f32 %v18678_v50, %v9816_v57  ;;  %v13356_v55 = vpop.f32.mrb[60].mxu1  ;;  %v10224_v30 = vadd.f32 %v10220_v32, %v10151_v45 }
 0x433   :  { %v9485_v58 = vadd.f32 %v13356_v55, %v18731_v44  ;;  %v9261_v61 = vpop.f32.mrb[61].mxu1  ;;  %v10227_v59 = vadd.f32 %v10223_v6, %v10154_v47  ;;  %vm10230_vm14 = vcmp.ge.f32.partialorder %v10226_v33, 1.0 }
 0x434   :  { %v10225_v1 = vadd.f32 %v10221_v34, %v10152_v0  ;;  %v9483_v19 = vadd.f32 %v18731_v44, %v9261_v61  ;;  %v13357_v20 = vpop.f32.mrb[62].mxu1  ;;  %v12253_v50 = vsel %vm10230_vm14, 1.0, %v20086_v35  ;;  %v10246_v48 = vsel %vm10230_vm14, 0.0, %v10226_v33 }
 0x435   :  { %v9821_v43 = vmul.f32 %v18600_v11, %v9485_v58  ;;  %v9486_v52 = vadd.f32 %v13357_v20, %v18731_v44  ;;  %v9264_v15 = vpop.f32.mrb[63].mxu1  ;;  %vm10228_vm15 = vcmp.ge.f32.partialorder %v10224_v30, 1.0  ;;  %vm10231_vm1 = vcmp.ge.f32.partialorder %v10227_v59, 1.0  ;;  %10242 = vst.msk [vmem:[#allocation3 + $0x30] sm:$0xff] %vm10211_vm11, %v12253_v50 }
 0x436   :  { %v12251_v47 = vsel %vm10228_vm15, 1.0, %v20086_v35  ;;  %v10244_v32 = vsel %vm10228_vm15, 0.0, %v10224_v30  ;;  %v12254_v62 = vsel %vm10231_vm1, 1.0, %v20086_v35  ;;  %v10247_v8 = vsel %vm10231_vm1, 0.0, %v10227_v59 }
 0x437   :  { %10240 = vst.msk [vmem:[#allocation3 + $0x20] sm:$0xff] %vm10211_vm11, %v12251_v47  ;;  %10243 = vst.msk [vmem:[#allocation3 + $0x38] sm:$0xff] %vm10211_vm11, %v12254_v62  ;;  %vm10229_vm2 = vcmp.ge.f32.partialorder %v10225_v1, 1.0  ;;  %v10157_v11 = vadd.f32 %v18611_v38, %v9821_v43  ;;  %v10250_v57 = vmul.f32 0.5, %v10246_v48  ;;  %v9819_v14 = vmul.f32 %v18602_v18, %v9483_v19  ;;  %v18828_v43 = vpop.permute.xlu1 %9803  ;;  %v18832_v48 = vpop.permute.xlu0 %9793 }
 0x438   :  { %v12252_v6 = vsel %vm10229_vm2, 1.0, %v20086_v35  ;;  %v10245_v60 = vsel %vm10229_vm2, 0.0, %v10225_v1  ;;  %v9822_v34 = vmul.f32 %v18684_v49, %v9486_v52  ;;  %v10248_v55 = vmul.f32 0.5, %v10244_v32 }
 0x439   :  { %10241 = vst.msk [vmem:[#allocation3 + $0x28] sm:$0xff] %vm10211_vm11, %v12252_v6  ;;  %v10254_v45 = vadd.f32 %v10250_v57, %v10157_v11  ;;  %v10155_v0 = vadd.f32 %v18615_v40, %v9819_v14  ;;  %v9484_v33 = vadd.f32 %v18731_v44, %v9264_v15  ;;  %v10251_v38 = vmul.f32 0.5, %v10247_v8  ;;  %v10699_v57 = vld [vmem:[#allocation3 + $0x6] ss:$16 sm:$0x3] }
 0x43a   :  { %v13360_v58 = vpop.f32.mrb[64].mxu1  ;;  %v10158_v61 = vadd.f32 %v18692_v54, %v9822_v34  ;;  %v10249_v30 = vmul.f32 0.5, %v10245_v60 }
 0x43b   :  { %v9489_v18 = vadd.f32 %v13360_v58, %v18731_v44  ;;  %v9277_v59 = vpop.f32.mrb[65].mxu1  ;;  %vm10258_vm3 = vcmp.ge.f32.partialorder %v10254_v45, 1.0  ;;  %v10252_v1 = vadd.f32 %v10248_v55, %v10155_v0  ;;  %v9820_v49 = vmul.f32 %v18686_v3, %v9484_v33  ;;  %v10723_v33 = vld [vmem:[#allocation3 + $0x7] ss:$16 sm:$0x3] }
 0x43c   :  { %v9487_v19 = vadd.f32 %v18731_v44, %v9277_v59  ;;  %v13361_v20 = vpop.f32.mrb[66].mxu1  ;;  %v12257_v40 = vsel %vm10258_vm3, 1.0, %v20086_v35  ;;  %v10274_v52 = vsel %vm10258_vm3, 0.0, %v10254_v45  ;;  %v10255_v15 = vadd.f32 %v10251_v38, %v10158_v61 }
 0x43d   :  { %v9825_v54 = vmul.f32 %v18624_v5, %v9489_v18  ;;  %v9280_v50 = vpop.f32.mrb[67].mxu1  ;;  %10270 = vst.msk [vmem:[#allocation3 + $0x50] sm:$0xff] %vm10211_vm11, %v12257_v40  ;;  %vm10256_vm4 = vcmp.ge.f32.partialorder %v10252_v1, 1.0  ;;  %v10156_v47 = vadd.f32 %v18694_v12, %v9820_v49  ;;  %v10278_v3 = vmul.f32 0.5, %v10274_v52  ;;  %v18845_v18 = vpop.permute.xlu1 %9708 }
 0x43e   :  { %v9823_v32 = vmul.f32 %v18628_v56, %v9487_v19  ;;  %v12255_v62 = vsel %vm10256_vm4, 1.0, %v20086_v35  ;;  %v10272_v8 = vsel %vm10256_vm4, 0.0, %v10252_v1  ;;  %vm10259_vm5 = vcmp.ge.f32.partialorder %v10255_v15, 1.0  ;;  %v10700_v14 = vld [vmem:[#allocation3 + $0x6] ss:$16 sm:$0xc]  ;;  %v18848_v49 = vpop.permute.xlu0 %9698 }
 0x43f   :  { %v10161_v11 = vadd.f32 %v18636_v42, %v9825_v54  ;;  %10268 = vst.msk [vmem:[#allocation3 + $0x40] sm:$0xff] %vm10211_vm11, %v12255_v62  ;;  %v12258_v5 = vsel %vm10259_vm5, 1.0, %v20086_v35  ;;  %v10275_v6 = vsel %vm10259_vm5, 0.0, %v10255_v15  ;;  %v10253_v60 = vadd.f32 %v10249_v30, %v10156_v47  ;;  %v10724_v12 = vld [vmem:[#allocation3 + $0x7] ss:$16 sm:$0xc] }
 0x440   :  { %v10159_v34 = vadd.f32 %v18639_v26, %v9823_v32  ;;  %10271 = vst.msk [vmem:[#allocation3 + $0x58] sm:$0xff] %vm10211_vm11, %v12258_v5  ;;  %v10276_v45 = vmul.f32 0.5, %v10272_v8  ;;  %v9490_v0 = vadd.f32 %v13361_v20, %v18731_v44  ;;  %v10279_v55 = vmul.f32 0.5, %v10275_v6 }
 0x441   :  { %v10282_v56 = vadd.f32 %v10278_v3, %v10161_v11  ;;  %vm10257_vm6 = vcmp.ge.f32.partialorder %v10253_v60, 1.0  ;;  %v9488_v42 = vadd.f32 %v18731_v44, %v9280_v50  ;;  %v10701_v61 = vor.u32 %v10700_v14, %v10699_v57  ;;  %v18859_v57 = vld [vmem:[#allocation3 + $0x2] ss:$16 sm:$0xc] }
 0x442   :  { %v13364_v58 = vpop.f32.mrb[68].mxu1  ;;  %v10725_v38 = vor.u32 %v10724_v12, %v10723_v33  ;;  %v12256_v30 = vsel %vm10257_vm6, 1.0, %v20086_v35  ;;  %v10273_v26 = vsel %vm10257_vm6, 0.0, %v10253_v60  ;;  %v10280_v59 = vadd.f32 %v10276_v45, %v10159_v34 }
 0x443   :  { %vm10286_vm7 = vcmp.ge.f32.partialorder %v10282_v56, 1.0  ;;  %v9293_v1 = vpop.f32.mrb[69].mxu1  ;;  %10269 = vst.msk [vmem:[#allocation3 + $0x48] sm:$0xff] %vm10211_vm11, %v12256_v30  ;;  %v9826_v40 = vmul.f32 %v18700_v36, %v9490_v0  ;;  %v9824_v52 = vmul.f32 %v18702_v23, %v9488_v42  ;;  %v10277_v54 = vmul.f32 0.5, %v10273_v26 }
 0x444   :  { %v12261_v19 = vsel %vm10286_vm7, 1.0, %v20086_v35  ;;  %v10302_v20 = vsel %vm10286_vm7, 0.0, %v10282_v56  ;;  %v13365_v15 = vpop.f32.mrb[70].mxu1  ;;  %vm10284_vm8 = vcmp.ge.f32.partialorder %v10280_v59, 1.0  ;;  %v9493_v50 = vadd.f32 %v13364_v58, %v18731_v44  ;;  %v18877_v58 = vpop.permute.xlu0 %10129 }
 0x445   :  { %10298 = vst.msk [vmem:[#allocation3 + $0x70] sm:$0xff] %vm10211_vm11, %v12261_v19  ;;  %v10306_v47 = vmul.f32 0.5, %v10302_v20  ;;  %v9296_v3 = vpop.f32.mrb[71].mxu1  ;;  %v12259_v32 = vsel %vm10284_vm8, 1.0, %v20086_v35  ;;  %v10300_v62 = vsel %vm10284_vm8, 0.0, %v10280_v59  ;;  %v10162_v8 = vadd.f32 %v18708_v63, %v9826_v40 }
 0x446   :  { %v10160_v11 = vadd.f32 %v18710_v29, %v9824_v52  ;;  %10296 = vst.msk [vmem:[#allocation3 + $0x60] sm:$0xff] %vm10211_vm11, %v12259_v32  ;;  %v9829_v36 = vmul.f32 %v18646_v31, %v9493_v50  ;;  %v9491_v23 = vadd.f32 %v18731_v44, %v9293_v1  ;;  %v10304_v14 = vmul.f32 0.5, %v10300_v62  ;;  %v10702_v6 = vld [vmem:[#allocation3 + $0x6] ss:$16 sm:$0x30]  ;;  %v18868_v29 = vpop.permute.xlu1 %10139 }
 0x447   :  { %v9494_v5 = vadd.f32 %v13365_v15, %v18731_v44  ;;  %v10283_v60 = vadd.f32 %v10279_v55, %v10162_v8  ;;  %v9492_v12 = vadd.f32 %v18731_v44, %v9296_v3  ;;  %v18866_v56 = vor.u32 %v10702_v6, %v10701_v61  ;;  %v10726_v63 = vld [vmem:[#allocation3 + $0x7] ss:$16 sm:$0x30]  ;;  %v18875_v42 = vld [vmem:[#allocation3 + $0x2] ss:$16 sm:$0x3] }
 0x448   :  { %v10281_v34 = vadd.f32 %v10277_v54, %v10160_v11  ;;  %v10165_v45 = vadd.f32 %v18651_v9, %v9829_v36  ;;  %v9827_v0 = vmul.f32 %v18648_v10, %v9491_v23  ;;  %v18873_v33 = vor.u32 %v10726_v63, %v10725_v38 }
 0x449   :  { %v9830_v31 = vmul.f32 %v18716_v4, %v9494_v5  ;;  %vm10287_vm9 = vcmp.ge.f32.partialorder %v10283_v60, 1.0  ;;  %v9828_v55 = vmul.f32 %v18718_v41, %v9492_v12  ;;  %v10580_v30 = vor.u32 %v18859_v57, %v18875_v42  ;;  %v10605_v42 = vld [vmem:[#allocation3 + $0x3] ss:$16 sm:$0x30] }
 0x44a   :  { %vm10285_vm0 = vcmp.ge.f32.partialorder %v10281_v34, 1.0  ;;  %v13368_v61 = vpop.f32.mrb[72].mxu1  ;;  %v12262_v9 = vsel %vm10287_vm9, 1.0, %v20086_v35  ;;  %v10303_v26 = vsel %vm10287_vm9, 0.0, %v10283_v60  ;;  %v10310_v59 = vadd.f32 %v10306_v47, %v10165_v45  ;;  %v18892_v47 = vpop.permute.xlu1 %10044 }
 0x44b   :  { %v12260_v10 = vsel %vm10285_vm0, 1.0, %v20086_v35  ;;  %v10301_v4 = vsel %vm10285_vm0, 0.0, %v10281_v34  ;;  %v9309_v38 = vpop.f32.mrb[73].mxu1  ;;  %10299 = vst.msk [vmem:[#allocation3 + $0x78] sm:$0xff] %vm10211_vm11, %v12262_v9  ;;  %v10163_v1 = vadd.f32 %v18654_v53, %v9827_v0  ;;  %v10166_v41 = vadd.f32 %v18724_v21, %v9830_v31 }
 0x44c   :  { %10297 = vst.msk [vmem:[#allocation3 + $0x68] sm:$0xff] %vm10211_vm11, %v12260_v10  ;;  %v10307_v19 = vmul.f32 0.5, %v10303_v26  ;;  %v13369_v20 = vpop.f32.mrb[74].mxu1  ;;  %v10164_v40 = vadd.f32 %v18726_v28, %v9828_v55  ;;  %v10305_v52 = vmul.f32 0.5, %v10301_v4  ;;  %v9497_v15 = vadd.f32 %v13368_v61, %v18731_v44  ;;  %v18896_v28 = vpop.permute.xlu0 %10034 }
 0x44d   :  { %v9495_v54 = vadd.f32 %v18731_v44, %v9309_v38  ;;  %v9312_v50 = vpop.f32.mrb[75].mxu1  ;;  %vm10314_vm10 = vcmp.ge.f32.partialorder %v10310_v59, 1.0  ;;  %v10308_v3 = vadd.f32 %v10304_v14, %v10163_v1  ;;  %v9498_v62 = vadd.f32 %v13369_v20, %v18731_v44  ;;  %v10704_v14 = vld [vmem:[#allocation3 + $0x6] ss:$16 sm:$0xc0] }
 0x44e   :  { %v10311_v32 = vadd.f32 %v10307_v19, %v10166_v41  ;;  %v12265_v53 = vsel %vm10314_vm10, 1.0, %v20086_v35  ;;  %v10330_v21 = vsel %vm10314_vm10, 0.0, %v10310_v59  ;;  %v10309_v8 = vadd.f32 %v10305_v52, %v10164_v40  ;;  %v10728_v45 = vld [vmem:[#allocation3 + $0x7] ss:$16 sm:$0xc0]  ;;  %v18910_v59 = vpop.permute.xlu1 %9728 }
 0x44f   :  { %v9833_v11 = vmul.f32 %v18656_v46, %v9497_v15  ;;  %10326 = vst.msk [vmem:[#allocation3 + $0x90] sm:$0xff] %vm10211_vm11, %v12265_v53  ;;  %vm10312_vm12 = vcmp.ge.f32.partialorder %v10308_v3, 1.0  ;;  %v10334_v36 = vmul.f32 0.5, %v10330_v21  ;;  %v9831_v23 = vmul.f32 %v18658_v13, %v9495_v54 }
 0x450   :  { %vm10315_vm13 = vcmp.ge.f32.partialorder %v10311_v32, 1.0  ;;  %v12263_v5 = vsel %vm10312_vm12, 1.0, %v20086_v35  ;;  %v10328_v6 = vsel %vm10312_vm12, 0.0, %v10308_v3  ;;  %vm10313_vm14 = vcmp.ge.f32.partialorder %v10309_v8, 1.0  ;;  %v18916_v20 = vpop.permute.xlu0 %9718 }
 0x451   :  { %v12266_v60 = vsel %vm10315_vm13, 1.0, %v20086_v35  ;;  %v10331_v34 = vsel %vm10315_vm13, 0.0, %v10311_v32  ;;  %10324 = vst.msk [vmem:[#allocation3 + $0x80] sm:$0xff] %vm10211_vm11, %v12263_v5  ;;  %v10169_v46 = vadd.f32 %v18660_v2, %v9833_v11  ;;  %v10167_v12 = vadd.f32 %v18662_v22, %v9831_v23  ;;  %v20087_v5 = vld [vmem:[#allocation101_spill] sm:$0xff] }
 0x452   :  { %10327 = vst.msk [vmem:[#allocation3 + $0x98] sm:$0xff] %vm10211_vm11, %v12266_v60  ;;  %v10332_v63 = vmul.f32 0.5, %v10328_v6  ;;  %v13372_v0 = vpop.f32.mrb[76].mxu1  ;;  %v12264_v13 = vsel %vm10313_vm14, 1.0, %v20086_v35  ;;  %v10329_v31 = vsel %vm10313_vm14, 0.0, %v10309_v8  ;;  %v9834_v55 = vmul.f32 %v18762_v24, %v9498_v62 }
 0x453   :  { %v10335_v61 = vmul.f32 0.5, %v10331_v34  ;;  %v9325_v9 = vpop.f32.mrb[77].mxu1  ;;  %10325 = vst.msk [vmem:[#allocation3 + $0x88] sm:$0xff] %vm10211_vm11, %v12264_v13  ;;  %v10338_v26 = vadd.f32 %v10334_v36, %v10169_v46  ;;  %v9496_v4 = vadd.f32 %v18731_v44, %v9312_v50  ;;  %v10333_v38 = vmul.f32 0.5, %v10329_v31 }
 0x454   :  { %v10336_v10 = vadd.f32 %v10332_v63, %v10167_v12  ;;  %v13373_v2 = vpop.f32.mrb[78].mxu1  ;;  %v10170_v22 = vadd.f32 %v18808_v27, %v9834_v55  ;;  %v10705_v1 = vor.u32 %v10704_v14, %v18866_v56  ;;  %v10729_v41 = vor.u32 %v10728_v45, %v18873_v33  ;;  %v10581_v60 = vld [vmem:[#allocation3 + $0x2] ss:$16 sm:$0x30]  ;;  %v18936_v46 = vpop.permute.xlu0 %10054 }
 0x455   :  { %v9501_v24 = vadd.f32 %v13372_v0, %v18731_v44  ;;  %v9328_v19 = vpop.f32.mrb[79].mxu1  ;;  %vm10342_vm15 = vcmp.ge.f32.partialorder %v10338_v26, 1.0  ;;  %v9832_v40 = vmul.f32 %v18770_v51, %v9496_v4  ;;  %v9499_v52 = vadd.f32 %v18731_v44, %v9325_v9  ;;  %v13757_v4 = vld [vmem:[%s19322_s9 + $0x60] sm:$0xff]  }
 0x456   :  { %vm10340_vm1 = vcmp.ge.f32.partialorder %v10336_v10, 1.0  ;;  %v12269_v15 = vsel %vm10342_vm15, 1.0, %v20086_v35  ;;  %v10358_v54 = vsel %vm10342_vm15, 0.0, %v10338_v26  ;;  %v10339_v56 = vadd.f32 %v10335_v61, %v10170_v22  ;;  %v18942_v61 = vld [vmem:[#allocation3 + $0x2] ss:$16 sm:$0xc0]  ;;  %12730 = vmatprep.subr.bf16.mxu1 %v13757_v4 }
 0x457   :  { %v12267_v27 = vsel %vm10340_vm1, 1.0, %v20086_v35  ;;  %v10356_v50 = vsel %vm10340_vm1, 0.0, %v10336_v10  ;;  %10354 = vst.msk [vmem:[#allocation3 + $0xb0] sm:$0xff] %vm10211_vm11, %v12269_v15  ;;  %v10168_v33 = vadd.f32 %v18813_v37, %v9832_v40  ;;  %v10746_v3 = vmax.f32 %v10705_v1, %v10729_v41  ;;  %v18931_v37 = vpop.permute.xlu1 %10064  ;;  %v10603_v10 = vld [vmem:[#allocation3 + $0x3] ss:$16 sm:$0xc] }
 0x458   :  { %10352 = vst.msk [vmem:[#allocation3 + $0xa0] sm:$0xff] %vm10211_vm11, %v12267_v27  ;;  %v9837_v32 = vmul.f32 %v18664_v25, %v9501_v24  ;;  %v10362_v62 = vmul.f32 0.5, %v10358_v54  ;;  %v9835_v51 = vmul.f32 %v18666_v7, %v9499_v52  ;;  %v10360_v53 = vmul.f32 0.5, %v10356_v50  ;;  %v10602_v22 = vld [vmem:[#allocation3 + $0x3] ss:$16 sm:$0x3]  ;;  %v18964_v27 = vpop.permute.xlu0 %9738 }
 0x459   :  { %v9502_v21 = vadd.f32 %v13373_v2, %v18731_v44  ;;  %vm10343_vm2 = vcmp.ge.f32.partialorder %v10339_v56, 1.0  ;;  %v10337_v8 = vadd.f32 %v10333_v38, %v10168_v33  ;;  %10752 = vrot.lane.b32.xlu0 %v10746_v3, %s13915_s30  ;;  %v9500_v36 = vadd.f32 %v18731_v44, %v9328_v19  ;;  %v10607_v40 = vld [vmem:[#allocation3 + $0x3] ss:$16 sm:$0xc0]  ;;  %v13759_v54 = vld [vmem:[%s19322_s9 + $0x68] sm:$0xff]  }
 0x45a   :  { %v10173_v11 = vadd.f32 %v18672_v17, %v9837_v32  ;;  %v13376_v23 = vpop.f32.mrb[80].mxu1  ;;  %v12270_v25 = vsel %vm10343_vm2, 1.0, %v20086_v35  ;;  %v10359_v14 = vsel %vm10343_vm2, 0.0, %v10339_v56  ;;  %v10171_v7 = vadd.f32 %v20087_v5, %v9835_v51  ;;  %v13760_v32 = vld [vmem:[%s19322_s9 + $0x28] sm:$0xff]  }
 0x45b   :  { %v9838_v6 = vmul.f32 %v18845_v18, %v9502_v21  ;;  %v9341_v34 = vpop.f32.mrb[81].mxu1  ;;  %10355 = vst.msk [vmem:[#allocation3 + $0xb8] sm:$0xff] %vm10211_vm11, %v12270_v25  ;;  %vm10341_vm3 = vcmp.ge.f32.partialorder %v10337_v8, 1.0  ;;  %v10363_v12 = vmul.f32 0.5, %v10359_v14  ;;  %v9836_v63 = vmul.f32 %v18848_v49, %v9500_v36  ;;  %v9749_v24 = vpop.permute.xlu1 %9748  ;;  %v20088_v21 = vld [vmem:[#allocation99_spill] sm:$0xff] }
 0x45c   :  { %v10366_v17 = vadd.f32 %v10362_v62, %v10173_v11  ;;  %v13377_v45 = vpop.f32.mrb[82].mxu1  ;;  %v12268_v0 = vsel %vm10341_vm3, 1.0, %v20086_v35  ;;  %v10357_v13 = vsel %vm10341_vm3, 0.0, %v10337_v8  ;;  %v10364_v31 = vadd.f32 %v10360_v53, %v10171_v7  ;;  %v13761_v36 = vld [vmem:[%s19322_s9 + $0x70] sm:$0xff]  }
 0x45d   :  { %v10174_v55 = vadd.f32 %v18892_v47, %v9838_v6  ;;  %v9344_v18 = vpop.f32.mrb[83].mxu1  ;;  %10353 = vst.msk [vmem:[#allocation3 + $0xa8] sm:$0xff] %vm10211_vm11, %v12268_v0  ;;  %v10172_v9 = vadd.f32 %v18896_v28, %v9836_v63  ;;  %v10361_v26 = vmul.f32 0.5, %v10357_v13  ;;  %v10582_v49 = vor.u32 %v10581_v60, %v10580_v30  ;;  %v13758_v30 = vld [vmem:[%s19322_s9 + $0x20] sm:$0xff]   ;;  %v20091_v13 = vld [vmem:[#allocation103_spill] sm:$0xff] }
 0x45e   :  { %vm10370_vm4 = vcmp.ge.f32.partialorder %v10366_v17, 1.0  ;;  %vm10368_vm5 = vcmp.ge.f32.partialorder %v10364_v31, 1.0  ;;  %v10604_v19 = vor.u32 %v10603_v10, %v10602_v22  ;;  %v9505_v52 = vadd.f32 %v13376_v23, %v18731_v44  ;;  %12731 = vmatpush3.bf16.msra.mxu1 %v13758_v30  ;;  %v20089_v23 = vld [vmem:[#allocation82_spill] sm:$0xff] }
 0x45f   :  { %v12273_v47 = vsel %vm10370_vm4, 1.0, %v20086_v35  ;;  %v10386_v38 = vsel %vm10370_vm4, 0.0, %v10366_v17  ;;  %v10367_v2 = vadd.f32 %v10363_v12, %v10174_v55  ;;  %v12271_v28 = vsel %vm10368_vm5, 1.0, %v20086_v35  ;;  %12732 = vmatprep.subr.bf16.mxu1 %v13759_v54  ;;  %v20094_v54 = vld [vmem:[#allocation174_spill] sm:$0xff] }
 0x460   :  { %10382 = vst.msk [vmem:[#allocation3 + $0xd0] sm:$0xff] %vm10211_vm11, %v12273_v47  ;;  %v10384_v1 = vsel %vm10368_vm5, 0.0, %v10364_v31  ;;  %v10365_v41 = vadd.f32 %v10361_v26, %v10172_v9  ;;  %v10584_v57 = vor.u32 %v18942_v61, %v10582_v49  ;;  %10380 = vst.msk [vmem:[#allocation3 + $0xc0] sm:$0xff] %vm10211_vm11, %v12271_v28  ;;  %v10390_v15 = vmul.f32 0.5, %v10386_v38  ;;  %v10085_v26 = vpop.permute.xlu1 %10084  ;;  %v10075_v47 = vpop.permute.xlu0 %10074  ;;  %v20093_v28 = vld [vmem:[#allocation111_spill] sm:$0xff] }
 0x461   :  { %vm10371_vm6 = vcmp.ge.f32.partialorder %v10367_v2, 1.0  ;;  %v9503_v33 = vadd.f32 %v18731_v44, %v9341_v34  ;;  %v10606_v53 = vor.u32 %v10605_v42, %v10604_v19  ;;  %v9841_v8 = vmul.f32 %v20088_v21, %v9505_v52  ;;  %v20090_v34 = vld [vmem:[#allocation102_spill] sm:$0xff] }
 0x462   :  { %v12274_v50 = vsel %vm10371_vm6, 1.0, %v20086_v35  ;;  %v10387_v56 = vsel %vm10371_vm6, 0.0, %v10367_v2  ;;  %vm10369_vm7 = vcmp.ge.f32.partialorder %v10365_v41, 1.0  ;;  %v13380_v3 = vpop.f32.mrb[84].mxu1  ;;  %v10388_v14 = vmul.f32 0.5, %v10384_v1  ;;  %12733 = vmatpush3.bf16.msra.mxu1 %v13760_v32  ;;  %v20092_v2 = vld [vmem:[#allocation110_spill] sm:$0xff] }
 0x463   :  { %10383 = vst.msk [vmem:[#allocation3 + $0xd8] sm:$0xff] %vm10211_vm11, %v12274_v50  ;;  %v12272_v62 = vsel %vm10369_vm7, 1.0, %v20086_v35  ;;  %v10385_v51 = vsel %vm10369_vm7, 0.0, %v10365_v41  ;;  %v9357_v11 = vpop.f32.mrb[85].mxu1  ;;  %v9839_v25 = vmul.f32 %v20089_v23, %v9503_v33  ;;  %v9506_v5 = vadd.f32 %v13377_v45, %v18731_v44  ;;  %v13762_v45 = vld [vmem:[%s19322_s9 + $0x30] sm:$0xff]   ;;  %12734 = vmatprep.subr.bf16.mxu1 %v13761_v36 }
 0x464   :  { %10381 = vst.msk [vmem:[#allocation3 + $0xc8] sm:$0xff] %vm10211_vm11, %v12272_v62  ;;  %v10391_v7 = vmul.f32 0.5, %v10387_v56  ;;  %v13381_v6 = vpop.f32.mrb[86].mxu1  ;;  %v10608_v60 = vor.u32 %v10607_v40, %v10606_v53  ;;  %v10177_v17 = vadd.f32 %v20090_v34, %v9841_v8  ;;  %v9504_v12 = vadd.f32 %v18731_v44, %v9344_v18  ;;  %v9769_v62 = vpop.permute.xlu1 %9768 }
 0x465   :  { %v10389_v63 = vmul.f32 0.5, %v10385_v51  ;;  %v9360_v0 = vpop.f32.mrb[87].mxu1  ;;  %v10175_v31 = vadd.f32 %v20091_v13, %v9839_v25  ;;  %v9842_v55 = vmul.f32 %v18910_v59, %v9506_v5  ;;  %v9509_v61 = vadd.f32 %v13380_v3, %v18731_v44 }
 0x466   :  { %v9507_v9 = vadd.f32 %v18731_v44, %v9357_v11  ;;  %v10625_v49 = vmax.f32 %v10584_v57, %v10608_v60  ;;  %v10394_v10 = vadd.f32 %v10390_v15, %v10177_v17  ;;  %v9840_v18 = vmul.f32 %v18916_v20, %v9504_v12  ;;  %12735 = vmatpush3.bf16.msra.mxu1 %v13762_v45  ;;  %v9759_v11 = vpop.permute.xlu0 %9758  ;;  %v10708_v12 = vld [vmem:[#allocation3 + $0x86] ss:$16 sm:$0xc] }
 0x467   :  { %v9510_v4 = vadd.f32 %v13381_v6, %v18731_v44  ;;  %v10392_v38 = vadd.f32 %v10388_v14, %v10175_v31  ;;  %v10178_v59 = vadd.f32 %v18931_v37, %v9842_v55  ;;  %v9845_v22 = vmul.f32 %v20092_v2, %v9509_v61  ;;  %v20096_v61 = vld [vmem:[#allocation177_spill] sm:$0xff]  ;;  %v10707_v2 = vld [vmem:[#allocation3 + $0x86] ss:$16 sm:$0x3] }
 0x468   :  { %v9843_v1 = vmul.f32 %v20093_v28, %v9507_v9  ;;  %10631 = vrot.lane.b32.xlu0 %v10625_v49, %s13915_s30  ;;  %vm10398_vm8 = vcmp.ge.f32.partialorder %v10394_v10, 1.0  ;;  %v10176_v41 = vadd.f32 %v18936_v46, %v9840_v18  ;;  %v9508_v42 = vadd.f32 %v18731_v44, %v9360_v0  ;;  %v10105_v49 = vpop.permute.xlu1 %10104 }
 0x469   :  { %v9846_v57 = vmul.f32 %v9749_v24, %v9510_v4  ;;  %v12277_v20 = vsel %vm10398_vm8, 1.0, %v20086_v35  ;;  %v10414_v30 = vsel %vm10398_vm8, 0.0, %v10394_v10  ;;  %vm10396_vm9 = vcmp.ge.f32.partialorder %v10392_v38, 1.0  ;;  %v20095_v24 = vld [vmem:[#allocation176_spill] sm:$0xff] }
 0x46a   :  { %v10395_v19 = vadd.f32 %v10391_v7, %v10178_v59  ;;  %v13384_v40 = vpop.f32.mrb[88].mxu1  ;;  %10410 = vst.msk [vmem:[#allocation3 + $0xf0] sm:$0xff] %vm10211_vm11, %v12277_v20  ;;  %v12275_v37 = vsel %vm10396_vm9, 1.0, %v20086_v35  ;;  %v10412_v52 = vsel %vm10396_vm9, 0.0, %v10392_v38  ;;  %v10393_v15 = vadd.f32 %v10389_v63, %v10176_v41  ;;  %v20097_v10 = vld [vmem:[#allocation104_spill] sm:$0xff]  ;;  %v10095_v28 = vpop.permute.xlu0 %10094 }
 0x46b   :  { %v10181_v50 = vadd.f32 %v20094_v54, %v9845_v22  ;;  %v9373_v56 = vpop.f32.mrb[89].mxu1  ;;  %10408 = vst.msk [vmem:[#allocation3 + $0xe0] sm:$0xff] %vm10211_vm11, %v12275_v37  ;;  %v10418_v46 = vmul.f32 0.5, %v10414_v30  ;;  %v10179_v33 = vadd.f32 %v20095_v24, %v9843_v1  ;;  %v10416_v3 = vmul.f32 0.5, %v10412_v52  ;;  %v20098_v41 = vld [vmem:[#allocation112_spill] sm:$0xff] }
 0x46c   :  { %vm10399_vm0 = vcmp.ge.f32.partialorder %v10395_v19, 1.0  ;;  %v13385_v32 = vpop.f32.mrb[90].mxu1  ;;  %vm10397_vm10 = vcmp.ge.f32.partialorder %v10393_v15, 1.0  ;;  %v10182_v21 = vadd.f32 %v10085_v26, %v9846_v57  ;;  %v9844_v7 = vmul.f32 %v18964_v27, %v9508_v42 }
 0x46d   :  { %v12278_v51 = vsel %vm10399_vm0, 1.0, %v20086_v35  ;;  %v10415_v53 = vsel %vm10399_vm0, 0.0, %v10395_v19  ;;  %v9376_v8 = vpop.f32.mrb[91].mxu1  ;;  %v12276_v36 = vsel %vm10397_vm10, 1.0, %v20086_v35  ;;  %v10413_v23 = vsel %vm10397_vm10, 0.0, %v10393_v15 }
 0x46e   :  { %10411 = vst.msk [vmem:[#allocation3 + $0xf8] sm:$0xff] %vm10211_vm11, %v12278_v51  ;;  %v10422_v25 = vadd.f32 %v10418_v46, %v10181_v50  ;;  %v10420_v14 = vadd.f32 %v10416_v3, %v10179_v33  ;;  %10409 = vst.msk [vmem:[#allocation3 + $0xe8] sm:$0xff] %vm10211_vm11, %v12276_v36  ;;  %v10419_v5 = vmul.f32 0.5, %v10415_v53  ;;  %v10417_v6 = vmul.f32 0.5, %v10413_v23  ;;  %v9789_v36 = vpop.permute.xlu1 %9788 }
 0x46f   :  { %v9513_v60 = vadd.f32 %v13384_v40, %v18731_v44  ;;  %v9511_v34 = vadd.f32 %v18731_v44, %v9373_v56  ;;  %v9514_v17 = vadd.f32 %v13385_v32, %v18731_v44  ;;  %v10180_v55 = vadd.f32 %v10075_v47, %v9844_v7  ;;  %v10710_v47 = vld [vmem:[#allocation3 + $0x86] ss:$16 sm:$0x30]  ;;  %v20099_v40 = vld [vmem:[#allocation179_spill] sm:$0xff] }
 0x470   :  { %vm10426_vm12 = vcmp.ge.f32.partialorder %v10422_v25, 1.0  ;;  %vm10424_vm13 = vcmp.ge.f32.partialorder %v10420_v14, 1.0  ;;  %v10423_v27 = vadd.f32 %v10419_v5, %v10182_v21  ;;  %v9512_v59 = vadd.f32 %v18731_v44, %v9376_v8  ;;  %v10731_v21 = vld [vmem:[#allocation3 + $0x87] ss:$16 sm:$0x3]  ;;  %v9779_v5 = vpop.permute.xlu0 %9778 }
 0x471   :  { %v12281_v63 = vsel %vm10426_vm12, 1.0, %v20086_v35  ;;  %v10442_v0 = vsel %vm10426_vm12, 0.0, %v10422_v25  ;;  %v12279_v13 = vsel %vm10424_vm13, 1.0, %v20086_v35  ;;  %v10440_v31 = vsel %vm10424_vm13, 0.0, %v10420_v14 }
 0x472   :  { %10438 = vst.msk [vmem:[#allocation3 + $0x110] sm:$0xff] %vm10211_vm11, %v12281_v63  ;;  %10436 = vst.msk [vmem:[#allocation3 + $0x100] sm:$0xff] %vm10211_vm11, %v12279_v13  ;;  %v9849_v9 = vmul.f32 %v20096_v61, %v9513_v60  ;;  %v10446_v45 = vmul.f32 0.5, %v10442_v0  ;;  %v13388_v26 = vpop.f32.mrb[92].mxu1  ;;  %v9847_v18 = vmul.f32 %v20097_v10, %v9511_v34  ;;  %v10444_v4 = vmul.f32 0.5, %v10440_v31  ;;  %v13763_v10 = vld [vmem:[%s19322_s9 + $0x78] sm:$0xff]  }
 0x473   :  { %v9850_v38 = vmul.f32 %v9769_v62, %v9514_v17  ;;  %v9389_v22 = vpop.f32.mrb[93].mxu1  ;;  %vm10427_vm14 = vcmp.ge.f32.partialorder %v10423_v27, 1.0  ;;  %v10421_v1 = vadd.f32 %v10417_v6, %v10180_v55  ;;  %v10709_v42 = vor.u32 %v10708_v12, %v10707_v2  ;;  %v19024_v46 = vld [vmem:[#allocation3 + $0x86] ss:$16 sm:$0xc0]  ;;  %12736 = vmatprep.subr.bf16.mxu1 %v13763_v10 }
 0x474   :  { %v10185_v57 = vadd.f32 %v20098_v41, %v9849_v9  ;;  %v19019_v20 = vpop.f32.mrb[94].mxu1  ;;  %v12282_v30 = vsel %vm10427_vm14, 1.0, %v20086_v35  ;;  %v10443_v19 = vsel %vm10427_vm14, 0.0, %v10423_v27  ;;  %v10183_v37 = vadd.f32 %v20099_v40, %v9847_v18  ;;  %v10732_v8 = vld [vmem:[#allocation3 + $0x87] ss:$16 sm:$0xc] }
 0x475   :  { %v10186_v52 = vadd.f32 %v10105_v49, %v9850_v38  ;;  %v9392_v15 = vpop.f32.mrb[95].mxu1  ;;  %10439 = vst.msk [vmem:[#allocation3 + $0x118] sm:$0xff] %vm10211_vm11, %v12282_v30  ;;  %vm10425_vm15 = vcmp.ge.f32.partialorder %v10421_v1, 1.0  ;;  %v10447_v50 = vmul.f32 0.5, %v10443_v19  ;;  %v9848_v56 = vmul.f32 %v9759_v11, %v9512_v59  ;;  %v13764_v18 = vld [vmem:[%s19322_s9 + $0x38] sm:$0xff]   ;;  %v20100_v59 = vld [vmem:[#allocation106_spill] sm:$0xff] }
 0x476   :  { %v10450_v54 = vadd.f32 %v10446_v45, %v10185_v57  ;;  %v12280_v24 = vsel %vm10425_vm15, 1.0, %v20086_v35  ;;  %v10441_v33 = vsel %vm10425_vm15, 0.0, %v10421_v1  ;;  %v10448_v3 = vadd.f32 %v10444_v4, %v10183_v37  ;;  %v10734_v14 = vld [vmem:[#allocation3 + $0x87] ss:$16 sm:$0x30]  ;;  %v20101_v1 = vld [vmem:[#allocation107_spill] sm:$0xff]  ;;  %12737 = vmatpush3.bf16.msra.mxu1 %v13764_v18 }
 0x477   :  { %v19027_v32 = vor.u32 %v10710_v47, %v10709_v42  ;;  %10437 = vst.msk [vmem:[#allocation3 + $0x108] sm:$0xff] %vm10211_vm11, %v12280_v24  ;;  %v10451_v62 = vadd.f32 %v10447_v50, %v10186_v52  ;;  %v10184_v51 = vadd.f32 %v10095_v28, %v9848_v56  ;;  %v10445_v53 = vmul.f32 0.5, %v10441_v33  ;;  %v10587_v34 = vld [vmem:[#allocation3 + $0x82] ss:$16 sm:$0xc]  ;;  %v10125_v56 = vpop.permute.xlu1 %10124 }
 0x478   :  { %vm10454_vm1 = vcmp.ge.f32.partialorder %v10450_v54, 1.0  ;;  %vm10452_vm2 = vcmp.ge.f32.partialorder %v10448_v3, 1.0  ;;  %v10733_v0 = vor.u32 %v10732_v8, %v10731_v21  ;;  %v10736_v13 = vld [vmem:[#allocation3 + $0x87] ss:$16 sm:$0xc0]  ;;  %v9517_v31 = vadd.f32 %v13388_v26, %v18731_v44 }
 0x479   :  { %v12285_v23 = vsel %vm10454_vm1, 1.0, %v20086_v35  ;;  %v10470_v11 = vsel %vm10454_vm1, 0.0, %v10450_v54  ;;  %v10713_v25 = vor.u32 %v19024_v46, %v19027_v32  ;;  %v12283_v7 = vsel %vm10452_vm2, 1.0, %v20086_v35  ;;  %v10586_v45 = vld [vmem:[#allocation3 + $0x82] ss:$16 sm:$0x3]  ;;  %v10115_v46 = vpop.permute.xlu0 %10114 }
 0x47a   :  { %10466 = vst.msk [vmem:[#allocation3 + $0x130] sm:$0xff] %vm10211_vm11, %v12285_v23  ;;  %v10468_v6 = vsel %vm10452_vm2, 0.0, %v10448_v3  ;;  %vm10455_vm3 = vcmp.ge.f32.partialorder %v10451_v62, 1.0  ;;  %v10449_v60 = vadd.f32 %v10445_v53, %v10184_v51  ;;  %v13392_v17 = vpop.f32.mrb[96].mxu1  ;;  %10464 = vst.msk [vmem:[#allocation3 + $0x120] sm:$0xff] %vm10211_vm11, %v12283_v7  ;;  %v10474_v55 = vmul.f32 0.5, %v10470_v11 }
 0x47b   :  { %v12286_v12 = vsel %vm10455_vm3, 1.0, %v20086_v35  ;;  %v10471_v63 = vsel %vm10455_vm3, 0.0, %v10451_v62  ;;  %v9405_v27 = vpop.f32.mrb[97].mxu1  ;;  %v9515_v61 = vadd.f32 %v18731_v44, %v9389_v22  ;;  %v10472_v9 = vmul.f32 0.5, %v10468_v6  ;;  %v19057_v57 = vld [vmem:[%s19319_s6] ss:$0 sm:$0xff] }
 0x47c   :  { %10467 = vst.msk [vmem:[#allocation3 + $0x138] sm:$0xff] %vm10211_vm11, %v12286_v12  ;;  %vm10453_vm4 = vcmp.ge.f32.partialorder %v10449_v60, 1.0  ;;  %v19040_v49 = vpop.f32.mrb[98].mxu1  ;;  %v10735_v38 = vor.u32 %v10734_v14, %v10733_v0  ;;  %v9853_v2 = vmul.f32 %v20100_v59, %v9517_v31  ;;  %v10610_v28 = vld [vmem:[#allocation3 + $0x83] ss:$16 sm:$0x3]  ;;  %v9518_v42 = vadd.f32 %v19057_v57, %v19019_v20  ;;  %v9809_v12 = vpop.permute.xlu1 %9808 }
 0x47d   :  { %v12284_v26 = vsel %vm10453_vm4, 1.0, %v20086_v35  ;;  %v10469_v4 = vsel %vm10453_vm4, 0.0, %v10449_v60  ;;  %v10611_v44 = vld [vmem:[#allocation3 + $0x83] ss:$16 sm:$0xc]  ;;  %v19050_v22 = vpop.f32.mrb[99].mxu1  ;;  %v9851_v41 = vmul.f32 %v20101_v1, %v9515_v61  ;;  %v9516_v30 = vadd.f32 %v19057_v57, %v9392_v15 }
 0x47e   :  { %10465 = vst.msk [vmem:[#allocation3 + $0x128] sm:$0xff] %vm10211_vm11, %v12284_v26  ;;  %v10475_v47 = vmul.f32 0.5, %v10471_v63  ;;  %v10589_v19 = vld [vmem:[#allocation3 + $0x82] ss:$16 sm:$0x30]  ;;  %v10737_v40 = vor.u32 %v10736_v13, %v10735_v38  ;;  %v10189_v37 = vadd.f32 %v18795_v39, %v9853_v2  ;;  %v10473_v52 = vmul.f32 0.5, %v10469_v4  ;;  %v9799_v63 = vpop.permute.xlu0 %9798 }
 0x47f   :  { %v10588_v54 = vor.u32 %v10587_v34, %v10586_v45  ;;  %v10613_v50 = vld [vmem:[#allocation3 + $0x83] ss:$16 sm:$0x30]  ;;  %v10187_v24 = vadd.f32 %v18798_v16, %v9851_v41  ;;  %v9854_v33 = vmul.f32 %v9789_v36, %v9518_v42  ;;  %v9852_v3 = vmul.f32 %v9779_v5, %v9516_v30  ;;  %v10591_v32 = vld [vmem:[#allocation3 + $0x82] ss:$16 sm:$0xc0] }
 0x480   :  { %v10612_v20 = vor.u32 %v10611_v44, %v10610_v28  ;;  %v10747_v62 = vmax.f32 %v10713_v25, %v10737_v40  ;;  %v10478_v51 = vadd.f32 %v10474_v55, %v10189_v37  ;;  %v9521_v53 = vadd.f32 %v19057_v57, %v13392_v17  ;;  %v10615_v11 = vld [vmem:[#allocation3 + $0x83] ss:$16 sm:$0xc0]  ;;  %v10939_v38 = vld [vmem:[#allocation3 + $0xe] ss:$16 sm:$0x3]  ;;  %v10145_v30 = vpop.permute.xlu1 %10144 }
 0x481   :  { %v10590_v15 = vor.u32 %v10589_v19, %v10588_v54  ;;  %v10476_v21 = vadd.f32 %v10472_v9, %v10187_v24  ;;  %v10190_v8 = vadd.f32 %v10125_v56, %v9854_v33  ;;  %v10188_v39 = vadd.f32 %v10115_v46, %v9852_v3  ;;  %v13765_v31 = vld [vmem:[%s19322_s9 + $0xc0] sm:$0xff]   ;;  %v10964_v59 = vld [vmem:[#allocation3 + $0xf] ss:$16 sm:$0xc] }
 0x482   :  { %v10614_v23 = vor.u32 %v10613_v50, %v10612_v20  ;;  %10754 = vrot.lane.b32.xlu1 %v10747_v62, %s13915_s30  ;;  %vm10482_vm5 = vcmp.ge.f32.partialorder %v10478_v51, 1.0  ;;  %v9857_v16 = vmul.f32 %v18828_v43, %v9521_v53  ;;  %v9519_v36 = vadd.f32 %v19057_v57, %v9405_v27  ;;  %12750 = vmatprep.subr.bf16.mxu1 %v13765_v31  ;;  %v10942_v2 = vld [vmem:[#allocation3 + $0xe] ss:$16 sm:$0x30]  ;;  %v10135_v19 = vpop.permute.xlu0 %10134 }
 0x483   :  { %v10592_v14 = vor.u32 %v10591_v32, %v10590_v15  ;;  %v12289_v5 = vsel %vm10482_vm5, 1.0, %v20086_v35  ;;  %v10498_v25 = vsel %vm10482_vm5, 0.0, %v10478_v51  ;;  %vm10480_vm6 = vcmp.ge.f32.partialorder %v10476_v21, 1.0  ;;  %v10963_v28 = vld [vmem:[#allocation3 + $0xf] ss:$16 sm:$0x3] }
 0x484   :  { %v10479_v7 = vadd.f32 %v10475_v47, %v10190_v8  ;;  %10494 = vst.msk [vmem:[#allocation3 + $0x150] sm:$0xff] %vm10211_vm11, %v12289_v5  ;;  %v12287_v6 = vsel %vm10480_vm6, 1.0, %v20086_v35  ;;  %v10496_v60 = vsel %vm10480_vm6, 0.0, %v10476_v21  ;;  %v10477_v34 = vadd.f32 %v10473_v52, %v10188_v39  ;;  %v10948_v47 = vld [vmem:[#allocation3 + $0x8e] ss:$16 sm:$0xc] }
 0x485   :  { %v10616_v17 = vor.u32 %v10615_v11, %v10614_v23  ;;  %10492 = vst.msk [vmem:[#allocation3 + $0x140] sm:$0xff] %vm10211_vm11, %v12287_v6  ;;  %v10193_v43 = vadd.f32 %v18868_v29, %v9857_v16  ;;  %v10502_v0 = vmul.f32 0.5, %v10498_v25  ;;  %v9855_v13 = vmul.f32 %v18832_v48, %v9519_v36  ;;  %v10940_v29 = vld [vmem:[#allocation3 + $0xe] ss:$16 sm:$0xc] }
 0x486   :  { %vm10483_vm7 = vcmp.ge.f32.partialorder %v10479_v7, 1.0  ;;  %vm10481_vm8 = vcmp.ge.f32.partialorder %v10477_v34, 1.0  ;;  %v10500_v18 = vmul.f32 0.5, %v10496_v60  ;;  %v9522_v26 = vadd.f32 %v19057_v57, %v19040_v49  ;;  %v10716_v37 = vld [vmem:[#allocation3 + $0x106] ss:$16 sm:$0xc] }
 0x487   :  { %v12290_v27 = vsel %vm10483_vm7, 1.0, %v20086_v35  ;;  %v10626_v55 = vmax.f32 %v10592_v14, %v10616_v17  ;;  %v10499_v61 = vsel %vm10483_vm7, 0.0, %v10479_v7  ;;  %v12288_v9 = vsel %vm10481_vm8, 1.0, %v20086_v35  ;;  %v19091_v52 = vld [vmem:[#allocation3 + $0xf] ss:$16 sm:$0xc0] }
 0x488   :  { %10495 = vst.msk [vmem:[#allocation3 + $0x158] sm:$0xff] %vm10211_vm11, %v12290_v27  ;;  %v10506_v45 = vadd.f32 %v10502_v0, %v10193_v43  ;;  %v10191_v10 = vadd.f32 %v18877_v58, %v9855_v13  ;;  %10493 = vst.msk [vmem:[#allocation3 + $0x148] sm:$0xff] %vm10211_vm11, %v12288_v9  ;;  %v10497_v48 = vsel %vm10481_vm8, 0.0, %v10477_v34  ;;  %v9520_v4 = vadd.f32 %v19057_v57, %v19050_v22  ;;  %v10966_v58 = vld [vmem:[#allocation3 + $0xf] ss:$16 sm:$0x30] }
 0x489   :  { %10633 = vrot.lane.b32.xlu1 %v10626_v55, %s13915_s30  ;;  %v9858_v41 = vmul.f32 %v9809_v12, %v9522_v26  ;;  %v10503_v49 = vmul.f32 0.5, %v10499_v61  ;;  %v10501_v40 = vmul.f32 0.5, %v10497_v48  ;;  %v10941_v22 = vor.u32 %v10940_v29, %v10939_v38  ;;  %v19089_v57 = vld [vmem:[#allocation3 + $0xe] ss:$16 sm:$0xc0] }
 0x48a   :  { %vm10510_vm9 = vcmp.ge.f32.partialorder %v10506_v45, 1.0  ;;  %v10504_v1 = vadd.f32 %v10500_v18, %v10191_v10  ;;  %v9856_v42 = vmul.f32 %v9799_v63, %v9520_v4  ;;  %v10715_v56 = vld [vmem:[#allocation3 + $0x106] ss:$16 sm:$0x3]  ;;  %v10965_v33 = vor.u32 %v10964_v59, %v10963_v28 }
 0x48b   :  { %v12293_v44 = vsel %vm10510_vm9, 1.0, %v20086_v35  ;;  %v10194_v54 = vadd.f32 %v10145_v30, %v9858_v41  ;;  %v10739_v46 = vld [vmem:[#allocation3 + $0x107] ss:$16 sm:$0x3]  ;;  %v10943_v11 = vor.u32 %v10942_v2, %v10941_v22  ;;  %v10717_v36 = vor.u32 %v10716_v37, %v10715_v56 }
 0x48c   :  { %10522 = vst.msk [vmem:[#allocation3 + $0x170] sm:$0xff] %vm10211_vm11, %v12293_v44  ;;  %vm10508_vm0 = vcmp.ge.f32.partialorder %v10504_v1, 1.0  ;;  %v10192_v50 = vadd.f32 %v10135_v19, %v9856_v42  ;;  %v10740_v24 = vld [vmem:[#allocation3 + $0x107] ss:$16 sm:$0xc]  ;;  %v10967_v14 = vor.u32 %v10966_v58, %v10965_v33  ;;  %vm10640_vm13 = vcmask 1048064  }
 0x48d   :  { %v10947_v3 = vld [vmem:[#allocation3 + $0x8e] ss:$16 sm:$0x3]  ;;  %v12291_v32 = vsel %vm10508_vm0, 1.0, %v20086_v35  ;;  %v10507_v15 = vadd.f32 %v10503_v49, %v10194_v54  ;;  %v10741_v5 = vor.u32 %v10740_v24, %v10739_v46  ;;  %v10945_v63 = vor.u32 %v19089_v57, %v10943_v11 }
 0x48e   :  { %v10595_v20 = vld [vmem:[#allocation3 + $0x102] ss:$16 sm:$0xc]  ;;  %v10950_v62 = vld [vmem:[#allocation3 + $0x8e] ss:$16 sm:$0x30]  ;;  %v10505_v53 = vadd.f32 %v10501_v40, %v10192_v50  ;;  %v10949_v6 = vor.u32 %v10948_v47, %v10947_v3  ;;  %v10969_v43 = vor.u32 %v19091_v52, %v10967_v14 }
 0x48f   :  { %v10972_v51 = vld [vmem:[#allocation3 + $0x8f] ss:$16 sm:$0xc]  ;;  %10520 = vst.msk [vmem:[#allocation3 + $0x160] sm:$0xff] %vm10211_vm11, %v12291_v32  ;;  %vm10511_vm10 = vcmp.ge.f32.partialorder %v10507_v15, 1.0  ;;  %vm13917_vm0 = vmmov 0  }
 0x490   :  { %v10718_v21 = vld [vmem:[#allocation3 + $0x106] ss:$16 sm:$0x30]  ;;  %v10594_v8 = vld [vmem:[#allocation3 + $0x102] ss:$16 sm:$0x3]  ;;  %v19109_v18 = vor.u32 %v10950_v62, %v10949_v6  ;;  %v19125_v57 = vmax.f32 %v10945_v63, %v10969_v43 }
 0x491   :  { %v10618_v39 = vld [vmem:[#allocation3 + $0x103] ss:$16 sm:$0x3]  ;;  %v10820_v16 = vld [vmem:[#allocation3 + $0xa] ss:$16 sm:$0xc]  ;;  %v10596_v9 = vor.u32 %v10595_v20, %v10594_v8  ;;  %v10719_v48 = vor.u32 %v10718_v21, %v10717_v36 }
 0x492   :  { %v10619_v23 = vld [vmem:[#allocation3 + $0x103] ss:$16 sm:$0xc]  ;;  %v10742_v25 = vld [vmem:[#allocation3 + $0x107] ss:$16 sm:$0x30] }
 0x493   :  { %v10597_v7 = vld [vmem:[#allocation3 + $0x102] ss:$16 sm:$0x30]  ;;  %v10971_v60 = vld [vmem:[#allocation3 + $0x8f] ss:$16 sm:$0x3]  ;;  %v10620_v45 = vor.u32 %v10619_v23, %v10618_v39  ;;  %v10743_v1 = vor.u32 %v10742_v25, %v10741_v5 }
 0x494   :  { %v10974_v34 = vld [vmem:[#allocation3 + $0x8f] ss:$16 sm:$0x30]  ;;  %v19095_v17 = vld [vmem:[#allocation3 + $0xb] ss:$16 sm:$0xc]  ;;  %v10973_v26 = vor.u32 %v10972_v51, %v10971_v60  ;;  %v10598_v41 = vor.u32 %v10597_v7, %v10596_v9 }
 0x495   :  { %vm10509_vm12 = vcmp.ge.f32.partialorder %v10505_v53, 1.0  ;;  %v10621_v12 = vld [vmem:[#allocation3 + $0x103] ss:$16 sm:$0x30]  ;;  %v12294_v55 = vsel %vm10511_vm10, 1.0, %v20086_v35  ;;  %vm11604_vm10 = vcmask 326656  }
 0x496   :  { %v10819_v0 = vld [vmem:[#allocation3 + $0xa] ss:$16 sm:$0x3]  ;;  %v19101_v27 = vld [vmem:[#allocation3 + $0x8b] ss:$16 sm:$0xc]  ;;  %v10622_v42 = vor.u32 %v10621_v12, %v10620_v45  ;;  %v19129_v54 = vor.u32 %v10974_v34, %v10973_v26 }
 0x497   :  { %v10822_v13 = vld [vmem:[#allocation3 + $0xa] ss:$16 sm:$0x30]  ;;  %v12292_v61 = vsel %vm10509_vm12, 1.0, %v20086_v35  ;;  %10523 = vst.msk [vmem:[#allocation3 + $0x178] sm:$0xff] %vm10211_vm11, %v12294_v55  ;;  %v10821_v47 = vor.u32 %v10820_v16, %v10819_v0 }
 0x498   :  { %v19099_v31 = vld [vmem:[#allocation3 + $0x8a] ss:$16 sm:$0xc]  ;;  %v19105_v10 = vld [vmem:[#allocation3 + $0x8e] ss:$16 sm:$0xc0] }
 0x499   :  { %v10843_v29 = vld [vmem:[#allocation3 + $0xb] ss:$16 sm:$0x3]  ;;  %10521 = vst.msk [vmem:[#allocation3 + $0x168] sm:$0xff] %vm10211_vm11, %v12292_v61  ;;  %v10953_v52 = vor.u32 %v19105_v10, %v19109_v18  ;;  %v19134_v32 = vor.u32 %v10822_v13, %v10821_v47 }
 0x49a   :  { %v19111_v4 = vld [vmem:[#allocation3 + $0x8f] ss:$16 sm:$0xc0]  ;;  %v10846_v38 = vld [vmem:[#allocation3 + $0xb] ss:$16 sm:$0x30]  ;;  %v10845_v56 = vor.u32 %v19095_v17, %v10843_v29 }
 0x49b   :  { %v10827_v59 = vld [vmem:[#allocation3 + $0x8a] ss:$16 sm:$0x3]  ;;  %v10851_v2 = vld [vmem:[#allocation3 + $0x8b] ss:$16 sm:$0x3]  ;;  %v10977_v17 = vor.u32 %v19111_v4, %v19129_v54 }
 0x49c   :  { %v19113_v28 = vld [vmem:[#allocation3 + $0x10e] ss:$16 sm:$0x3]  ;;  %v19117_v44 = vld [vmem:[#allocation3 + $0x10f] ss:$16 sm:$0xc]  ;;  %v10829_v62 = vor.u32 %v19099_v31, %v10827_v59  ;;  %v10853_v15 = vor.u32 %v19101_v27, %v10851_v2  ;;  %v10847_v12 = vor.u32 %v10846_v38, %v10845_v56 }
 0x49d   :  { %v19115_v58 = vld [vmem:[#allocation3 + $0x10e] ss:$16 sm:$0xc]  ;;  %v10830_v30 = vld [vmem:[#allocation3 + $0x8a] ss:$16 sm:$0x30] }
 0x49e   :  { %v10854_v19 = vld [vmem:[#allocation3 + $0x8b] ss:$16 sm:$0x30]  ;;  %v19119_v49 = vld [vmem:[#allocation3 + $0x10f] ss:$16 sm:$0x3]  ;;  %v10957_v21 = vor.u32 %v19115_v58, %v19113_v28  ;;  %v10831_v27 = vor.u32 %v10830_v30, %v10829_v62 }
 0x49f   :  { %v19121_v40 = vld [vmem:[#allocation3 + $0x10a] ss:$16 sm:$0x3]  ;;  %v10646_v22 = vld [vmem:[#allocation3 + $0x4] ss:$16 sm:$0xc]  ;;  %v10981_v5 = vor.u32 %v19117_v44, %v19119_v49  ;;  %v10855_v55 = vor.u32 %v10854_v19, %v10853_v15 }
 0x4a0   :  { %v19123_v37 = vld [vmem:[#allocation3 + $0x10a] ss:$16 sm:$0xc]  ;;  %v10670_v46 = vld [vmem:[#allocation3 + $0x5] ss:$16 sm:$0xc] }
 0x4a1   :  { %v19131_v50 = vld [vmem:[#allocation3 + $0xa] ss:$16 sm:$0xc0]  ;;  %v10525_v24 = vld [vmem:[#allocation3] ss:$16 sm:$0xc]  ;;  %v10837_v25 = vor.u32 %v19123_v37, %v19121_v40 }
 0x4a2   :  { %v10720_v33 = vld [vmem:[#allocation3 + $0x106] ss:$16 sm:$0xc0]  ;;  %v10744_v3 = vld [vmem:[#allocation3 + $0x107] ss:$16 sm:$0xc0] }
 0x4a3   :  { %v19136_v20 = vld [vmem:[#allocation3 + $0xb] ss:$16 sm:$0xc0]  ;;  %v19139_v51 = vld [vmem:[#allocation3 + $0x8a] ss:$16 sm:$0xc0]  ;;  %v10721_v23 = vor.u32 %v10720_v33, %v10719_v48  ;;  %v10745_v11 = vor.u32 %v10744_v3, %v10743_v1  ;;  %v10825_v48 = vor.u32 %v19131_v50, %v19134_v32 }
 0x4a4   :  { %v19142_v53 = vld [vmem:[#allocation3 + $0x8b] ss:$16 sm:$0xc0]  ;;  %v10645_v8 = vld [vmem:[#allocation3 + $0x4] ss:$16 sm:$0x3]  ;;  %v10849_v58 = vor.u32 %v19136_v20, %v10847_v12  ;;  %v10833_v44 = vor.u32 %v19139_v51, %v10831_v27 }
 0x4a5   :  { %v10648_v39 = vld [vmem:[#allocation3 + $0x4] ss:$16 sm:$0x30]  ;;  %v10599_v14 = vld [vmem:[#allocation3 + $0x102] ss:$16 sm:$0xc0]  ;;  %v10748_v31 = vmax.f32 %v10721_v23, %v10745_v11  ;;  %v10647_v61 = vor.u32 %v10646_v22, %v10645_v8  ;;  %v10857_v1 = vor.u32 %v19142_v53, %v10855_v55 }
 0x4a6   :  { %v10623_v16 = vld [vmem:[#allocation3 + $0x103] ss:$16 sm:$0xc0]  ;;  %v10958_v36 = vld [vmem:[#allocation3 + $0x10e] ss:$16 sm:$0x30]  ;;  %v10600_v60 = vor.u32 %v10599_v14, %v10598_v41  ;;  %v10866_v11 = vmax.f32 %v10825_v48, %v10849_v58 }
 0x4a7   :  { %v10669_v7 = vld [vmem:[#allocation3 + $0x5] ss:$16 sm:$0x3]  ;;  %v10624_v34 = vor.u32 %v10623_v16, %v10622_v42  ;;  %v10982_v63 = vld [vmem:[#allocation3 + $0x10f] ss:$16 sm:$0x30]  ;;  %10756 = vrot.lane.b32.xlu0 %v10748_v31, %s13915_s30  ;;  %v10649_v42 = vor.u32 %v10648_v39, %v10647_v61  ;;  %v10959_v19 = vor.u32 %v10958_v36, %v10957_v21  ;;  %v10867_v14 = vmax.f32 %v10833_v44, %v10857_v1 }
 0x4a8   :  { %v10672_v6 = vld [vmem:[#allocation3 + $0x5] ss:$16 sm:$0x30]  ;;  %v10860_v43 = vld [vmem:[#allocation3 + $0x10b] ss:$16 sm:$0xc]  ;;  %v10671_v2 = vor.u32 %v10670_v46, %v10669_v7  ;;  %v10983_v33 = vor.u32 %v10982_v63, %v10981_v5 }
 0x4a9   :  { %v10650_v0 = vld [vmem:[#allocation3 + $0x4] ss:$16 sm:$0xc0]  ;;  %v10524_v13 = vld [vmem:[#allocation3] ss:$16 sm:$0x3]  ;;  %v10627_v29 = vmax.f32 %v10600_v60, %v10624_v34 }
 0x4aa   :  { %v10527_v9 = vld [vmem:[#allocation3] ss:$16 sm:$0x30]  ;;  %v10549_v45 = vld [vmem:[#allocation3 + $0x1] ss:$16 sm:$0xc]  ;;  %v10526_v4 = vor.u32 %v10525_v24, %v10524_v13  ;;  %v10673_v22 = vor.u32 %v10672_v6, %v10671_v2  ;;  %v10987_v24 = vmax.f32 %v10953_v52, %v10977_v17  ;;  %v10651_v20 = vor.u32 %v10650_v0, %v10649_v42 }
 0x4ab   :  { %v10838_v26 = vld [vmem:[#allocation3 + $0x10a] ss:$16 sm:$0x30]  ;;  %v10859_v59 = vld [vmem:[#allocation3 + $0x10b] ss:$16 sm:$0x3]  ;;  %10635 = vrot.lane.b32.xlu1 %v10627_v29, %s13915_s30  ;;  %10992 = vrot.lane.b32.xlu0 %v19125_v57, %s13915_s30 }
 0x4ac   :  { %v10674_v28 = vld [vmem:[#allocation3 + $0x5] ss:$16 sm:$0xc0]  ;;  %v10548_v38 = vld [vmem:[#allocation3 + $0x1] ss:$16 sm:$0x3]  ;;  %v10528_v54 = vor.u32 %v10527_v9, %v10526_v4  ;;  %v10861_v3 = vor.u32 %v10860_v43, %v10859_v59  ;;  %v10839_v16 = vor.u32 %v10838_v26, %v10837_v25 }
 0x4ad   :  { %v10862_v41 = vld [vmem:[#allocation3 + $0x10b] ss:$16 sm:$0x30]  ;;  %v10551_v47 = vld [vmem:[#allocation3 + $0x1] ss:$16 sm:$0x30]  ;;  %v10550_v50 = vor.u32 %v10549_v45, %v10548_v38  ;;  %v10675_v15 = vor.u32 %v10674_v28, %v10673_v22 }
 0x4ae   :  { %v10529_v30 = vld [vmem:[#allocation3] ss:$16 sm:$0xc0]  ;;  %v10960_v49 = vld [vmem:[#allocation3 + $0x10e] ss:$16 sm:$0xc0]  ;;  %v10863_v36 = vor.u32 %v10862_v41, %v10861_v3 }
 0x4af   :  { %v10984_v40 = vld [vmem:[#allocation3 + $0x10f] ss:$16 sm:$0xc0]  ;;  %v10840_v37 = vld [vmem:[#allocation3 + $0x10a] ss:$16 sm:$0xc0]  ;;  %v10552_v53 = vor.u32 %v10551_v47, %v10550_v50  ;;  %v10530_v21 = vor.u32 %v10529_v30, %v10528_v54  ;;  %10994 = vrot.lane.b32.xlu1 %v10987_v24, %s13915_s30  ;;  %v10692_v5 = vmax.f32 %v10651_v20, %v10675_v15  ;;  %v10961_v17 = vor.u32 %v10960_v49, %v10959_v19 }
 0x4b0   :  { %v10553_v56 = vld [vmem:[#allocation3 + $0x1] ss:$16 sm:$0xc0]  ;;  %v10653_v46 = vld [vmem:[#allocation3 + $0x84] ss:$16 sm:$0x3]  ;;  %v10985_v12 = vor.u32 %v10984_v40, %v10983_v33  ;;  %v10841_v63 = vor.u32 %v10840_v37, %v10839_v16  ;;  %10872 = vrot.lane.b32.xlu0 %v10866_v11, %s13915_s30 }
 0x4b1   :  { %v10864_v32 = vld [vmem:[#allocation3 + $0x10b] ss:$16 sm:$0xc0]  ;;  %v10654_v62 = vld [vmem:[#allocation3 + $0x84] ss:$16 sm:$0xc]  ;;  %v10554_v7 = vor.u32 %v10553_v56, %v10552_v53 }
 0x4b2   :  { %v10656_v51 = vld [vmem:[#allocation3 + $0x84] ss:$16 sm:$0x30]  ;;  %v10655_v8 = vor.u32 %v10654_v62, %v10653_v46  ;;  %v10677_v39 = vld [vmem:[#allocation3 + $0x85] ss:$16 sm:$0x3]  ;;  %v10865_v13 = vor.u32 %v10864_v32, %v10863_v36  ;;  %v10988_v28 = vmax.f32 %v10961_v17, %v10985_v12 }
 0x4b3   :  { %v10678_v23 = vld [vmem:[#allocation3 + $0x85] ss:$16 sm:$0xc]  ;;  %v10658_v52 = vld [vmem:[#allocation3 + $0x84] ss:$16 sm:$0xc0]  ;;  %v10571_v25 = vmax.f32 %v10530_v21, %v10554_v7  ;;  %10874 = vrot.lane.b32.xlu1 %v10867_v14, %s13915_s30 }
 0x4b4   :  { %v10679_v10 = vor.u32 %v10678_v23, %v10677_v39  ;;  %v10680_v18 = vld [vmem:[#allocation3 + $0x85] ss:$16 sm:$0x30]  ;;  %v10657_v6 = vor.u32 %v10656_v51, %v10655_v8  ;;  %v10532_v34 = vld [vmem:[#allocation3 + $0x80] ss:$16 sm:$0x3]  ;;  %v10868_v1 = vmax.f32 %v10841_v63, %v10865_v13  ;;  %10996 = vrot.lane.b32.xlu0 %v10988_v28, %s13915_s30 }
 0x4b5   :  { %v10682_v60 = vld [vmem:[#allocation3 + $0x85] ss:$16 sm:$0xc0]  ;;  %v10533_v0 = vld [vmem:[#allocation3 + $0x80] ss:$16 sm:$0xc] }
 0x4b6   :  { %v10681_v43 = vor.u32 %v10680_v18, %v10679_v10  ;;  %v10535_v57 = vld [vmem:[#allocation3 + $0x80] ss:$16 sm:$0x30]  ;;  %10695 = vst.msk [vmem:[#allocation4 + $0x8] sm:$0xff] %vm10211_vm11, %v10692_v5  ;;  %v10659_v31 = vor.u32 %v10658_v52, %v10657_v6  ;;  %v10534_v27 = vor.u32 %v10533_v0, %v10532_v34  ;;  %10574 = vst.msk [vmem:[#allocation4] sm:$0xff] %vm10211_vm11, %v10571_v25 }
 0x4b7   :  { %v10556_v55 = vld [vmem:[#allocation3 + $0x81] ss:$16 sm:$0x3]  ;;  %v10537_v48 = vld [vmem:[#allocation3 + $0x80] ss:$16 sm:$0xc0]  ;;  %10876 = vrot.lane.b32.xlu1 %v10868_v1, %s13915_s30 }
 0x4b8   :  { %v10557_v61 = vld [vmem:[#allocation3 + $0x81] ss:$16 sm:$0xc]  ;;  %v10683_v9 = vor.u32 %v10682_v60, %v10681_v43  ;;  %v10536_v26 = vor.u32 %v10535_v57, %v10534_v27  ;;  %v10661_v2 = vld [vmem:[#allocation3 + $0x104] ss:$16 sm:$0x3] }
 0x4b9   :  { %v10558_v45 = vor.u32 %v10557_v61, %v10556_v55  ;;  %v10559_v29 = vld [vmem:[#allocation3 + $0x81] ss:$16 sm:$0x30]  ;;  %v10662_v58 = vld [vmem:[#allocation3 + $0x104] ss:$16 sm:$0xc] }
 0x4ba   :  { %v10561_v59 = vld [vmem:[#allocation3 + $0x81] ss:$16 sm:$0xc0]  ;;  %v10693_v4 = vmax.f32 %v10659_v31, %v10683_v9  ;;  %v10664_v44 = vld [vmem:[#allocation3 + $0x104] ss:$16 sm:$0x30]  ;;  %v10538_v41 = vor.u32 %v10537_v48, %v10536_v26  ;;  %v10663_v42 = vor.u32 %v10662_v58, %v10661_v2 }
 0x4bb   :  { %v10560_v38 = vor.u32 %v10559_v29, %v10558_v45  ;;  %v10685_v47 = vld [vmem:[#allocation3 + $0x105] ss:$16 sm:$0x3]  ;;  %v10666_v37 = vld [vmem:[#allocation3 + $0x104] ss:$16 sm:$0xc0] }
 0x4bc   :  { %v10686_v30 = vld [vmem:[#allocation3 + $0x105] ss:$16 sm:$0xc]  ;;  %10696 = vst.msk [vmem:[#allocation4 + $0x28] sm:$0xff] %vm10211_vm11, %v10693_v4  ;;  %v10665_v22 = vor.u32 %v10664_v44, %v10663_v42 }
 0x4bd   :  { %v10562_v19 = vor.u32 %v10561_v59, %v10560_v38  ;;  %v10687_v49 = vor.u32 %v10686_v30, %v10685_v47  ;;  %v10688_v40 = vld [vmem:[#allocation3 + $0x105] ss:$16 sm:$0x30]  ;;  %v10540_v50 = vld [vmem:[#allocation3 + $0x100] ss:$16 sm:$0x3] }
 0x4be   :  { %v10690_v54 = vld [vmem:[#allocation3 + $0x105] ss:$16 sm:$0xc0]  ;;  %v10541_v24 = vld [vmem:[#allocation3 + $0x100] ss:$16 sm:$0xc]  ;;  %v10667_v3 = vor.u32 %v10666_v37, %v10665_v22 }
 0x4bf   :  { %v10572_v56 = vmax.f32 %v10538_v41, %v10562_v19  ;;  %v10689_v46 = vor.u32 %v10688_v40, %v10687_v49  ;;  %v10543_v33 = vld [vmem:[#allocation3 + $0x100] ss:$16 sm:$0x30]  ;;  %v10542_v32 = vor.u32 %v10541_v24, %v10540_v50  ;;  %v10564_v20 = vld [vmem:[#allocation3 + $0x101] ss:$16 sm:$0x3] }
 0x4c0   :  { %v10565_v62 = vld [vmem:[#allocation3 + $0x101] ss:$16 sm:$0xc]  ;;  %v10545_v21 = vld [vmem:[#allocation3 + $0x100] ss:$16 sm:$0xc0] }
 0x4c1   :  { %10575 = vst.msk [vmem:[#allocation4 + $0x20] sm:$0xff] %vm10211_vm11, %v10572_v56  ;;  %v10691_v51 = vor.u32 %v10690_v54, %v10689_v46  ;;  %v10566_v15 = vor.u32 %v10565_v62, %v10564_v20  ;;  %v10567_v53 = vld [vmem:[#allocation3 + $0x101] ss:$16 sm:$0x30]  ;;  %v10544_v8 = vor.u32 %v10543_v33, %v10542_v32 }
 0x4c2   :  { %v10569_v39 = vld [vmem:[#allocation3 + $0x101] ss:$16 sm:$0xc0]  ;;  %v10885_v14 = vld [vmem:[#allocation3 + $0xc] ss:$16 sm:$0x3] }
 0x4c3   :  { %v10694_v23 = vmax.f32 %v10667_v3, %v10691_v51  ;;  %v10568_v11 = vor.u32 %v10567_v53, %v10566_v15  ;;  %v10886_v16 = vld [vmem:[#allocation3 + $0xc] ss:$16 sm:$0xc]  ;;  %v10546_v10 = vor.u32 %v10545_v21, %v10544_v8  ;;  %v10909_v7 = vld [vmem:[#allocation3 + $0xd] ss:$16 sm:$0x3] }
 0x4c4   :  { %v10887_v18 = vor.u32 %v10886_v16, %v10885_v14  ;;  %v10888_v52 = vld [vmem:[#allocation3 + $0xc] ss:$16 sm:$0x30]  ;;  %v10910_v6 = vld [vmem:[#allocation3 + $0xd] ss:$16 sm:$0xc] }
 0x4c5   :  { %v10890_v36 = vld [vmem:[#allocation3 + $0xc] ss:$16 sm:$0xc0]  ;;  %10697 = vst.msk [vmem:[#allocation4 + $0x48] sm:$0xff] %vm10211_vm11, %v10694_v23  ;;  %v10570_v5 = vor.u32 %v10569_v39, %v10568_v11  ;;  %v10911_v34 = vor.u32 %v10910_v6, %v10909_v7 }
 0x4c6   :  { %v10889_v60 = vor.u32 %v10888_v52, %v10887_v18  ;;  %v10912_v17 = vld [vmem:[#allocation3 + $0xd] ss:$16 sm:$0x30]  ;;  %v10893_v43 = vld [vmem:[#allocation3 + $0x8c] ss:$16 sm:$0x3] }
 0x4c7   :  { %v10914_v12 = vld [vmem:[#allocation3 + $0xd] ss:$16 sm:$0xc0]  ;;  %v10573_v63 = vmax.f32 %v10546_v10, %v10570_v5  ;;  %v10894_v0 = vld [vmem:[#allocation3 + $0x8c] ss:$16 sm:$0xc]  ;;  %v10913_v13 = vor.u32 %v10912_v17, %v10911_v34 }
 0x4c8   :  { %v10891_v57 = vor.u32 %v10890_v36, %v10889_v60  ;;  %v10895_v25 = vor.u32 %v10894_v0, %v10893_v43  ;;  %v10896_v31 = vld [vmem:[#allocation3 + $0x8c] ss:$16 sm:$0x30]  ;;  %v10917_v55 = vld [vmem:[#allocation3 + $0x8d] ss:$16 sm:$0x3] }
 0x4c9   :  { %v10898_v27 = vld [vmem:[#allocation3 + $0x8c] ss:$16 sm:$0xc0]  ;;  %10576 = vst.msk [vmem:[#allocation4 + $0x40] sm:$0xff] %vm10211_vm11, %v10573_v63  ;;  %v10915_v9 = vor.u32 %v10914_v12, %v10913_v13 }
 0x4ca   :  { %v10918_v61 = vld [vmem:[#allocation3 + $0x8d] ss:$16 sm:$0xc]  ;;  %v10897_v45 = vor.u32 %v10896_v31, %v10895_v25  ;;  %v10765_v59 = vld [vmem:[#allocation3 + $0x8] ss:$16 sm:$0x3] }
 0x4cb   :  { %v10919_v29 = vor.u32 %v10918_v61, %v10917_v55  ;;  %v10920_v48 = vld [vmem:[#allocation3 + $0x8d] ss:$16 sm:$0x30]  ;;  %v10932_v2 = vmax.f32 %v10891_v57, %v10915_v9  ;;  %v10766_v38 = vld [vmem:[#allocation3 + $0x8] ss:$16 sm:$0xc] }
 0x4cc   :  { %v10922_v26 = vld [vmem:[#allocation3 + $0x8d] ss:$16 sm:$0xc0]  ;;  %v10899_v28 = vor.u32 %v10898_v27, %v10897_v45  ;;  %v10768_v58 = vld [vmem:[#allocation3 + $0x8] ss:$16 sm:$0x30]  ;;  %v10767_v44 = vor.u32 %v10766_v38, %v10765_v59 }
 0x4cd   :  { %v10921_v4 = vor.u32 %v10920_v48, %v10919_v29  ;;  %v10770_v1 = vld [vmem:[#allocation3 + $0x8] ss:$16 sm:$0xc0]  ;;  %v10789_v41 = vld [vmem:[#allocation3 + $0x9] ss:$16 sm:$0x3] }
 0x4ce   :  { %10935 = vst.msk [vmem:[#allocation4 + $0x18] sm:$0xff] %vm10211_vm11, %v10932_v2  ;;  %v10790_v47 = vld [vmem:[#allocation3 + $0x9] ss:$16 sm:$0xc]  ;;  %v10769_v19 = vor.u32 %v10768_v58, %v10767_v44 }
 0x4cf   :  { %v10923_v42 = vor.u32 %v10922_v26, %v10921_v4  ;;  %v10792_v30 = vld [vmem:[#allocation3 + $0x9] ss:$16 sm:$0x30]  ;;  %v10791_v49 = vor.u32 %v10790_v47, %v10789_v41  ;;  %v10773_v37 = vld [vmem:[#allocation3 + $0x88] ss:$16 sm:$0x3] }
 0x4d0   :  { %v10794_v40 = vld [vmem:[#allocation3 + $0x9] ss:$16 sm:$0xc0]  ;;  %v10774_v54 = vld [vmem:[#allocation3 + $0x88] ss:$16 sm:$0xc]  ;;  %v10771_v56 = vor.u32 %v10770_v1, %v10769_v19 }
 0x4d1   :  { %v10933_v22 = vmax.f32 %v10899_v28, %v10923_v42  ;;  %v10776_v50 = vld [vmem:[#allocation3 + $0x88] ss:$16 sm:$0x30]  ;;  %v10793_v46 = vor.u32 %v10792_v30, %v10791_v49  ;;  %v10775_v24 = vor.u32 %v10774_v54, %v10773_v37  ;;  %v10797_v3 = vld [vmem:[#allocation3 + $0x89] ss:$16 sm:$0x3]  ;;  %v10753_v28 = vpop.permute.xlu0 %10752 }
 0x4d2   :  { %v10778_v33 = vld [vmem:[#allocation3 + $0x88] ss:$16 sm:$0xc0]  ;;  %v10798_v32 = vld [vmem:[#allocation3 + $0x89] ss:$16 sm:$0xc] }
 0x4d3   :  { %10936 = vst.msk [vmem:[#allocation4 + $0x38] sm:$0xff] %vm10211_vm11, %v10933_v22  ;;  %v10800_v20 = vld [vmem:[#allocation3 + $0x89] ss:$16 sm:$0x30]  ;;  %v10795_v62 = vor.u32 %v10794_v40, %v10793_v46  ;;  %v10777_v51 = vor.u32 %v10776_v50, %v10775_v24  ;;  %v10799_v15 = vor.u32 %v10798_v32, %v10797_v3  ;;  %v13766_v30 = vld [vmem:[%s19322_s9 + $0x80] sm:$0xff]   ;;  %v13769_v37 = vld [vmem:[%s19322_s9 + $0xd0] sm:$0xff]  }
 0x4d4   :  { %v10802_v53 = vld [vmem:[#allocation3 + $0x89] ss:$16 sm:$0xc0]  ;;  %v10901_v21 = vld [vmem:[#allocation3 + $0x10c] ss:$16 sm:$0x3] }
 0x4d5   :  { %v10902_v8 = vld [vmem:[#allocation3 + $0x10c] ss:$16 sm:$0xc]  ;;  %v10812_v39 = vmax.f32 %v10771_v56, %v10795_v62  ;;  %v10779_v23 = vor.u32 %v10778_v33, %v10777_v51  ;;  %v10801_v11 = vor.u32 %v10800_v20, %v10799_v15  ;;  %v10925_v10 = vld [vmem:[#allocation3 + $0x10d] ss:$16 sm:$0x3] }
 0x4d6   :  { %v10903_v14 = vor.u32 %v10902_v8, %v10901_v21  ;;  %v10904_v16 = vld [vmem:[#allocation3 + $0x10c] ss:$16 sm:$0x30]  ;;  %v10926_v18 = vld [vmem:[#allocation3 + $0x10d] ss:$16 sm:$0xc] }
 0x4d7   :  { %v10928_v52 = vld [vmem:[#allocation3 + $0x10d] ss:$16 sm:$0x30]  ;;  %10815 = vst.msk [vmem:[#allocation4 + $0x10] sm:$0xff] %vm10211_vm11, %v10812_v39  ;;  %v10803_v36 = vor.u32 %v10802_v53, %v10801_v11  ;;  %v10927_v7 = vor.u32 %v10926_v18, %v10925_v10  ;;  %v13770_v22 = vld [vmem:[%s19322_s9 + $0x90] sm:$0xff]   ;;  %v13773_v24 = vld [vmem:[%s19322_s9 + $0xe0] sm:$0xff]  }
 0x4d8   :  { %v10905_v5 = vor.u32 %v10904_v16, %v10903_v14  ;;  %v10906_v6 = vld [vmem:[#allocation3 + $0x10c] ss:$16 sm:$0xc0]  ;;  %v10930_v60 = vld [vmem:[#allocation3 + $0x10d] ss:$16 sm:$0xc0] }
 0x4d9   :  { %v10781_v34 = vld [vmem:[#allocation3 + $0x108] ss:$16 sm:$0x3]  ;;  %v10813_v12 = vmax.f32 %v10779_v23, %v10803_v36  ;;  %v10929_v63 = vor.u32 %v10928_v52, %v10927_v7  ;;  %v10805_v13 = vld [vmem:[#allocation3 + $0x109] ss:$16 sm:$0x3] }
 0x4da   :  { %v10782_v17 = vld [vmem:[#allocation3 + $0x108] ss:$16 sm:$0xc]  ;;  %v10907_v43 = vor.u32 %v10906_v6, %v10905_v5  ;;  %v10806_v25 = vld [vmem:[#allocation3 + $0x109] ss:$16 sm:$0xc]  ;;  %v10632_v4 = vpop.permute.xlu0 %10631 }
 0x4db   :  { %v10783_v0 = vor.u32 %v10782_v17, %v10781_v34  ;;  %v10784_v57 = vld [vmem:[#allocation3 + $0x108] ss:$16 sm:$0x30]  ;;  %v10808_v31 = vld [vmem:[#allocation3 + $0x109] ss:$16 sm:$0x30]  ;;  %v10931_v27 = vor.u32 %v10930_v60, %v10929_v63  ;;  %v10807_v61 = vor.u32 %v10806_v25, %v10805_v13 }
 0x4dc   :  { %10816 = vst.msk [vmem:[#allocation4 + $0x30] sm:$0xff] %vm10211_vm11, %v10813_v12  ;;  %v10786_v9 = vld [vmem:[#allocation3 + $0x108] ss:$16 sm:$0xc0]  ;;  %v13774_v32 = vld [vmem:[%s19322_s9 + $0xa0] sm:$0xff]   ;;  %v13777_v23 = vld [vmem:[%s19322_s9 + $0xf0] sm:$0xff]  }
 0x4dd   :  { %v10785_v55 = vor.u32 %v10784_v57, %v10783_v0  ;;  %v10810_v45 = vld [vmem:[#allocation3 + $0x109] ss:$16 sm:$0xc0]  ;;  %v10934_v29 = vmax.f32 %v10907_v43, %v10931_v27  ;;  %v10809_v48 = vor.u32 %v10808_v31, %v10807_v61  ;;  %10761 = vst.msk [vmem:[#allocation4 + $0x8] sm:$0xff] %vm10640_vm13, %v10753_v28  ;;  %10641 = vst.msk [vmem:[#allocation4] sm:$0xff] %vm10640_vm13, %v10632_v4  ;;  %v13778_v18 = vld [vmem:[%s19322_s9 + $0xb0] sm:$0xff]  }
 0x4de   :  { %v13767_v49 = vld [vmem:[%s19322_s9 + $0xc8] sm:$0xff]   ;;  %v13771_v54 = vld [vmem:[%s19322_s9 + $0xd8] sm:$0xff]   ;;  %v13781_v43 = vld [vmem:[%s19324_s11] sm:$0xff]  }
 0x4df   :  { %v10787_v26 = vor.u32 %v10786_v9, %v10785_v55  ;;  %10937 = vst.msk [vmem:[#allocation4 + $0x58] sm:$0xff] %vm10211_vm11, %v10934_v29  ;;  %v10811_v59 = vor.u32 %v10810_v45, %v10809_v48  ;;  %v13768_v40 = vld [vmem:[%s19322_s9 + $0x88] sm:$0xff]   ;;  %v13772_v46 = vld [vmem:[%s19322_s9 + $0x98] sm:$0xff]   ;;  %v13783_v57 = vld [vmem:[%s19324_s11 + $0x10] sm:$0xff]  }
 0x4e0   :  { %v13775_v20 = vld [vmem:[%s19322_s9 + $0xe8] sm:$0xff]   ;;  %v13779_v36 = vld [vmem:[%s19322_s9 + $0xf8] sm:$0xff]   ;;  %v13785_v25 = vld [vmem:[%s19324_s11 + $0x20] sm:$0xff]  }
 0x4e1   :  { %v10814_v2 = vmax.f32 %v10787_v26, %v10811_v59  ;;  %v13776_v8 = vld [vmem:[%s19322_s9 + $0xa8] sm:$0xff]   ;;  %v13780_v5 = vld [vmem:[%s19322_s9 + $0xb8] sm:$0xff]   ;;  %v13787_v48 = vld [vmem:[%s19324_s11 + $0x30] sm:$0xff]  }
 0x4e2   :  { %v13782_v0 = vld [vmem:[%s19324_s11 + $0x8] sm:$0xff]   ;;  %v13784_v13 = vld [vmem:[%s19324_s11 + $0x18] sm:$0xff]  }
 0x4e3   :  { %10817 = vst.msk [vmem:[#allocation4 + $0x50] sm:$0xff] %vm10211_vm11, %v10814_v2  ;;  %v13786_v9 = vld [vmem:[%s19324_s11 + $0x28] sm:$0xff]   ;;  %v13788_v26 = vld [vmem:[%s19324_s11 + $0x38] sm:$0xff]  }
 0x4e4   :  { %v11005_v44 = vld [vmem:[#allocation4 + $0x8] sm:$0xff]  ;;  %v11004_v42 = vld [vmem:[#allocation4] sm:$0xff] }
 0x4f4   :  { %v10755_v38 = vpop.permute.xlu1 %10754 }
 0x4f5   :  { %10762 = vst.msk [vmem:[#allocation4 + $0x28] sm:$0xff] %vm10640_vm13, %v10755_v38 }
 0x4fb   :  { %v10634_v58 = vpop.permute.xlu1 %10633 }
 0x4fc   :  { %10642 = vst.msk [vmem:[#allocation4 + $0x20] sm:$0xff] %vm10640_vm13, %v10634_v58  ;;  %v11009_v1 = vld [vmem:[#allocation4 + $0x28] sm:$0xff]  ;;  %v12295_v58 = vld [vmem:[%s19323_s10] ss:$0 sm:$0xff] }
 0x4fd   :  { %v11017_v41 = vpack.c.bf16 %v11009_v1, %v11005_v44 }
 0x4ff   :  { %11319 = vmatprep.mubr.bf16.mxu1 %v11017_v41 }
 0x503   :  { %v11008_v47 = vld [vmem:[#allocation4 + $0x20] sm:$0xff] }
 0x504   :  { %v11016_v19 = vpack.c.bf16 %v11008_v47, %v11004_v42 }
 0x506   :  { %11320 = vmatmul.mubr.bf16.vlgmr.msra.gmra.mrb[100].mxu1 %v11016_v19 }
 0x507   :  { %12751 = vmatpush3.bf16.msra.mxu1 %v13766_v30 }
 0x508   :  { %12752 = vmatprep.subr.bf16.mxu1 %v13767_v49 }
 0x50b   :  { %12753 = vmatpush3.bf16.msra.mxu1 %v13768_v40 }
 0x50c   :  { %12754 = vmatprep.subr.bf16.mxu1 %v13769_v37 }
 0x50f   :  { %12755 = vmatpush3.bf16.msra.mxu1 %v13770_v22 }
 0x510   :  { %12756 = vmatprep.subr.bf16.mxu1 %v13771_v54 }
 0x513   :  { %12757 = vmatpush3.bf16.msra.mxu1 %v13772_v46 }
 0x514   :  { %12758 = vmatprep.subr.bf16.mxu1 %v13773_v24 }
 0x517   :  { %12759 = vmatpush3.bf16.msra.mxu1 %v13774_v32 }
 0x518   :  { %12760 = vmatprep.subr.bf16.mxu1 %v13775_v20 }
 0x519   :  { %v10757_v50 = vpop.permute.xlu0 %10756 }
 0x51a   :  { %10763 = vst.msk [vmem:[#allocation4 + $0x48] sm:$0xff] %vm10640_vm13, %v10757_v50 }
 0x51b   :  { %12761 = vmatpush3.bf16.msra.mxu1 %v13776_v8 }
 0x51c   :  { %12762 = vmatprep.subr.bf16.mxu1 %v13777_v23 }
 0x51d   :  { %v10636_v56 = vpop.permute.xlu1 %10635  ;;  %v10993_v33 = vpop.permute.xlu0 %10992 }
 0x51e   :  { %10643 = vst.msk [vmem:[#allocation4 + $0x40] sm:$0xff] %vm10640_vm13, %v10636_v56  ;;  %11001 = vst.msk [vmem:[#allocation4 + $0x18] sm:$0xff] %vm10640_vm13, %v10993_v33 }
 0x51f   :  { %12763 = vmatpush3.bf16.msra.mxu1 %v13778_v18 }
 0x520   :  { %12764 = vmatprep.subr.bf16.mxu1 %v13779_v36 }
 0x521   :  { %v10995_v3 = vpop.permute.xlu1 %10994  ;;  %v11013_v51 = vld [vmem:[#allocation4 + $0x48] sm:$0xff] }
 0x522   :  { %11002 = vst.msk [vmem:[#allocation4 + $0x38] sm:$0xff] %vm10640_vm13, %v10995_v3  ;;  %v10873_v62 = vpop.permute.xlu0 %10872  ;;  %v11021_v53 = vpack.c.bf16 %v11013_v51, %v11013_v51 }
 0x523   :  { %10881 = vst.msk [vmem:[#allocation4 + $0x10] sm:$0xff] %vm10640_vm13, %v10873_v62  ;;  %12765 = vmatpush3.bf16.msra.mxu1 %v13780_v5 }
 0x524   :  { %11327 = vmatprep.mubr.bf16.mxu1 %v11021_v53  ;;  %13394 = vmatprep.subr.bf16.mxu1 %v13781_v43 }
 0x525   :  { %v10875_v15 = vpop.permute.xlu1 %10874  ;;  %v11012_v21 = vld [vmem:[#allocation4 + $0x40] sm:$0xff]  ;;  %v11007_v14 = vld [vmem:[#allocation4 + $0x18] sm:$0xff] }
 0x526   :  { %10882 = vst.msk [vmem:[#allocation4 + $0x30] sm:$0xff] %vm10640_vm13, %v10875_v15  ;;  %v11020_v39 = vpack.c.bf16 %v11012_v21, %v11012_v21  ;;  %v10997_v11 = vpop.permute.xlu0 %10996 }
 0x527   :  { %11003 = vst.msk [vmem:[#allocation4 + $0x58] sm:$0xff] %vm10640_vm13, %v10997_v11 }
 0x528   :  { %11328 = vmatmul.mubr.bf16.gmra.mrb[104].mxu1 %v11020_v39 }
 0x529   :  { %v10877_v16 = vpop.permute.xlu1 %10876  ;;  %v11011_v10 = vld [vmem:[#allocation4 + $0x38] sm:$0xff] }
 0x52a   :  { %10883 = vst.msk [vmem:[#allocation4 + $0x50] sm:$0xff] %vm10640_vm13, %v10877_v16  ;;  %v11019_v52 = vpack.c.bf16 %v11011_v10, %v11007_v14  ;;  %v11006_v7 = vld [vmem:[#allocation4 + $0x10] sm:$0xff] }
 0x52c   :  { %11367 = vmatprep.mubr.bf16.mxu1 %v11019_v52 }
 0x52d   :  { %v11010_v6 = vld [vmem:[#allocation4 + $0x30] sm:$0xff] }
 0x52e   :  { %v11015_v60 = vld [vmem:[#allocation4 + $0x58] sm:$0xff]  ;;  %v11018_v34 = vpack.c.bf16 %v11010_v6, %v11006_v7 }
 0x52f   :  { %v11023_v17 = vpack.c.bf16 %v11015_v60, %v11015_v60 }
 0x530   :  { %11368 = vmatmul.mubr.bf16.vlgmr.msra.gmra.mrb[108].mxu1 %v11018_v34 }
 0x531   :  { %11375 = vmatprep.mubr.bf16.mxu1 %v11023_v17  ;;  %v11014_v12 = vld [vmem:[#allocation4 + $0x50] sm:$0xff]  ;;  %13395 = vmatpush3.bf16.msra.mxu1 %v13781_v43 }
 0x532   :  { %v11022_v63 = vpack.c.bf16 %v11014_v12, %v11014_v12  ;;  %13396 = vmatprep.subr.bf16.mxu1 %v13782_v0 }
 0x535   :  { %13397 = vmatpush3.bf16.msra.mxu1 %v13782_v0 }
 0x536   :  { %13398 = vmatprep.subr.bf16.mxu1 %v13783_v57 }
 0x538   :  { %11376 = vmatmul.mubr.bf16.gmra.mrb[112].mxu1 %v11022_v63 }
 0x539   :  { %13399 = vmatpush3.bf16.msra.mxu1 %v13783_v57 }
 0x53a   :  { %13400 = vmatprep.subr.bf16.mxu1 %v13784_v13 }
 0x53d   :  { %13401 = vmatpush3.bf16.msra.mxu1 %v13784_v13 }
 0x53e   :  { %13402 = vmatprep.subr.bf16.mxu1 %v13785_v25 }
 0x541   :  { %13403 = vmatpush3.bf16.msra.mxu1 %v13785_v25 }
 0x542   :  { %13404 = vmatprep.subr.bf16.mxu1 %v13786_v9 }
 0x545   :  { %13405 = vmatpush3.bf16.msra.mxu1 %v13786_v9 }
 0x546   :  { %13406 = vmatprep.subr.bf16.mxu1 %v13787_v48 }
 0x549   :  { %13407 = vmatpush3.bf16.msra.mxu1 %v13787_v48 }
 0x54a   :  { %13408 = vmatprep.subr.bf16.mxu1 %v13788_v26 }
 0x54d   :  { %13409 = vmatpush3.bf16.msra.mxu1 %v13788_v26 }
 0x5d9   :  { %v12738_v31 = vpop.f32.mrb[100].mxu1 }
 0x5da   :  { %v12739_v27 = vpop.f32.mrb[101].mxu1 }
 0x5db   :  { %v12740_v55 = vadd.f32 %v12739_v27, %v12738_v31  ;;  %v12741_v61 = vpop.f32.mrb[102].mxu1 }
 0x5dc   :  { %v12742_v45 = vpop.f32.mrb[103].mxu1 }
 0x5dd   :  { %v12743_v29 = vadd.f32 %v12742_v45, %v12741_v61  ;;  %v11322_v41 = vadd.f32 %v12740_v55, %v12295_v58 }
 0x5df   :  { %v11325_v19 = vadd.f32 %v12743_v29, %v12295_v58 }
 0x5fb   :  { %v12744_v59 = vpop.f32.mrb[104].mxu1 }
 0x5fc   :  { %v12745_v2 = vpop.f32.mrb[105].mxu1 }
 0x5fd   :  { %v12746_v28 = vadd.f32 %v12745_v2, %v12744_v59  ;;  %v12747_v4 = vpop.f32.mrb[106].mxu1 }
 0x5fe   :  { %v12748_v38 = vpop.f32.mrb[107].mxu1 }
 0x5ff   :  { %v11330_v50 = vadd.f32 %v12746_v28, %v12295_v58 }
 0x603   :  { %v12766_v44 = vpop.f32.mrb[108].mxu1 }
 0x604   :  { %v12767_v1 = vpop.f32.mrb[109].mxu1 }
 0x605   :  { %v12768_v42 = vadd.f32 %v12767_v1, %v12766_v44  ;;  %v12769_v47 = vpop.f32.mrb[110].mxu1 }
 0x606   :  { %v12770_v30 = vpop.f32.mrb[111].mxu1 }
 0x607   :  { %v11370_v49 = vadd.f32 %v12768_v42, %v11322_v41  ;;  %v12771_v40 = vadd.f32 %v12770_v30, %v12769_v47 }
 0x609   :  { %11383 = vst [vmem:[#allocation5] sm:$0xff] %v11370_v49  ;;  %v11373_v37 = vadd.f32 %v12771_v40, %v11325_v19 }
 0x60b   :  { %11384 = vst [vmem:[#allocation5 + $0x8] sm:$0xff] %v11373_v37  ;;  %v12772_v22 = vpop.f32.mrb[112].mxu1 }
 0x60c   :  { %v12773_v54 = vpop.f32.mrb[113].mxu1 }
 0x60d   :  { %v12774_v56 = vadd.f32 %v12773_v54, %v12772_v22  ;;  %v12775_v46 = vpop.f32.mrb[114].mxu1 }
 0x60e   :  { %v12776_v24 = vpop.f32.mrb[115].mxu1 }
 0x60f   :  { %v11378_v33 = vadd.f32 %v12774_v56, %v11330_v50 }
 0x610   :  { %v11386_v3 = vld [vmem:[#allocation5] sm:$0x3]  ;;  %v11394_v51 = vld [vmem:[#allocation5 + $0x2] sm:$0x3]  ;;  %v11402_v39 = vld [vmem:[#allocation5 + $0x4] sm:$0x3] }
 0x611   :  { %vm11388_vm11 = vcmp.ge.f32.partialorder %v11386_v3, 1.0  ;;  %11385 = vst [vmem:[#allocation5 + $0x10] sm:$0xff] %v11378_v33  ;;  %v11410_v10 = vld [vmem:[#allocation5 + $0x6] sm:$0x3] }
 0x612   :  { %v12328_v32 = vsel %vm11388_vm11, 1.0, %v20086_v35  ;;  %v11392_v20 = vsel %vm11388_vm11, 0.0, %v11386_v3  ;;  %v11418_v7 = vld [vmem:[#allocation5 + $0x8] sm:$0x3]  ;;  %v11426_v12 = vld [vmem:[#allocation5 + $0xa] sm:$0x3] }
 0x613   :  { %v11393_v62 = vmul.f32 0.5, %v11392_v20  ;;  %11391 = vst [vmem:[#allocation6] sm:$0x3] %v12328_v32  ;;  %v11434_v13 = vld [vmem:[#allocation5 + $0xc] sm:$0x3]  ;;  %v11677_v33 = vld [vmem:[%s19326_s13] sm:$0xff] }
 0x614   :  { %v11442_v61 = vld [vmem:[#allocation5 + $0xe] sm:$0x3]  ;;  %v11679_v32 = vld [vmem:[%s19326_s13 + $0x10] sm:$0xff]  ;;  %v13916_v20 = vmov 0.0|0.0  }
 0x615   :  { %v11395_v15 = vadd.f32 %v11394_v51, %v11393_v62  ;;  %v11678_v3 = vld [vmem:[%s19326_s13 + $0x8] sm:$0xff]  ;;  %13439 = vmatprep.subr.bf16.mxu1 %v13916_v20  ;;  %v11680_v51 = vld [vmem:[%s19326_s13 + $0x18] sm:$0xff] }
 0x616   :  { %v13440_v62 = vpack.c.bf16 %v11678_v3, %v11677_v33 }
 0x617   :  { %vm11396_vm14 = vcmp.ge.f32.partialorder %v11395_v15, 1.0 }
 0x618   :  { %v11400_v53 = vsel %vm11396_vm14, 0.0, %v11395_v15  ;;  %v12329_v21 = vsel %vm11396_vm14, 1.0, %v20086_v35  ;;  %v11450_v26 = vld [vmem:[#allocation5 + $0x10] sm:$0x3]  ;;  %v11458_v38 = vld [vmem:[#allocation5 + $0x12] sm:$0x3]  ;;  %v13443_v15 = vpack.c.bf16 %v11680_v51, %v11679_v32 }
 0x619   :  { %v11401_v8 = vmul.f32 0.5, %v11400_v53  ;;  %11399 = vst [vmem:[#allocation6 + $0x2] sm:$0x3] %v12329_v21  ;;  %v11466_v19 = vld [vmem:[#allocation5 + $0x14] sm:$0x3]  ;;  %v11681_v53 = vld [vmem:[%s19326_s13 + $0x20] sm:$0xff] }
 0x61a   :  { %v11474_v54 = vld [vmem:[#allocation5 + $0x16] sm:$0x3]  ;;  %v12340_v21 = vld [vmem:[%s19325_s12] ss:$0 sm:$0xff]  ;;  %s13918_s12 = smov [#allocation8]  }
 0x61b   :  { %v11403_v23 = vadd.f32 %v11402_v39, %v11401_v8  ;;  %s11763_s13 = sshll.u32 %s13918_s12, 4  ;;  %s11764_s13 = int_to_ptr.vmem [resolvable:$true] %s11763_s13 }
 0x61c   :  { %s13889_s4 = scalar_lea.vmem %s11764_s13, 32  ;;  %p13894_p1 = scmp.lt.s32.totalorder %s11764_s13, %s11764_s13 }
 0x61d   :  { %vm11404_vm15 = vcmp.ge.f32.partialorder %v11403_v23, 1.0  ;;  %p13890_p0 = scmp.ne.s32.totalorder %s11764_s13, %s13889_s4  ;;  %p13895_p2 = scmp.lt.s32.totalorder %s13889_s4, %s13889_s4 }
 0x61e   :  { %v11408_v11 = vsel %vm11404_vm15, 0.0, %v11403_v23  ;;  %v12330_v14 = vsel %vm11404_vm15, 1.0, %v20086_v35 }
 0x61f   :  { %v11409_v16 = vmul.f32 0.5, %v11408_v11  ;;  %11407 = vst [vmem:[#allocation6 + $0x4] sm:$0x3] %v12330_v14  ;;  %p13896_p3 = por %p13895_p2, %p13894_p1 }
 0x621   :  { %v11411_v18 = vadd.f32 %v11410_v10, %v11409_v16  ;;  %p13897_p4 = pnand %p13896_p3, %p13890_p0 }
 0x623   :  { %vm11412_vm1 = vcmp.ge.f32.partialorder %v11411_v18, 1.0 }
 0x624   :  { %v11416_v52 = vsel %vm11412_vm1, 0.0, %v11411_v18  ;;  %v12331_v36 = vsel %vm11412_vm1, 1.0, %v20086_v35 }
 0x625   :  { %v11417_v5 = vmul.f32 0.5, %v11416_v52  ;;  %11415 = vst [vmem:[#allocation6 + $0x6] sm:$0x3] %v12331_v36 }
 0x627   :  { %v11419_v6 = vadd.f32 %v11418_v7, %v11417_v5 }
 0x629   :  { %vm11420_vm2 = vcmp.ge.f32.partialorder %v11419_v6, 1.0 }
 0x62a   :  { %v11424_v60 = vsel %vm11420_vm2, 0.0, %v11419_v6  ;;  %v12332_v34 = vsel %vm11420_vm2, 1.0, %v20086_v35 }
 0x62b   :  { %v11425_v17 = vmul.f32 0.5, %v11424_v60  ;;  %11423 = vst [vmem:[#allocation6 + $0x8] sm:$0x3] %v12332_v34 }
 0x62c   :  { %v11480_v58 = vld [vmem:[#allocation6] sm:$0xff] }
 0x62d   :  { %v11427_v63 = vadd.f32 %v11426_v12, %v11425_v17 }
 0x62f   :  { %vm11428_vm3 = vcmp.ge.f32.partialorder %v11427_v63, 1.0 }
 0x630   :  { %v11432_v43 = vsel %vm11428_vm3, 0.0, %v11427_v63  ;;  %v12333_v0 = vsel %vm11428_vm3, 1.0, %v20086_v35 }
 0x631   :  { %v11433_v57 = vmul.f32 0.5, %v11432_v43  ;;  %11431 = vst [vmem:[#allocation6 + $0xa] sm:$0x3] %v12333_v0 }
 0x633   :  { %v11435_v25 = vadd.f32 %v11434_v13, %v11433_v57 }
 0x635   :  { %vm11436_vm4 = vcmp.ge.f32.partialorder %v11435_v25, 1.0 }
 0x636   :  { %v11440_v31 = vsel %vm11436_vm4, 0.0, %v11435_v25  ;;  %v12334_v27 = vsel %vm11436_vm4, 1.0, %v20086_v35 }
 0x637   :  { %v11441_v55 = vmul.f32 0.5, %v11440_v31  ;;  %11439 = vst [vmem:[#allocation6 + $0xc] sm:$0x3] %v12334_v27 }
 0x639   :  { %v11443_v9 = vadd.f32 %v11442_v61, %v11441_v55 }
 0x63b   :  { %vm11444_vm5 = vcmp.ge.f32.partialorder %v11443_v9, 1.0 }
 0x63c   :  { %v11448_v45 = vsel %vm11444_vm5, 0.0, %v11443_v9  ;;  %v12335_v29 = vsel %vm11444_vm5, 1.0, %v20086_v35 }
 0x63d   :  { %v11449_v48 = vmul.f32 0.5, %v11448_v45  ;;  %11447 = vst [vmem:[#allocation6 + $0xe] sm:$0x3] %v12335_v29 }
 0x63f   :  { %v11451_v59 = vadd.f32 %v11450_v26, %v11449_v48 }
 0x641   :  { %vm11452_vm6 = vcmp.ge.f32.partialorder %v11451_v59, 1.0 }
 0x642   :  { %v12336_v2 = vsel %vm11452_vm6, 1.0, %v20086_v35  ;;  %v11456_v28 = vsel %vm11452_vm6, 0.0, %v11451_v59 }
 0x643   :  { %11455 = vst [vmem:[#allocation6 + $0x10] sm:$0x3] %v12336_v2  ;;  %v11457_v4 = vmul.f32 0.5, %v11456_v28 }
 0x644   :  { %v11481_v44 = vld [vmem:[#allocation6 + $0x8] sm:$0xff] }
 0x645   :  { %v11459_v1 = vadd.f32 %v11458_v38, %v11457_v4  ;;  %v11483_v41 = vpack.c.bf16 %v11481_v44, %v11480_v58 }
 0x647   :  { %vm11460_vm7 = vcmp.ge.f32.partialorder %v11459_v1, 1.0  ;;  %13410 = vmatprep.mubr.bf16.mxu1 %v11483_v41 }
 0x648   :  { %v12337_v42 = vsel %vm11460_vm7, 1.0, %v20086_v35  ;;  %v11464_v47 = vsel %vm11460_vm7, 0.0, %v11459_v1  ;;  %vm11755_vm7 = vcmask 25600  }
 0x649   :  { %11463 = vst [vmem:[#allocation6 + $0x12] sm:$0x3] %v12337_v42  ;;  %v11465_v30 = vmul.f32 0.5, %v11464_v47 }
 0x64b   :  { %v11467_v49 = vadd.f32 %v11466_v19, %v11465_v30 }
 0x64d   :  { %vm11468_vm8 = vcmp.ge.f32.partialorder %v11467_v49, 1.0 }
 0x64e   :  { %v12338_v40 = vsel %vm11468_vm8, 1.0, %v20086_v35  ;;  %v11472_v37 = vsel %vm11468_vm8, 0.0, %v11467_v49 }
 0x64f   :  { %11471 = vst [vmem:[#allocation6 + $0x14] sm:$0x3] %v12338_v40  ;;  %v11473_v22 = vmul.f32 0.5, %v11472_v37 }
 0x651   :  { %v11475_v50 = vadd.f32 %v11474_v54, %v11473_v22 }
 0x653   :  { %vm11476_vm9 = vcmp.ge.f32.partialorder %v11475_v50, 1.0 }
 0x654   :  { %v12339_v56 = vsel %vm11476_vm9, 1.0, %v20086_v35 }
 0x655   :  { %11479 = vst [vmem:[#allocation6 + $0x16] sm:$0x3] %v12339_v56 }
 0x65c   :  { %v11482_v46 = vld [vmem:[#allocation6 + $0x10] sm:$0xff] }
 0x65d   :  { %v11484_v24 = vpack.c.bf16 %v11482_v46, %v11482_v46 }
 0x65f   :  { %13411 = vmatmul.mubr.bf16.vlgmr.msra.gmra.mrb[116].mxu1 %v11484_v24 }
 0x660   :  { %13424 = vmatprep.mubr.msk.f32.mxu1 %vm13917_vm0, %v20086_v35  ;;  %13441 = vmatpush3.bf16.msra.mxu1 %v13440_v62 }
 0x661   :  { %13442 = vmatprep.subr.bf16.mxu1 %v13916_v20 }
 0x664   :  { %13444 = vmatpush3.bf16.msra.mxu1 %v13443_v15 }
 0x665   :  { %13422 = vmatprep.subr.mxu1 %v20086_v35 }
 0x668   :  { %13423 = vmatpush3.msra.mxu1 %v11681_v53 }
 0x732   :  { %v13412_v8 = vpop.f32.mrb[116].mxu1 }
 0x733   :  { %v11599_v39 = vadd.f32 %v13412_v8, %v12340_v21  ;;  %v11590_v23 = vpop.f32.mrb[117].mxu1 }
 0x734   :  { %v11591_v11 = vadd.f32 %v12340_v21, %v11590_v23  ;;  %v13413_v14 = vpop.f32.mrb[118].mxu1 }
 0x735   :  { %11607 = vst.msk [vmem:[#allocation7 + $0x10] sm:$0xff] %vm11604_vm10, %v11599_v39  ;;  %v11593_v16 = vpop.f32.mrb[119].mxu1 }
 0x736   :  { %11605 = vst.msk [vmem:[#allocation7] sm:$0xff] %vm11604_vm10, %v11591_v11  ;;  %v11594_v35 = vadd.f32 %v12340_v21, %v11593_v16 }
 0x738   :  { %11606 = vst.msk [vmem:[#allocation7 + $0x8] sm:$0xff] %vm11604_vm10, %v11594_v35 }
 0x73c   :  { %v11656_v58 = vld [vmem:[#allocation7 + $0x10] sm:$0x3]  ;;  %v11662_v19 = vld [vmem:[#allocation7 + $0x12] sm:$0x3]  ;;  %v11668_v56 = vld [vmem:[#allocation7 + $0x14] sm:$0x3] }
 0x73d   :  { %v11608_v10 = vld [vmem:[#allocation7] sm:$0x3]  ;;  %v11614_v36 = vld [vmem:[#allocation7 + $0x2] sm:$0x3]  ;;  %v11620_v60 = vld [vmem:[#allocation7 + $0x4] sm:$0x3] }
 0x73e   :  { %vm11611_vm12 = vcmp.ge.f32.partialorder %v11608_v10, 1.0  ;;  %v11626_v63 = vld [vmem:[#allocation7 + $0x6] sm:$0x3]  ;;  %v11674_v62 = vld [vmem:[#allocation7 + $0x16] sm:$0x3] }
 0x73f   :  { %v11612_v18 = vsel %vm11611_vm12, 0.0, %v11608_v10  ;;  %v11632_v13 = vld [vmem:[#allocation7 + $0x8] sm:$0x3]  ;;  %v11638_v55 = vld [vmem:[#allocation7 + $0xa] sm:$0x3] }
 0x740   :  { %v11613_v52 = vmul.f32 0.5, %v11612_v18  ;;  %v11644_v29 = vld [vmem:[#allocation7 + $0xc] sm:$0x3]  ;;  %v11650_v2 = vld [vmem:[#allocation7 + $0xe] sm:$0x3] }
 0x742   :  { %v11615_v5 = vadd.f32 %v11614_v36, %v11613_v52 }
 0x744   :  { %vm11617_vm13 = vcmp.ge.f32.partialorder %v11615_v5, 1.0  ;;  %v11616_v44 = vadd.f32 %v11615_v5, %v11608_v10 }
 0x745   :  { %v11618_v7 = vsel %vm11617_vm13, 0.0, %v11615_v5 }
 0x746   :  { %v11619_v6 = vmul.f32 0.5, %v11618_v7 }
 0x748   :  { %v11621_v34 = vadd.f32 %v11620_v60, %v11619_v6 }
 0x74a   :  { %vm11623_vm11 = vcmp.ge.f32.partialorder %v11621_v34, 1.0  ;;  %v11622_v41 = vadd.f32 %v11621_v34, %v11616_v44 }
 0x74b   :  { %v11624_v17 = vsel %vm11623_vm11, 0.0, %v11621_v34 }
 0x74c   :  { %v11625_v12 = vmul.f32 0.5, %v11624_v17 }
 0x74e   :  { %v11627_v43 = vadd.f32 %v11626_v63, %v11625_v12 }
 0x750   :  { %vm11629_vm14 = vcmp.ge.f32.partialorder %v11627_v43, 1.0  ;;  %v11628_v47 = vadd.f32 %v11627_v43, %v11622_v41 }
 0x751   :  { %v11630_v0 = vsel %vm11629_vm14, 0.0, %v11627_v43 }
 0x752   :  { %v11631_v57 = vmul.f32 0.5, %v11630_v0 }
 0x754   :  { %v11633_v25 = vadd.f32 %v11632_v13, %v11631_v57 }
 0x756   :  { %vm11635_vm15 = vcmp.ge.f32.partialorder %v11633_v25, 1.0  ;;  %v11634_v49 = vadd.f32 %v11633_v25, %v11628_v47 }
 0x757   :  { %v11636_v31 = vsel %vm11635_vm15, 0.0, %v11633_v25 }
 0x758   :  { %v11637_v27 = vmul.f32 0.5, %v11636_v31 }
 0x75a   :  { %v11639_v61 = vadd.f32 %v11638_v55, %v11637_v27 }
 0x75c   :  { %vm11641_vm1 = vcmp.ge.f32.partialorder %v11639_v61, 1.0  ;;  %v11640_v37 = vadd.f32 %v11639_v61, %v11634_v49 }
 0x75d   :  { %v11642_v9 = vsel %vm11641_vm1, 0.0, %v11639_v61 }
 0x75e   :  { %v11643_v45 = vmul.f32 0.5, %v11642_v9 }
 0x760   :  { %v11645_v48 = vadd.f32 %v11644_v29, %v11643_v45 }
 0x762   :  { %vm11647_vm2 = vcmp.ge.f32.partialorder %v11645_v48, 1.0  ;;  %v11646_v54 = vadd.f32 %v11645_v48, %v11640_v37 }
 0x763   :  { %v11648_v26 = vsel %vm11647_vm2, 0.0, %v11645_v48 }
 0x764   :  { %v11649_v59 = vmul.f32 0.5, %v11648_v26 }
 0x766   :  { %v11651_v28 = vadd.f32 %v11650_v2, %v11649_v59 }
 0x768   :  { %vm11653_vm3 = vcmp.ge.f32.partialorder %v11651_v28, 1.0  ;;  %v11652_v46 = vadd.f32 %v11651_v28, %v11646_v54 }
 0x769   :  { %v11654_v4 = vsel %vm11653_vm3, 0.0, %v11651_v28 }
 0x76a   :  { %v11655_v38 = vmul.f32 0.5, %v11654_v4 }
 0x76c   :  { %v11657_v1 = vadd.f32 %v11656_v58, %v11655_v38 }
 0x76e   :  { %vm11659_vm4 = vcmp.ge.f32.partialorder %v11657_v1, 1.0  ;;  %v11658_v33 = vadd.f32 %v11657_v1, %v11652_v46 }
 0x76f   :  { %v11660_v42 = vsel %vm11659_vm4, 0.0, %v11657_v1 }
 0x770   :  { %v11661_v30 = vmul.f32 0.5, %v11660_v42 }
 0x772   :  { %v11663_v40 = vadd.f32 %v11662_v19, %v11661_v30 }
 0x774   :  { %vm11665_vm5 = vcmp.ge.f32.partialorder %v11663_v40, 1.0  ;;  %v11664_v32 = vadd.f32 %v11663_v40, %v11658_v33 }
 0x775   :  { %v11666_v22 = vsel %vm11665_vm5, 0.0, %v11663_v40 }
 0x776   :  { %v11667_v50 = vmul.f32 0.5, %v11666_v22 }
 0x778   :  { %v11669_v24 = vadd.f32 %v11668_v56, %v11667_v50 }
 0x77a   :  { %vm11671_vm6 = vcmp.ge.f32.partialorder %v11669_v24, 1.0  ;;  %v11670_v51 = vadd.f32 %v11669_v24, %v11664_v32 }
 0x77b   :  { %v11672_v3 = vsel %vm11671_vm6, 0.0, %v11669_v24 }
 0x77c   :  { %v11673_v20 = vmul.f32 0.5, %v11672_v3 }
 0x77e   :  { %v11675_v15 = vadd.f32 %v11674_v62, %v11673_v20 }
 0x780   :  { %v11676_v53 = vadd.f32 %v11675_v15, %v11670_v51 }
 0x782   :  { %13425 = vmatmul.mubr.msk.f32.vlgmr.msra.gmra.mrb[120].mxu1 %vm11604_vm10, %v11676_v53 }
 0x855   :  { %v11751_v21 = vpop.f32.mrb[120].mxu1 }
 0x856   :  { %11756 = vst.msk [vmem:[#allocation8] sm:$0x3] %vm11755_vm7, %v11751_v21  ;;  %v13426_v8 = vpop.f32.mrb[121].mxu1 }
 0x857   :  { %13900 = shalt.err (!%p13897_p4)
}
 0x858   :  { %s13901_s17 = scalar_lea.hbm %s19327_s14, 32 }
 0x859   :  { %p13902_p5 = scmp.ne.s32.totalorder %s19327_s14, %s13901_s17  ;;  %p13905_p6 = scmp.lt.u32.totalorder %s13901_s17, %s19327_s14 }
 0x85b   :  { %p13907_p7 = pnand %p13905_p6, %p13902_p5 }
 0x85d   :  { %13910 = shalt.err (!%p13907_p7)
}
 0x85e   :  { %11766 = dma.vmem_to_hbm [thread:$0]  %s11764_s13, 32, %s19327_s14, [#allocation9]  }
 0x85f   :  { %13911 = dma.done.wait [#allocation9], 32  }
 0x860   :  { %13912 = vsyncadd [#allocation9], 4294967264 }
 0x861   :  { %11770 = vsyncpa [#allocation9], 1 }

</bundles_post_ra>
